<compile_context>
chip_gen: v5e
topology: v5e:2x2
jax: 0.10.0
libtpu: 0.0.40
codegen_flags: <defaults>
</compile_context>

<pallas_src>
import functools

import jax
import jax.numpy as jnp
import numpy as np
from jax.experimental import pallas as pl
from jax.experimental.pallas import tpu as pltpu

EPS = 1e-5
TN_TARGET = 1024    # points per tile (v5e-safe; fits default scoped VMEM)
C64_PAD = 128       # 64-channel intermediates are zero-padded to 128 lanes


def _round_up(x, m):
    return (x + m - 1) // m * m


def _pick_tile(np_padded):
    """Largest point tile that divides np_padded, is a multiple of 128 (when
    tiling) and is <= TN_TARGET."""
    if np_padded <= TN_TARGET:
        return np_padded
    best, t = 128, 128
    while t <= TN_TARGET:
        if np_padded % t == 0:
            best = t
        t += 128
    return best


# ----------------------------------------------------------------------------
# Fused per-point layer:
#   y = [relu(prev_bn(x))] @ W  [+ per-batch global bias]
# plus packed per-tile BN statistics (sublane 0 = channel sum, 1 = sum-of-sq).
# ----------------------------------------------------------------------------
def _pp_layer_kernel(*refs, cin, cout, tn, n_valid, n_padded, in_norm, add_bbias):
    it = iter(refs)
    x_ref = next(it)
    w_ref = next(it)
    scale_ref = next(it) if in_norm else None
    shift_ref = next(it) if in_norm else None
    bbias_ref = next(it) if add_bbias else None
    y_ref = next(it)
    stat_ref = next(it)

    x = x_ref[0].astype(jnp.float32)                        # (tn, cin)
    if in_norm:  # fused BN-apply + ReLU of the previous layer
        x = jnp.maximum(x * scale_ref[...] + shift_ref[...], 0.0)

    if cin <= 8:
        # tiny K (the xyz layers): broadcast FMAs on the VPU, skip the MXU
        w = w_ref[...].astype(jnp.float32)                  # (cin, cout)
        y = x[:, 0:1] * w[0:1, :]
        for c in range(1, cin):
            y = y + x[:, c:c + 1] * w[c:c + 1, :]
    else:
        y = jnp.dot(x.astype(jnp.bfloat16), w_ref[...],
                    preferred_element_type=jnp.float32)     # (tn, cout)

    if add_bbias:
        y = y + bbias_ref[0]                                # (1, cout) per-batch bias

    # packed per-tile BN statistics (mask padded point rows if any)
    ym = y
    if n_valid < n_padded:
        row = (pl.program_id(1) * tn
               + jax.lax.broadcasted_iota(jnp.int32, (tn, 1), 0))
        ym = jnp.where(row < n_valid, y, 0.0)
    csum = jnp.broadcast_to(jnp.sum(ym, axis=0, keepdims=True), (8, cout))
    csq = jnp.broadcast_to(jnp.sum(ym * ym, axis=0, keepdims=True), (8, cout))
    srow = jax.lax.broadcasted_iota(jnp.int32, (8, cout), 0)
    stat_ref[0, 0] = jnp.where(srow == 0, csum, jnp.where(srow == 1, csq, 0.0))

    y_ref[0] = y.astype(y_ref.dtype)


def pp_layer(x, w, *, scale=None, shift=None, bbias=None, n_valid):
    """x: (B, Np, Cin) -> (y (B, Np, Cout) bf16, stats (B, nt, 8, Cout) f32)."""
    B, Np, Cin = x.shape
    Cout = w.shape[1]
    tn = _pick_tile(Np)
    nt = Np // tn
    in_norm = scale is not None
    add_bbias = bbias is not None

    kernel = functools.partial(
        _pp_layer_kernel, cin=Cin, cout=Cout, tn=tn, n_valid=n_valid,
        n_padded=Np, in_norm=in_norm, add_bbias=add_bbias)

    w_in = w if Cin <= 8 else w.astype(jnp.bfloat16)

    in_specs = [pl.BlockSpec((1, tn, Cin), lambda b, n: (b, n, 0)),
                pl.BlockSpec((Cin, Cout), lambda b, n: (0, 0))]   # resident weight
    args = [x, w_in]
    if in_norm:
        in_specs += [pl.BlockSpec((1, Cin), lambda b, n: (0, 0)),
                     pl.BlockSpec((1, Cin), lambda b, n: (0, 0))]
        args += [scale, shift]
    if add_bbias:
        in_specs.append(pl.BlockSpec((1, 1, Cout), lambda b, n: (b, 0, 0)))
        args.append(bbias)

    out_shape = [jax.ShapeDtypeStruct((B, Np, Cout), jnp.bfloat16),
                 jax.ShapeDtypeStruct((B, nt, 8, Cout), jnp.float32)]
    out_specs = [pl.BlockSpec((1, tn, Cout), lambda b, n: (b, n, 0)),
                 pl.BlockSpec((1, 1, 8, Cout), lambda b, n: (b, n, 0, 0))]

    y, st = pl.pallas_call(
        kernel,
        grid=(B, nt),
        in_specs=in_specs,
        out_specs=out_specs,
        out_shape=out_shape,
        compiler_params=pltpu.CompilerParams(
            dimension_semantics=("parallel", "parallel")),
    )(*args)
    return y, st


# ----------------------------------------------------------------------------
# Fused wide layer + global reduce (stn_c3 / feat_c3, 128 -> 1024):
#   y = relu(prev_bn(x)) @ W, but only per-tile channel {sum, sumsq, max, min}
#   are written — the 1024-wide activation never touches HBM.
# ----------------------------------------------------------------------------
def _wide_reduce_kernel(x_ref, w_ref, scale_ref, shift_ref, stat_ref, *,
                        cout, tn, n_valid, n_padded):
    x = x_ref[0].astype(jnp.float32)                        # (tn, cin)
    x = jnp.maximum(x * scale_ref[...] + shift_ref[...], 0.0)
    y = jnp.dot(x.astype(jnp.bfloat16), w_ref[...],
                preferred_element_type=jnp.float32)         # (tn, cout)

    if n_valid < n_padded:
        row = (pl.program_id(1) * tn
               + jax.lax.broadcasted_iota(jnp.int32, (tn, 1), 0))
        valid = row < n_valid
        ys = jnp.where(valid, y, 0.0)
        ymx = jnp.where(valid, y, -jnp.inf)
        ymn = jnp.where(valid, y, jnp.inf)
    else:
        ys = ymx = ymn = y

    csum = jnp.broadcast_to(jnp.sum(ys, axis=0, keepdims=True), (8, cout))
    csq = jnp.broadcast_to(jnp.sum(ys * ys, axis=0, keepdims=True), (8, cout))
    cmax = jnp.broadcast_to(jnp.max(ymx, axis=0, keepdims=True), (8, cout))
    cmin = jnp.broadcast_to(jnp.min(ymn, axis=0, keepdims=True), (8, cout))
    srow = jax.lax.broadcasted_iota(jnp.int32, (8, cout), 0)
    stat_ref[0, 0] = jnp.where(srow == 0, csum,
                     jnp.where(srow == 1, csq,
                     jnp.where(srow == 2, cmax,
                     jnp.where(srow == 3, cmin, 0.0))))


def wide_reduce_layer(x, w, *, scale, shift, n_valid):
    """x: (B, Np, Cin) -> stats (B, nt, 8, Cout) f32 (rows: sum, sumsq, max, min)."""
    B, Np, Cin = x.shape
    Cout = w.shape[1]
    tn = _pick_tile(Np)
    nt = Np // tn
    kernel = functools.partial(_wide_reduce_kernel, cout=Cout, tn=tn,
                               n_valid=n_valid, n_padded=Np)
    return pl.pallas_call(
        kernel,
        grid=(B, nt),
        in_specs=[pl.BlockSpec((1, tn, Cin), lambda b, n: (b, n, 0)),
                  pl.BlockSpec((Cin, Cout), lambda b, n: (0, 0)),
                  pl.BlockSpec((1, Cin), lambda b, n: (0, 0)),
                  pl.BlockSpec((1, Cin), lambda b, n: (0, 0))],
        out_specs=pl.BlockSpec((1, 1, 8, Cout), lambda b, n: (b, n, 0, 0)),
        out_shape=jax.ShapeDtypeStruct((B, nt, 8, Cout), jnp.float32),
        compiler_params=pltpu.CompilerParams(
            dimension_semantics=("parallel", "parallel")),
    )(x, w.astype(jnp.bfloat16), scale, shift)


# ----------------------------------------------------------------------------
# BN finalization (tiny JAX glue over the packed statistics).
# ----------------------------------------------------------------------------
def bn_affine(stats, gamma, beta, count, out_dim=None):
    """stats: (B, nt, 8, C); sublane 0 = sum, 1 = sumsq.  Returns (1, C') scale/
    shift, optionally zero-padded up to out_dim channels."""
    c = gamma.shape[0]
    s = jnp.sum(stats[:, :, 0, :c], axis=(0, 1))
    q = jnp.sum(stats[:, :, 1, :c], axis=(0, 1))
    mean = s / count
    var = jnp.maximum(q / count - mean * mean, 0.0)
    scale = gamma * jax.lax.rsqrt(var + EPS)
    shift = beta - mean * scale
    if out_dim is not None and out_dim > c:
        pad = out_dim - c
        scale = jnp.concatenate([scale, jnp.zeros((pad,), scale.dtype)])
        shift = jnp.concatenate([shift, jnp.zeros((pad,), shift.dtype)])
    return scale.reshape(1, -1), shift.reshape(1, -1)


def bn_affine_and_extreme(stats, gamma, beta, count, relu):
    """Finalize BN + global max over points of bn(y) from {sum,sumsq,max,min}."""
    scale, shift = bn_affine(stats, gamma, beta, count)     # (1, C)
    ymax = jnp.max(stats[:, :, 2, :], axis=1)               # (B, C)
    ymin = jnp.min(stats[:, :, 3, :], axis=1)               # (B, C)
    g = jnp.where(scale >= 0.0, ymax * scale + shift, ymin * scale + shift)
    if relu:
        g = jnp.maximum(g, 0.0)
    return g                                                # (B, C)


# ----------------------------------------------------------------------------
# STN FC head, fully fused: fc1 -> bn4 -> relu -> fc2 -> bn5 -> relu -> fc3 + b.
# (BN over the batch rows — exactly PyTorch training-mode BatchNorm1d on (B,C).)
# ----------------------------------------------------------------------------
def _stn_head_kernel(g_ref, w1_ref, g4_ref, b4_ref, w2_ref, g5_ref, b5_ref,
                     w3_ref, b3_ref, o_ref):
    def bn_relu(h, gamma, beta):
        m = jnp.mean(h, axis=0, keepdims=True)
        v = jnp.mean(jnp.square(h - m), axis=0, keepdims=True)
        return jnp.maximum((h - m) * jax.lax.rsqrt(v + EPS) * gamma + beta, 0.0)

    h = jnp.dot(g_ref[...].astype(jnp.bfloat16), w1_ref[...],
                preferred_element_type=jnp.float32)
    h = bn_relu(h, g4_ref[...], b4_ref[...])
    h = jnp.dot(h.astype(jnp.bfloat16), w2_ref[...],
                preferred_element_type=jnp.float32)
    h = bn_relu(h, g5_ref[...], b5_ref[...])
    h = jnp.dot(h, w3_ref[...], preferred_element_type=jnp.float32) + b3_ref[...]
    o_ref[...] = h


def stn_head(g, params):
    B = g.shape[0]
    p1, p2, p3 = params["stn_fc1"], params["stn_fc2"], params["stn_fc3"]
    args = (g,
            p1["w"].astype(jnp.bfloat16),
            p1["g"].reshape(1, -1), p1["be"].reshape(1, -1),
            p2["w"].astype(jnp.bfloat16),
            p2["g"].reshape(1, -1), p2["be"].reshape(1, -1),
            p3["w"], p3["b"].reshape(1, -1))

    def full(shape):
        return pl.BlockSpec(shape, lambda i: tuple(0 for _ in shape))

    return pl.pallas_call(
        _stn_head_kernel,
        grid=(1,),
        in_specs=[full(a.shape) for a in args],
        out_specs=pl.BlockSpec((B, 9), lambda i: (0, 0)),
        out_shape=jax.ShapeDtypeStruct((B, 9), jnp.float32),
        compiler_params=pltpu.CompilerParams(dimension_semantics=("arbitrary",)),
    )(*args)


# ----------------------------------------------------------------------------
# Final k-class layer, computed transposed -> lane-dense (B, k, N) output.
# ----------------------------------------------------------------------------
def _final_kernel(x_ref, wt_ref, b_ref, scale_ref, shift_ref, o_ref):
    x = x_ref[0].astype(jnp.float32)                        # (tn, 128)
    x = jnp.maximum(x * scale_ref[...] + shift_ref[...], 0.0)
    yt = jax.lax.dot_general(wt_ref[...], x.astype(jnp.bfloat16),
                             (((1,), (1,)), ((), ())),
                             preferred_element_type=jnp.float32)    # (k, tn)
    o_ref[0] = yt + b_ref[...]


def final_layer(x, w, b, scale, shift, *, n_valid):
    B, Np, Cin = x.shape
    K = w.shape[1]
    tn = _pick_tile(Np)
    nt = Np // tn
    wt = jnp.transpose(w).astype(jnp.bfloat16)              # (K, Cin)
    bt = b.reshape(K, 1)
    out = pl.pallas_call(
        _final_kernel,
        grid=(B, nt),
        in_specs=[pl.BlockSpec((1, tn, Cin), lambda bb, n: (bb, n, 0)),
                  pl.BlockSpec((K, Cin), lambda bb, n: (0, 0)),
                  pl.BlockSpec((K, 1), lambda bb, n: (0, 0)),
                  pl.BlockSpec((1, Cin), lambda bb, n: (0, 0)),
                  pl.BlockSpec((1, Cin), lambda bb, n: (0, 0))],
        out_specs=pl.BlockSpec((1, K, tn), lambda bb, n: (bb, 0, n)),
        out_shape=jax.ShapeDtypeStruct((B, K, Np), jnp.float32),
        compiler_params=pltpu.CompilerParams(
            dimension_semantics=("parallel", "parallel")),
    )(x, wt, bt, scale, shift)
    return out[:, :, :n_valid]                              # (B, K, N)


# ----------------------------------------------------------------------------
# Parameters.  Conv/Linear weights stored as (Cin, Cout).  Biases of layers
# followed by training-mode BatchNorm are omitted (mean subtraction cancels
# them exactly), matching the PyTorch math with less work.
# ----------------------------------------------------------------------------
def init_params(key, k_classes=2):
    spec = [
        ("stn_c1", 3, 64, True), ("stn_c2", 64, 128, True), ("stn_c3", 128, 1024, True),
        ("stn_fc1", 1024, 512, True), ("stn_fc2", 512, 256, True), ("stn_fc3", 256, 9, False),
        ("feat_c1", 3, 64, True), ("feat_c2", 64, 128, True), ("feat_c3", 128, 1024, True),
        ("c1", 1088, 512, True), ("c2", 512, 256, True), ("c3", 256, 128, True),
        ("c4", 128, k_classes, False),
    ]
    keys = jax.random.split(key, len(spec))
    params = {}
    for kk, (name, ci, co, has_bn) in zip(keys, spec):
        k1, k2 = jax.random.split(kk)
        bound = 1.0 / np.sqrt(ci)
        p = {"w": jax.random.uniform(k1, (ci, co), jnp.float32, -bound, bound)}
        if has_bn:
            p["g"] = jnp.ones((co,), jnp.float32)    # BatchNorm affine (default init)
            p["be"] = jnp.zeros((co,), jnp.float32)
        else:
            p["b"] = jax.random.uniform(k2, (co,), jnp.float32, -bound, bound)
        params[name] = p
    return params


# ----------------------------------------------------------------------------
# Full forward (batch > 1 path of the PyTorch module):  x (B, N, 3) -> (B, k, N).
# ----------------------------------------------------------------------------
def pointnet_dense_cls_forward(params, x):
    B, N, _ = x.shape
    Np = _round_up(N, 8) if N <= TN_TARGET else _round_up(N, 128)
    xp = x if Np == N else jnp.pad(x, ((0, 0), (0, Np - N), (0, 0)))
    cnt = float(B * N)

    def pad_cols(w, to):
        return jnp.pad(w, ((0, 0), (0, to - w.shape[1])))

    def pad_rows(w, to):
        return jnp.pad(w, ((0, to - w.shape[0]), (0, 0)))

    # ---- STN3d conv chain ---------------------------------------------------
    w_s1 = pad_cols(params["stn_c1"]["w"], C64_PAD)                 # (3, 128), lane-dense out
    y, st = pp_layer(xp, w_s1, n_valid=N)
    sc, sh = bn_affine(st, params["stn_c1"]["g"], params["stn_c1"]["be"], cnt,
                       out_dim=C64_PAD)
    w_s2 = pad_rows(params["stn_c2"]["w"], C64_PAD)                 # (128, 128)
    y, st = pp_layer(y, w_s2, scale=sc, shift=sh, n_valid=N)
    sc, sh = bn_affine(st, params["stn_c2"]["g"], params["stn_c2"]["be"], cnt)
    st3 = wide_reduce_layer(y, params["stn_c3"]["w"], scale=sc, shift=sh, n_valid=N)
    g = bn_affine_and_extreme(st3, params["stn_c3"]["g"], params["stn_c3"]["be"],
                              cnt, relu=True)                       # (B, 1024)

    t9 = stn_head(g, params)                                        # (B, 9)
    trans = t9.reshape(B, 3, 3) + jnp.eye(3, dtype=jnp.float32)[None]
    xt = jnp.einsum("bnc,bcd->bnd", xp, trans)                      # tiny per-batch 3x3 transform

    # ---- PointNetfeat (global_feat=False, feature_transform=False) ----------
    w_f1 = pad_cols(params["feat_c1"]["w"], C64_PAD)
    pf, st = pp_layer(xt, w_f1, n_valid=N)                          # pre-BN pointfeat (128-ch padded)
    sc_pf, sh_pf = bn_affine(st, params["feat_c1"]["g"], params["feat_c1"]["be"],
                             cnt, out_dim=C64_PAD)
    w_f2 = pad_rows(params["feat_c2"]["w"], C64_PAD)
    y, st = pp_layer(pf, w_f2, scale=sc_pf, shift=sh_pf, n_valid=N)
    sc, sh = bn_affine(st, params["feat_c2"]["g"], params["feat_c2"]["be"], cnt)
    st3 = wide_reduce_layer(y, params["feat_c3"]["w"], scale=sc, shift=sh, n_valid=N)
    gmax = bn_affine_and_extreme(st3, params["feat_c3"]["g"], params["feat_c3"]["be"],
                                 cnt, relu=False)                   # bn3, no relu

    # ---- Dense head: split c1 kills the (B*N, 1024) broadcast + 1088 concat -
    w_c1 = params["c1"]["w"]                    # (1088, 512): [:1024] global, [1024:] pointfeat
    gbias = jnp.dot(gmax, w_c1[:1024]).reshape(B, 1, w_c1.shape[1]) # tiny per-batch projection
    w_p = pad_rows(w_c1[1024:], C64_PAD)                            # (128, 512)
    y, st = pp_layer(pf, w_p, scale=sc_pf, shift=sh_pf, bbias=gbias, n_valid=N)
    sc, sh = bn_affine(st, params["c1"]["g"], params["c1"]["be"], cnt)
    y, st = pp_layer(y, params["c2"]["w"], scale=sc, shift=sh, n_valid=N)
    sc, sh = bn_affine(st, params["c2"]["g"], params["c2"]["be"], cnt)
    y, st = pp_layer(y, params["c3"]["w"], scale=sc, shift=sh, n_valid=N)
    sc, sh = bn_affine(st, params["c3"]["g"], params["c3"]["be"], cnt)
    return final_layer(y, params["c4"]["w"], params["c4"]["b"], sc, sh, n_valid=N)


if __name__ == "__main__":
    key = jax.random.PRNGKey(0)
    pkey, xkey = jax.random.split(key)

    K_CLASSES = 2
    B, N = 2, 16                                  # batch > 1 -> BatchNorm path
    params = init_params(pkey, K_CLASSES)
    x = jax.random.normal(xkey, (B, N, 3), jnp.float32)

    fwd = jax.jit(pointnet_dense_cls_forward)
    out = jax.block_until_ready(fwd(params, x))

    assert out.shape == (B, K_CLASSES, N), out.shape
    assert bool(jnp.all(jnp.isfinite(out)))
    print("KERNEL_OK")
</pallas_src>

<mosaic_0001>
module attributes {stable_mosaic.version = 11 : i64} {
  func.func @_pp_layer_kernel(%arg0: i32, %arg1: i32, %arg2: memref<1x16x3xf32, #tpu.memory_space<vmem>>, %arg3: memref<3x128xf32, #tpu.memory_space<vmem>>, %arg4: memref<1x16x128xbf16, #tpu.memory_space<vmem>>, %arg5: memref<1x1x8x128xf32, #tpu.memory_space<vmem>>) attributes {dimension_semantics = [#tpu.dimension_semantics<parallel>, #tpu.dimension_semantics<parallel>], iteration_bounds = array<i64: 2, 1>, scalar_prefetch = 0 : i64, scratch_operands = 0 : i64, tpu.core_type = #tpu.core_type<tc>, window_params = [{transform_indices = @transform_0, window_bounds = array<i64: 1, 16, 3>}, {pipeline_mode = #tpu.pipeline_mode<synchronous>, transform_indices = @transform_1, window_bounds = array<i64: 3, 128>}, {transform_indices = @transform_2, window_bounds = array<i64: 1, 16, 128>}, {transform_indices = @transform_3, window_bounds = array<i64: 1, 1, 8, 128>}]} {
    %c0 = arith.constant 0 : index
    %c0_0 = arith.constant 0 : index
    %c0_1 = arith.constant 0 : index
    %0 = vector.load %arg2[%c0, %c0_0, %c0_1] : memref<1x16x3xf32, #tpu.memory_space<vmem>>, vector<1x16x3xf32>
    %1 = vector.shape_cast %0 : vector<1x16x3xf32> to vector<16x3xf32>
    %c0_2 = arith.constant 0 : index
    %c0_3 = arith.constant 0 : index
    %2 = vector.load %arg3[%c0_2, %c0_3] : memref<3x128xf32, #tpu.memory_space<vmem>>, vector<3x128xf32>
    %3 = vector.extract_strided_slice %1 {offsets = [0, 0], sizes = [16, 1], strides = [1, 1]} : vector<16x3xf32> to vector<16x1xf32>
    %4 = vector.extract_strided_slice %2 {offsets = [0, 0], sizes = [1, 128], strides = [1, 1]} : vector<3x128xf32> to vector<1x128xf32>
    %5 = vector.broadcast %3 : vector<16x1xf32> to vector<16x128xf32>
    %6 = vector.broadcast %4 : vector<1x128xf32> to vector<16x128xf32>
    %7 = arith.mulf %5, %6 : vector<16x128xf32>
    %8 = vector.extract_strided_slice %1 {offsets = [0, 1], sizes = [16, 1], strides = [1, 1]} : vector<16x3xf32> to vector<16x1xf32>
    %9 = vector.extract_strided_slice %2 {offsets = [1, 0], sizes = [1, 128], strides = [1, 1]} : vector<3x128xf32> to vector<1x128xf32>
    %10 = vector.broadcast %8 : vector<16x1xf32> to vector<16x128xf32>
    %11 = vector.broadcast %9 : vector<1x128xf32> to vector<16x128xf32>
    %12 = arith.mulf %10, %11 : vector<16x128xf32>
    %13 = arith.addf %7, %12 : vector<16x128xf32>
    %14 = vector.extract_strided_slice %1 {offsets = [0, 2], sizes = [16, 1], strides = [1, 1]} : vector<16x3xf32> to vector<16x1xf32>
    %15 = vector.extract_strided_slice %2 {offsets = [2, 0], sizes = [1, 128], strides = [1, 1]} : vector<3x128xf32> to vector<1x128xf32>
    %16 = vector.broadcast %14 : vector<16x1xf32> to vector<16x128xf32>
    %17 = vector.broadcast %15 : vector<1x128xf32> to vector<16x128xf32>
    %18 = arith.mulf %16, %17 : vector<16x128xf32>
    %19 = arith.addf %13, %18 : vector<16x128xf32>
    %cst = arith.constant dense<0.000000e+00> : vector<128xf32>
    %20 = vector.multi_reduction <add>, %19, %cst [0] : vector<16x128xf32> to vector<128xf32>
    %21 = vector.shape_cast %20 : vector<128xf32> to vector<1x128xf32>
    %22 = vector.shape_cast %21 : vector<1x128xf32> to vector<1x128xf32>
    %23 = vector.broadcast %22 : vector<1x128xf32> to vector<8x128xf32>
    %24 = arith.mulf %19, %19 : vector<16x128xf32>
    %cst_4 = arith.constant dense<0.000000e+00> : vector<128xf32>
    %25 = vector.multi_reduction <add>, %24, %cst_4 [0] : vector<16x128xf32> to vector<128xf32>
    %26 = vector.shape_cast %25 : vector<128xf32> to vector<1x128xf32>
    %27 = vector.shape_cast %26 : vector<1x128xf32> to vector<1x128xf32>
    %28 = vector.broadcast %27 : vector<1x128xf32> to vector<8x128xf32>
    %29 = tpu.iota {dimensions = array<i32: 0>} : vector<8x128xi32>
    %c0_i32 = arith.constant 0 : i32
    %30 = vector.broadcast %c0_i32 : i32 to vector<8x128xi32>
    %31 = arith.cmpi eq, %29, %30 : vector<8x128xi32>
    %c1_i32 = arith.constant 1 : i32
    %32 = vector.broadcast %c1_i32 : i32 to vector<8x128xi32>
    %33 = arith.cmpi eq, %29, %32 : vector<8x128xi32>
    %cst_5 = arith.constant 0.000000e+00 : f32
    %34 = vector.broadcast %cst_5 : f32 to vector<8x128xf32>
    %35 = arith.select %33, %28, %34 : vector<8x128xi1>, vector<8x128xf32>
    %36 = arith.select %31, %23, %35 : vector<8x128xi1>, vector<8x128xf32>
    %c0_6 = arith.constant 0 : index
    %c0_7 = arith.constant 0 : index
    %c0_8 = arith.constant 0 : index
    %c0_9 = arith.constant 0 : index
    %37 = vector.load %arg5[%c0_6, %c0_7, %c0_8, %c0_9] : memref<1x1x8x128xf32, #tpu.memory_space<vmem>>, vector<1x1x8x128xf32>
    %38 = vector.shape_cast %37 : vector<1x1x8x128xf32> to vector<8x128xf32>
    %39 = vector.shape_cast %36 : vector<8x128xf32> to vector<1x1x8x128xf32>
    tpu.vector_store %arg5[%c0_6, %c0_7, %c0_8, %c0_9], %39 {strides = array<i32>} : memref<1x1x8x128xf32, #tpu.memory_space<vmem>>, vector<1x1x8x128xf32>,
    %40 = arith.truncf %19 : vector<16x128xf32> to vector<16x128xbf16>
    %c0_10 = arith.constant 0 : index
    %c0_11 = arith.constant 0 : index
    %c0_12 = arith.constant 0 : index
    %41 = vector.load %arg4[%c0_10, %c0_11, %c0_12] : memref<1x16x128xbf16, #tpu.memory_space<vmem>>, vector<1x16x128xbf16>
    %42 = vector.shape_cast %41 : vector<1x16x128xbf16> to vector<16x128xbf16>
    %43 = vector.shape_cast %40 : vector<16x128xbf16> to vector<1x16x128xbf16>
    tpu.vector_store %arg4[%c0_10, %c0_11, %c0_12], %43 {strides = array<i32>} : memref<1x16x128xbf16, #tpu.memory_space<vmem>>, vector<1x16x128xbf16>,
    return
  }
  func.func @transform_0(%arg0: i32, %arg1: i32) -> (i32, i32, i32) {
    %c0_i32 = arith.constant 0 : i32
    %c0_i32_0 = arith.constant 0 : i32
    return %arg0, %arg1, %c0_i32 : i32, i32, i32
  }
  func.func @transform_1(%arg0: i32, %arg1: i32) -> (i32, i32) {
    %c0_i32 = arith.constant 0 : i32
    %c0_i32_0 = arith.constant 0 : i32
    %c0_i32_1 = arith.constant 0 : i32
    return %c0_i32, %c0_i32_0 : i32, i32
  }
  func.func @transform_2(%arg0: i32, %arg1: i32) -> (i32, i32, i32) {
    %c0_i32 = arith.constant 0 : i32
    %c0_i32_0 = arith.constant 0 : i32
    return %arg0, %arg1, %c0_i32 : i32, i32, i32
  }
  func.func @transform_3(%arg0: i32, %arg1: i32) -> (i32, i32, i32, i32) {
    %c0_i32 = arith.constant 0 : i32
    %c0_i32_0 = arith.constant 0 : i32
    %c0_i32_1 = arith.constant 0 : i32
    return %arg0, %arg1, %c0_i32, %c0_i32_0 : i32, i32, i32, i32
  }
}

module attributes {stable_mosaic.version = 11 : i64} {
  func.func @_pp_layer_kernel(%arg0: i32, %arg1: i32, %arg2: memref<1x16x128xbf16, #tpu.memory_space<vmem>>, %arg3: memref<128x128xbf16, #tpu.memory_space<vmem>>, %arg4: memref<1x128xf32, #tpu.memory_space<vmem>>, %arg5: memref<1x128xf32, #tpu.memory_space<vmem>>, %arg6: memref<1x16x128xbf16, #tpu.memory_space<vmem>>, %arg7: memref<1x1x8x128xf32, #tpu.memory_space<vmem>>) attributes {dimension_semantics = [#tpu.dimension_semantics<parallel>, #tpu.dimension_semantics<parallel>], iteration_bounds = array<i64: 2, 1>, scalar_prefetch = 0 : i64, scratch_operands = 0 : i64, tpu.core_type = #tpu.core_type<tc>, window_params = [{transform_indices = @transform_0, window_bounds = array<i64: 1, 16, 128>}, {pipeline_mode = #tpu.pipeline_mode<synchronous>, transform_indices = @transform_1, window_bounds = array<i64: 128, 128>}, {pipeline_mode = #tpu.pipeline_mode<synchronous>, transform_indices = @transform_2, window_bounds = array<i64: 1, 128>}, {pipeline_mode = #tpu.pipeline_mode<synchronous>, transform_indices = @transform_3, window_bounds = array<i64: 1, 128>}, {transform_indices = @transform_4, window_bounds = array<i64: 1, 16, 128>}, {transform_indices = @transform_5, window_bounds = array<i64: 1, 1, 8, 128>}]} {
    %c0 = arith.constant 0 : index
    %c0_0 = arith.constant 0 : index
    %c0_1 = arith.constant 0 : index
    %0 = vector.load %arg2[%c0, %c0_0, %c0_1] : memref<1x16x128xbf16, #tpu.memory_space<vmem>>, vector<1x16x128xbf16>
    %1 = vector.shape_cast %0 : vector<1x16x128xbf16> to vector<16x128xbf16>
    %2 = arith.extf %1 : vector<16x128xbf16> to vector<16x128xf32>
    %c0_2 = arith.constant 0 : index
    %c0_3 = arith.constant 0 : index
    %3 = vector.load %arg4[%c0_2, %c0_3] : memref<1x128xf32, #tpu.memory_space<vmem>>, vector<1x128xf32>
    %4 = vector.broadcast %3 : vector<1x128xf32> to vector<16x128xf32>
    %5 = arith.mulf %2, %4 : vector<16x128xf32>
    %c0_4 = arith.constant 0 : index
    %c0_5 = arith.constant 0 : index
    %6 = vector.load %arg5[%c0_4, %c0_5] : memref<1x128xf32, #tpu.memory_space<vmem>>, vector<1x128xf32>
    %7 = vector.broadcast %6 : vector<1x128xf32> to vector<16x128xf32>
    %8 = arith.addf %5, %7 : vector<16x128xf32>
    %cst = arith.constant 0.000000e+00 : f32
    %9 = vector.broadcast %cst : f32 to vector<16x128xf32>
    %10 = arith.maximumf %8, %9 : vector<16x128xf32>
    %11 = arith.truncf %10 : vector<16x128xf32> to vector<16x128xbf16>
    %c0_6 = arith.constant 0 : index
    %c0_7 = arith.constant 0 : index
    %12 = vector.load %arg3[%c0_6, %c0_7] : memref<128x128xbf16, #tpu.memory_space<vmem>>, vector<128x128xbf16>
    %cst_8 = arith.constant dense<0.000000e+00> : vector<16x128xf32>
    %13 = tpu.matmul %11, %12, %cst_8 {dimension_numbers = #tpu.dot_dimension_numbers<[1], [0], [0], [1], [0, 0, 1, 1], [], []>} : vector<16x128xbf16>, vector<128x128xbf16>, vector<16x128xf32> -> vector<16x128xf32>
    %cst_9 = arith.constant dense<0.000000e+00> : vector<128xf32>
    %14 = vector.multi_reduction <add>, %13, %cst_9 [0] : vector<16x128xf32> to vector<128xf32>
    %15 = vector.shape_cast %14 : vector<128xf32> to vector<1x128xf32>
    %16 = vector.shape_cast %15 : vector<1x128xf32> to vector<1x128xf32>
    %17 = vector.broadcast %16 : vector<1x128xf32> to vector<8x128xf32>
    %18 = arith.mulf %13, %13 : vector<16x128xf32>
    %cst_10 = arith.constant dense<0.000000e+00> : vector<128xf32>
    %19 = vector.multi_reduction <add>, %18, %cst_10 [0] : vector<16x128xf32> to vector<128xf32>
    %20 = vector.shape_cast %19 : vector<128xf32> to vector<1x128xf32>
    %21 = vector.shape_cast %20 : vector<1x128xf32> to vector<1x128xf32>
    %22 = vector.broadcast %21 : vector<1x128xf32> to vector<8x128xf32>
    %23 = tpu.iota {dimensions = array<i32: 0>} : vector<8x128xi32>
    %c0_i32 = arith.constant 0 : i32
    %24 = vector.broadcast %c0_i32 : i32 to vector<8x128xi32>
    %25 = arith.cmpi eq, %23, %24 : vector<8x128xi32>
    %c1_i32 = arith.constant 1 : i32
    %26 = vector.broadcast %c1_i32 : i32 to vector<8x128xi32>
    %27 = arith.cmpi eq, %23, %26 : vector<8x128xi32>
    %cst_11 = arith.constant 0.000000e+00 : f32
    %28 = vector.broadcast %cst_11 : f32 to vector<8x128xf32>
    %29 = arith.select %27, %22, %28 : vector<8x128xi1>, vector<8x128xf32>
    %30 = arith.select %25, %17, %29 : vector<8x128xi1>, vector<8x128xf32>
    %c0_12 = arith.constant 0 : index
    %c0_13 = arith.constant 0 : index
    %c0_14 = arith.constant 0 : index
    %c0_15 = arith.constant 0 : index
    %31 = vector.load %arg7[%c0_12, %c0_13, %c0_14, %c0_15] : memref<1x1x8x128xf32, #tpu.memory_space<vmem>>, vector<1x1x8x128xf32>
    %32 = vector.shape_cast %31 : vector<1x1x8x128xf32> to vector<8x128xf32>
    %33 = vector.shape_cast %30 : vector<8x128xf32> to vector<1x1x8x128xf32>
    tpu.vector_store %arg7[%c0_12, %c0_13, %c0_14, %c0_15], %33 {strides = array<i32>} : memref<1x1x8x128xf32, #tpu.memory_space<vmem>>, vector<1x1x8x128xf32>,
    %34 = arith.truncf %13 : vector<16x128xf32> to vector<16x128xbf16>
    %c0_16 = arith.constant 0 : index
    %c0_17 = arith.constant 0 : index
    %c0_18 = arith.constant 0 : index
    %35 = vector.load %arg6[%c0_16, %c0_17, %c0_18] : memref<1x16x128xbf16, #tpu.memory_space<vmem>>, vector<1x16x128xbf16>
    %36 = vector.shape_cast %35 : vector<1x16x128xbf16> to vector<16x128xbf16>
    %37 = vector.shape_cast %34 : vector<16x128xbf16> to vector<1x16x128xbf16>
    tpu.vector_store %arg6[%c0_16, %c0_17, %c0_18], %37 {strides = array<i32>} : memref<1x16x128xbf16, #tpu.memory_space<vmem>>, vector<1x16x128xbf16>,
    return
  }
  func.func @transform_0(%arg0: i32, %arg1: i32) -> (i32, i32, i32) {
    %c0_i32 = arith.constant 0 : i32
    %c0_i32_0 = arith.constant 0 : i32
    return %arg0, %arg1, %c0_i32 : i32, i32, i32
  }
  func.func @transform_1(%arg0: i32, %arg1: i32) -> (i32, i32) {
    %c0_i32 = arith.constant 0 : i32
    %c0_i32_0 = arith.constant 0 : i32
    %c0_i32_1 = arith.constant 0 : i32
    return %c0_i32, %c0_i32_0 : i32, i32
  }
  func.func @transform_2(%arg0: i32, %arg1: i32) -> (i32, i32) {
    %c0_i32 = arith.constant 0 : i32
    %c0_i32_0 = arith.constant 0 : i32
    %c0_i32_1 = arith.constant 0 : i32
    return %c0_i32, %c0_i32_0 : i32, i32
  }
  func.func @transform_3(%arg0: i32, %arg1: i32) -> (i32, i32) {
    %c0_i32 = arith.constant 0 : i32
    %c0_i32_0 = arith.constant 0 : i32
    %c0_i32_1 = arith.constant 0 : i32
    return %c0_i32, %c0_i32_0 : i32, i32
  }
  func.func @transform_4(%arg0: i32, %arg1: i32) -> (i32, i32, i32) {
    %c0_i32 = arith.constant 0 : i32
    %c0_i32_0 = arith.constant 0 : i32
    return %arg0, %arg1, %c0_i32 : i32, i32, i32
  }
  func.func @transform_5(%arg0: i32, %arg1: i32) -> (i32, i32, i32, i32) {
    %c0_i32 = arith.constant 0 : i32
    %c0_i32_0 = arith.constant 0 : i32
    %c0_i32_1 = arith.constant 0 : i32
    return %arg0, %arg1, %c0_i32, %c0_i32_0 : i32, i32, i32, i32
  }
}

module attributes {stable_mosaic.version = 11 : i64} {
  func.func @_wide_reduce_kernel(%arg0: i32, %arg1: i32, %arg2: memref<1x16x128xbf16, #tpu.memory_space<vmem>>, %arg3: memref<128x1024xbf16, #tpu.memory_space<vmem>>, %arg4: memref<1x128xf32, #tpu.memory_space<vmem>>, %arg5: memref<1x128xf32, #tpu.memory_space<vmem>>, %arg6: memref<1x1x8x1024xf32, #tpu.memory_space<vmem>>) attributes {dimension_semantics = [#tpu.dimension_semantics<parallel>, #tpu.dimension_semantics<parallel>], iteration_bounds = array<i64: 2, 1>, scalar_prefetch = 0 : i64, scratch_operands = 0 : i64, tpu.core_type = #tpu.core_type<tc>, window_params = [{transform_indices = @transform_0, window_bounds = array<i64: 1, 16, 128>}, {pipeline_mode = #tpu.pipeline_mode<synchronous>, transform_indices = @transform_1, window_bounds = array<i64: 128, 1024>}, {pipeline_mode = #tpu.pipeline_mode<synchronous>, transform_indices = @transform_2, window_bounds = array<i64: 1, 128>}, {pipeline_mode = #tpu.pipeline_mode<synchronous>, transform_indices = @transform_3, window_bounds = array<i64: 1, 128>}, {transform_indices = @transform_4, window_bounds = array<i64: 1, 1, 8, 1024>}]} {
    %c0 = arith.constant 0 : index
    %c0_0 = arith.constant 0 : index
    %c0_1 = arith.constant 0 : index
    %0 = vector.load %arg2[%c0, %c0_0, %c0_1] : memref<1x16x128xbf16, #tpu.memory_space<vmem>>, vector<1x16x128xbf16>
    %1 = vector.shape_cast %0 : vector<1x16x128xbf16> to vector<16x128xbf16>
    %2 = arith.extf %1 : vector<16x128xbf16> to vector<16x128xf32>
    %c0_2 = arith.constant 0 : index
    %c0_3 = arith.constant 0 : index
    %3 = vector.load %arg4[%c0_2, %c0_3] : memref<1x128xf32, #tpu.memory_space<vmem>>, vector<1x128xf32>
    %4 = vector.broadcast %3 : vector<1x128xf32> to vector<16x128xf32>
    %5 = arith.mulf %2, %4 : vector<16x128xf32>
    %c0_4 = arith.constant 0 : index
    %c0_5 = arith.constant 0 : index
    %6 = vector.load %arg5[%c0_4, %c0_5] : memref<1x128xf32, #tpu.memory_space<vmem>>, vector<1x128xf32>
    %7 = vector.broadcast %6 : vector<1x128xf32> to vector<16x128xf32>
    %8 = arith.addf %5, %7 : vector<16x128xf32>
    %cst = arith.constant 0.000000e+00 : f32
    %9 = vector.broadcast %cst : f32 to vector<16x128xf32>
    %10 = arith.maximumf %8, %9 : vector<16x128xf32>
    %11 = arith.truncf %10 : vector<16x128xf32> to vector<16x128xbf16>
    %c0_6 = arith.constant 0 : index
    %c0_7 = arith.constant 0 : index
    %12 = vector.load %arg3[%c0_6, %c0_7] : memref<128x1024xbf16, #tpu.memory_space<vmem>>, vector<128x1024xbf16>
    %cst_8 = arith.constant dense<0.000000e+00> : vector<16x1024xf32>
    %13 = tpu.matmul %11, %12, %cst_8 {dimension_numbers = #tpu.dot_dimension_numbers<[1], [0], [0], [1], [0, 0, 1, 1], [], []>} : vector<16x128xbf16>, vector<128x1024xbf16>, vector<16x1024xf32> -> vector<16x1024xf32>
    %cst_9 = arith.constant dense<0.000000e+00> : vector<1024xf32>
    %14 = vector.multi_reduction <add>, %13, %cst_9 [0] : vector<16x1024xf32> to vector<1024xf32>
    %15 = vector.shape_cast %14 : vector<1024xf32> to vector<1x1024xf32>
    %16 = vector.shape_cast %15 : vector<1x1024xf32> to vector<1x1024xf32>
    %17 = vector.broadcast %16 : vector<1x1024xf32> to vector<8x1024xf32>
    %18 = arith.mulf %13, %13 : vector<16x1024xf32>
    %cst_10 = arith.constant dense<0.000000e+00> : vector<1024xf32>
    %19 = vector.multi_reduction <add>, %18, %cst_10 [0] : vector<16x1024xf32> to vector<1024xf32>
    %20 = vector.shape_cast %19 : vector<1024xf32> to vector<1x1024xf32>
    %21 = vector.shape_cast %20 : vector<1x1024xf32> to vector<1x1024xf32>
    %22 = vector.broadcast %21 : vector<1x1024xf32> to vector<8x1024xf32>
    %cst_11 = arith.constant dense<0xFF800000> : vector<1024xf32>
    %23 = vector.multi_reduction <maximumf>, %13, %cst_11 [0] : vector<16x1024xf32> to vector<1024xf32>
    %24 = vector.shape_cast %23 : vector<1024xf32> to vector<1x1024xf32>
    %25 = vector.shape_cast %24 : vector<1x1024xf32> to vector<1x1024xf32>
    %26 = vector.broadcast %25 : vector<1x1024xf32> to vector<8x1024xf32>
    %cst_12 = arith.constant dense<0x7F800000> : vector<1024xf32>
    %27 = vector.multi_reduction <minimumf>, %13, %cst_12 [0] : vector<16x1024xf32> to vector<1024xf32>
    %28 = vector.shape_cast %27 : vector<1024xf32> to vector<1x1024xf32>
    %29 = vector.shape_cast %28 : vector<1x1024xf32> to vector<1x1024xf32>
    %30 = vector.broadcast %29 : vector<1x1024xf32> to vector<8x1024xf32>
    %31 = tpu.iota {dimensions = array<i32: 0>} : vector<8x1024xi32>
    %c0_i32 = arith.constant 0 : i32
    %32 = vector.broadcast %c0_i32 : i32 to vector<8x1024xi32>
    %33 = arith.cmpi eq, %31, %32 : vector<8x1024xi32>
    %c1_i32 = arith.constant 1 : i32
    %34 = vector.broadcast %c1_i32 : i32 to vector<8x1024xi32>
    %35 = arith.cmpi eq, %31, %34 : vector<8x1024xi32>
    %c2_i32 = arith.constant 2 : i32
    %36 = vector.broadcast %c2_i32 : i32 to vector<8x1024xi32>
    %37 = arith.cmpi eq, %31, %36 : vector<8x1024xi32>
    %c3_i32 = arith.constant 3 : i32
    %38 = vector.broadcast %c3_i32 : i32 to vector<8x1024xi32>
    %39 = arith.cmpi eq, %31, %38 : vector<8x1024xi32>
    %cst_13 = arith.constant 0.000000e+00 : f32
    %40 = vector.broadcast %cst_13 : f32 to vector<8x1024xf32>
    %41 = arith.select %39, %30, %40 : vector<8x1024xi1>, vector<8x1024xf32>
    %42 = arith.select %37, %26, %41 : vector<8x1024xi1>, vector<8x1024xf32>
    %43 = arith.select %35, %22, %42 : vector<8x1024xi1>, vector<8x1024xf32>
    %44 = arith.select %33, %17, %43 : vector<8x1024xi1>, vector<8x1024xf32>
    %c0_14 = arith.constant 0 : index
    %c0_15 = arith.constant 0 : index
    %c0_16 = arith.constant 0 : index
    %c0_17 = arith.constant 0 : index
    %45 = vector.load %arg6[%c0_14, %c0_15, %c0_16, %c0_17] : memref<1x1x8x1024xf32, #tpu.memory_space<vmem>>, vector<1x1x8x1024xf32>
    %46 = vector.shape_cast %45 : vector<1x1x8x1024xf32> to vector<8x1024xf32>
    %47 = vector.shape_cast %44 : vector<8x1024xf32> to vector<1x1x8x1024xf32>
    tpu.vector_store %arg6[%c0_14, %c0_15, %c0_16, %c0_17], %47 {strides = array<i32>} : memref<1x1x8x1024xf32, #tpu.memory_space<vmem>>, vector<1x1x8x1024xf32>,
    return
  }
  func.func @transform_0(%arg0: i32, %arg1: i32) -> (i32, i32, i32) {
    %c0_i32 = arith.constant 0 : i32
    %c0_i32_0 = arith.constant 0 : i32
    return %arg0, %arg1, %c0_i32 : i32, i32, i32
  }
  func.func @transform_1(%arg0: i32, %arg1: i32) -> (i32, i32) {
    %c0_i32 = arith.constant 0 : i32
    %c0_i32_0 = arith.constant 0 : i32
    %c0_i32_1 = arith.constant 0 : i32
    return %c0_i32, %c0_i32_0 : i32, i32
  }
  func.func @transform_2(%arg0: i32, %arg1: i32) -> (i32, i32) {
    %c0_i32 = arith.constant 0 : i32
    %c0_i32_0 = arith.constant 0 : i32
    %c0_i32_1 = arith.constant 0 : i32
    return %c0_i32, %c0_i32_0 : i32, i32
  }
  func.func @transform_3(%arg0: i32, %arg1: i32) -> (i32, i32) {
    %c0_i32 = arith.constant 0 : i32
    %c0_i32_0 = arith.constant 0 : i32
    %c0_i32_1 = arith.constant 0 : i32
    return %c0_i32, %c0_i32_0 : i32, i32
  }
  func.func @transform_4(%arg0: i32, %arg1: i32) -> (i32, i32, i32, i32) {
    %c0_i32 = arith.constant 0 : i32
    %c0_i32_0 = arith.constant 0 : i32
    %c0_i32_1 = arith.constant 0 : i32
    return %arg0, %arg1, %c0_i32, %c0_i32_0 : i32, i32, i32, i32
  }
}

module attributes {stable_mosaic.version = 11 : i64} {
  func.func @_stn_head_kernel(%arg0: i32, %arg1: memref<2x1024xf32, #tpu.memory_space<vmem>>, %arg2: memref<1024x512xbf16, #tpu.memory_space<vmem>>, %arg3: memref<1x512xf32, #tpu.memory_space<vmem>>, %arg4: memref<1x512xf32, #tpu.memory_space<vmem>>, %arg5: memref<512x256xbf16, #tpu.memory_space<vmem>>, %arg6: memref<1x256xf32, #tpu.memory_space<vmem>>, %arg7: memref<1x256xf32, #tpu.memory_space<vmem>>, %arg8: memref<256x9xf32, #tpu.memory_space<vmem>>, %arg9: memref<1x9xf32, #tpu.memory_space<vmem>>, %arg10: memref<2x9xf32, #tpu.memory_space<vmem>>) attributes {dimension_semantics = [#tpu.dimension_semantics<arbitrary>], iteration_bounds = array<i64: 1>, scalar_prefetch = 0 : i64, scratch_operands = 0 : i64, tpu.core_type = #tpu.core_type<tc>, window_params = [{pipeline_mode = #tpu.pipeline_mode<synchronous>, transform_indices = @transform_0, window_bounds = array<i64: 2, 1024>}, {pipeline_mode = #tpu.pipeline_mode<synchronous>, transform_indices = @transform_1, window_bounds = array<i64: 1024, 512>}, {pipeline_mode = #tpu.pipeline_mode<synchronous>, transform_indices = @transform_2, window_bounds = array<i64: 1, 512>}, {pipeline_mode = #tpu.pipeline_mode<synchronous>, transform_indices = @transform_3, window_bounds = array<i64: 1, 512>}, {pipeline_mode = #tpu.pipeline_mode<synchronous>, transform_indices = @transform_4, window_bounds = array<i64: 512, 256>}, {pipeline_mode = #tpu.pipeline_mode<synchronous>, transform_indices = @transform_5, window_bounds = array<i64: 1, 256>}, {pipeline_mode = #tpu.pipeline_mode<synchronous>, transform_indices = @transform_6, window_bounds = array<i64: 1, 256>}, {pipeline_mode = #tpu.pipeline_mode<synchronous>, transform_indices = @transform_7, window_bounds = array<i64: 256, 9>}, {pipeline_mode = #tpu.pipeline_mode<synchronous>, transform_indices = @transform_8, window_bounds = array<i64: 1, 9>}, {pipeline_mode = #tpu.pipeline_mode<synchronous>, transform_indices = @transform_9, window_bounds = array<i64: 2, 9>}]} {
    %c0 = arith.constant 0 : index
    %c0_0 = arith.constant 0 : index
    %0 = vector.load %arg1[%c0, %c0_0] : memref<2x1024xf32, #tpu.memory_space<vmem>>, vector<2x1024xf32>
    %1 = arith.truncf %0 : vector<2x1024xf32> to vector<2x1024xbf16>
    %c0_1 = arith.constant 0 : index
    %c0_2 = arith.constant 0 : index
    %2 = vector.load %arg2[%c0_1, %c0_2] : memref<1024x512xbf16, #tpu.memory_space<vmem>>, vector<1024x512xbf16>
    %cst = arith.constant dense<0.000000e+00> : vector<2x512xf32>
    %3 = tpu.matmul %1, %2, %cst {dimension_numbers = #tpu.dot_dimension_numbers<[1], [0], [0], [1], [0, 0, 1, 1], [], []>} : vector<2x1024xbf16>, vector<1024x512xbf16>, vector<2x512xf32> -> vector<2x512xf32>
    %c0_3 = arith.constant 0 : index
    %c0_4 = arith.constant 0 : index
    %4 = vector.load %arg3[%c0_3, %c0_4] : memref<1x512xf32, #tpu.memory_space<vmem>>, vector<1x512xf32>
    %c0_5 = arith.constant 0 : index
    %c0_6 = arith.constant 0 : index
    %5 = vector.load %arg4[%c0_5, %c0_6] : memref<1x512xf32, #tpu.memory_space<vmem>>, vector<1x512xf32>
    %cst_7 = arith.constant dense<0.000000e+00> : vector<512xf32>
    %6 = vector.multi_reduction <add>, %3, %cst_7 [0] : vector<2x512xf32> to vector<512xf32>
    %7 = vector.shape_cast %6 : vector<512xf32> to vector<1x512xf32>
    %cst_8 = arith.constant 2.000000e+00 : f32
    %8 = vector.broadcast %cst_8 : f32 to vector<1x512xf32>
    %9 = arith.divf %7, %8 : vector<1x512xf32>
    %10 = vector.broadcast %9 : vector<1x512xf32> to vector<2x512xf32>
    %11 = arith.subf %3, %10 : vector<2x512xf32>
    %12 = arith.mulf %11, %11 : vector<2x512xf32>
    %cst_9 = arith.constant dense<0.000000e+00> : vector<512xf32>
    %13 = vector.multi_reduction <add>, %12, %cst_9 [0] : vector<2x512xf32> to vector<512xf32>
    %14 = vector.shape_cast %13 : vector<512xf32> to vector<1x512xf32>
    %cst_10 = arith.constant 2.000000e+00 : f32
    %15 = vector.broadcast %cst_10 : f32 to vector<1x512xf32>
    %16 = arith.divf %14, %15 : vector<1x512xf32>
    %17 = vector.broadcast %9 : vector<1x512xf32> to vector<2x512xf32>
    %18 = arith.subf %3, %17 : vector<2x512xf32>
    %cst_11 = arith.constant 9.99999974E-6 : f32
    %19 = vector.broadcast %cst_11 : f32 to vector<1x512xf32>
    %20 = arith.addf %16, %19 : vector<1x512xf32>
    %21 = math.rsqrt %20 : vector<1x512xf32>
    %22 = vector.broadcast %21 : vector<1x512xf32> to vector<2x512xf32>
    %23 = arith.mulf %18, %22 : vector<2x512xf32>
    %24 = vector.broadcast %4 : vector<1x512xf32> to vector<2x512xf32>
    %25 = arith.mulf %23, %24 : vector<2x512xf32>
    %26 = vector.broadcast %5 : vector<1x512xf32> to vector<2x512xf32>
    %27 = arith.addf %25, %26 : vector<2x512xf32>
    %cst_12 = arith.constant 0.000000e+00 : f32
    %28 = vector.broadcast %cst_12 : f32 to vector<2x512xf32>
    %29 = arith.maximumf %27, %28 : vector<2x512xf32>
    %30 = arith.truncf %29 : vector<2x512xf32> to vector<2x512xbf16>
    %c0_13 = arith.constant 0 : index
    %c0_14 = arith.constant 0 : index
    %31 = vector.load %arg5[%c0_13, %c0_14] : memref<512x256xbf16, #tpu.memory_space<vmem>>, vector<512x256xbf16>
    %cst_15 = arith.constant dense<0.000000e+00> : vector<2x256xf32>
    %32 = tpu.matmul %30, %31, %cst_15 {dimension_numbers = #tpu.dot_dimension_numbers<[1], [0], [0], [1], [0, 0, 1, 1], [], []>} : vector<2x512xbf16>, vector<512x256xbf16>, vector<2x256xf32> -> vector<2x256xf32>
    %c0_16 = arith.constant 0 : index
    %c0_17 = arith.constant 0 : index
    %33 = vector.load %arg6[%c0_16, %c0_17] : memref<1x256xf32, #tpu.memory_space<vmem>>, vector<1x256xf32>
    %c0_18 = arith.constant 0 : index
    %c0_19 = arith.constant 0 : index
    %34 = vector.load %arg7[%c0_18, %c0_19] : memref<1x256xf32, #tpu.memory_space<vmem>>, vector<1x256xf32>
    %cst_20 = arith.constant dense<0.000000e+00> : vector<256xf32>
    %35 = vector.multi_reduction <add>, %32, %cst_20 [0] : vector<2x256xf32> to vector<256xf32>
    %36 = vector.shape_cast %35 : vector<256xf32> to vector<1x256xf32>
    %cst_21 = arith.constant 2.000000e+00 : f32
    %37 = vector.broadcast %cst_21 : f32 to vector<1x256xf32>
    %38 = arith.divf %36, %37 : vector<1x256xf32>
    %39 = vector.broadcast %38 : vector<1x256xf32> to vector<2x256xf32>
    %40 = arith.subf %32, %39 : vector<2x256xf32>
    %41 = arith.mulf %40, %40 : vector<2x256xf32>
    %cst_22 = arith.constant dense<0.000000e+00> : vector<256xf32>
    %42 = vector.multi_reduction <add>, %41, %cst_22 [0] : vector<2x256xf32> to vector<256xf32>
    %43 = vector.shape_cast %42 : vector<256xf32> to vector<1x256xf32>
    %cst_23 = arith.constant 2.000000e+00 : f32
    %44 = vector.broadcast %cst_23 : f32 to vector<1x256xf32>
    %45 = arith.divf %43, %44 : vector<1x256xf32>
    %46 = vector.broadcast %38 : vector<1x256xf32> to vector<2x256xf32>
    %47 = arith.subf %32, %46 : vector<2x256xf32>
    %cst_24 = arith.constant 9.99999974E-6 : f32
    %48 = vector.broadcast %cst_24 : f32 to vector<1x256xf32>
    %49 = arith.addf %45, %48 : vector<1x256xf32>
    %50 = math.rsqrt %49 : vector<1x256xf32>
    %51 = vector.broadcast %50 : vector<1x256xf32> to vector<2x256xf32>
    %52 = arith.mulf %47, %51 : vector<2x256xf32>
    %53 = vector.broadcast %33 : vector<1x256xf32> to vector<2x256xf32>
    %54 = arith.mulf %52, %53 : vector<2x256xf32>
    %55 = vector.broadcast %34 : vector<1x256xf32> to vector<2x256xf32>
    %56 = arith.addf %54, %55 : vector<2x256xf32>
    %cst_25 = arith.constant 0.000000e+00 : f32
    %57 = vector.broadcast %cst_25 : f32 to vector<2x256xf32>
    %58 = arith.maximumf %56, %57 : vector<2x256xf32>
    %c0_26 = arith.constant 0 : index
    %c0_27 = arith.constant 0 : index
    %59 = vector.load %arg8[%c0_26, %c0_27] : memref<256x9xf32, #tpu.memory_space<vmem>>, vector<256x9xf32>
    %cst_28 = arith.constant dense<0.000000e+00> : vector<2x9xf32>
    %60 = tpu.matmul %58, %59, %cst_28 {dimension_numbers = #tpu.dot_dimension_numbers<[1], [0], [0], [1], [0, 0, 1, 1], [], []>} : vector<2x256xf32>, vector<256x9xf32>, vector<2x9xf32> -> vector<2x9xf32>
    %c0_29 = arith.constant 0 : index
    %c0_30 = arith.constant 0 : index
    %61 = vector.load %arg9[%c0_29, %c0_30] : memref<1x9xf32, #tpu.memory_space<vmem>>, vector<1x9xf32>
    %62 = vector.broadcast %61 : vector<1x9xf32> to vector<2x9xf32>
    %63 = arith.addf %60, %62 : vector<2x9xf32>
    %c0_31 = arith.constant 0 : index
    %c0_32 = arith.constant 0 : index
    %64 = vector.load %arg10[%c0_31, %c0_32] : memref<2x9xf32, #tpu.memory_space<vmem>>, vector<2x9xf32>
    tpu.vector_store %arg10[%c0_31, %c0_32], %63 {strides = array<i32>} : memref<2x9xf32, #tpu.memory_space<vmem>>, vector<2x9xf32>,
    return
  }
  func.func @transform_0(%arg0: i32) -> (i32, i32) {
    %c0_i32 = arith.constant 0 : i32
    %c0_i32_0 = arith.constant 0 : i32
    %c0_i32_1 = arith.constant 0 : i32
    return %c0_i32, %c0_i32_0 : i32, i32
  }
  func.func @transform_1(%arg0: i32) -> (i32, i32) {
    %c0_i32 = arith.constant 0 : i32
    %c0_i32_0 = arith.constant 0 : i32
    %c0_i32_1 = arith.constant 0 : i32
    return %c0_i32, %c0_i32_0 : i32, i32
  }
  func.func @transform_2(%arg0: i32) -> (i32, i32) {
    %c0_i32 = arith.constant 0 : i32
    %c0_i32_0 = arith.constant 0 : i32
    %c0_i32_1 = arith.constant 0 : i32
    return %c0_i32, %c0_i32_0 : i32, i32
  }
  func.func @transform_3(%arg0: i32) -> (i32, i32) {
    %c0_i32 = arith.constant 0 : i32
    %c0_i32_0 = arith.constant 0 : i32
    %c0_i32_1 = arith.constant 0 : i32
    return %c0_i32, %c0_i32_0 : i32, i32
  }
  func.func @transform_4(%arg0: i32) -> (i32, i32) {
    %c0_i32 = arith.constant 0 : i32
    %c0_i32_0 = arith.constant 0 : i32
    %c0_i32_1 = arith.constant 0 : i32
    return %c0_i32, %c0_i32_0 : i32, i32
  }
  func.func @transform_5(%arg0: i32) -> (i32, i32) {
    %c0_i32 = arith.constant 0 : i32
    %c0_i32_0 = arith.constant 0 : i32
    %c0_i32_1 = arith.constant 0 : i32
    return %c0_i32, %c0_i32_0 : i32, i32
  }
  func.func @transform_6(%arg0: i32) -> (i32, i32) {
    %c0_i32 = arith.constant 0 : i32
    %c0_i32_0 = arith.constant 0 : i32
    %c0_i32_1 = arith.constant 0 : i32
    return %c0_i32, %c0_i32_0 : i32, i32
  }
  func.func @transform_7(%arg0: i32) -> (i32, i32) {
    %c0_i32 = arith.constant 0 : i32
    %c0_i32_0 = arith.constant 0 : i32
    %c0_i32_1 = arith.constant 0 : i32
    return %c0_i32, %c0_i32_0 : i32, i32
  }
  func.func @transform_8(%arg0: i32) -> (i32, i32) {
    %c0_i32 = arith.constant 0 : i32
    %c0_i32_0 = arith.constant 0 : i32
    %c0_i32_1 = arith.constant 0 : i32
    return %c0_i32, %c0_i32_0 : i32, i32
  }
  func.func @transform_9(%arg0: i32) -> (i32, i32) {
    %c0_i32 = arith.constant 0 : i32
    %c0_i32_0 = arith.constant 0 : i32
    %c0_i32_1 = arith.constant 0 : i32
    return %c0_i32, %c0_i32_0 : i32, i32
  }
}

module attributes {stable_mosaic.version = 11 : i64} {
  func.func @_pp_layer_kernel(%arg0: i32, %arg1: i32, %arg2: memref<1x16x128xbf16, #tpu.memory_space<vmem>>, %arg3: memref<128x512xbf16, #tpu.memory_space<vmem>>, %arg4: memref<1x128xf32, #tpu.memory_space<vmem>>, %arg5: memref<1x128xf32, #tpu.memory_space<vmem>>, %arg6: memref<1x1x512xf32, #tpu.memory_space<vmem>>, %arg7: memref<1x16x512xbf16, #tpu.memory_space<vmem>>, %arg8: memref<1x1x8x512xf32, #tpu.memory_space<vmem>>) attributes {dimension_semantics = [#tpu.dimension_semantics<parallel>, #tpu.dimension_semantics<parallel>], iteration_bounds = array<i64: 2, 1>, scalar_prefetch = 0 : i64, scratch_operands = 0 : i64, tpu.core_type = #tpu.core_type<tc>, window_params = [{transform_indices = @transform_0, window_bounds = array<i64: 1, 16, 128>}, {pipeline_mode = #tpu.pipeline_mode<synchronous>, transform_indices = @transform_1, window_bounds = array<i64: 128, 512>}, {pipeline_mode = #tpu.pipeline_mode<synchronous>, transform_indices = @transform_2, window_bounds = array<i64: 1, 128>}, {pipeline_mode = #tpu.pipeline_mode<synchronous>, transform_indices = @transform_3, window_bounds = array<i64: 1, 128>}, {transform_indices = @transform_4, window_bounds = array<i64: 1, 1, 512>}, {transform_indices = @transform_5, window_bounds = array<i64: 1, 16, 512>}, {transform_indices = @transform_6, window_bounds = array<i64: 1, 1, 8, 512>}]} {
    %c0 = arith.constant 0 : index
    %c0_0 = arith.constant 0 : index
    %c0_1 = arith.constant 0 : index
    %0 = vector.load %arg2[%c0, %c0_0, %c0_1] : memref<1x16x128xbf16, #tpu.memory_space<vmem>>, vector<1x16x128xbf16>
    %1 = vector.shape_cast %0 : vector<1x16x128xbf16> to vector<16x128xbf16>
    %2 = arith.extf %1 : vector<16x128xbf16> to vector<16x128xf32>
    %c0_2 = arith.constant 0 : index
    %c0_3 = arith.constant 0 : index
    %3 = vector.load %arg4[%c0_2, %c0_3] : memref<1x128xf32, #tpu.memory_space<vmem>>, vector<1x128xf32>
    %4 = vector.broadcast %3 : vector<1x128xf32> to vector<16x128xf32>
    %5 = arith.mulf %2, %4 : vector<16x128xf32>
    %c0_4 = arith.constant 0 : index
    %c0_5 = arith.constant 0 : index
    %6 = vector.load %arg5[%c0_4, %c0_5] : memref<1x128xf32, #tpu.memory_space<vmem>>, vector<1x128xf32>
    %7 = vector.broadcast %6 : vector<1x128xf32> to vector<16x128xf32>
    %8 = arith.addf %5, %7 : vector<16x128xf32>
    %cst = arith.constant 0.000000e+00 : f32
    %9 = vector.broadcast %cst : f32 to vector<16x128xf32>
    %10 = arith.maximumf %8, %9 : vector<16x128xf32>
    %11 = arith.truncf %10 : vector<16x128xf32> to vector<16x128xbf16>
    %c0_6 = arith.constant 0 : index
    %c0_7 = arith.constant 0 : index
    %12 = vector.load %arg3[%c0_6, %c0_7] : memref<128x512xbf16, #tpu.memory_space<vmem>>, vector<128x512xbf16>
    %cst_8 = arith.constant dense<0.000000e+00> : vector<16x512xf32>
    %13 = tpu.matmul %11, %12, %cst_8 {dimension_numbers = #tpu.dot_dimension_numbers<[1], [0], [0], [1], [0, 0, 1, 1], [], []>} : vector<16x128xbf16>, vector<128x512xbf16>, vector<16x512xf32> -> vector<16x512xf32>
    %c0_9 = arith.constant 0 : index
    %c0_10 = arith.constant 0 : index
    %c0_11 = arith.constant 0 : index
    %14 = vector.load %arg6[%c0_9, %c0_10, %c0_11] : memref<1x1x512xf32, #tpu.memory_space<vmem>>, vector<1x1x512xf32>
    %15 = vector.shape_cast %14 : vector<1x1x512xf32> to vector<1x512xf32>
    %16 = vector.broadcast %15 : vector<1x512xf32> to vector<16x512xf32>
    %17 = arith.addf %13, %16 : vector<16x512xf32>
    %cst_12 = arith.constant dense<0.000000e+00> : vector<512xf32>
    %18 = vector.multi_reduction <add>, %17, %cst_12 [0] : vector<16x512xf32> to vector<512xf32>
    %19 = vector.shape_cast %18 : vector<512xf32> to vector<1x512xf32>
    %20 = vector.shape_cast %19 : vector<1x512xf32> to vector<1x512xf32>
    %21 = vector.broadcast %20 : vector<1x512xf32> to vector<8x512xf32>
    %22 = arith.mulf %17, %17 : vector<16x512xf32>
    %cst_13 = arith.constant dense<0.000000e+00> : vector<512xf32>
    %23 = vector.multi_reduction <add>, %22, %cst_13 [0] : vector<16x512xf32> to vector<512xf32>
    %24 = vector.shape_cast %23 : vector<512xf32> to vector<1x512xf32>
    %25 = vector.shape_cast %24 : vector<1x512xf32> to vector<1x512xf32>
    %26 = vector.broadcast %25 : vector<1x512xf32> to vector<8x512xf32>
    %27 = tpu.iota {dimensions = array<i32: 0>} : vector<8x512xi32>
    %c0_i32 = arith.constant 0 : i32
    %28 = vector.broadcast %c0_i32 : i32 to vector<8x512xi32>
    %29 = arith.cmpi eq, %27, %28 : vector<8x512xi32>
    %c1_i32 = arith.constant 1 : i32
    %30 = vector.broadcast %c1_i32 : i32 to vector<8x512xi32>
    %31 = arith.cmpi eq, %27, %30 : vector<8x512xi32>
    %cst_14 = arith.constant 0.000000e+00 : f32
    %32 = vector.broadcast %cst_14 : f32 to vector<8x512xf32>
    %33 = arith.select %31, %26, %32 : vector<8x512xi1>, vector<8x512xf32>
    %34 = arith.select %29, %21, %33 : vector<8x512xi1>, vector<8x512xf32>
    %c0_15 = arith.constant 0 : index
    %c0_16 = arith.constant 0 : index
    %c0_17 = arith.constant 0 : index
    %c0_18 = arith.constant 0 : index
    %35 = vector.load %arg8[%c0_15, %c0_16, %c0_17, %c0_18] : memref<1x1x8x512xf32, #tpu.memory_space<vmem>>, vector<1x1x8x512xf32>
    %36 = vector.shape_cast %35 : vector<1x1x8x512xf32> to vector<8x512xf32>
    %37 = vector.shape_cast %34 : vector<8x512xf32> to vector<1x1x8x512xf32>
    tpu.vector_store %arg8[%c0_15, %c0_16, %c0_17, %c0_18], %37 {strides = array<i32>} : memref<1x1x8x512xf32, #tpu.memory_space<vmem>>, vector<1x1x8x512xf32>,
    %38 = arith.truncf %17 : vector<16x512xf32> to vector<16x512xbf16>
    %c0_19 = arith.constant 0 : index
    %c0_20 = arith.constant 0 : index
    %c0_21 = arith.constant 0 : index
    %39 = vector.load %arg7[%c0_19, %c0_20, %c0_21] : memref<1x16x512xbf16, #tpu.memory_space<vmem>>, vector<1x16x512xbf16>
    %40 = vector.shape_cast %39 : vector<1x16x512xbf16> to vector<16x512xbf16>
    %41 = vector.shape_cast %38 : vector<16x512xbf16> to vector<1x16x512xbf16>
    tpu.vector_store %arg7[%c0_19, %c0_20, %c0_21], %41 {strides = array<i32>} : memref<1x16x512xbf16, #tpu.memory_space<vmem>>, vector<1x16x512xbf16>,
    return
  }
  func.func @transform_0(%arg0: i32, %arg1: i32) -> (i32, i32, i32) {
    %c0_i32 = arith.constant 0 : i32
    %c0_i32_0 = arith.constant 0 : i32
    return %arg0, %arg1, %c0_i32 : i32, i32, i32
  }
  func.func @transform_1(%arg0: i32, %arg1: i32) -> (i32, i32) {
    %c0_i32 = arith.constant 0 : i32
    %c0_i32_0 = arith.constant 0 : i32
    %c0_i32_1 = arith.constant 0 : i32
    return %c0_i32, %c0_i32_0 : i32, i32
  }
  func.func @transform_2(%arg0: i32, %arg1: i32) -> (i32, i32) {
    %c0_i32 = arith.constant 0 : i32
    %c0_i32_0 = arith.constant 0 : i32
    %c0_i32_1 = arith.constant 0 : i32
    return %c0_i32, %c0_i32_0 : i32, i32
  }
  func.func @transform_3(%arg0: i32, %arg1: i32) -> (i32, i32) {
    %c0_i32 = arith.constant 0 : i32
    %c0_i32_0 = arith.constant 0 : i32
    %c0_i32_1 = arith.constant 0 : i32
    return %c0_i32, %c0_i32_0 : i32, i32
  }
  func.func @transform_4(%arg0: i32, %arg1: i32) -> (i32, i32, i32) {
    %c0_i32 = arith.constant 0 : i32
    %c0_i32_0 = arith.constant 0 : i32
    %c0_i32_1 = arith.constant 0 : i32
    return %arg0, %c0_i32, %c0_i32_0 : i32, i32, i32
  }
  func.func @transform_5(%arg0: i32, %arg1: i32) -> (i32, i32, i32) {
    %c0_i32 = arith.constant 0 : i32
    %c0_i32_0 = arith.constant 0 : i32
    return %arg0, %arg1, %c0_i32 : i32, i32, i32
  }
  func.func @transform_6(%arg0: i32, %arg1: i32) -> (i32, i32, i32, i32) {
    %c0_i32 = arith.constant 0 : i32
    %c0_i32_0 = arith.constant 0 : i32
    %c0_i32_1 = arith.constant 0 : i32
    return %arg0, %arg1, %c0_i32, %c0_i32_0 : i32, i32, i32, i32
  }
}

module attributes {stable_mosaic.version = 11 : i64} {
  func.func @_pp_layer_kernel(%arg0: i32, %arg1: i32, %arg2: memref<1x16x512xbf16, #tpu.memory_space<vmem>>, %arg3: memref<512x256xbf16, #tpu.memory_space<vmem>>, %arg4: memref<1x512xf32, #tpu.memory_space<vmem>>, %arg5: memref<1x512xf32, #tpu.memory_space<vmem>>, %arg6: memref<1x16x256xbf16, #tpu.memory_space<vmem>>, %arg7: memref<1x1x8x256xf32, #tpu.memory_space<vmem>>) attributes {dimension_semantics = [#tpu.dimension_semantics<parallel>, #tpu.dimension_semantics<parallel>], iteration_bounds = array<i64: 2, 1>, scalar_prefetch = 0 : i64, scratch_operands = 0 : i64, tpu.core_type = #tpu.core_type<tc>, window_params = [{transform_indices = @transform_0, window_bounds = array<i64: 1, 16, 512>}, {pipeline_mode = #tpu.pipeline_mode<synchronous>, transform_indices = @transform_1, window_bounds = array<i64: 512, 256>}, {pipeline_mode = #tpu.pipeline_mode<synchronous>, transform_indices = @transform_2, window_bounds = array<i64: 1, 512>}, {pipeline_mode = #tpu.pipeline_mode<synchronous>, transform_indices = @transform_3, window_bounds = array<i64: 1, 512>}, {transform_indices = @transform_4, window_bounds = array<i64: 1, 16, 256>}, {transform_indices = @transform_5, window_bounds = array<i64: 1, 1, 8, 256>}]} {
    %c0 = arith.constant 0 : index
    %c0_0 = arith.constant 0 : index
    %c0_1 = arith.constant 0 : index
    %0 = vector.load %arg2[%c0, %c0_0, %c0_1] : memref<1x16x512xbf16, #tpu.memory_space<vmem>>, vector<1x16x512xbf16>
    %1 = vector.shape_cast %0 : vector<1x16x512xbf16> to vector<16x512xbf16>
    %2 = arith.extf %1 : vector<16x512xbf16> to vector<16x512xf32>
    %c0_2 = arith.constant 0 : index
    %c0_3 = arith.constant 0 : index
    %3 = vector.load %arg4[%c0_2, %c0_3] : memref<1x512xf32, #tpu.memory_space<vmem>>, vector<1x512xf32>
    %4 = vector.broadcast %3 : vector<1x512xf32> to vector<16x512xf32>
    %5 = arith.mulf %2, %4 : vector<16x512xf32>
    %c0_4 = arith.constant 0 : index
    %c0_5 = arith.constant 0 : index
    %6 = vector.load %arg5[%c0_4, %c0_5] : memref<1x512xf32, #tpu.memory_space<vmem>>, vector<1x512xf32>
    %7 = vector.broadcast %6 : vector<1x512xf32> to vector<16x512xf32>
    %8 = arith.addf %5, %7 : vector<16x512xf32>
    %cst = arith.constant 0.000000e+00 : f32
    %9 = vector.broadcast %cst : f32 to vector<16x512xf32>
    %10 = arith.maximumf %8, %9 : vector<16x512xf32>
    %11 = arith.truncf %10 : vector<16x512xf32> to vector<16x512xbf16>
    %c0_6 = arith.constant 0 : index
    %c0_7 = arith.constant 0 : index
    %12 = vector.load %arg3[%c0_6, %c0_7] : memref<512x256xbf16, #tpu.memory_space<vmem>>, vector<512x256xbf16>
    %cst_8 = arith.constant dense<0.000000e+00> : vector<16x256xf32>
    %13 = tpu.matmul %11, %12, %cst_8 {dimension_numbers = #tpu.dot_dimension_numbers<[1], [0], [0], [1], [0, 0, 1, 1], [], []>} : vector<16x512xbf16>, vector<512x256xbf16>, vector<16x256xf32> -> vector<16x256xf32>
    %cst_9 = arith.constant dense<0.000000e+00> : vector<256xf32>
    %14 = vector.multi_reduction <add>, %13, %cst_9 [0] : vector<16x256xf32> to vector<256xf32>
    %15 = vector.shape_cast %14 : vector<256xf32> to vector<1x256xf32>
    %16 = vector.shape_cast %15 : vector<1x256xf32> to vector<1x256xf32>
    %17 = vector.broadcast %16 : vector<1x256xf32> to vector<8x256xf32>
    %18 = arith.mulf %13, %13 : vector<16x256xf32>
    %cst_10 = arith.constant dense<0.000000e+00> : vector<256xf32>
    %19 = vector.multi_reduction <add>, %18, %cst_10 [0] : vector<16x256xf32> to vector<256xf32>
    %20 = vector.shape_cast %19 : vector<256xf32> to vector<1x256xf32>
    %21 = vector.shape_cast %20 : vector<1x256xf32> to vector<1x256xf32>
    %22 = vector.broadcast %21 : vector<1x256xf32> to vector<8x256xf32>
    %23 = tpu.iota {dimensions = array<i32: 0>} : vector<8x256xi32>
    %c0_i32 = arith.constant 0 : i32
    %24 = vector.broadcast %c0_i32 : i32 to vector<8x256xi32>
    %25 = arith.cmpi eq, %23, %24 : vector<8x256xi32>
    %c1_i32 = arith.constant 1 : i32
    %26 = vector.broadcast %c1_i32 : i32 to vector<8x256xi32>
    %27 = arith.cmpi eq, %23, %26 : vector<8x256xi32>
    %cst_11 = arith.constant 0.000000e+00 : f32
    %28 = vector.broadcast %cst_11 : f32 to vector<8x256xf32>
    %29 = arith.select %27, %22, %28 : vector<8x256xi1>, vector<8x256xf32>
    %30 = arith.select %25, %17, %29 : vector<8x256xi1>, vector<8x256xf32>
    %c0_12 = arith.constant 0 : index
    %c0_13 = arith.constant 0 : index
    %c0_14 = arith.constant 0 : index
    %c0_15 = arith.constant 0 : index
    %31 = vector.load %arg7[%c0_12, %c0_13, %c0_14, %c0_15] : memref<1x1x8x256xf32, #tpu.memory_space<vmem>>, vector<1x1x8x256xf32>
    %32 = vector.shape_cast %31 : vector<1x1x8x256xf32> to vector<8x256xf32>
    %33 = vector.shape_cast %30 : vector<8x256xf32> to vector<1x1x8x256xf32>
    tpu.vector_store %arg7[%c0_12, %c0_13, %c0_14, %c0_15], %33 {strides = array<i32>} : memref<1x1x8x256xf32, #tpu.memory_space<vmem>>, vector<1x1x8x256xf32>,
    %34 = arith.truncf %13 : vector<16x256xf32> to vector<16x256xbf16>
    %c0_16 = arith.constant 0 : index
    %c0_17 = arith.constant 0 : index
    %c0_18 = arith.constant 0 : index
    %35 = vector.load %arg6[%c0_16, %c0_17, %c0_18] : memref<1x16x256xbf16, #tpu.memory_space<vmem>>, vector<1x16x256xbf16>
    %36 = vector.shape_cast %35 : vector<1x16x256xbf16> to vector<16x256xbf16>
    %37 = vector.shape_cast %34 : vector<16x256xbf16> to vector<1x16x256xbf16>
    tpu.vector_store %arg6[%c0_16, %c0_17, %c0_18], %37 {strides = array<i32>} : memref<1x16x256xbf16, #tpu.memory_space<vmem>>, vector<1x16x256xbf16>,
    return
  }
  func.func @transform_0(%arg0: i32, %arg1: i32) -> (i32, i32, i32) {
    %c0_i32 = arith.constant 0 : i32
    %c0_i32_0 = arith.constant 0 : i32
    return %arg0, %arg1, %c0_i32 : i32, i32, i32
  }
  func.func @transform_1(%arg0: i32, %arg1: i32) -> (i32, i32) {
    %c0_i32 = arith.constant 0 : i32
    %c0_i32_0 = arith.constant 0 : i32
    %c0_i32_1 = arith.constant 0 : i32
    return %c0_i32, %c0_i32_0 : i32, i32
  }
  func.func @transform_2(%arg0: i32, %arg1: i32) -> (i32, i32) {
    %c0_i32 = arith.constant 0 : i32
    %c0_i32_0 = arith.constant 0 : i32
    %c0_i32_1 = arith.constant 0 : i32
    return %c0_i32, %c0_i32_0 : i32, i32
  }
  func.func @transform_3(%arg0: i32, %arg1: i32) -> (i32, i32) {
    %c0_i32 = arith.constant 0 : i32
    %c0_i32_0 = arith.constant 0 : i32
    %c0_i32_1 = arith.constant 0 : i32
    return %c0_i32, %c0_i32_0 : i32, i32
  }
  func.func @transform_4(%arg0: i32, %arg1: i32) -> (i32, i32, i32) {
    %c0_i32 = arith.constant 0 : i32
    %c0_i32_0 = arith.constant 0 : i32
    return %arg0, %arg1, %c0_i32 : i32, i32, i32
  }
  func.func @transform_5(%arg0: i32, %arg1: i32) -> (i32, i32, i32, i32) {
    %c0_i32 = arith.constant 0 : i32
    %c0_i32_0 = arith.constant 0 : i32
    %c0_i32_1 = arith.constant 0 : i32
    return %arg0, %arg1, %c0_i32, %c0_i32_0 : i32, i32, i32, i32
  }
}

module attributes {stable_mosaic.version = 11 : i64} {
  func.func @_pp_layer_kernel(%arg0: i32, %arg1: i32, %arg2: memref<1x16x256xbf16, #tpu.memory_space<vmem>>, %arg3: memref<256x128xbf16, #tpu.memory_space<vmem>>, %arg4: memref<1x256xf32, #tpu.memory_space<vmem>>, %arg5: memref<1x256xf32, #tpu.memory_space<vmem>>, %arg6: memref<1x16x128xbf16, #tpu.memory_space<vmem>>, %arg7: memref<1x1x8x128xf32, #tpu.memory_space<vmem>>) attributes {dimension_semantics = [#tpu.dimension_semantics<parallel>, #tpu.dimension_semantics<parallel>], iteration_bounds = array<i64: 2, 1>, scalar_prefetch = 0 : i64, scratch_operands = 0 : i64, tpu.core_type = #tpu.core_type<tc>, window_params = [{transform_indices = @transform_0, window_bounds = array<i64: 1, 16, 256>}, {pipeline_mode = #tpu.pipeline_mode<synchronous>, transform_indices = @transform_1, window_bounds = array<i64: 256, 128>}, {pipeline_mode = #tpu.pipeline_mode<synchronous>, transform_indices = @transform_2, window_bounds = array<i64: 1, 256>}, {pipeline_mode = #tpu.pipeline_mode<synchronous>, transform_indices = @transform_3, window_bounds = array<i64: 1, 256>}, {transform_indices = @transform_4, window_bounds = array<i64: 1, 16, 128>}, {transform_indices = @transform_5, window_bounds = array<i64: 1, 1, 8, 128>}]} {
    %c0 = arith.constant 0 : index
    %c0_0 = arith.constant 0 : index
    %c0_1 = arith.constant 0 : index
    %0 = vector.load %arg2[%c0, %c0_0, %c0_1] : memref<1x16x256xbf16, #tpu.memory_space<vmem>>, vector<1x16x256xbf16>
    %1 = vector.shape_cast %0 : vector<1x16x256xbf16> to vector<16x256xbf16>
    %2 = arith.extf %1 : vector<16x256xbf16> to vector<16x256xf32>
    %c0_2 = arith.constant 0 : index
    %c0_3 = arith.constant 0 : index
    %3 = vector.load %arg4[%c0_2, %c0_3] : memref<1x256xf32, #tpu.memory_space<vmem>>, vector<1x256xf32>
    %4 = vector.broadcast %3 : vector<1x256xf32> to vector<16x256xf32>
    %5 = arith.mulf %2, %4 : vector<16x256xf32>
    %c0_4 = arith.constant 0 : index
    %c0_5 = arith.constant 0 : index
    %6 = vector.load %arg5[%c0_4, %c0_5] : memref<1x256xf32, #tpu.memory_space<vmem>>, vector<1x256xf32>
    %7 = vector.broadcast %6 : vector<1x256xf32> to vector<16x256xf32>
    %8 = arith.addf %5, %7 : vector<16x256xf32>
    %cst = arith.constant 0.000000e+00 : f32
    %9 = vector.broadcast %cst : f32 to vector<16x256xf32>
    %10 = arith.maximumf %8, %9 : vector<16x256xf32>
    %11 = arith.truncf %10 : vector<16x256xf32> to vector<16x256xbf16>
    %c0_6 = arith.constant 0 : index
    %c0_7 = arith.constant 0 : index
    %12 = vector.load %arg3[%c0_6, %c0_7] : memref<256x128xbf16, #tpu.memory_space<vmem>>, vector<256x128xbf16>
    %cst_8 = arith.constant dense<0.000000e+00> : vector<16x128xf32>
    %13 = tpu.matmul %11, %12, %cst_8 {dimension_numbers = #tpu.dot_dimension_numbers<[1], [0], [0], [1], [0, 0, 1, 1], [], []>} : vector<16x256xbf16>, vector<256x128xbf16>, vector<16x128xf32> -> vector<16x128xf32>
    %cst_9 = arith.constant dense<0.000000e+00> : vector<128xf32>
    %14 = vector.multi_reduction <add>, %13, %cst_9 [0] : vector<16x128xf32> to vector<128xf32>
    %15 = vector.shape_cast %14 : vector<128xf32> to vector<1x128xf32>
    %16 = vector.shape_cast %15 : vector<1x128xf32> to vector<1x128xf32>
    %17 = vector.broadcast %16 : vector<1x128xf32> to vector<8x128xf32>
    %18 = arith.mulf %13, %13 : vector<16x128xf32>
    %cst_10 = arith.constant dense<0.000000e+00> : vector<128xf32>
    %19 = vector.multi_reduction <add>, %18, %cst_10 [0] : vector<16x128xf32> to vector<128xf32>
    %20 = vector.shape_cast %19 : vector<128xf32> to vector<1x128xf32>
    %21 = vector.shape_cast %20 : vector<1x128xf32> to vector<1x128xf32>
    %22 = vector.broadcast %21 : vector<1x128xf32> to vector<8x128xf32>
    %23 = tpu.iota {dimensions = array<i32: 0>} : vector<8x128xi32>
    %c0_i32 = arith.constant 0 : i32
    %24 = vector.broadcast %c0_i32 : i32 to vector<8x128xi32>
    %25 = arith.cmpi eq, %23, %24 : vector<8x128xi32>
    %c1_i32 = arith.constant 1 : i32
    %26 = vector.broadcast %c1_i32 : i32 to vector<8x128xi32>
    %27 = arith.cmpi eq, %23, %26 : vector<8x128xi32>
    %cst_11 = arith.constant 0.000000e+00 : f32
    %28 = vector.broadcast %cst_11 : f32 to vector<8x128xf32>
    %29 = arith.select %27, %22, %28 : vector<8x128xi1>, vector<8x128xf32>
    %30 = arith.select %25, %17, %29 : vector<8x128xi1>, vector<8x128xf32>
    %c0_12 = arith.constant 0 : index
    %c0_13 = arith.constant 0 : index
    %c0_14 = arith.constant 0 : index
    %c0_15 = arith.constant 0 : index
    %31 = vector.load %arg7[%c0_12, %c0_13, %c0_14, %c0_15] : memref<1x1x8x128xf32, #tpu.memory_space<vmem>>, vector<1x1x8x128xf32>
    %32 = vector.shape_cast %31 : vector<1x1x8x128xf32> to vector<8x128xf32>
    %33 = vector.shape_cast %30 : vector<8x128xf32> to vector<1x1x8x128xf32>
    tpu.vector_store %arg7[%c0_12, %c0_13, %c0_14, %c0_15], %33 {strides = array<i32>} : memref<1x1x8x128xf32, #tpu.memory_space<vmem>>, vector<1x1x8x128xf32>,
    %34 = arith.truncf %13 : vector<16x128xf32> to vector<16x128xbf16>
    %c0_16 = arith.constant 0 : index
    %c0_17 = arith.constant 0 : index
    %c0_18 = arith.constant 0 : index
    %35 = vector.load %arg6[%c0_16, %c0_17, %c0_18] : memref<1x16x128xbf16, #tpu.memory_space<vmem>>, vector<1x16x128xbf16>
    %36 = vector.shape_cast %35 : vector<1x16x128xbf16> to vector<16x128xbf16>
    %37 = vector.shape_cast %34 : vector<16x128xbf16> to vector<1x16x128xbf16>
    tpu.vector_store %arg6[%c0_16, %c0_17, %c0_18], %37 {strides = array<i32>} : memref<1x16x128xbf16, #tpu.memory_space<vmem>>, vector<1x16x128xbf16>,
    return
  }
  func.func @transform_0(%arg0: i32, %arg1: i32) -> (i32, i32, i32) {
    %c0_i32 = arith.constant 0 : i32
    %c0_i32_0 = arith.constant 0 : i32
    return %arg0, %arg1, %c0_i32 : i32, i32, i32
  }
  func.func @transform_1(%arg0: i32, %arg1: i32) -> (i32, i32) {
    %c0_i32 = arith.constant 0 : i32
    %c0_i32_0 = arith.constant 0 : i32
    %c0_i32_1 = arith.constant 0 : i32
    return %c0_i32, %c0_i32_0 : i32, i32
  }
  func.func @transform_2(%arg0: i32, %arg1: i32) -> (i32, i32) {
    %c0_i32 = arith.constant 0 : i32
    %c0_i32_0 = arith.constant 0 : i32
    %c0_i32_1 = arith.constant 0 : i32
    return %c0_i32, %c0_i32_0 : i32, i32
  }
  func.func @transform_3(%arg0: i32, %arg1: i32) -> (i32, i32) {
    %c0_i32 = arith.constant 0 : i32
    %c0_i32_0 = arith.constant 0 : i32
    %c0_i32_1 = arith.constant 0 : i32
    return %c0_i32, %c0_i32_0 : i32, i32
  }
  func.func @transform_4(%arg0: i32, %arg1: i32) -> (i32, i32, i32) {
    %c0_i32 = arith.constant 0 : i32
    %c0_i32_0 = arith.constant 0 : i32
    return %arg0, %arg1, %c0_i32 : i32, i32, i32
  }
  func.func @transform_5(%arg0: i32, %arg1: i32) -> (i32, i32, i32, i32) {
    %c0_i32 = arith.constant 0 : i32
    %c0_i32_0 = arith.constant 0 : i32
    %c0_i32_1 = arith.constant 0 : i32
    return %arg0, %arg1, %c0_i32, %c0_i32_0 : i32, i32, i32, i32
  }
}

module attributes {stable_mosaic.version = 11 : i64} {
  func.func @_final_kernel(%arg0: i32, %arg1: i32, %arg2: memref<1x16x128xbf16, #tpu.memory_space<vmem>>, %arg3: memref<2x128xbf16, #tpu.memory_space<vmem>>, %arg4: memref<2x1xf32, #tpu.memory_space<vmem>>, %arg5: memref<1x128xf32, #tpu.memory_space<vmem>>, %arg6: memref<1x128xf32, #tpu.memory_space<vmem>>, %arg7: memref<1x2x16xf32, #tpu.memory_space<vmem>>) attributes {dimension_semantics = [#tpu.dimension_semantics<parallel>, #tpu.dimension_semantics<parallel>], iteration_bounds = array<i64: 2, 1>, scalar_prefetch = 0 : i64, scratch_operands = 0 : i64, tpu.core_type = #tpu.core_type<tc>, window_params = [{transform_indices = @transform_0, window_bounds = array<i64: 1, 16, 128>}, {pipeline_mode = #tpu.pipeline_mode<synchronous>, transform_indices = @transform_1, window_bounds = array<i64: 2, 128>}, {pipeline_mode = #tpu.pipeline_mode<synchronous>, transform_indices = @transform_2, window_bounds = array<i64: 2, 1>}, {pipeline_mode = #tpu.pipeline_mode<synchronous>, transform_indices = @transform_3, window_bounds = array<i64: 1, 128>}, {pipeline_mode = #tpu.pipeline_mode<synchronous>, transform_indices = @transform_4, window_bounds = array<i64: 1, 128>}, {transform_indices = @transform_5, window_bounds = array<i64: 1, 2, 16>}]} {
    %c0 = arith.constant 0 : index
    %c0_0 = arith.constant 0 : index
    %c0_1 = arith.constant 0 : index
    %0 = vector.load %arg2[%c0, %c0_0, %c0_1] : memref<1x16x128xbf16, #tpu.memory_space<vmem>>, vector<1x16x128xbf16>
    %1 = vector.shape_cast %0 : vector<1x16x128xbf16> to vector<16x128xbf16>
    %2 = arith.extf %1 : vector<16x128xbf16> to vector<16x128xf32>
    %c0_2 = arith.constant 0 : index
    %c0_3 = arith.constant 0 : index
    %3 = vector.load %arg5[%c0_2, %c0_3] : memref<1x128xf32, #tpu.memory_space<vmem>>, vector<1x128xf32>
    %4 = vector.broadcast %3 : vector<1x128xf32> to vector<16x128xf32>
    %5 = arith.mulf %2, %4 : vector<16x128xf32>
    %c0_4 = arith.constant 0 : index
    %c0_5 = arith.constant 0 : index
    %6 = vector.load %arg6[%c0_4, %c0_5] : memref<1x128xf32, #tpu.memory_space<vmem>>, vector<1x128xf32>
    %7 = vector.broadcast %6 : vector<1x128xf32> to vector<16x128xf32>
    %8 = arith.addf %5, %7 : vector<16x128xf32>
    %cst = arith.constant 0.000000e+00 : f32
    %9 = vector.broadcast %cst : f32 to vector<16x128xf32>
    %10 = arith.maximumf %8, %9 : vector<16x128xf32>
    %c0_6 = arith.constant 0 : index
    %c0_7 = arith.constant 0 : index
    %11 = vector.load %arg3[%c0_6, %c0_7] : memref<2x128xbf16, #tpu.memory_space<vmem>>, vector<2x128xbf16>
    %12 = arith.truncf %10 : vector<16x128xf32> to vector<16x128xbf16>
    %cst_8 = arith.constant dense<0.000000e+00> : vector<2x16xf32>
    %13 = tpu.matmul %11, %12, %cst_8 {dimension_numbers = #tpu.dot_dimension_numbers<[1], [1], [0], [0], [0, 0, 1, 0], [], []>} : vector<2x128xbf16>, vector<16x128xbf16>, vector<2x16xf32> -> vector<2x16xf32>
    %c0_9 = arith.constant 0 : index
    %c0_10 = arith.constant 0 : index
    %14 = vector.load %arg4[%c0_9, %c0_10] : memref<2x1xf32, #tpu.memory_space<vmem>>, vector<2x1xf32>
    %15 = vector.broadcast %14 : vector<2x1xf32> to vector<2x16xf32>
    %16 = arith.addf %13, %15 : vector<2x16xf32>
    %c0_11 = arith.constant 0 : index
    %c0_12 = arith.constant 0 : index
    %c0_13 = arith.constant 0 : index
    %17 = vector.load %arg7[%c0_11, %c0_12, %c0_13] : memref<1x2x16xf32, #tpu.memory_space<vmem>>, vector<1x2x16xf32>
    %18 = vector.shape_cast %17 : vector<1x2x16xf32> to vector<2x16xf32>
    %19 = vector.shape_cast %16 : vector<2x16xf32> to vector<1x2x16xf32>
    tpu.vector_store %arg7[%c0_11, %c0_12, %c0_13], %19 {strides = array<i32>} : memref<1x2x16xf32, #tpu.memory_space<vmem>>, vector<1x2x16xf32>,
    return
  }
  func.func @transform_0(%arg0: i32, %arg1: i32) -> (i32, i32, i32) {
    %c0_i32 = arith.constant 0 : i32
    %c0_i32_0 = arith.constant 0 : i32
    return %arg0, %arg1, %c0_i32 : i32, i32, i32
  }
  func.func @transform_1(%arg0: i32, %arg1: i32) -> (i32, i32) {
    %c0_i32 = arith.constant 0 : i32
    %c0_i32_0 = arith.constant 0 : i32
    %c0_i32_1 = arith.constant 0 : i32
    return %c0_i32, %c0_i32_0 : i32, i32
  }
  func.func @transform_2(%arg0: i32, %arg1: i32) -> (i32, i32) {
    %c0_i32 = arith.constant 0 : i32
    %c0_i32_0 = arith.constant 0 : i32
    %c0_i32_1 = arith.constant 0 : i32
    return %c0_i32, %c0_i32_0 : i32, i32
  }
  func.func @transform_3(%arg0: i32, %arg1: i32) -> (i32, i32) {
    %c0_i32 = arith.constant 0 : i32
    %c0_i32_0 = arith.constant 0 : i32
    %c0_i32_1 = arith.constant 0 : i32
    return %c0_i32, %c0_i32_0 : i32, i32
  }
  func.func @transform_4(%arg0: i32, %arg1: i32) -> (i32, i32) {
    %c0_i32 = arith.constant 0 : i32
    %c0_i32_0 = arith.constant 0 : i32
    %c0_i32_1 = arith.constant 0 : i32
    return %c0_i32, %c0_i32_0 : i32, i32
  }
  func.func @transform_5(%arg0: i32, %arg1: i32) -> (i32, i32, i32) {
    %c0_i32 = arith.constant 0 : i32
    %c0_i32_0 = arith.constant 0 : i32
    return %arg0, %c0_i32, %arg1 : i32, i32, i32
  }
}

</mosaic_0001>

<bundles_post_ra>
// kernel: pointnet_dense_cls_forward.11
= control target key start
LH: loop header
LB: loop body
LE: loop exit
PB: predicated region body
PF: predicated region fallthrough
CT: control target
= control target key end

     0   :  { %s523_s12 = smov 0   ;;  %s525_s13 = smov 0   ;;  %s566_s0 = inlined_call_operand.vmem [shape: f32[2,16,3], index: 0, kind: input, shape index: {}]   ;;  %s567_s1 = inlined_call_operand.vmem [shape: f32[3,128], index: 1, kind: input, shape index: {}]   ;;  %s568_s2 = inlined_call_operand.vmem [shape: bf16[2,16,128], index: 2, kind: output, shape index: {0}]   ;;  %s569_s3 = inlined_call_operand.vmem [shape: f32[2,1,8,128], index: 3, kind: output, shape index: {1}]  }
   0x1   :  { %s527_s14 = smov 0  }
   0x2 LB: > { %s26_s15 = sadd.s32 1, %s494_s13  ;;  %p430_p0 = scmp.ge.s32.totalorder %s498_s14, 1  ;;  %s498_s14 = sphi %s527_s14, %s14_s14   ;;  %s494_s13 = sphi %s525_s13, %s571_s13   ;;  %s490_s12 = sphi %s523_s12, %s570_s12  }
   0x3   : > { %p28_p1 = scmp.ge.s32.totalorder %s26_s15, 2  ;;  %p163_p2 = scmp.lt.s32.totalorder %s498_s14, 3 }
   0x5   : > { %s573_s15 = smov (%p28_p1, %s26_s15), 0  ;;  %p164_p3 = pnand %p430_p0, %p163_p2 }
   0x6   : > { %p203_p4 = scmp.lt.s32.totalorder (!%p164_p3), %s490_s12, 1 }
   0x7   : > { %167 = sbr.rel (%p164_p3) target bundleno = 164 (0xa4), region = 28 }
   0xc   : > { %v500_v0 = vmov 1   ;;  %v501_v1 = vmov 0   ;;  %s575_s12 = smov (!%p203_p4, %s490_s12), 1  ;;  %v502_v2 = vmov 2   ;;  %v231_v5 = vld [vmem:[%s567_s1] sm:$0x7]  ;;  %v287_v33 = vlaneseq }
   0xd   : > { %473 = vset.pattern.permute.xlu1 %v500_v0  ;;  %472 = vset.pattern.permute.xlu0 %v501_v1  ;;  %s438_s16 = sshll.u32 %s575_s12, 4  ;;  %v253_v7 = vperm.slane %v231_v5, 1  ;;  %v242_v8 = vperm.slane %v231_v5, 0  ;;  %v266_v11 = vperm.slane %v231_v5, 2  ;;  %s439_s22 = sshll.u32 %s575_s12, 3 }
   0xe   : > { %474 = vset.pattern.permute.xlu2 %v502_v2  ;;  %s210_s19 = scalar_lea.vmem %s566_s0, %s438_s16  ;;  %s220_s25 = scalar_lea.vmem %s568_s2, %s439_s22  ;;  %v288_v38 = vshrl.u32 %v287_v33, 7 }
   0xf   : > { %v229_v3 = vld [vmem:[%s210_s19] sm:$0xff]  ;;  %v230_v4 = vld [vmem:[%s210_s19 + $0x8] sm:$0xff]  ;;  %s228_s28 = scalar_lea.vmem %s569_s3, %s439_s22 }
  0x10   : > { %246 = vperm.xlu1 %473, %v229_v3   ;;  %234 = vperm.xlu0 %472, %v229_v3   ;;  %vm290_vm0 = vcmp.eq.s32.totalorder %v288_v38, 1  ;;  %vm289_vm1 = vcmp.eq.s32.totalorder %v288_v38, 0 }
  0x11   : > { %259 = vperm.xlu2 %474, %v229_v3  }
  0x18   : > { %250 = vperm.xlu1 %473, %v230_v4   ;;  %239 = vperm.xlu0 %472, %v230_v4  }
  0x19   : > { %263 = vperm.xlu2 %474, %v230_v4  }
  0x20   : > { %475 = vset.pattern.permute.xlu0 %v502_v2 }
  0x6b   : > { %v260_v6 = vpop.permute.xlu2 %259 }
  0x6c   : > { %v267_v14 = vmul.f32 %v266_v11, %v260_v6 }
  0x73   : > { %v264_v16 = vpop.permute.xlu2 %263 }
  0x74   : > { %v268_v22 = vmul.f32 %v266_v11, %v264_v16 }
  0x82   : > { %v247_v9 = vpop.permute.xlu1 %246  ;;  %v235_v10 = vpop.permute.xlu0 %234 }
  0x83   : > { %v254_v12 = vmul.f32 %v253_v7, %v247_v9  ;;  %v243_v13 = vmul.f32 %v242_v8, %v235_v10 }
  0x85   : > { %v256_v15 = vadd.f32 %v254_v12, %v243_v13 }
  0x87   : > { %v269_v21 = vadd.f32 %v267_v14, %v256_v15 }
  0x89   : > { %v278_v25 = vmul.f32 %v269_v21, %v269_v21 }
  0x8a   : > { %v251_v17 = vpop.permute.xlu1 %250  ;;  %v240_v18 = vpop.permute.xlu0 %239 }
  0x8b   : > { %v255_v19 = vmul.f32 %v253_v7, %v251_v17  ;;  %v244_v20 = vmul.f32 %v242_v8, %v240_v18 }
  0x8d   : > { %v257_v23 = vadd.f32 %v255_v19, %v244_v20 }
  0x8f   : > { %v270_v24 = vadd.f32 %v268_v22, %v257_v23 }
  0x91   : > { %v271_v26 = vadd.f32 %v270_v24, %v269_v21  ;;  %v279_v27 = vmul.f32 %v270_v24, %v270_v24  ;;  %v443_v28 = vpack.c.bf16 %v270_v24, %v269_v21 }
  0x93   : > { %v272_v29 = vrot.slane %v271_v26, 4  ;;  %v280_v30 = vadd.f32 %v279_v27, %v278_v25  ;;  %444 = vst [vmem:[%s220_s25] sm:$0xff] %v443_v28  }
  0x95   : > { %v273_v31 = vadd.f32 %v272_v29, %v271_v26  ;;  %v281_v32 = vrot.slane %v280_v30, 4 }
  0x97   : > { %v274_v34 = vrot.slane %v273_v31, 2  ;;  %v282_v35 = vadd.f32 %v281_v32, %v280_v30 }
  0x99   : > { %v275_v36 = vadd.f32 %v274_v34, %v273_v31  ;;  %v283_v37 = vrot.slane %v282_v35, 2 }
  0x9b   : > { %v284_v39 = vadd.f32 %v283_v37, %v282_v35  ;;  %v276_v40 = vrot.slane %v275_v36, 1 }
  0x9d   : > { %v285_v41 = vrot.slane %v284_v39, 1  ;;  %v277_v43 = vadd.f32 %v276_v40, %v275_v36 }
  0x9f   : > { %v286_v42 = vadd.f32 %v285_v41, %v284_v39 }
  0xa1   : > { %v291_v44 = vsel %vm290_vm0, %v286_v42, 0.0 }
  0xa2   : > { %v292_v45 = vsel %vm289_vm1, %v277_v43, %v291_v44 }
  0xa3   : > { %293 = vst [vmem:[%s228_s28] sm:$0xff] %v292_v45 }
  0xa4 PF: > { %s14_s14 = sadd.s32 1, %s498_s14   ;;  %s570_s12 = smov %s494_s13 }
  0xa5   : > { %p11_p5 = scmp.ge.s32.totalorder %s14_s14, 4   ;;  %s571_s13 = smov %s573_s15 }
  0xa7   :  { %13 = sbr.rel (!%p11_p5) target bundleno = 2 (0x2), region = 70 }

// kernel: pointnet_dense_cls_forward.12
= control target key start
LH: loop header
LB: loop body
LE: loop exit
PB: predicated region body
PF: predicated region fallthrough
CT: control target
= control target key end

     0   :  { %s678_s18 = smov 0   ;;  %s680_s19 = smov 0   ;;  %s749_s0 = inlined_call_operand.vmem [shape: bf16[2,16,128], index: 0, kind: input, shape index: {}]   ;;  %s750_s1 = inlined_call_operand.vmem [shape: bf16[128,128], index: 1, kind: input, shape index: {}]   ;;  %s751_s2 = inlined_call_operand.vmem [shape: f32[1,128], index: 2, kind: input, shape index: {}]   ;;  %s752_s3 = inlined_call_operand.vmem [shape: f32[1,128], index: 3, kind: input, shape index: {}]   ;;  %s753_s4 = inlined_call_operand.vmem [shape: bf16[2,16,128], index: 4, kind: output, shape index: {0}]   ;;  %s754_s5 = inlined_call_operand.vmem [shape: f32[2,1,8,128], index: 5, kind: output, shape index: {1}]  }
   0x1   :  { %s682_s20 = smov 0  }
   0x2 LB: > { %s28_s21 = sadd.s32 1, %s642_s19  ;;  %p539_p0 = scmp.ge.s32.totalorder %s646_s20, 1  ;;  %s646_s20 = sphi %s682_s20, %s16_s20   ;;  %s642_s19 = sphi %s680_s19, %s756_s19   ;;  %s638_s18 = sphi %s678_s18, %s755_s18  }
   0x3   : > { %p30_p1 = scmp.ge.s32.totalorder %s28_s21, 2  ;;  %p213_p2 = scmp.lt.s32.totalorder %s646_s20, 3 }
   0x5   : > { %s758_s21 = smov (%p30_p1, %s28_s21), 0  ;;  %p214_p3 = pnand %p539_p0, %p213_p2 }
   0x6   : > { %p257_p4 = scmp.lt.s32.totalorder (!%p214_p3), %s638_s18, 1 }
   0x7   : > { %217 = sbr.rel (%p214_p3) target bundleno = 197 (0xc5), region = 36 }
   0xc   : > { %v588_v0 = vld [vmem:[%s750_s1 + $0x38] sm:$0xff]  ;;  %v587_v1 = vld [vmem:[%s750_s1 + $0x30] sm:$0xff]  ;;  %s760_s18 = smov (!%p257_p4, %s638_s18), 1  ;;  %v586_v2 = vld [vmem:[%s750_s1 + $0x28] sm:$0xff]  ;;  %v396_v30 = vlaneseq }
   0xd   : > { %366 = vmatpush.bf16.msra.mxu0 %v588_v0  ;;  %s702_s26 = sshll.u32 %s760_s18, 3  ;;  %v585_v3 = vld [vmem:[%s750_s1 + $0x20] sm:$0xff]  ;;  %v584_v8 = vld [vmem:[%s750_s1 + $0x18] sm:$0xff]  ;;  %v583_v12 = vld [vmem:[%s750_s1 + $0x10] sm:$0xff] }
   0xe   : > { %s264_s6 = scalar_lea.vmem %s749_s0, %s702_s26  ;;  %v622_v7 = vld [vmem:[%s751_s2] ss:$0 sm:$0xff]  ;;  %v582_v15 = vld [vmem:[%s750_s1 + $0x8] sm:$0xff]  ;;  %s274_s27 = scalar_lea.vmem %s753_s4, %s702_s26  ;;  %v397_v35 = vshrl.u32 %v396_v30, 7 }
   0xf   : > { %v590_v4 = vld [vmem:[%s264_s6] sm:$0xff]   ;;  %s282_s30 = scalar_lea.vmem %s754_s5, %s702_s26 }
  0x10   : > { %v591_v5 = vunpack.c.l.bf16 %v590_v4  ;;  %v592_v6 = vunpack.c.h.bf16 %v590_v4  ;;  %v623_v11 = vld [vmem:[%s752_s3] ss:$0 sm:$0xff]  ;;  %vm399_vm0 = vcmp.eq.s32.totalorder %v397_v35, 1  ;;  %vm398_vm1 = vcmp.eq.s32.totalorder %v397_v35, 0 }
  0x11   : > { %367 = vmatpush.bf16.msra.mxu0 %v587_v1  ;;  %v581_v18 = vld [vmem:[%s750_s1] sm:$0xff] }
  0x12   : > { %v291_v9 = vmul.f32 %v622_v7, %v591_v5  ;;  %v292_v10 = vmul.f32 %v622_v7, %v592_v6 }
  0x14   : > { %v297_v13 = vadd.f32 %v623_v11, %v291_v9  ;;  %v298_v14 = vadd.f32 %v623_v11, %v292_v10 }
  0x15   : > { %368 = vmatpush.bf16.msra.mxu0 %v586_v2 }
  0x16   : > { %v299_v16 = vmax.f32 %v297_v13, 0.0  ;;  %v300_v17 = vmax.f32 %v298_v14, 0.0 }
  0x18   : > { %v301_v19 = vpack.c.bf16 %v300_v17, %v299_v16 }
  0x19   : > { %369 = vmatpush.bf16.msra.mxu0 %v585_v3 }
  0x1d   : > { %370 = vmatpush.bf16.msra.mxu0 %v584_v8 }
  0x21   : > { %371 = vmatpush.bf16.msra.mxu0 %v583_v12 }
  0x25   : > { %372 = vmatpush.bf16.msra.mxu0 %v582_v15 }
  0x29   : > { %373 = vmatpush.bf16.msra.mxu0 %v581_v18 }
  0x2c   : > { %374 = vmatmul.bf16.vlgmr.msra.gmra.mxu0 %v301_v19 }
  0xa9   : > { %v375_v20 = vpop.f32.mrf.mxu0 }
  0xaa   : > { %v387_v22 = vmul.f32 %v375_v20, %v375_v20 }
  0xb1   : > { %v377_v21 = vpop.f32.mrf.mxu0 }
  0xb2   : > { %v380_v23 = vadd.f32 %v377_v21, %v375_v20  ;;  %v388_v24 = vmul.f32 %v377_v21, %v377_v21  ;;  %v596_v25 = vpack.c.bf16 %v377_v21, %v375_v20 }
  0xb4   : > { %v381_v26 = vrot.slane %v380_v23, 4  ;;  %v389_v27 = vadd.f32 %v388_v24, %v387_v22  ;;  %597 = vst [vmem:[%s274_s27] sm:$0xff] %v596_v25  }
  0xb6   : > { %v382_v28 = vadd.f32 %v381_v26, %v380_v23  ;;  %v390_v29 = vrot.slane %v389_v27, 4 }
  0xb8   : > { %v383_v31 = vrot.slane %v382_v28, 2  ;;  %v391_v32 = vadd.f32 %v390_v29, %v389_v27 }
  0xba   : > { %v384_v33 = vadd.f32 %v383_v31, %v382_v28  ;;  %v392_v34 = vrot.slane %v391_v32, 2 }
  0xbc   : > { %v393_v36 = vadd.f32 %v392_v34, %v391_v32  ;;  %v385_v37 = vrot.slane %v384_v33, 1 }
  0xbe   : > { %v394_v38 = vrot.slane %v393_v36, 1  ;;  %v386_v40 = vadd.f32 %v385_v37, %v384_v33 }
  0xc0   : > { %v395_v39 = vadd.f32 %v394_v38, %v393_v36 }
  0xc2   : > { %v400_v41 = vsel %vm399_vm0, %v395_v39, 0.0 }
  0xc3   : > { %v401_v42 = vsel %vm398_vm1, %v386_v40, %v400_v41 }
  0xc4   : > { %402 = vst [vmem:[%s282_s30] sm:$0xff] %v401_v42 }
  0xc5 PF: > { %s16_s20 = sadd.s32 1, %s646_s20   ;;  %s755_s18 = smov %s642_s19 }
  0xc6   : > { %p13_p5 = scmp.ge.s32.totalorder %s16_s20, 4   ;;  %s756_s19 = smov %s758_s21 }
  0xc8   :  { %15 = sbr.rel (!%p13_p5) target bundleno = 2 (0x2), region = 78 }

// kernel: pointnet_dense_cls_forward.13
= control target key start
LH: loop header
LB: loop body
LE: loop exit
PB: predicated region body
PF: predicated region fallthrough
CT: control target
= control target key end

     0   :  { %s1538_s15 = smov 0   ;;  %s1540_s16 = smov 0   ;;  %s2110_s0 = inlined_call_operand.vmem [shape: bf16[2,16,128], index: 0, kind: input, shape index: {}]   ;;  %s2111_s1 = inlined_call_operand.vmem [shape: bf16[128,1024], index: 1, kind: input, shape index: {}]   ;;  %s2112_s2 = inlined_call_operand.vmem [shape: f32[1,128], index: 2, kind: input, shape index: {}]   ;;  %s2113_s3 = inlined_call_operand.vmem [shape: f32[1,128], index: 3, kind: input, shape index: {}]   ;;  %s2114_s4 = inlined_call_operand.vmem [shape: f32[2,1,8,1024], index: 4, kind: output, shape index: {}]  }
   0x1   :  { %s1542_s17 = smov 0  }
   0x2 LB: > { %s26_s18 = sadd.s32 1, %s1507_s16  ;;  %p1130_p0 = scmp.ge.s32.totalorder %s1511_s17, 1  ;;  %s1511_s17 = sphi %s1542_s17, %s14_s17   ;;  %s1507_s16 = sphi %s1540_s16, %s2116_s16   ;;  %s1503_s15 = sphi %s1538_s15, %s2115_s15  }
   0x3   : > { %p28_p1 = scmp.ge.s32.totalorder %s26_s18, 2  ;;  %p183_p2 = scmp.lt.s32.totalorder %s1511_s17, 3 }
   0x5   : > { %s2118_s18 = smov (%p28_p1, %s26_s18), 0  ;;  %p184_p3 = pnand %p1130_p0, %p183_p2 }
   0x6   : > { %p218_p4 = scmp.lt.s32.totalorder (!%p184_p3), %s1503_s15, 1 }
   0x7   : > { %187 = sbr.rel (%p184_p3) target bundleno = 261 (0x105), region = 36 }
   0xc   : > { %v1361_v0 = vld [vmem:[%s2111_s1 + $0x1c0] sm:$0xf]  ;;  %v1451_v2 = vld [vmem:[%s2111_s1 + $0x1c4] sm:$0xf]  ;;  %v1369_v5 = vld [vmem:[%s2111_s1 + $0x1c8] sm:$0xf] }
   0xd   : > { %v1455_v1 = vld [vmem:[%s2111_s1 + $0x1dc] sm:$0xf0]  ;;  %v1363_v4 = vld [vmem:[%s2111_s1 + $0x1e0] sm:$0xf0]  ;;  %v1456_v6 = vld [vmem:[%s2111_s1 + $0x1e4] sm:$0xf0] }
   0xe   : > { %v1362_v3 = vor.u32 %v1455_v1, %v1361_v0  ;;  %v1366_v7 = vor.u32 %v1451_v2, %v1363_v4  ;;  %v1370_v8 = vor.u32 %v1456_v6, %v1369_v5  ;;  %v1452_v9 = vld [vmem:[%s2111_s1 + $0x1cc] sm:$0xf]  ;;  %v1329_v11 = vld [vmem:[%s2111_s1 + $0x180] sm:$0xf]  ;;  %v1443_v14 = vld [vmem:[%s2111_s1 + $0x184] sm:$0xf] }
   0xf   : > { %v1371_v10 = vld [vmem:[%s2111_s1 + $0x1e8] sm:$0xf0]  ;;  %v1447_v13 = vld [vmem:[%s2111_s1 + $0x19c] sm:$0xf0]  ;;  %v1331_v15 = vld [vmem:[%s2111_s1 + $0x1a0] sm:$0xf0] }
  0x10   : > { %639 = vmatpush.bf16.msra.mxu0 %v1362_v3  ;;  %v1374_v12 = vor.u32 %v1452_v9, %v1371_v10  ;;  %653 = vmatpush.bf16.msra.mxu1 %v1366_v7  ;;  %v1330_v16 = vor.u32 %v1447_v13, %v1329_v11  ;;  %v1334_v17 = vor.u32 %v1443_v14, %v1331_v15  ;;  %v1337_v18 = vld [vmem:[%s2111_s1 + $0x188] sm:$0xf]  ;;  %v1444_v20 = vld [vmem:[%s2111_s1 + $0x18c] sm:$0xf]  ;;  %v1297_v23 = vld [vmem:[%s2111_s1 + $0x140] sm:$0xf] }
  0x11   : > { %667 = vmatpush.bf16.msra.mxu2 %v1370_v8  ;;  %v1448_v19 = vld [vmem:[%s2111_s1 + $0x1a4] sm:$0xf0]  ;;  %v1339_v22 = vld [vmem:[%s2111_s1 + $0x1a8] sm:$0xf0]  ;;  %v1439_v24 = vld [vmem:[%s2111_s1 + $0x15c] sm:$0xf0] }
  0x12   : > { %681 = vmatpush.bf16.msra.mxu3 %v1374_v12  ;;  %v1338_v21 = vor.u32 %v1448_v19, %v1337_v18  ;;  %v1342_v25 = vor.u32 %v1444_v20, %v1339_v22  ;;  %v1435_v26 = vld [vmem:[%s2111_s1 + $0x144] sm:$0xf]  ;;  %v1305_v28 = vld [vmem:[%s2111_s1 + $0x148] sm:$0xf]  ;;  %v1298_v29 = vor.u32 %v1439_v24, %v1297_v23  ;;  %v1436_v31 = vld [vmem:[%s2111_s1 + $0x14c] sm:$0xf] }
  0x13   : > { %v1299_v27 = vld [vmem:[%s2111_s1 + $0x160] sm:$0xf0]  ;;  %v1440_v30 = vld [vmem:[%s2111_s1 + $0x164] sm:$0xf0]  ;;  %v1307_v32 = vld [vmem:[%s2111_s1 + $0x168] sm:$0xf0] }
  0x14   : > { %640 = vmatpush.bf16.msra.mxu0 %v1330_v16  ;;  %654 = vmatpush.bf16.msra.mxu1 %v1334_v17  ;;  %v1302_v33 = vor.u32 %v1435_v26, %v1299_v27  ;;  %v1306_v34 = vor.u32 %v1440_v30, %v1305_v28  ;;  %v1265_v35 = vld [vmem:[%s2111_s1 + $0x100] sm:$0xf]  ;;  %v1427_v37 = vld [vmem:[%s2111_s1 + $0x104] sm:$0xf]  ;;  %v1310_v38 = vor.u32 %v1436_v31, %v1307_v32  ;;  %v1273_v40 = vld [vmem:[%s2111_s1 + $0x108] sm:$0xf] }
  0x15   : > { %668 = vmatpush.bf16.msra.mxu2 %v1338_v21  ;;  %v1431_v36 = vld [vmem:[%s2111_s1 + $0x11c] sm:$0xf0]  ;;  %v1267_v39 = vld [vmem:[%s2111_s1 + $0x120] sm:$0xf0]  ;;  %v1432_v41 = vld [vmem:[%s2111_s1 + $0x124] sm:$0xf0] }
  0x16   : > { %682 = vmatpush.bf16.msra.mxu3 %v1342_v25  ;;  %v1428_v42 = vld [vmem:[%s2111_s1 + $0x10c] sm:$0xf]  ;;  %v1266_v44 = vor.u32 %v1431_v36, %v1265_v35  ;;  %v1270_v45 = vor.u32 %v1427_v37, %v1267_v39  ;;  %v1274_v46 = vor.u32 %v1432_v41, %v1273_v40  ;;  %v1233_v47 = vld [vmem:[%s2111_s1 + $0xc0] sm:$0xf]  ;;  %v1419_v49 = vld [vmem:[%s2111_s1 + $0xc4] sm:$0xf] }
  0x17   : > { %v1275_v43 = vld [vmem:[%s2111_s1 + $0x128] sm:$0xf0]  ;;  %v1423_v48 = vld [vmem:[%s2111_s1 + $0xdc] sm:$0xf0]  ;;  %v1235_v51 = vld [vmem:[%s2111_s1 + $0xe0] sm:$0xf0] }
  0x18   : > { %641 = vmatpush.bf16.msra.mxu0 %v1298_v29  ;;  %655 = vmatpush.bf16.msra.mxu1 %v1302_v33  ;;  %v1278_v50 = vor.u32 %v1428_v42, %v1275_v43  ;;  %v1241_v52 = vld [vmem:[%s2111_s1 + $0xc8] sm:$0xf]  ;;  %v1420_v54 = vld [vmem:[%s2111_s1 + $0xcc] sm:$0xf]  ;;  %v1234_v56 = vor.u32 %v1423_v48, %v1233_v47  ;;  %v1238_v57 = vor.u32 %v1419_v49, %v1235_v51  ;;  %v1201_v59 = vld [vmem:[%s2111_s1 + $0x80] sm:$0xf] }
  0x19   : > { %669 = vmatpush.bf16.msra.mxu2 %v1306_v34  ;;  %v1424_v53 = vld [vmem:[%s2111_s1 + $0xe4] sm:$0xf0]  ;;  %v1243_v55 = vld [vmem:[%s2111_s1 + $0xe8] sm:$0xf0]  ;;  %v1415_v60 = vld [vmem:[%s2111_s1 + $0x9c] sm:$0xf0] }
  0x1a   : > { %683 = vmatpush.bf16.msra.mxu3 %v1310_v38  ;;  %v1242_v58 = vor.u32 %v1424_v53, %v1241_v52  ;;  %v1411_v61 = vld [vmem:[%s2111_s1 + $0x84] sm:$0xf]  ;;  %v1246_v62 = vor.u32 %v1420_v54, %v1243_v55  ;;  %v1209_v0 = vld [vmem:[%s2111_s1 + $0x88] sm:$0xf]  ;;  %v1412_v2 = vld [vmem:[%s2111_s1 + $0x8c] sm:$0xf]  ;;  %v1202_v4 = vor.u32 %v1415_v60, %v1201_v59 }
  0x1b   : > { %v1203_v63 = vld [vmem:[%s2111_s1 + $0xa0] sm:$0xf0]  ;;  %v1416_v1 = vld [vmem:[%s2111_s1 + $0xa4] sm:$0xf0]  ;;  %v1211_v3 = vld [vmem:[%s2111_s1 + $0xa8] sm:$0xf0] }
  0x1c   : > { %642 = vmatpush.bf16.msra.mxu0 %v1266_v44  ;;  %656 = vmatpush.bf16.msra.mxu1 %v1270_v45  ;;  %v1169_v5 = vld [vmem:[%s2111_s1 + $0x40] sm:$0xf]  ;;  %v1206_v6 = vor.u32 %v1411_v61, %v1203_v63  ;;  %v1210_v7 = vor.u32 %v1416_v1, %v1209_v0  ;;  %v1403_v9 = vld [vmem:[%s2111_s1 + $0x44] sm:$0xf]  ;;  %v1214_v11 = vor.u32 %v1412_v2, %v1211_v3  ;;  %v1177_v12 = vld [vmem:[%s2111_s1 + $0x48] sm:$0xf] }
  0x1d   : > { %670 = vmatpush.bf16.msra.mxu2 %v1274_v46  ;;  %v1407_v8 = vld [vmem:[%s2111_s1 + $0x5c] sm:$0xf0]  ;;  %v1171_v10 = vld [vmem:[%s2111_s1 + $0x60] sm:$0xf0]  ;;  %v1408_v13 = vld [vmem:[%s2111_s1 + $0x64] sm:$0xf0] }
  0x1e   : > { %684 = vmatpush.bf16.msra.mxu3 %v1278_v50  ;;  %v1404_v14 = vld [vmem:[%s2111_s1 + $0x4c] sm:$0xf]  ;;  %v1137_v16 = vld [vmem:[%s2111_s1] sm:$0xf]  ;;  %v1170_v18 = vor.u32 %v1407_v8, %v1169_v5  ;;  %v1395_v19 = vld [vmem:[%s2111_s1 + $0x4] sm:$0xf]  ;;  %v1174_v23 = vor.u32 %v1403_v9, %v1171_v10  ;;  %v1178_v24 = vor.u32 %v1408_v13, %v1177_v12 }
  0x1f   : > { %v1179_v15 = vld [vmem:[%s2111_s1 + $0x68] sm:$0xf0]  ;;  %v1399_v17 = vld [vmem:[%s2111_s1 + $0x1c] sm:$0xf0]  ;;  %v1139_v20 = vld [vmem:[%s2111_s1 + $0x20] sm:$0xf0] }
  0x20   : > { %643 = vmatpush.bf16.msra.mxu0 %v1234_v56  ;;  %657 = vmatpush.bf16.msra.mxu1 %v1238_v57  ;;  %v1145_v21 = vld [vmem:[%s2111_s1 + $0x8] sm:$0xf]  ;;  %v1396_v25 = vld [vmem:[%s2111_s1 + $0xc] sm:$0xf]  ;;  %v1182_v26 = vor.u32 %v1404_v14, %v1179_v15  ;;  %v1377_v28 = vld [vmem:[%s2111_s1 + $0x1d0] sm:$0xf]  ;;  %v1138_v31 = vor.u32 %v1399_v17, %v1137_v16  ;;  %v1142_v35 = vor.u32 %v1395_v19, %v1139_v20 }
  0x21   : > { %671 = vmatpush.bf16.msra.mxu2 %v1242_v58  ;;  %v1400_v22 = vld [vmem:[%s2111_s1 + $0x24] sm:$0xf0]  ;;  %v1147_v27 = vld [vmem:[%s2111_s1 + $0x28] sm:$0xf0]  ;;  %v1457_v29 = vld [vmem:[%s2111_s1 + $0x1ec] sm:$0xf0] }
  0x22   : > { %685 = vmatpush.bf16.msra.mxu3 %v1246_v62  ;;  %v1453_v30 = vld [vmem:[%s2111_s1 + $0x1d4] sm:$0xf]  ;;  %s2120_s15 = smov (!%p218_p4, %s1503_s15), 1  ;;  %v1385_v33 = vld [vmem:[%s2111_s1 + $0x1d8] sm:$0xf]  ;;  %v1146_v36 = vor.u32 %v1400_v22, %v1145_v21  ;;  %v1150_v39 = vor.u32 %v1396_v25, %v1147_v27  ;;  %v1378_v40 = vor.u32 %v1457_v29, %v1377_v28 }
  0x23   : > { %v1379_v32 = vld [vmem:[%s2111_s1 + $0x1f0] sm:$0xf0]  ;;  %v1458_v34 = vld [vmem:[%s2111_s1 + $0x1f4] sm:$0xf0]  ;;  %v1454_v37 = vld [vmem:[%s2111_s1 + $0x1dc] sm:$0xf] }
  0x24   : > { %644 = vmatpush.bf16.msra.mxu0 %v1202_v4  ;;  %658 = vmatpush.bf16.msra.mxu1 %v1206_v6  ;;  %v1387_v38 = vld [vmem:[%s2111_s1 + $0x1f8] sm:$0xf0]  ;;  %s1393_s5 = sshll.u32 %s2120_s15, 3  ;;  %v1487_v41 = vld [vmem:[%s2112_s2] ss:$0 sm:$0xff]  ;;  %v1382_v44 = vor.u32 %v1453_v30, %v1379_v32  ;;  %v1386_v45 = vor.u32 %v1458_v34, %v1385_v33  ;;  %s1394_s19 = sshll.u32 %s2120_s15, 6 }
  0x25   : > { %672 = vmatpush.bf16.msra.mxu2 %v1210_v7  ;;  %s225_s8 = scalar_lea.vmem %s2110_s0, %s1393_s5  ;;  %v1488_v42 = vld [vmem:[%s2113_s3] ss:$0 sm:$0xff]  ;;  %v1345_v43 = vld [vmem:[%s2111_s1 + $0x190] sm:$0xf]  ;;  %v1445_v48 = vld [vmem:[%s2111_s1 + $0x194] sm:$0xf]  ;;  %v1390_v49 = vor.u32 %v1454_v37, %v1387_v38  ;;  %s1991_s22 = scalar_lea.vmem %s2114_s4, %s1394_s19 }
  0x26   : > { %686 = vmatpush.bf16.msra.mxu3 %v1214_v11  ;;  %v1460_v46 = vld [vmem:[%s225_s8] sm:$0xff]   ;;  %v1449_v47 = vld [vmem:[%s2111_s1 + $0x1ac] sm:$0xf0]  ;;  %v1347_v52 = vld [vmem:[%s2111_s1 + $0x1b0] sm:$0xf0] }
  0x27   : > { %v1461_v50 = vunpack.c.l.bf16 %v1460_v46  ;;  %v1462_v51 = vunpack.c.h.bf16 %v1460_v46  ;;  %v1353_v53 = vld [vmem:[%s2111_s1 + $0x198] sm:$0xf]  ;;  %v1446_v55 = vld [vmem:[%s2111_s1 + $0x19c] sm:$0xf]  ;;  %v1346_v59 = vor.u32 %v1449_v47, %v1345_v43  ;;  %v1350_v60 = vor.u32 %v1445_v48, %v1347_v52  ;;  %v1313_v1 = vld [vmem:[%s2111_s1 + $0x150] sm:$0xf] }
  0x28   : > { %645 = vmatpush.bf16.msra.mxu0 %v1170_v18  ;;  %659 = vmatpush.bf16.msra.mxu1 %v1174_v23  ;;  %v1450_v54 = vld [vmem:[%s2111_s1 + $0x1b4] sm:$0xf0]  ;;  %v1355_v56 = vld [vmem:[%s2111_s1 + $0x1b8] sm:$0xf0]  ;;  %v1441_v2 = vld [vmem:[%s2111_s1 + $0x16c] sm:$0xf0] }
  0x29   : > { %673 = vmatpush.bf16.msra.mxu2 %v1178_v24  ;;  %v244_v57 = vmul.f32 %v1487_v41, %v1461_v50  ;;  %v245_v58 = vmul.f32 %v1487_v41, %v1462_v51  ;;  %v1354_v61 = vor.u32 %v1450_v54, %v1353_v53  ;;  %v1358_v0 = vor.u32 %v1446_v55, %v1355_v56  ;;  %v1437_v3 = vld [vmem:[%s2111_s1 + $0x154] sm:$0xf]  ;;  %v1321_v5 = vld [vmem:[%s2111_s1 + $0x158] sm:$0xf]  ;;  %v1438_v9 = vld [vmem:[%s2111_s1 + $0x15c] sm:$0xf] }
  0x2a   : > { %687 = vmatpush.bf16.msra.mxu3 %v1182_v26  ;;  %v1315_v4 = vld [vmem:[%s2111_s1 + $0x170] sm:$0xf0]  ;;  %v1442_v6 = vld [vmem:[%s2111_s1 + $0x174] sm:$0xf0]  ;;  %v1323_v10 = vld [vmem:[%s2111_s1 + $0x178] sm:$0xf0]  ;;  %v1314_v12 = vor.u32 %v1441_v2, %v1313_v1 }
  0x2b   : > { %v250_v62 = vadd.f32 %v1488_v42, %v244_v57  ;;  %v251_v63 = vadd.f32 %v1488_v42, %v245_v58  ;;  %v1318_v13 = vor.u32 %v1437_v3, %v1315_v4  ;;  %v1281_v14 = vld [vmem:[%s2111_s1 + $0x110] sm:$0xf]  ;;  %v1322_v16 = vor.u32 %v1442_v6, %v1321_v5  ;;  %v1429_v18 = vld [vmem:[%s2111_s1 + $0x114] sm:$0xf]  ;;  %v1289_v20 = vld [vmem:[%s2111_s1 + $0x118] sm:$0xf] }
  0x2c   : > { %646 = vmatpush.bf16.msra.mxu0 %v1138_v31  ;;  %660 = vmatpush.bf16.msra.mxu1 %v1142_v35  ;;  %v1433_v15 = vld [vmem:[%s2111_s1 + $0x12c] sm:$0xf0]  ;;  %v1326_v17 = vor.u32 %v1438_v9, %v1323_v10  ;;  %v1283_v19 = vld [vmem:[%s2111_s1 + $0x130] sm:$0xf0]  ;;  %v1434_v21 = vld [vmem:[%s2111_s1 + $0x134] sm:$0xf0] }
  0x2d   : > { %674 = vmatpush.bf16.msra.mxu2 %v1146_v36  ;;  %v252_v7 = vmax.f32 %v250_v62, 0.0  ;;  %v253_v8 = vmax.f32 %v251_v63, 0.0  ;;  %v1430_v22 = vld [vmem:[%s2111_s1 + $0x11c] sm:$0xf]  ;;  %v1282_v24 = vor.u32 %v1433_v15, %v1281_v14  ;;  %v1286_v25 = vor.u32 %v1429_v18, %v1283_v19  ;;  %v1249_v26 = vld [vmem:[%s2111_s1 + $0xd0] sm:$0xf] }
  0x2e   : > { %688 = vmatpush.bf16.msra.mxu3 %v1150_v39  ;;  %v1291_v23 = vld [vmem:[%s2111_s1 + $0x138] sm:$0xf0]  ;;  %v1425_v27 = vld [vmem:[%s2111_s1 + $0xec] sm:$0xf0]  ;;  %v1290_v28 = vor.u32 %v1434_v21, %v1289_v20  ;;  %v1421_v30 = vld [vmem:[%s2111_s1 + $0xd4] sm:$0xf]  ;;  %v991_v15 = vlaneseq }
  0x2f   : > { %v1836_v11 = vpack.c.bf16 %v253_v8, %v252_v7  ;;  %v1294_v29 = vor.u32 %v1430_v22, %v1291_v23  ;;  %v1251_v31 = vld [vmem:[%s2111_s1 + $0xf0] sm:$0xf0]  ;;  %v1257_v32 = vld [vmem:[%s2111_s1 + $0xd8] sm:$0xf]  ;;  %v1422_v34 = vld [vmem:[%s2111_s1 + $0xdc] sm:$0xf]  ;;  %v1250_v36 = vor.u32 %v1425_v27, %v1249_v26 }
  0x30   : > { %695 = vmatpush.bf16.msrb.mxu0 %v1378_v40  ;;  %709 = vmatpush.bf16.msrb.mxu1 %v1382_v44  ;;  %v1426_v33 = vld [vmem:[%s2111_s1 + $0xf4] sm:$0xf0]  ;;  %v1259_v35 = vld [vmem:[%s2111_s1 + $0xf8] sm:$0xf0]  ;;  %v1254_v37 = vor.u32 %v1421_v30, %v1251_v31  ;;  %v1217_v38 = vld [vmem:[%s2111_s1 + $0x90] sm:$0xf] }
  0x31   : > { %723 = vmatpush.bf16.msrb.mxu2 %v1386_v45  ;;  %689 = vmatmul.bf16.vlgmr.msra.gmra.mxu3 %v1836_v11  ;;  %v1417_v39 = vld [vmem:[%s2111_s1 + $0xac] sm:$0xf0]  ;;  %v1258_v40 = vor.u32 %v1426_v33, %v1257_v32  ;;  %v1262_v41 = vor.u32 %v1422_v34, %v1259_v35  ;;  %v1413_v42 = vld [vmem:[%s2111_s1 + $0x94] sm:$0xf]  ;;  %v1225_v44 = vld [vmem:[%s2111_s1 + $0x98] sm:$0xf] }
  0x32   : > { %737 = vmatpush.bf16.msrb.mxu3 %v1390_v49  ;;  %675 = vmatmul.bf16.vlgmr.msra.gmra.mxu2 %v1836_v11  ;;  %v1219_v43 = vld [vmem:[%s2111_s1 + $0xb0] sm:$0xf0]  ;;  %v1418_v45 = vld [vmem:[%s2111_s1 + $0xb4] sm:$0xf0]  ;;  %v1414_v46 = vld [vmem:[%s2111_s1 + $0x9c] sm:$0xf]  ;;  %v1218_v48 = vor.u32 %v1417_v39, %v1217_v38 }
  0x33   : > { %647 = vmatmul.bf16.vlgmr.msra.gmra.mxu0 %v1836_v11  ;;  %661 = vmatmul.bf16.vlgmr.msra.gmra.mxu1 %v1836_v11  ;;  %v1227_v47 = vld [vmem:[%s2111_s1 + $0xb8] sm:$0xf0]  ;;  %v1222_v49 = vor.u32 %v1413_v42, %v1219_v43  ;;  %v1185_v50 = vld [vmem:[%s2111_s1 + $0x50] sm:$0xf]  ;;  %v1226_v52 = vor.u32 %v1418_v45, %v1225_v44  ;;  %v1405_v54 = vld [vmem:[%s2111_s1 + $0x54] sm:$0xf] }
  0x34   : > { %696 = vmatpush.bf16.msrb.mxu0 %v1346_v59  ;;  %710 = vmatpush.bf16.msrb.mxu1 %v1350_v60  ;;  %v1409_v51 = vld [vmem:[%s2111_s1 + $0x6c] sm:$0xf0]  ;;  %v1230_v53 = vor.u32 %v1414_v46, %v1227_v47  ;;  %v1187_v55 = vld [vmem:[%s2111_s1 + $0x70] sm:$0xf0]  ;;  %v1193_v56 = vld [vmem:[%s2111_s1 + $0x58] sm:$0xf] }
  0x35   : > { %724 = vmatpush.bf16.msrb.mxu2 %v1354_v61  ;;  %v1410_v57 = vld [vmem:[%s2111_s1 + $0x74] sm:$0xf0]  ;;  %v1406_v58 = vld [vmem:[%s2111_s1 + $0x5c] sm:$0xf]  ;;  %v1186_v60 = vor.u32 %v1409_v51, %v1185_v50  ;;  %v1190_v61 = vor.u32 %v1405_v54, %v1187_v55  ;;  %v1153_v62 = vld [vmem:[%s2111_s1 + $0x10] sm:$0xf] }
  0x36   : > { %738 = vmatpush.bf16.msrb.mxu3 %v1358_v0  ;;  %v1195_v59 = vld [vmem:[%s2111_s1 + $0x78] sm:$0xf0]  ;;  %v1401_v63 = vld [vmem:[%s2111_s1 + $0x2c] sm:$0xf0]  ;;  %v1194_v0 = vor.u32 %v1410_v57, %v1193_v56  ;;  %v1397_v2 = vld [vmem:[%s2111_s1 + $0x14] sm:$0xf] }
  0x37   : > { %v1198_v1 = vor.u32 %v1406_v58, %v1195_v59  ;;  %v1155_v3 = vld [vmem:[%s2111_s1 + $0x30] sm:$0xf0]  ;;  %v1161_v4 = vld [vmem:[%s2111_s1 + $0x18] sm:$0xf]  ;;  %v1398_v6 = vld [vmem:[%s2111_s1 + $0x1c] sm:$0xf]  ;;  %v1154_v8 = vor.u32 %v1401_v63, %v1153_v62 }
  0x38   : > { %697 = vmatpush.bf16.msrb.mxu0 %v1314_v12  ;;  %711 = vmatpush.bf16.msrb.mxu1 %v1318_v13  ;;  %v1402_v5 = vld [vmem:[%s2111_s1 + $0x34] sm:$0xf0]  ;;  %v1163_v7 = vld [vmem:[%s2111_s1 + $0x38] sm:$0xf0]  ;;  %v1158_v9 = vor.u32 %v1397_v2, %v1155_v3  ;;  %v1978_v23 = vshrl.u32 %v991_v15, 7 }
  0x39   : > { %725 = vmatpush.bf16.msrb.mxu2 %v1322_v16  ;;  %v1162_v10 = vor.u32 %v1402_v5, %v1161_v4  ;;  %v1166_v12 = vor.u32 %v1398_v6, %v1163_v7 }
  0x3a   : > { %739 = vmatpush.bf16.msrb.mxu3 %v1326_v17  ;;  %vm996_vm0 = vcmp.eq.s32.totalorder %v1978_v23, 3  ;;  %vm995_vm1 = vcmp.eq.s32.totalorder %v1978_v23, 2  ;;  %vm994_vm2 = vcmp.eq.s32.totalorder %v1978_v23, 1  ;;  %vm993_vm3 = vcmp.eq.s32.totalorder %v1978_v23, 0 }
  0x3c   : > { %698 = vmatpush.bf16.msrb.mxu0 %v1282_v24  ;;  %712 = vmatpush.bf16.msrb.mxu1 %v1286_v25 }
  0x3d   : > { %726 = vmatpush.bf16.msrb.mxu2 %v1290_v28 }
  0x3e   : > { %740 = vmatpush.bf16.msrb.mxu3 %v1294_v29 }
  0x40   : > { %699 = vmatpush.bf16.msrb.mxu0 %v1250_v36  ;;  %713 = vmatpush.bf16.msrb.mxu1 %v1254_v37 }
  0x41   : > { %727 = vmatpush.bf16.msrb.mxu2 %v1258_v40 }
  0x42   : > { %741 = vmatpush.bf16.msrb.mxu3 %v1262_v41 }
  0x44   : > { %700 = vmatpush.bf16.msrb.mxu0 %v1218_v48  ;;  %714 = vmatpush.bf16.msrb.mxu1 %v1222_v49 }
  0x45   : > { %728 = vmatpush.bf16.msrb.mxu2 %v1226_v52 }
  0x46   : > { %742 = vmatpush.bf16.msrb.mxu3 %v1230_v53 }
  0x48   : > { %701 = vmatpush.bf16.msrb.mxu0 %v1186_v60  ;;  %715 = vmatpush.bf16.msrb.mxu1 %v1190_v61 }
  0x49   : > { %729 = vmatpush.bf16.msrb.mxu2 %v1194_v0 }
  0x4a   : > { %743 = vmatpush.bf16.msrb.mxu3 %v1198_v1 }
  0x4c   : > { %702 = vmatpush.bf16.msrb.mxu0 %v1154_v8  ;;  %716 = vmatpush.bf16.msrb.mxu1 %v1158_v9 }
  0x4d   : > { %730 = vmatpush.bf16.msrb.mxu2 %v1162_v10 }
  0x4e   : > { %744 = vmatpush.bf16.msrb.mxu3 %v1166_v12 }
  0x4f   : > { %703 = vmatmul.bf16.vlgmr.msrb.gmra.mxu0 %v1836_v11  ;;  %717 = vmatmul.bf16.vlgmr.msrb.gmra.mxu1 %v1836_v11 }
  0x50   : > { %731 = vmatmul.bf16.vlgmr.msrb.gmra.mxu2 %v1836_v11 }
  0x51   : > { %745 = vmatmul.bf16.vlgmr.msrb.gmra.mxu3 %v1836_v11 }
  0xb0   : > { %v648_v13 = vpop.f32.mrf.mxu0  ;;  %v662_v14 = vpop.f32.mrf.mxu1 }
  0xb1   : > { %v807_v16 = vmul.f32 %v648_v13, %v648_v13  ;;  %v808_v19 = vmul.f32 %v662_v14, %v662_v14 }
  0xb4   : > { %v1968_v18 = vpop.f32.mrf.mxu3 }
  0xb5   : > { %v1966_v17 = vpop.f32.mrf.mxu2  ;;  %v1976_v21 = vmul.f32 %v1968_v18, %v1968_v18 }
  0xb6   : > { %v1972_v20 = vmul.f32 %v1966_v17, %v1966_v17 }
  0xb8   : > { %v650_v22 = vpop.f32.mrf.mxu0  ;;  %v664_v11 = vpop.f32.mrf.mxu1 }
  0xb9   : > { %v751_v24 = vadd.f32 %v650_v22, %v648_v13  ;;  %v815_v25 = vmul.f32 %v650_v22, %v650_v22  ;;  %v879_v26 = vmax.f32 %v648_v13, %v650_v22  ;;  %v935_v27 = vmin.f32 %v648_v13, %v650_v22 }
  0xba   : > { %v758_v28 = vadd.f32 %v664_v11, %v662_v14  ;;  %v816_v29 = vmul.f32 %v664_v11, %v664_v11  ;;  %v886_v30 = vmax.f32 %v662_v14, %v664_v11  ;;  %v942_v31 = vmin.f32 %v662_v14, %v664_v11 }
  0xbb   : > { %v752_v32 = vrot.slane %v751_v24, 4  ;;  %v823_v33 = vadd.f32 %v815_v25, %v807_v16  ;;  %v880_v34 = vrot.slane %v879_v26, 4  ;;  %v936_v35 = vrot.slane %v935_v27, 4 }
  0xbc   : > { %v759_v36 = vrot.slane %v758_v28, 4  ;;  %v830_v37 = vadd.f32 %v816_v29, %v808_v19  ;;  %v887_v38 = vrot.slane %v886_v30, 4  ;;  %v943_v39 = vrot.slane %v942_v31, 4 }
  0xbd   : > { %v753_v40 = vadd.f32 %v752_v32, %v751_v24  ;;  %v824_v41 = vrot.slane %v823_v33, 4  ;;  %v881_v42 = vmax.f32 %v879_v26, %v880_v34  ;;  %v937_v43 = vmin.f32 %v935_v27, %v936_v35  ;;  %v678_v8 = vpop.f32.mrf.mxu2 }
  0xbe   : > { %v760_v44 = vadd.f32 %v759_v36, %v758_v28  ;;  %v831_v45 = vrot.slane %v830_v37, 4  ;;  %v888_v46 = vmax.f32 %v886_v30, %v887_v38  ;;  %v944_v47 = vmin.f32 %v942_v31, %v943_v39  ;;  %v692_v30 = vpop.f32.mrf.mxu3 }
  0xbf   : > { %v754_v48 = vrot.slane %v753_v40, 2  ;;  %v825_v49 = vadd.f32 %v824_v41, %v823_v33  ;;  %v882_v50 = vrot.slane %v881_v42, 2  ;;  %v938_v51 = vrot.slane %v937_v43, 2 }
  0xc0   : > { %v761_v52 = vrot.slane %v760_v44, 2  ;;  %v832_v53 = vadd.f32 %v831_v45, %v830_v37  ;;  %v889_v54 = vrot.slane %v888_v46, 2  ;;  %v945_v55 = vrot.slane %v944_v47, 2 }
  0xc1   : > { %v755_v56 = vadd.f32 %v754_v48, %v753_v40  ;;  %v826_v57 = vrot.slane %v825_v49, 2  ;;  %v883_v58 = vmax.f32 %v881_v42, %v882_v50  ;;  %v939_v59 = vmin.f32 %v937_v43, %v938_v51 }
  0xc2   : > { %v762_v60 = vadd.f32 %v761_v52, %v760_v44  ;;  %v833_v61 = vrot.slane %v832_v53, 2  ;;  %v890_v62 = vmax.f32 %v888_v46, %v889_v54  ;;  %v946_v63 = vmin.f32 %v944_v47, %v945_v55 }
  0xc3   : > { %v756_v0 = vrot.slane %v755_v56, 1  ;;  %v827_v1 = vadd.f32 %v826_v57, %v825_v49  ;;  %v884_v2 = vrot.slane %v883_v58, 1  ;;  %v940_v3 = vrot.slane %v939_v59, 1 }
  0xc4   : > { %v763_v4 = vrot.slane %v762_v60, 1  ;;  %v834_v5 = vadd.f32 %v833_v61, %v832_v53  ;;  %v891_v6 = vrot.slane %v890_v62, 1  ;;  %v947_v7 = vrot.slane %v946_v63, 1 }
  0xc5   : > { %v757_v9 = vadd.f32 %v756_v0, %v755_v56  ;;  %v828_v10 = vrot.slane %v827_v1, 1  ;;  %v885_v12 = vmax.f32 %v883_v58, %v884_v2  ;;  %v941_v13 = vmin.f32 %v939_v59, %v940_v3 }
  0xc6   : > { %v764_v14 = vadd.f32 %v763_v4, %v762_v60  ;;  %v835_v15 = vrot.slane %v834_v5, 1  ;;  %v892_v16 = vmax.f32 %v890_v62, %v891_v6  ;;  %v948_v19 = vmin.f32 %v946_v63, %v947_v7 }
  0xc7   : > { %v829_v22 = vadd.f32 %v828_v10, %v827_v1  ;;  %v997_v11 = vsel %vm996_vm0, %v941_v13, 0.0  ;;  %v765_v24 = vadd.f32 %v678_v8, %v1966_v17  ;;  %v817_v25 = vmul.f32 %v678_v8, %v678_v8 }
  0xc8   : > { %v1005_v26 = vsel %vm995_vm1, %v885_v12, %v997_v11  ;;  %v836_v27 = vadd.f32 %v835_v15, %v834_v5  ;;  %v998_v28 = vsel %vm996_vm0, %v948_v19, 0.0  ;;  %v893_v29 = vmax.f32 %v1966_v17, %v678_v8 }
  0xc9   : > { %v1013_v31 = vsel %vm994_vm2, %v829_v22, %v1005_v26  ;;  %v1006_v32 = vsel %vm995_vm1, %v892_v16, %v998_v28  ;;  %v766_v33 = vrot.slane %v765_v24, 4  ;;  %v837_v34 = vadd.f32 %v817_v25, %v1972_v20 }
  0xca   : > { %v1021_v35 = vsel %vm993_vm3, %v757_v9, %v1013_v31  ;;  %v1014_v36 = vsel %vm994_vm2, %v836_v27, %v1006_v32  ;;  %v894_v37 = vrot.slane %v893_v29, 4  ;;  %v949_v38 = vmin.f32 %v1966_v17, %v678_v8 }
  0xcb   : > { %1029 = vst [vmem:[%s1991_s22] sm:$0xff] %v1021_v35  ;;  %v1022_v39 = vsel %vm993_vm3, %v764_v14, %v1014_v36  ;;  %v767_v40 = vadd.f32 %v766_v33, %v765_v24  ;;  %v838_v41 = vrot.slane %v837_v34, 4  ;;  %v772_v42 = vadd.f32 %v692_v30, %v1968_v18 }
  0xcc   : > { %v2012_v43 = vpop.f32.mrf.mxu0  ;;  %1030 = vst [vmem:[%s1991_s22 + $0x8] sm:$0xff] %v1022_v39  ;;  %v895_v20 = vmax.f32 %v893_v29, %v894_v37  ;;  %v950_v44 = vrot.slane %v949_v38, 4  ;;  %v818_v45 = vmul.f32 %v692_v30, %v692_v30  ;;  %v900_v46 = vmax.f32 %v1968_v18, %v692_v30  ;;  %v2018_v58 = vpop.f32.mrf.mxu1 }
  0xcd   : > { %v768_v47 = vrot.slane %v767_v40, 2  ;;  %v839_v48 = vadd.f32 %v838_v41, %v837_v34  ;;  %v773_v49 = vrot.slane %v772_v42, 4  ;;  %v956_v17 = vmin.f32 %v1968_v18, %v692_v30 }
  0xce   : > { %v896_v50 = vrot.slane %v895_v20, 2  ;;  %v951_v51 = vmin.f32 %v949_v38, %v950_v44  ;;  %v844_v52 = vadd.f32 %v818_v45, %v1976_v21  ;;  %v901_v53 = vrot.slane %v900_v46, 4 }
  0xcf   : > { %v769_v54 = vadd.f32 %v768_v47, %v767_v40  ;;  %v840_v55 = vrot.slane %v839_v48, 2  ;;  %v774_v56 = vadd.f32 %v773_v49, %v772_v42  ;;  %v957_v57 = vrot.slane %v956_v17, 4 }
  0xd0   : > { %v897_v59 = vmax.f32 %v895_v20, %v896_v50  ;;  %v952_v60 = vrot.slane %v951_v51, 2  ;;  %v845_v61 = vrot.slane %v844_v52, 4  ;;  %v902_v62 = vmax.f32 %v900_v46, %v901_v53 }
  0xd1   : > { %v770_v63 = vrot.slane %v769_v54, 1  ;;  %v841_v0 = vadd.f32 %v840_v55, %v839_v48  ;;  %v775_v1 = vrot.slane %v774_v56, 2  ;;  %v958_v2 = vmin.f32 %v956_v17, %v957_v57 }
  0xd2   : > { %v898_v18 = vrot.slane %v897_v59, 1  ;;  %v953_v3 = vmin.f32 %v951_v51, %v952_v60  ;;  %v846_v4 = vadd.f32 %v845_v61, %v844_v52  ;;  %v903_v5 = vrot.slane %v902_v62, 2 }
  0xd3   : > { %v842_v21 = vrot.slane %v841_v0, 1  ;;  %v776_v6 = vadd.f32 %v775_v1, %v774_v56  ;;  %v959_v7 = vrot.slane %v958_v2, 2  ;;  %v771_v8 = vadd.f32 %v770_v63, %v769_v54  ;;  %v2020_v13 = vpop.f32.mrf.mxu2 }
  0xd4   : > { %v954_v9 = vrot.slane %v953_v3, 1  ;;  %v847_v10 = vrot.slane %v846_v4, 2  ;;  %v904_v12 = vmax.f32 %v902_v62, %v903_v5  ;;  %v899_v15 = vmax.f32 %v897_v59, %v898_v18  ;;  %v706_v22 = vpop.f32.mrf.mxu0  ;;  %v720_v39 = vpop.f32.mrf.mxu1 }
  0xd5   : > { %v843_v14 = vadd.f32 %v842_v21, %v841_v0  ;;  %v777_v16 = vrot.slane %v776_v6, 1  ;;  %v960_v19 = vmin.f32 %v958_v2, %v959_v7  ;;  %v811_v26 = vmul.f32 %v2012_v43, %v2012_v43  ;;  %v2052_v59 = vpop.f32.mrf.mxu3 }
  0xd6   : > { %v955_v11 = vmin.f32 %v953_v3, %v954_v9  ;;  %v848_v24 = vadd.f32 %v847_v10, %v846_v4  ;;  %v905_v25 = vrot.slane %v904_v12, 1  ;;  %v812_v29 = vmul.f32 %v2018_v58, %v2018_v58 }
  0xd7   : > { %v778_v27 = vadd.f32 %v777_v16, %v776_v6  ;;  %v961_v28 = vrot.slane %v960_v19, 1  ;;  %v2028_v30 = vmul.f32 %v2020_v13, %v2020_v13  ;;  %v779_v34 = vadd.f32 %v706_v22, %v2012_v43 }
  0xd8   : > { %v999_v31 = vsel %vm996_vm0, %v955_v11, 0.0  ;;  %v849_v32 = vrot.slane %v848_v24, 1  ;;  %v906_v33 = vmax.f32 %v904_v12, %v905_v25  ;;  %v819_v37 = vmul.f32 %v706_v22, %v706_v22 }
  0xd9   : > { %v1007_v35 = vsel %vm995_vm1, %v899_v15, %v999_v31  ;;  %v962_v36 = vmin.f32 %v960_v19, %v961_v28  ;;  %v907_v38 = vmax.f32 %v2012_v43, %v706_v22  ;;  %v780_v42 = vrot.slane %v779_v34, 4 }
  0xda   : > { %v1015_v40 = vsel %vm994_vm2, %v843_v14, %v1007_v35  ;;  %v850_v41 = vadd.f32 %v849_v32, %v848_v24  ;;  %v963_v20 = vmin.f32 %v2012_v43, %v706_v22  ;;  %v851_v46 = vadd.f32 %v819_v37, %v811_v26 }
  0xdb   : > { %v1023_v44 = vsel %vm993_vm3, %v771_v8, %v1015_v40  ;;  %v1000_v45 = vsel %vm996_vm0, %v962_v36, 0.0  ;;  %v908_v47 = vrot.slane %v907_v38, 4  ;;  %v781_v49 = vadd.f32 %v780_v42, %v779_v34  ;;  %v734_v16 = vpop.f32.mrf.mxu2 }
  0xdc   : > { %1031 = vst [vmem:[%s1991_s22 + $0x10] sm:$0xff] %v1023_v44  ;;  %v1008_v48 = vsel %vm995_vm1, %v906_v33, %v1000_v45  ;;  %v964_v17 = vrot.slane %v963_v20, 4  ;;  %v786_v50 = vadd.f32 %v720_v39, %v2018_v58  ;;  %v852_v51 = vrot.slane %v851_v46, 4 }
  0xdd   : > { %v1016_v43 = vsel %vm994_vm2, %v850_v41, %v1008_v48  ;;  %v909_v52 = vmax.f32 %v907_v38, %v908_v47  ;;  %v820_v53 = vmul.f32 %v720_v39, %v720_v39  ;;  %v782_v55 = vrot.slane %v781_v49, 2 }
  0xde   : > { %v1024_v54 = vsel %vm993_vm3, %v778_v27, %v1016_v43  ;;  %v965_v56 = vmin.f32 %v963_v20, %v964_v17  ;;  %v787_v57 = vrot.slane %v786_v50, 4  ;;  %v853_v60 = vadd.f32 %v852_v51, %v851_v46 }
  0xdf   : > { %1032 = vst [vmem:[%s1991_s22 + $0x18] sm:$0xff] %v1024_v54  ;;  %v910_v61 = vrot.slane %v909_v52, 2  ;;  %v858_v62 = vadd.f32 %v820_v53, %v812_v29  ;;  %v914_v63 = vmax.f32 %v2018_v58, %v720_v39  ;;  %v783_v0 = vadd.f32 %v782_v55, %v781_v49  ;;  %v748_v49 = vpop.f32.mrf.mxu3 }
  0xe0   : > { %v966_v1 = vrot.slane %v965_v56, 2  ;;  %v788_v2 = vadd.f32 %v787_v57, %v786_v50  ;;  %v970_v18 = vmin.f32 %v2018_v58, %v720_v39  ;;  %v854_v3 = vrot.slane %v853_v60, 2 }
  0xe1   : > { %v911_v4 = vmax.f32 %v909_v52, %v910_v61  ;;  %v859_v5 = vrot.slane %v858_v62, 4  ;;  %v915_v21 = vrot.slane %v914_v63, 4  ;;  %v814_v6 = vmul.f32 %v2052_v59, %v2052_v59 }
  0xe2   : > { %v967_v7 = vmin.f32 %v965_v56, %v966_v1  ;;  %v789_v8 = vrot.slane %v788_v2, 2  ;;  %v971_v9 = vrot.slane %v970_v18, 4  ;;  %v855_v10 = vadd.f32 %v854_v3, %v853_v60 }
  0xe3   : > { %v912_v12 = vrot.slane %v911_v4, 1  ;;  %v860_v14 = vadd.f32 %v859_v5, %v858_v62  ;;  %v916_v15 = vmax.f32 %v914_v63, %v915_v21  ;;  %v784_v19 = vrot.slane %v783_v0, 1 }
  0xe4   : > { %v968_v22 = vrot.slane %v967_v7, 1  ;;  %v790_v11 = vadd.f32 %v789_v8, %v788_v2  ;;  %v972_v24 = vmin.f32 %v970_v18, %v971_v9  ;;  %v856_v58 = vrot.slane %v855_v10, 1 }
  0xe5   : > { %v913_v25 = vmax.f32 %v911_v4, %v912_v12  ;;  %v861_v26 = vrot.slane %v860_v14, 2  ;;  %v917_v27 = vrot.slane %v916_v15, 2  ;;  %v793_v32 = vadd.f32 %v734_v16, %v2020_v13 }
  0xe6   : > { %v969_v28 = vmin.f32 %v967_v7, %v968_v22  ;;  %v791_v29 = vrot.slane %v790_v11, 1  ;;  %v973_v31 = vrot.slane %v972_v24, 2  ;;  %v857_v33 = vadd.f32 %v856_v58, %v855_v10 }
  0xe7   : > { %v862_v34 = vadd.f32 %v861_v26, %v860_v14  ;;  %v918_v35 = vmax.f32 %v916_v15, %v917_v27  ;;  %v821_v36 = vmul.f32 %v734_v16, %v734_v16  ;;  %v785_v37 = vadd.f32 %v784_v19, %v783_v0 }
  0xe8   : > { %v1001_v38 = vsel %vm996_vm0, %v969_v28, 0.0  ;;  %v974_v39 = vmin.f32 %v972_v24, %v973_v31  ;;  %v794_v40 = vrot.slane %v793_v32, 4  ;;  %v921_v48 = vmax.f32 %v2020_v13, %v734_v16 }
  0xe9   : > { %v1009_v41 = vsel %vm995_vm1, %v913_v25, %v1001_v38  ;;  %v863_v42 = vrot.slane %v862_v34, 1  ;;  %v919_v20 = vrot.slane %v918_v35, 1  ;;  %v865_v44 = vadd.f32 %v821_v36, %v2028_v30 }
  0xea   : > { %v1017_v45 = vsel %vm994_vm2, %v857_v33, %v1009_v41  ;;  %v975_v46 = vrot.slane %v974_v39, 1  ;;  %v795_v47 = vadd.f32 %v794_v40, %v793_v32  ;;  %v792_v50 = vadd.f32 %v791_v29, %v790_v11 }
  0xeb   : > { %v1025_v17 = vsel %vm993_vm3, %v785_v37, %v1017_v45  ;;  %v920_v43 = vmax.f32 %v918_v35, %v919_v20  ;;  %v866_v51 = vrot.slane %v865_v44, 4  ;;  %v864_v52 = vadd.f32 %v863_v42, %v862_v34 }
  0xec   : > { %1033 = vst [vmem:[%s1991_s22 + $0x20] sm:$0xff] %v1025_v17  ;;  %v976_v53 = vmin.f32 %v974_v39, %v975_v46  ;;  %v922_v54 = vrot.slane %v921_v48, 4  ;;  %v977_v30 = vmin.f32 %v2020_v13, %v734_v16  ;;  %v796_v55 = vrot.slane %v795_v47, 2 }
  0xed   : > { %v867_v56 = vadd.f32 %v866_v51, %v865_v44  ;;  %v800_v57 = vadd.f32 %v748_v49, %v2052_v59  ;;  %v822_v60 = vmul.f32 %v748_v49, %v748_v49  ;;  %v928_v0 = vmax.f32 %v2052_v59, %v748_v49 }
  0xee   : > { %v1002_v61 = vsel %vm996_vm0, %v976_v53, 0.0  ;;  %v923_v62 = vmax.f32 %v921_v48, %v922_v54  ;;  %v978_v63 = vrot.slane %v977_v30, 4  ;;  %v797_v15 = vadd.f32 %v796_v55, %v795_v47 }
  0xef   : > { %v1010_v1 = vsel %vm995_vm1, %v920_v43, %v1002_v61  ;;  %v868_v2 = vrot.slane %v867_v56, 2  ;;  %v801_v18 = vrot.slane %v800_v57, 4  ;;  %v872_v3 = vadd.f32 %v822_v60, %v814_v6 }
  0xf0   : > { %v1018_v13 = vsel %vm994_vm2, %v864_v52, %v1010_v1  ;;  %v924_v4 = vrot.slane %v923_v62, 2  ;;  %v979_v5 = vmin.f32 %v977_v30, %v978_v63  ;;  %v929_v14 = vrot.slane %v928_v0, 4 }
  0xf1   : > { %v1026_v21 = vsel %vm993_vm3, %v792_v50, %v1018_v13  ;;  %v869_v7 = vadd.f32 %v868_v2, %v867_v56  ;;  %v873_v8 = vrot.slane %v872_v3, 4  ;;  %v802_v12 = vadd.f32 %v801_v18, %v800_v57 }
  0xf2   : > { %1034 = vst [vmem:[%s1991_s22 + $0x28] sm:$0xff] %v1026_v21  ;;  %v925_v9 = vmax.f32 %v923_v62, %v924_v4  ;;  %v980_v10 = vrot.slane %v979_v5, 2  ;;  %v984_v19 = vmin.f32 %v2052_v59, %v748_v49  ;;  %v930_v24 = vmax.f32 %v928_v0, %v929_v14 }
  0xf3   : > { %v874_v16 = vadd.f32 %v873_v8, %v872_v3  ;;  %v870_v6 = vrot.slane %v869_v7, 1  ;;  %v803_v27 = vrot.slane %v802_v12, 2  ;;  %v798_v29 = vrot.slane %v797_v15, 1 }
  0xf4   : > { %v926_v22 = vrot.slane %v925_v9, 1  ;;  %v981_v11 = vmin.f32 %v979_v5, %v980_v10  ;;  %v985_v25 = vrot.slane %v984_v19, 4  ;;  %v931_v28 = vrot.slane %v930_v24, 2 }
  0xf5   : > { %v875_v58 = vrot.slane %v874_v16, 2  ;;  %v871_v34 = vadd.f32 %v870_v6, %v869_v7  ;;  %v804_v38 = vadd.f32 %v803_v27, %v802_v12  ;;  %v799_v40 = vadd.f32 %v798_v29, %v797_v15 }
  0xf6   : > { %v982_v26 = vrot.slane %v981_v11, 1  ;;  %v927_v31 = vmax.f32 %v925_v9, %v926_v22  ;;  %v986_v33 = vmin.f32 %v984_v19, %v985_v25  ;;  %v932_v36 = vmax.f32 %v930_v24, %v931_v28 }
  0xf7   : > { %v876_v32 = vadd.f32 %v875_v58, %v874_v16  ;;  %v805_v47 = vrot.slane %v804_v38, 1 }
  0xf8   : > { %v983_v35 = vmin.f32 %v981_v11, %v982_v26  ;;  %v987_v37 = vrot.slane %v986_v33, 2  ;;  %v933_v39 = vrot.slane %v932_v36, 1 }
  0xf9   : > { %v877_v42 = vrot.slane %v876_v32, 1  ;;  %v806_v43 = vadd.f32 %v805_v47, %v804_v38 }
  0xfa   : > { %v1003_v59 = vsel %vm996_vm0, %v983_v35, 0.0  ;;  %v988_v20 = vmin.f32 %v986_v33, %v987_v37  ;;  %v934_v48 = vmax.f32 %v932_v36, %v933_v39 }
  0xfb   : > { %v1011_v41 = vsel %vm995_vm1, %v927_v31, %v1003_v59  ;;  %v878_v49 = vadd.f32 %v877_v42, %v876_v32 }
  0xfc   : > { %v1019_v44 = vsel %vm994_vm2, %v871_v34, %v1011_v41  ;;  %v989_v46 = vrot.slane %v988_v20, 1 }
  0xfd   : > { %v1027_v45 = vsel %vm993_vm3, %v799_v40, %v1019_v44 }
  0xfe   : > { %1035 = vst [vmem:[%s1991_s22 + $0x30] sm:$0xff] %v1027_v45  ;;  %v990_v17 = vmin.f32 %v988_v20, %v989_v46 }
 0x100   : > { %v1004_v50 = vsel %vm996_vm0, %v990_v17, 0.0 }
 0x101   : > { %v1012_v51 = vsel %vm995_vm1, %v934_v48, %v1004_v50 }
 0x102   : > { %v1020_v52 = vsel %vm994_vm2, %v878_v49, %v1012_v51 }
 0x103   : > { %v1028_v53 = vsel %vm993_vm3, %v806_v43, %v1020_v52 }
 0x104   : > { %1036 = vst [vmem:[%s1991_s22 + $0x38] sm:$0xff] %v1028_v53 }
 0x105 PF: > { %s14_s17 = sadd.s32 1, %s1511_s17   ;;  %s2115_s15 = smov %s1507_s16 }
 0x106   : > { %p11_p5 = scmp.ge.s32.totalorder %s14_s17, 4   ;;  %s2116_s16 = smov %s2118_s18 }
 0x108   :  { %13 = sbr.rel (!%p11_p5) target bundleno = 2 (0x2), region = 66 }

// kernel: pointnet_dense_cls_forward.18
= control target key start
LH: loop header
LB: loop body
LE: loop exit
PB: predicated region body
PF: predicated region fallthrough
CT: control target
= control target key end

     0   :  { %s1122_s21 = smov 0   ;;  %s1124_s22 = smov 0   ;;  %s1398_s0 = inlined_call_operand.vmem [shape: bf16[2,16,128], index: 0, kind: input, shape index: {}]   ;;  %s1399_s1 = inlined_call_operand.vmem [shape: bf16[128,512], index: 1, kind: input, shape index: {}]   ;;  %s1400_s2 = inlined_call_operand.vmem [shape: f32[1,128], index: 2, kind: input, shape index: {}]   ;;  %s1401_s3 = inlined_call_operand.vmem [shape: f32[1,128], index: 3, kind: input, shape index: {}]   ;;  %s1402_s4 = inlined_call_operand.vmem [shape: f32[2,1,512], index: 4, kind: input, shape index: {}]   ;;  %s1403_s5 = inlined_call_operand.vmem [shape: bf16[2,16,512], index: 5, kind: output, shape index: {0}]   ;;  %s1404_s6 = inlined_call_operand.vmem [shape: f32[2,1,8,512], index: 6, kind: output, shape index: {1}]  }
   0x1   :  { %s1126_s23 = smov 0  }
   0x2 LB: > { %s29_s24 = sadd.s32 1, %s1081_s22  ;;  %p860_p0 = scmp.ge.s32.totalorder %s1085_s23, 1  ;;  %s1085_s23 = sphi %s1126_s23, %s17_s23   ;;  %s1081_s22 = sphi %s1124_s22, %s1406_s22   ;;  %s1077_s21 = sphi %s1122_s21, %s1405_s21  }
   0x3   : > { %p31_p1 = scmp.ge.s32.totalorder %s29_s24, 2  ;;  %p247_p2 = scmp.lt.s32.totalorder %s1085_s23, 3 }
   0x5   : > { %s1408_s24 = smov (%p31_p1, %s29_s24), 0  ;;  %p248_p3 = pnand %p860_p0, %p247_p2 }
   0x6   : > { %p300_p4 = scmp.lt.s32.totalorder (!%p248_p3), %s1077_s21, 1 }
   0x7   : > { %251 = sbr.rel (%p248_p3) target bundleno = 209 (0xd1), region = 40 }
   0xc   : > { %v982_v0 = vld [vmem:[%s1399_s1 + $0xe0] sm:$0xf]  ;;  %v1031_v1 = vld [vmem:[%s1399_s1 + $0xec] sm:$0xf0]  ;;  %v1029_v2 = vld [vmem:[%s1399_s1 + $0xe4] sm:$0xf] }
   0xd   : > { %v983_v3 = vor.u32 %v1031_v1, %v982_v0  ;;  %v984_v4 = vld [vmem:[%s1399_s1 + $0xf0] sm:$0xf0]  ;;  %v990_v5 = vld [vmem:[%s1399_s1 + $0xe8] sm:$0xf]  ;;  %v1032_v6 = vld [vmem:[%s1399_s1 + $0xf4] sm:$0xf0] }
   0xe   : > { %v987_v7 = vor.u32 %v1029_v2, %v984_v4  ;;  %v991_v8 = vor.u32 %v1032_v6, %v990_v5  ;;  %v1030_v9 = vld [vmem:[%s1399_s1 + $0xec] sm:$0xf]  ;;  %v992_v10 = vld [vmem:[%s1399_s1 + $0xf8] sm:$0xf0]  ;;  %v966_v11 = vld [vmem:[%s1399_s1 + $0xc0] sm:$0xf] }
   0xf   : > { %554 = vmatpush.bf16.msra.mxu0 %v983_v3  ;;  %v995_v12 = vor.u32 %v1030_v9, %v992_v10  ;;  %v1027_v13 = vld [vmem:[%s1399_s1 + $0xcc] sm:$0xf0]  ;;  %v1025_v14 = vld [vmem:[%s1399_s1 + $0xc4] sm:$0xf]  ;;  %v968_v15 = vld [vmem:[%s1399_s1 + $0xd0] sm:$0xf0] }
  0x10   : > { %568 = vmatpush.bf16.msra.mxu1 %v987_v7  ;;  %582 = vmatpush.bf16.msra.mxu2 %v991_v8  ;;  %v967_v16 = vor.u32 %v1027_v13, %v966_v11  ;;  %v971_v17 = vor.u32 %v1025_v14, %v968_v15  ;;  %v974_v18 = vld [vmem:[%s1399_s1 + $0xc8] sm:$0xf]  ;;  %v1028_v19 = vld [vmem:[%s1399_s1 + $0xd4] sm:$0xf0]  ;;  %v1026_v20 = vld [vmem:[%s1399_s1 + $0xcc] sm:$0xf] }
  0x11   : > { %596 = vmatpush.bf16.msra.mxu3 %v995_v12  ;;  %v975_v21 = vor.u32 %v1028_v19, %v974_v18  ;;  %v976_v22 = vld [vmem:[%s1399_s1 + $0xd8] sm:$0xf0]  ;;  %v950_v23 = vld [vmem:[%s1399_s1 + $0xa0] sm:$0xf]  ;;  %v1023_v24 = vld [vmem:[%s1399_s1 + $0xac] sm:$0xf0] }
  0x12   : > { %v979_v25 = vor.u32 %v1026_v20, %v976_v22  ;;  %v1021_v26 = vld [vmem:[%s1399_s1 + $0xa4] sm:$0xf]  ;;  %v952_v27 = vld [vmem:[%s1399_s1 + $0xb0] sm:$0xf0]  ;;  %v958_v28 = vld [vmem:[%s1399_s1 + $0xa8] sm:$0xf]  ;;  %v951_v29 = vor.u32 %v1023_v24, %v950_v23 }
  0x13   : > { %555 = vmatpush.bf16.msra.mxu0 %v967_v16  ;;  %v1024_v30 = vld [vmem:[%s1399_s1 + $0xb4] sm:$0xf0]  ;;  %v1022_v31 = vld [vmem:[%s1399_s1 + $0xac] sm:$0xf]  ;;  %v960_v32 = vld [vmem:[%s1399_s1 + $0xb8] sm:$0xf0]  ;;  %v955_v33 = vor.u32 %v1021_v26, %v952_v27 }
  0x14   : > { %569 = vmatpush.bf16.msra.mxu1 %v971_v17  ;;  %583 = vmatpush.bf16.msra.mxu2 %v975_v21  ;;  %v959_v34 = vor.u32 %v1024_v30, %v958_v28  ;;  %v934_v35 = vld [vmem:[%s1399_s1 + $0x80] sm:$0xf]  ;;  %v1019_v36 = vld [vmem:[%s1399_s1 + $0x8c] sm:$0xf0]  ;;  %v1017_v37 = vld [vmem:[%s1399_s1 + $0x84] sm:$0xf]  ;;  %v963_v38 = vor.u32 %v1022_v31, %v960_v32 }
  0x15   : > { %597 = vmatpush.bf16.msra.mxu3 %v979_v25  ;;  %v936_v39 = vld [vmem:[%s1399_s1 + $0x90] sm:$0xf0]  ;;  %v942_v40 = vld [vmem:[%s1399_s1 + $0x88] sm:$0xf]  ;;  %v1020_v41 = vld [vmem:[%s1399_s1 + $0x94] sm:$0xf0]  ;;  %v935_v44 = vor.u32 %v1019_v36, %v934_v35 }
  0x16   : > { %v1018_v42 = vld [vmem:[%s1399_s1 + $0x8c] sm:$0xf]  ;;  %v944_v43 = vld [vmem:[%s1399_s1 + $0x98] sm:$0xf0]  ;;  %v939_v45 = vor.u32 %v1017_v37, %v936_v39  ;;  %v943_v46 = vor.u32 %v1020_v41, %v942_v40  ;;  %v918_v47 = vld [vmem:[%s1399_s1 + $0x60] sm:$0xf] }
  0x17   : > { %556 = vmatpush.bf16.msra.mxu0 %v951_v29  ;;  %v1015_v48 = vld [vmem:[%s1399_s1 + $0x6c] sm:$0xf0]  ;;  %v1013_v49 = vld [vmem:[%s1399_s1 + $0x64] sm:$0xf]  ;;  %v947_v50 = vor.u32 %v1018_v42, %v944_v43  ;;  %v920_v51 = vld [vmem:[%s1399_s1 + $0x70] sm:$0xf0] }
  0x18   : > { %570 = vmatpush.bf16.msra.mxu1 %v955_v33  ;;  %584 = vmatpush.bf16.msra.mxu2 %v959_v34  ;;  %v926_v52 = vld [vmem:[%s1399_s1 + $0x68] sm:$0xf]  ;;  %v1016_v53 = vld [vmem:[%s1399_s1 + $0x74] sm:$0xf0]  ;;  %v1014_v54 = vld [vmem:[%s1399_s1 + $0x6c] sm:$0xf]  ;;  %v919_v56 = vor.u32 %v1015_v48, %v918_v47  ;;  %v923_v57 = vor.u32 %v1013_v49, %v920_v51 }
  0x19   : > { %598 = vmatpush.bf16.msra.mxu3 %v963_v38  ;;  %v928_v55 = vld [vmem:[%s1399_s1 + $0x78] sm:$0xf0]  ;;  %v927_v58 = vor.u32 %v1016_v53, %v926_v52  ;;  %v902_v59 = vld [vmem:[%s1399_s1 + $0x40] sm:$0xf]  ;;  %v1011_v60 = vld [vmem:[%s1399_s1 + $0x4c] sm:$0xf0] }
  0x1a   : > { %v1009_v61 = vld [vmem:[%s1399_s1 + $0x44] sm:$0xf]  ;;  %v931_v62 = vor.u32 %v1014_v54, %v928_v55  ;;  %v904_v63 = vld [vmem:[%s1399_s1 + $0x50] sm:$0xf0]  ;;  %v910_v0 = vld [vmem:[%s1399_s1 + $0x48] sm:$0xf]  ;;  %v903_v4 = vor.u32 %v1011_v60, %v902_v59  ;;  %v674_v59 = vlaneseq }
  0x1b   : > { %557 = vmatpush.bf16.msra.mxu0 %v935_v44  ;;  %v1012_v1 = vld [vmem:[%s1399_s1 + $0x54] sm:$0xf0]  ;;  %v1010_v2 = vld [vmem:[%s1399_s1 + $0x4c] sm:$0xf]  ;;  %v912_v3 = vld [vmem:[%s1399_s1 + $0x58] sm:$0xf0]  ;;  %v907_v7 = vor.u32 %v1009_v61, %v904_v63 }
  0x1c   : > { %571 = vmatpush.bf16.msra.mxu1 %v939_v45  ;;  %585 = vmatpush.bf16.msra.mxu2 %v943_v46  ;;  %v886_v5 = vld [vmem:[%s1399_s1 + $0x20] sm:$0xf]  ;;  %v1007_v6 = vld [vmem:[%s1399_s1 + $0x2c] sm:$0xf0]  ;;  %v911_v8 = vor.u32 %v1012_v1, %v910_v0  ;;  %v1005_v9 = vld [vmem:[%s1399_s1 + $0x24] sm:$0xf]  ;;  %v915_v12 = vor.u32 %v1010_v2, %v912_v3 }
  0x1d   : > { %599 = vmatpush.bf16.msra.mxu3 %v947_v50  ;;  %v888_v10 = vld [vmem:[%s1399_s1 + $0x30] sm:$0xf0]  ;;  %v894_v11 = vld [vmem:[%s1399_s1 + $0x28] sm:$0xf]  ;;  %v1008_v13 = vld [vmem:[%s1399_s1 + $0x34] sm:$0xf0]  ;;  %v887_v16 = vor.u32 %v1007_v6, %v886_v5 }
  0x1e   : > { %v1006_v14 = vld [vmem:[%s1399_s1 + $0x2c] sm:$0xf]  ;;  %v896_v15 = vld [vmem:[%s1399_s1 + $0x38] sm:$0xf0]  ;;  %v870_v17 = vld [vmem:[%s1399_s1] sm:$0xf]  ;;  %v891_v18 = vor.u32 %v1005_v9, %v888_v10  ;;  %v895_v19 = vor.u32 %v1008_v13, %v894_v11 }
  0x1f   : > { %558 = vmatpush.bf16.msra.mxu0 %v919_v56  ;;  %s1410_s21 = smov (!%p300_p4, %s1077_s21), 1  ;;  %v1003_v20 = vld [vmem:[%s1399_s1 + $0xc] sm:$0xf0]  ;;  %v1001_v21 = vld [vmem:[%s1399_s1 + $0x4] sm:$0xf]  ;;  %v899_v23 = vor.u32 %v1006_v14, %v896_v15  ;;  %v1362_v6 = vshrl.u32 %v674_v59, 7 }
  0x20   : > { %572 = vmatpush.bf16.msra.mxu1 %v923_v57  ;;  %586 = vmatpush.bf16.msra.mxu2 %v927_v58  ;;  %v872_v22 = vld [vmem:[%s1399_s1 + $0x10] sm:$0xf0]  ;;  %v878_v24 = vld [vmem:[%s1399_s1 + $0x8] sm:$0xf]  ;;  %v1004_v25 = vld [vmem:[%s1399_s1 + $0x14] sm:$0xf0]  ;;  %v871_v29 = vor.u32 %v1003_v20, %v870_v17 }
  0x21   : > { %600 = vmatpush.bf16.msra.mxu3 %v931_v62  ;;  %s998_s29 = sshll.u32 %s1410_s21, 3  ;;  %v1002_v26 = vld [vmem:[%s1399_s1 + $0xc] sm:$0xf]  ;;  %v880_v27 = vld [vmem:[%s1399_s1 + $0x18] sm:$0xf0]  ;;  %v875_v31 = vor.u32 %v1001_v21, %v872_v22  ;;  %v879_v32 = vor.u32 %v1004_v25, %v878_v24  ;;  %s863_s17 = sshll.u32 %s1410_s21, 2 }
  0x22   : > { %s307_s12 = scalar_lea.vmem %s1398_s0, %s998_s29  ;;  %v1061_v28 = vld [vmem:[%s1400_s2] ss:$0 sm:$0xff]  ;;  %v883_v36 = vor.u32 %v1002_v26, %v880_v27  ;;  %s312_s20 = scalar_lea.vmem %s1402_s4, %s863_s17  ;;  %vm676_vm0 = vcmp.eq.s32.totalorder %v1362_v6, 0  ;;  %vm677_vm1 = vcmp.eq.s32.totalorder %v1362_v6, 1 }
  0x23   : > { %559 = vmatpush.bf16.msra.mxu0 %v903_v4  ;;  %v1034_v30 = vld [vmem:[%s307_s12] sm:$0xff]   ;;  %s999_s25 = sshll.u32 %s1410_s21, 5 }
  0x24   : > { %573 = vmatpush.bf16.msra.mxu1 %v907_v7  ;;  %587 = vmatpush.bf16.msra.mxu2 %v911_v8  ;;  %v1035_v33 = vunpack.c.l.bf16 %v1034_v30  ;;  %v1036_v34 = vunpack.c.h.bf16 %v1034_v30  ;;  %v1062_v35 = vld [vmem:[%s1401_s3] ss:$0 sm:$0xff]  ;;  %s1358_s28 = scalar_lea.vmem %s1403_s5, %s999_s25  ;;  %s332_s7 = scalar_lea.vmem %s1404_s6, %s999_s25 }
  0x25   : > { %601 = vmatpush.bf16.msra.mxu3 %v915_v12  ;;  %v384_v44 = vld [vmem:[%s312_s20] sm:$0xf] }
  0x26   : > { %v341_v37 = vmul.f32 %v1061_v28, %v1035_v33  ;;  %v342_v38 = vmul.f32 %v1061_v28, %v1036_v34  ;;  %v386_v45 = vperm.slane %v384_v44, 0  ;;  %v387_v46 = vperm.slane %v384_v44, 1 }
  0x27   : > { %560 = vmatpush.bf16.msra.mxu0 %v887_v16  ;;  %v388_v52 = vperm.slane %v384_v44, 2  ;;  %v389_v53 = vperm.slane %v384_v44, 3 }
  0x28   : > { %574 = vmatpush.bf16.msra.mxu1 %v891_v18  ;;  %588 = vmatpush.bf16.msra.mxu2 %v895_v19  ;;  %v347_v39 = vadd.f32 %v1062_v35, %v341_v37  ;;  %v348_v40 = vadd.f32 %v1062_v35, %v342_v38 }
  0x29   : > { %602 = vmatpush.bf16.msra.mxu3 %v899_v23 }
  0x2a   : > { %v349_v41 = vmax.f32 %v347_v39, 0.0  ;;  %v350_v42 = vmax.f32 %v348_v40, 0.0 }
  0x2b   : > { %561 = vmatpush.bf16.msra.mxu0 %v871_v29 }
  0x2c   : > { %575 = vmatpush.bf16.msra.mxu1 %v875_v31  ;;  %589 = vmatpush.bf16.msra.mxu2 %v879_v32  ;;  %v351_v43 = vpack.c.bf16 %v350_v42, %v349_v41 }
  0x2d   : > { %603 = vmatpush.bf16.msra.mxu3 %v883_v36 }
  0x2e   : > { %562 = vmatmul.bf16.vlgmr.msra.gmra.mxu0 %v351_v43 }
  0x2f   : > { %576 = vmatmul.bf16.vlgmr.msra.gmra.mxu1 %v351_v43  ;;  %590 = vmatmul.bf16.vlgmr.msra.gmra.mxu2 %v351_v43 }
  0x30   : > { %604 = vmatmul.bf16.vlgmr.msra.gmra.mxu3 %v351_v43 }
  0xab   : > { %v563_v47 = vpop.f32.mrf.mxu0 }
  0xac   : > { %v577_v48 = vpop.f32.mrf.mxu1  ;;  %v564_v49 = vadd.f32 %v563_v47, %v386_v45 }
  0xad   : > { %v578_v50 = vadd.f32 %v577_v48, %v387_v46 }
  0xae   : > { %v638_v63 = vmul.f32 %v564_v49, %v564_v49 }
  0xaf   : > { %v690_v51 = vpack.c.bf16 %v578_v50, %v564_v49  ;;  %v639_v0 = vmul.f32 %v578_v50, %v578_v50 }
  0xb1   : > { %694 = vst [vmem:[%s1358_s28] sm:$0xff] %v690_v51 }
  0xb2   : > { %v591_v54 = vpop.f32.mrf.mxu2 }
  0xb3   : > { %v605_v55 = vpop.f32.mrf.mxu3  ;;  %v592_v56 = vadd.f32 %v591_v54, %v388_v52  ;;  %v565_v58 = vpop.f32.mrf.mxu0 }
  0xb4   : > { %v606_v57 = vadd.f32 %v605_v55, %v389_v53  ;;  %v579_v60 = vpop.f32.mrf.mxu1  ;;  %v566_v61 = vadd.f32 %v565_v58, %v386_v45 }
  0xb5   : > { %v580_v62 = vadd.f32 %v579_v60, %v387_v46  ;;  %v640_v18 = vmul.f32 %v592_v56, %v592_v56 }
  0xb6   : > { %v691_v1 = vpack.c.bf16 %v606_v57, %v592_v56  ;;  %v610_v2 = vadd.f32 %v566_v61, %v564_v49  ;;  %v642_v3 = vmul.f32 %v566_v61, %v566_v61  ;;  %v641_v19 = vmul.f32 %v606_v57, %v606_v57 }
  0xb7   : > { %v617_v4 = vadd.f32 %v580_v62, %v578_v50  ;;  %v643_v5 = vmul.f32 %v580_v62, %v580_v62  ;;  %v692_v7 = vpack.c.bf16 %v580_v62, %v566_v61 }
  0xb8   : > { %695 = vst [vmem:[%s1358_s28 + $0x8] sm:$0xff] %v691_v1  ;;  %v611_v8 = vrot.slane %v610_v2, 4  ;;  %v646_v9 = vadd.f32 %v642_v3, %v638_v63 }
  0xb9   : > { %v618_v10 = vrot.slane %v617_v4, 4  ;;  %v653_v11 = vadd.f32 %v643_v5, %v639_v0  ;;  %696 = vst [vmem:[%s1358_s28 + $0x10] sm:$0xff] %v692_v7 }
  0xba   : > { %v612_v12 = vadd.f32 %v611_v8, %v610_v2  ;;  %v647_v13 = vrot.slane %v646_v9, 4  ;;  %v593_v16 = vpop.f32.mrf.mxu2 }
  0xbb   : > { %v619_v14 = vadd.f32 %v618_v10, %v617_v4  ;;  %v654_v15 = vrot.slane %v653_v11, 4  ;;  %v607_v17 = vpop.f32.mrf.mxu3  ;;  %v594_v20 = vadd.f32 %v593_v16, %v388_v52 }
  0xbc   : > { %v608_v21 = vadd.f32 %v607_v17, %v389_v53  ;;  %v613_v22 = vrot.slane %v612_v12, 2  ;;  %v648_v23 = vadd.f32 %v647_v13, %v646_v9 }
  0xbd   : > { %v620_v24 = vrot.slane %v619_v14, 2  ;;  %v655_v25 = vadd.f32 %v654_v15, %v653_v11  ;;  %v624_v26 = vadd.f32 %v594_v20, %v592_v56  ;;  %v644_v27 = vmul.f32 %v594_v20, %v594_v20 }
  0xbe   : > { %v631_v28 = vadd.f32 %v608_v21, %v606_v57  ;;  %v645_v29 = vmul.f32 %v608_v21, %v608_v21  ;;  %v614_v30 = vadd.f32 %v613_v22, %v612_v12  ;;  %v649_v31 = vrot.slane %v648_v23, 2 }
  0xbf   : > { %v621_v32 = vadd.f32 %v620_v24, %v619_v14  ;;  %v656_v33 = vrot.slane %v655_v25, 2  ;;  %v625_v34 = vrot.slane %v624_v26, 4  ;;  %v660_v35 = vadd.f32 %v644_v27, %v640_v18 }
  0xc0   : > { %v632_v36 = vrot.slane %v631_v28, 4  ;;  %v667_v37 = vadd.f32 %v645_v29, %v641_v19  ;;  %v615_v38 = vrot.slane %v614_v30, 1  ;;  %v650_v39 = vadd.f32 %v649_v31, %v648_v23 }
  0xc1   : > { %v622_v40 = vrot.slane %v621_v32, 1  ;;  %v657_v41 = vadd.f32 %v656_v33, %v655_v25  ;;  %v626_v42 = vadd.f32 %v625_v34, %v624_v26  ;;  %v661_v43 = vrot.slane %v660_v35, 4 }
  0xc2   : > { %v633_v44 = vadd.f32 %v632_v36, %v631_v28  ;;  %v668_v45 = vrot.slane %v667_v37, 4  ;;  %v616_v46 = vadd.f32 %v615_v38, %v614_v30  ;;  %v651_v47 = vrot.slane %v650_v39, 1 }
  0xc3   : > { %v658_v48 = vrot.slane %v657_v41, 1  ;;  %v627_v49 = vrot.slane %v626_v42, 2  ;;  %v662_v50 = vadd.f32 %v661_v43, %v660_v35  ;;  %v623_v54 = vadd.f32 %v622_v40, %v621_v32 }
  0xc4   : > { %v634_v51 = vrot.slane %v633_v44, 2  ;;  %v669_v52 = vadd.f32 %v668_v45, %v667_v37  ;;  %v652_v53 = vadd.f32 %v651_v47, %v650_v39  ;;  %v693_v56 = vpack.c.bf16 %v608_v21, %v594_v20 }
  0xc5   : > { %v659_v55 = vadd.f32 %v658_v48, %v657_v41  ;;  %v628_v57 = vadd.f32 %v627_v49, %v626_v42  ;;  %v663_v58 = vrot.slane %v662_v50, 2 }
  0xc6   : > { %v635_v59 = vadd.f32 %v634_v51, %v633_v44  ;;  %v670_v60 = vrot.slane %v669_v52, 2  ;;  %v678_v61 = vsel %vm677_vm1, %v652_v53, 0.0  ;;  %697 = vst [vmem:[%s1358_s28 + $0x18] sm:$0xff] %v693_v56 }
  0xc7   : > { %v679_v62 = vsel %vm677_vm1, %v659_v55, 0.0  ;;  %v682_v63 = vsel %vm676_vm0, %v616_v46, %v678_v61  ;;  %v664_v1 = vadd.f32 %v663_v58, %v662_v50  ;;  %v629_v2 = vrot.slane %v628_v57, 1 }
  0xc8   : > { %v683_v0 = vsel %vm676_vm0, %v623_v54, %v679_v62  ;;  %686 = vst [vmem:[%s332_s7] sm:$0xff] %v682_v63  ;;  %v671_v3 = vadd.f32 %v670_v60, %v669_v52  ;;  %v636_v5 = vrot.slane %v635_v59, 1 }
  0xc9   : > { %687 = vst [vmem:[%s332_s7 + $0x8] sm:$0xff] %v683_v0  ;;  %v665_v4 = vrot.slane %v664_v1, 1  ;;  %v630_v9 = vadd.f32 %v629_v2, %v628_v57 }
  0xca   : > { %v672_v7 = vrot.slane %v671_v3, 1  ;;  %v637_v12 = vadd.f32 %v636_v5, %v635_v59 }
  0xcb   : > { %v666_v8 = vadd.f32 %v665_v4, %v664_v1 }
  0xcc   : > { %v673_v10 = vadd.f32 %v672_v7, %v671_v3 }
  0xcd   : > { %v680_v11 = vsel %vm677_vm1, %v666_v8, 0.0 }
  0xce   : > { %v684_v13 = vsel %vm676_vm0, %v630_v9, %v680_v11  ;;  %v681_v14 = vsel %vm677_vm1, %v673_v10, 0.0 }
  0xcf   : > { %688 = vst [vmem:[%s332_s7 + $0x10] sm:$0xff] %v684_v13  ;;  %v685_v15 = vsel %vm676_vm0, %v637_v12, %v681_v14 }
  0xd0   : > { %689 = vst [vmem:[%s332_s7 + $0x18] sm:$0xff] %v685_v15 }
  0xd1 PF: > { %s17_s23 = sadd.s32 1, %s1085_s23   ;;  %s1405_s21 = smov %s1081_s22 }
  0xd2   : > { %p14_p5 = scmp.ge.s32.totalorder %s17_s23, 4   ;;  %s1406_s22 = smov %s1408_s24 }
  0xd4   :  { %16 = sbr.rel (!%p14_p5) target bundleno = 2 (0x2), region = 85 }

// kernel: pointnet_dense_cls_forward.14
= control target key start
LH: loop header
LB: loop body
LE: loop exit
PB: predicated region body
PF: predicated region fallthrough
CT: control target
= control target key end

     0   :  { %vm2017_vm0 = vcmask 1041408   ;;  %s6680_s1 = inlined_call_operand.vmem [shape: bf16[1024,512], index: 1, kind: input, shape index: {}]   ;;  %s6681_s0 = inlined_call_operand.vmem [shape: f32[2,1024], index: 0, kind: input, shape index: {}]   ;;  %s6682_s4 = inlined_call_operand.vmem [shape: bf16[512,256], index: 4, kind: input, shape index: {}]   ;;  %s6683_s2 = inlined_call_operand.vmem [shape: f32[1,512], index: 2, kind: input, shape index: {}]   ;;  %s6684_s3 = inlined_call_operand.vmem [shape: f32[1,512], index: 3, kind: input, shape index: {}]   ;;  %s6685_s8 = inlined_call_operand.vmem [shape: f32[1,9], index: 8, kind: input, shape index: {}]   ;;  %s6686_s7 = inlined_call_operand.vmem [shape: f32[256,9], index: 7, kind: input, shape index: {}]   ;;  %s6687_s5 = inlined_call_operand.vmem [shape: f32[1,256], index: 5, kind: input, shape index: {}]   ;;  %s6688_s6 = inlined_call_operand.vmem [shape: f32[1,256], index: 6, kind: input, shape index: {}]   ;;  %s6689_s9 = inlined_call_operand.vmem [shape: f32[2,9], index: 9, kind: output, shape index: {}]  }
   0x1   :  { %v2941_v0 = vld [vmem:[%s6680_s1 + $0xe0] sm:$0xf]  ;;  %v4137_v1 = vld [vmem:[%s6680_s1 + $0xec] sm:$0xf0] }
   0x2   :  { %v3069_v2 = vld [vmem:[%s6680_s1 + $0x1e0] sm:$0xf]  ;;  %v2942_v3 = vor.u32 %v4137_v1, %v2941_v0  ;;  %v4169_v4 = vld [vmem:[%s6680_s1 + $0x1ec] sm:$0xf0] }
   0x3   :  { %v3197_v5 = vld [vmem:[%s6680_s1 + $0x2e0] sm:$0xf]  ;;  %v4201_v6 = vld [vmem:[%s6680_s1 + $0x2ec] sm:$0xf0]  ;;  %v3070_v7 = vor.u32 %v4169_v4, %v3069_v2 }
   0x4   :  { %v3198_v8 = vor.u32 %v4201_v6, %v3197_v5  ;;  %v3325_v9 = vld [vmem:[%s6680_s1 + $0x3e0] sm:$0xf]  ;;  %v4233_v10 = vld [vmem:[%s6680_s1 + $0x3ec] sm:$0xf0]  ;;  %1599 = vmatpush.bf16.msra.mxu0 %v2942_v3 }
   0x5   :  { %v2925_v11 = vld [vmem:[%s6680_s1 + $0xc0] sm:$0xf]  ;;  %v3326_v12 = vor.u32 %v4233_v10, %v3325_v9  ;;  %v4133_v13 = vld [vmem:[%s6680_s1 + $0xcc] sm:$0xf0]  ;;  %1612 = vmatpush.bf16.msra.mxu1 %v3070_v7 }
   0x6   :  { %v3053_v14 = vld [vmem:[%s6680_s1 + $0x1c0] sm:$0xf]  ;;  %v4165_v15 = vld [vmem:[%s6680_s1 + $0x1cc] sm:$0xf0]  ;;  %1625 = vmatpush.bf16.msra.mxu2 %v3198_v8  ;;  %v2926_v16 = vor.u32 %v4133_v13, %v2925_v11 }
   0x7   :  { %v3054_v17 = vor.u32 %v4165_v15, %v3053_v14  ;;  %v3181_v18 = vld [vmem:[%s6680_s1 + $0x2c0] sm:$0xf]  ;;  %v4197_v19 = vld [vmem:[%s6680_s1 + $0x2cc] sm:$0xf0]  ;;  %1638 = vmatpush.bf16.msra.mxu3 %v3326_v12 }
   0x8   :  { %v3309_v20 = vld [vmem:[%s6680_s1 + $0x3c0] sm:$0xf]  ;;  %v3182_v21 = vor.u32 %v4197_v19, %v3181_v18  ;;  %v4229_v22 = vld [vmem:[%s6680_s1 + $0x3cc] sm:$0xf0]  ;;  %1600 = vmatpush.bf16.msra.mxu0 %v2926_v16 }
   0x9   :  { %v2909_v23 = vld [vmem:[%s6680_s1 + $0xa0] sm:$0xf]  ;;  %v4129_v24 = vld [vmem:[%s6680_s1 + $0xac] sm:$0xf0]  ;;  %v3310_v25 = vor.u32 %v4229_v22, %v3309_v20  ;;  %1613 = vmatpush.bf16.msra.mxu1 %v3054_v17 }
   0xa   :  { %v3037_v26 = vld [vmem:[%s6680_s1 + $0x1a0] sm:$0xf]  ;;  %v4161_v27 = vld [vmem:[%s6680_s1 + $0x1ac] sm:$0xf0]  ;;  %v2910_v29 = vor.u32 %v4129_v24, %v2909_v23  ;;  %1626 = vmatpush.bf16.msra.mxu2 %v3182_v21 }
   0xb   :  { %v3165_v28 = vld [vmem:[%s6680_s1 + $0x2a0] sm:$0xf]  ;;  %v4193_v30 = vld [vmem:[%s6680_s1 + $0x2ac] sm:$0xf0]  ;;  %v3038_v33 = vor.u32 %v4161_v27, %v3037_v26  ;;  %1639 = vmatpush.bf16.msra.mxu3 %v3310_v25 }
   0xc   :  { %v3293_v31 = vld [vmem:[%s6680_s1 + $0x3a0] sm:$0xf]  ;;  %v4225_v32 = vld [vmem:[%s6680_s1 + $0x3ac] sm:$0xf0]  ;;  %v3166_v34 = vor.u32 %v4193_v30, %v3165_v28  ;;  %1601 = vmatpush.bf16.msra.mxu0 %v2910_v29 }
   0xd   :  { %v2893_v35 = vld [vmem:[%s6680_s1 + $0x80] sm:$0xf]  ;;  %v4125_v36 = vld [vmem:[%s6680_s1 + $0x8c] sm:$0xf0]  ;;  %v3294_v38 = vor.u32 %v4225_v32, %v3293_v31  ;;  %1614 = vmatpush.bf16.msra.mxu1 %v3038_v33 }
   0xe   :  { %v3021_v37 = vld [vmem:[%s6680_s1 + $0x180] sm:$0xf]  ;;  %v4157_v39 = vld [vmem:[%s6680_s1 + $0x18c] sm:$0xf0]  ;;  %v2894_v44 = vor.u32 %v4125_v36, %v2893_v35  ;;  %1627 = vmatpush.bf16.msra.mxu2 %v3166_v34 }
   0xf   :  { %v3149_v40 = vld [vmem:[%s6680_s1 + $0x280] sm:$0xf]  ;;  %v4189_v41 = vld [vmem:[%s6680_s1 + $0x28c] sm:$0xf0]  ;;  %v3022_v45 = vor.u32 %v4157_v39, %v3021_v37  ;;  %1640 = vmatpush.bf16.msra.mxu3 %v3294_v38 }
  0x10   :  { %v3277_v42 = vld [vmem:[%s6680_s1 + $0x380] sm:$0xf]  ;;  %v4221_v43 = vld [vmem:[%s6680_s1 + $0x38c] sm:$0xf0]  ;;  %v3150_v46 = vor.u32 %v4189_v41, %v3149_v40  ;;  %1602 = vmatpush.bf16.msra.mxu0 %v2894_v44 }
  0x11   :  { %v2877_v47 = vld [vmem:[%s6680_s1 + $0x60] sm:$0xf]  ;;  %v4121_v48 = vld [vmem:[%s6680_s1 + $0x6c] sm:$0xf0]  ;;  %v3278_v50 = vor.u32 %v4221_v43, %v3277_v42  ;;  %1615 = vmatpush.bf16.msra.mxu1 %v3022_v45 }
  0x12   :  { %v3005_v49 = vld [vmem:[%s6680_s1 + $0x160] sm:$0xf]  ;;  %v4153_v51 = vld [vmem:[%s6680_s1 + $0x16c] sm:$0xf0]  ;;  %v2878_v56 = vor.u32 %v4121_v48, %v2877_v47  ;;  %1628 = vmatpush.bf16.msra.mxu2 %v3150_v46 }
  0x13   :  { %v3133_v52 = vld [vmem:[%s6680_s1 + $0x260] sm:$0xf]  ;;  %v4185_v53 = vld [vmem:[%s6680_s1 + $0x26c] sm:$0xf0]  ;;  %v3006_v57 = vor.u32 %v4153_v51, %v3005_v49  ;;  %1641 = vmatpush.bf16.msra.mxu3 %v3278_v50 }
  0x14   :  { %v3261_v54 = vld [vmem:[%s6680_s1 + $0x360] sm:$0xf]  ;;  %v4217_v55 = vld [vmem:[%s6680_s1 + $0x36c] sm:$0xf0]  ;;  %v3134_v58 = vor.u32 %v4185_v53, %v3133_v52  ;;  %1603 = vmatpush.bf16.msra.mxu0 %v2878_v56 }
  0x15   :  { %v2861_v59 = vld [vmem:[%s6680_s1 + $0x40] sm:$0xf]  ;;  %v4117_v60 = vld [vmem:[%s6680_s1 + $0x4c] sm:$0xf0]  ;;  %v3262_v62 = vor.u32 %v4217_v55, %v3261_v54  ;;  %1616 = vmatpush.bf16.msra.mxu1 %v3006_v57 }
  0x16   :  { %v2989_v61 = vld [vmem:[%s6680_s1 + $0x140] sm:$0xf]  ;;  %v4149_v63 = vld [vmem:[%s6680_s1 + $0x14c] sm:$0xf0]  ;;  %v2862_v4 = vor.u32 %v4117_v60, %v2861_v59  ;;  %1629 = vmatpush.bf16.msra.mxu2 %v3134_v58 }
  0x17   :  { %v3117_v0 = vld [vmem:[%s6680_s1 + $0x240] sm:$0xf]  ;;  %v4181_v1 = vld [vmem:[%s6680_s1 + $0x24c] sm:$0xf0]  ;;  %v2990_v5 = vor.u32 %v4149_v63, %v2989_v61  ;;  %1642 = vmatpush.bf16.msra.mxu3 %v3262_v62 }
  0x18   :  { %v3245_v2 = vld [vmem:[%s6680_s1 + $0x340] sm:$0xf]  ;;  %v4213_v3 = vld [vmem:[%s6680_s1 + $0x34c] sm:$0xf0]  ;;  %v3118_v6 = vor.u32 %v4181_v1, %v3117_v0  ;;  %1604 = vmatpush.bf16.msra.mxu0 %v2862_v4 }
  0x19   :  { %v2845_v7 = vld [vmem:[%s6680_s1 + $0x20] sm:$0xf]  ;;  %v4113_v8 = vld [vmem:[%s6680_s1 + $0x2c] sm:$0xf0]  ;;  %v3246_v10 = vor.u32 %v4213_v3, %v3245_v2  ;;  %1617 = vmatpush.bf16.msra.mxu1 %v2990_v5 }
  0x1a   :  { %v2973_v9 = vld [vmem:[%s6680_s1 + $0x120] sm:$0xf]  ;;  %v4145_v11 = vld [vmem:[%s6680_s1 + $0x12c] sm:$0xf0]  ;;  %v2846_v16 = vor.u32 %v4113_v8, %v2845_v7  ;;  %1630 = vmatpush.bf16.msra.mxu2 %v3118_v6 }
  0x1b   :  { %v3101_v12 = vld [vmem:[%s6680_s1 + $0x220] sm:$0xf]  ;;  %v4177_v13 = vld [vmem:[%s6680_s1 + $0x22c] sm:$0xf0]  ;;  %v2974_v19 = vor.u32 %v4145_v11, %v2973_v9  ;;  %1643 = vmatpush.bf16.msra.mxu3 %v3246_v10 }
  0x1c   :  { %v3229_v14 = vld [vmem:[%s6680_s1 + $0x320] sm:$0xf]  ;;  %v4209_v15 = vld [vmem:[%s6680_s1 + $0x32c] sm:$0xf0]  ;;  %v3102_v20 = vor.u32 %v4177_v13, %v3101_v12  ;;  %1605 = vmatpush.bf16.msra.mxu0 %v2846_v16 }
  0x1d   :  { %v2829_v17 = vld [vmem:[%s6680_s1] sm:$0xf]  ;;  %v4109_v18 = vld [vmem:[%s6680_s1 + $0xc] sm:$0xf0]  ;;  %v3230_v24 = vor.u32 %v4209_v15, %v3229_v14  ;;  %1618 = vmatpush.bf16.msra.mxu1 %v2974_v19 }
  0x1e   :  { %v2957_v21 = vld [vmem:[%s6680_s1 + $0x100] sm:$0xf]  ;;  %v4141_v22 = vld [vmem:[%s6680_s1 + $0x10c] sm:$0xf0]  ;;  %v2830_v31 = vor.u32 %v4109_v18, %v2829_v17  ;;  %1631 = vmatpush.bf16.msra.mxu2 %v3102_v20 }
  0x1f   :  { %v3085_v23 = vld [vmem:[%s6680_s1 + $0x200] sm:$0xf]  ;;  %v4173_v25 = vld [vmem:[%s6680_s1 + $0x20c] sm:$0xf0]  ;;  %v2958_v35 = vor.u32 %v4141_v22, %v2957_v21  ;;  %1644 = vmatpush.bf16.msra.mxu3 %v3230_v24 }
  0x20   :  { %v3213_v26 = vld [vmem:[%s6680_s1 + $0x300] sm:$0xf]  ;;  %v4205_v27 = vld [vmem:[%s6680_s1 + $0x30c] sm:$0xf0]  ;;  %v3086_v36 = vor.u32 %v4173_v25, %v3085_v23  ;;  %1606 = vmatpush.bf16.msra.mxu0 %v2830_v31 }
  0x21   :  { %v3453_v28 = vld [vmem:[%s6680_s1 + $0x4e0] sm:$0xf]  ;;  %v4265_v29 = vld [vmem:[%s6680_s1 + $0x4ec] sm:$0xf0]  ;;  %v3214_v39 = vor.u32 %v4205_v27, %v3213_v26  ;;  %1619 = vmatpush.bf16.msra.mxu1 %v2958_v35 }
  0x22   :  { %v3581_v30 = vld [vmem:[%s6680_s1 + $0x5e0] sm:$0xf]  ;;  %v4297_v32 = vld [vmem:[%s6680_s1 + $0x5ec] sm:$0xf0]  ;;  %v3454_v40 = vor.u32 %v4265_v29, %v3453_v28  ;;  %1632 = vmatpush.bf16.msra.mxu2 %v3086_v36 }
  0x23   :  { %v3709_v33 = vld [vmem:[%s6680_s1 + $0x6e0] sm:$0xf]  ;;  %v4329_v34 = vld [vmem:[%s6680_s1 + $0x6ec] sm:$0xf0]  ;;  %v3582_v41 = vor.u32 %v4297_v32, %v3581_v30  ;;  %1645 = vmatpush.bf16.msra.mxu3 %v3214_v39 }
  0x24   :  { %v3837_v37 = vld [vmem:[%s6680_s1 + $0x7e0] sm:$0xf]  ;;  %v4361_v38 = vld [vmem:[%s6680_s1 + $0x7ec] sm:$0xf0]  ;;  %v3710_v42 = vor.u32 %v4329_v34, %v3709_v33  ;;  %1651 = vmatpush.bf16.msrb.mxu0 %v3454_v40 }
  0x25   :  { %v3437_v43 = vld [vmem:[%s6680_s1 + $0x4c0] sm:$0xf]  ;;  %v4261_v44 = vld [vmem:[%s6680_s1 + $0x4cc] sm:$0xf0]  ;;  %v3838_v46 = vor.u32 %v4361_v38, %v3837_v37  ;;  %1664 = vmatpush.bf16.msrb.mxu1 %v3582_v41 }
  0x26   :  { %v3565_v45 = vld [vmem:[%s6680_s1 + $0x5c0] sm:$0xf]  ;;  %v4293_v47 = vld [vmem:[%s6680_s1 + $0x5cc] sm:$0xf0]  ;;  %v3438_v53 = vor.u32 %v4261_v44, %v3437_v43  ;;  %1677 = vmatpush.bf16.msrb.mxu2 %v3710_v42 }
  0x27   :  { %v3693_v48 = vld [vmem:[%s6680_s1 + $0x6c0] sm:$0xf]  ;;  %v4325_v49 = vld [vmem:[%s6680_s1 + $0x6cc] sm:$0xf0]  ;;  %v3566_v54 = vor.u32 %v4293_v47, %v3565_v45  ;;  %1690 = vmatpush.bf16.msrb.mxu3 %v3838_v46  ;;  %v33_v45 = vld [vmem:[%s6681_s0 + $0x8] sm:$0xff] }
  0x28   :  { %v3821_v50 = vld [vmem:[%s6680_s1 + $0x7c0] sm:$0xf]  ;;  %v4357_v51 = vld [vmem:[%s6680_s1 + $0x7cc] sm:$0xf0]  ;;  %v3694_v55 = vor.u32 %v4325_v49, %v3693_v48  ;;  %1652 = vmatpush.bf16.msrb.mxu0 %v3438_v53  ;;  %38 = vst [vmem:[#allocation1 + $0x20] ss:$4 sm:$0xff] %v33_v45 }
  0x29   :  { %v32_v52 = vld [vmem:[%s6681_s0] sm:$0xff]  ;;  %v4257_v57 = vld [vmem:[%s6680_s1 + $0x4ac] sm:$0xf0]  ;;  %v3822_v59 = vor.u32 %v4357_v51, %v3821_v50  ;;  %1665 = vmatpush.bf16.msrb.mxu1 %v3566_v54 }
  0x2a   :  { %36 = vst [vmem:[#allocation1] ss:$4 sm:$0xff] %v32_v52  ;;  %v3421_v56 = vld [vmem:[%s6680_s1 + $0x4a0] sm:$0xf]  ;;  %v4289_v60 = vld [vmem:[%s6680_s1 + $0x5ac] sm:$0xf0]  ;;  %1678 = vmatpush.bf16.msrb.mxu2 %v3694_v55 }
  0x2b   :  { %v3549_v58 = vld [vmem:[%s6680_s1 + $0x5a0] sm:$0xf]  ;;  %v4321_v62 = vld [vmem:[%s6680_s1 + $0x6ac] sm:$0xf0]  ;;  %v3422_v1 = vor.u32 %v4257_v57, %v3421_v56  ;;  %1691 = vmatpush.bf16.msrb.mxu3 %v3822_v59  ;;  %v4127_v45 = vld [vmem:[%s6680_s1 + $0xa4] sm:$0xf] }
  0x2c   :  { %v3677_v61 = vld [vmem:[%s6680_s1 + $0x6a0] sm:$0xf]  ;;  %v4353_v0 = vld [vmem:[%s6680_s1 + $0x7ac] sm:$0xf0]  ;;  %v3550_v4 = vor.u32 %v4289_v60, %v3549_v58 }
  0x2d   :  { %v3805_v63 = vld [vmem:[%s6680_s1 + $0x7a0] sm:$0xf]  ;;  %v4253_v3 = vld [vmem:[%s6680_s1 + $0x48c] sm:$0xf0]  ;;  %v3678_v5 = vor.u32 %v4321_v62, %v3677_v61  ;;  %1653 = vmatpush.bf16.msrb.mxu0 %v3422_v1 }
  0x2e   :  { %v3405_v2 = vld [vmem:[%s6680_s1 + $0x480] sm:$0xf]  ;;  %v4285_v7 = vld [vmem:[%s6680_s1 + $0x58c] sm:$0xf0]  ;;  %v3806_v9 = vor.u32 %v4353_v0, %v3805_v63  ;;  %1666 = vmatpush.bf16.msrb.mxu1 %v3550_v4 }
  0x2f   :  { %v3533_v6 = vld [vmem:[%s6680_s1 + $0x580] sm:$0xf]  ;;  %v4317_v10 = vld [vmem:[%s6680_s1 + $0x68c] sm:$0xf0]  ;;  %v3406_v15 = vor.u32 %v4253_v3, %v3405_v2  ;;  %1679 = vmatpush.bf16.msrb.mxu2 %v3678_v5 }
  0x30   :  { %v3661_v8 = vld [vmem:[%s6680_s1 + $0x680] sm:$0xf]  ;;  %v4349_v12 = vld [vmem:[%s6680_s1 + $0x78c] sm:$0xf0]  ;;  %v3534_v16 = vor.u32 %v4285_v7, %v3533_v6  ;;  %1692 = vmatpush.bf16.msrb.mxu3 %v3806_v9  ;;  %v4135_v6 = vld [vmem:[%s6680_s1 + $0xe4] sm:$0xf] }
  0x31   :  { %v3789_v11 = vld [vmem:[%s6680_s1 + $0x780] sm:$0xf]  ;;  %v41_v13 = vld.sshfl [vmem:[#allocation1 + $0x10] sm:$0xff pattern:$0x73625140]  ;;  %v3662_v21 = vor.u32 %v4317_v10, %v3661_v8  ;;  %1654 = vmatpush.bf16.msrb.mxu0 %v3406_v15 }
  0x32   :  { %v39_v14 = vld.sshfl [vmem:[#allocation1] sm:$0xff pattern:$0x73625140]  ;;  %v4785_v17 = vpack.c.bf16 %v41_v13, %v41_v13  ;;  %v42_v19 = vld.sshfl [vmem:[#allocation1 + $0x18] sm:$0xff pattern:$0x73625140]  ;;  %v3790_v27 = vor.u32 %v4349_v12, %v3789_v11  ;;  %1667 = vmatpush.bf16.msrb.mxu1 %v3534_v16 }
  0x33   :  { %v4787_v18 = vpack.c.bf16 %v39_v14, %v39_v14  ;;  %v40_v20 = vld.sshfl [vmem:[#allocation1 + $0x8] sm:$0xff pattern:$0x73625140]  ;;  %v3389_v22 = vld [vmem:[%s6680_s1 + $0x460] sm:$0xf]  ;;  %v4798_v25 = vpack.c.bf16 %v42_v19, %v42_v19  ;;  %1680 = vmatpush.bf16.msrb.mxu2 %v3662_v21 }
  0x34   :  { %v4249_v23 = vld [vmem:[%s6680_s1 + $0x46c] sm:$0xf0]  ;;  %v3517_v24 = vld [vmem:[%s6680_s1 + $0x560] sm:$0xf]  ;;  %v4800_v26 = vpack.c.bf16 %v40_v20, %v40_v20  ;;  %1633 = vmatmul.bf16.vlgmr.msra.gmra.mxu2 %v4785_v17  ;;  %1693 = vmatpush.bf16.msrb.mxu3 %v3790_v27  ;;  %v2943_v7 = vld [vmem:[%s6680_s1 + $0xf0] sm:$0xf0] }
  0x35   :  { %v4281_v28 = vld [vmem:[%s6680_s1 + $0x56c] sm:$0xf0]  ;;  %v3645_v29 = vld [vmem:[%s6680_s1 + $0x660] sm:$0xf]  ;;  %1607 = vmatmul.bf16.vlgmr.msra.gmra.mxu0 %v4787_v18  ;;  %1646 = vmatmul.bf16.vlgmr.msra.gmra.mxu3 %v4798_v25  ;;  %v3390_v33 = vor.u32 %v4249_v23, %v3389_v22  ;;  %v4167_v8 = vld [vmem:[%s6680_s1 + $0x1e4] sm:$0xf]  ;;  %v2946_v23 = vor.u32 %v4135_v6, %v2943_v7 }
  0x36   :  { %v4313_v30 = vld [vmem:[%s6680_s1 + $0x66c] sm:$0xf0]  ;;  %v3773_v31 = vld [vmem:[%s6680_s1 + $0x760] sm:$0xf]  ;;  %1620 = vmatmul.bf16.vlgmr.msra.gmra.mxu1 %v4800_v26  ;;  %v3518_v34 = vor.u32 %v4281_v28, %v3517_v24  ;;  %v3071_v9 = vld [vmem:[%s6680_s1 + $0x1f0] sm:$0xf0] }
  0x37   :  { %v4345_v32 = vld [vmem:[%s6680_s1 + $0x76c] sm:$0xf0]  ;;  %v3646_v35 = vor.u32 %v4313_v30, %v3645_v29  ;;  %v3373_v36 = vld [vmem:[%s6680_s1 + $0x440] sm:$0xf]  ;;  %1655 = vmatpush.bf16.msrb.mxu0 %v3390_v33  ;;  %v4199_v10 = vld [vmem:[%s6680_s1 + $0x2e4] sm:$0xf]  ;;  %v3074_v28 = vor.u32 %v4167_v8, %v3071_v9 }
  0x38   :  { %v4245_v37 = vld [vmem:[%s6680_s1 + $0x44c] sm:$0xf0]  ;;  %v3501_v38 = vld [vmem:[%s6680_s1 + $0x540] sm:$0xf]  ;;  %v3774_v39 = vor.u32 %v4345_v32, %v3773_v31  ;;  %1668 = vmatpush.bf16.msrb.mxu1 %v3518_v34  ;;  %v3199_v12 = vld [vmem:[%s6680_s1 + $0x2f0] sm:$0xf0] }
  0x39   :  { %v4277_v40 = vld [vmem:[%s6680_s1 + $0x54c] sm:$0xf0]  ;;  %v3629_v41 = vld [vmem:[%s6680_s1 + $0x640] sm:$0xf]  ;;  %v3374_v46 = vor.u32 %v4245_v37, %v3373_v36  ;;  %1681 = vmatpush.bf16.msrb.mxu2 %v3646_v35  ;;  %v4231_v13 = vld [vmem:[%s6680_s1 + $0x3e4] sm:$0xf]  ;;  %v3202_v29 = vor.u32 %v4199_v10, %v3199_v12 }
  0x3a   :  { %v4309_v42 = vld [vmem:[%s6680_s1 + $0x64c] sm:$0xf0]  ;;  %v3757_v43 = vld [vmem:[%s6680_s1 + $0x740] sm:$0xf]  ;;  %v3502_v47 = vor.u32 %v4277_v40, %v3501_v38  ;;  %1694 = vmatpush.bf16.msrb.mxu3 %v3774_v39  ;;  %v3327_v14 = vld [vmem:[%s6680_s1 + $0x3f0] sm:$0xf0] }
  0x3b   :  { %v4341_v44 = vld [vmem:[%s6680_s1 + $0x74c] sm:$0xf0]  ;;  %v3630_v48 = vor.u32 %v4309_v42, %v3629_v41  ;;  %v3357_v49 = vld [vmem:[%s6680_s1 + $0x420] sm:$0xf]  ;;  %1656 = vmatpush.bf16.msrb.mxu0 %v3374_v46  ;;  %v4131_v20 = vld [vmem:[%s6680_s1 + $0xc4] sm:$0xf]  ;;  %v3330_v32 = vor.u32 %v4231_v13, %v3327_v14 }
  0x3c   :  { %v4241_v50 = vld [vmem:[%s6680_s1 + $0x42c] sm:$0xf0]  ;;  %v3485_v51 = vld [vmem:[%s6680_s1 + $0x520] sm:$0xf]  ;;  %v3758_v52 = vor.u32 %v4341_v44, %v3757_v43  ;;  %1669 = vmatpush.bf16.msrb.mxu1 %v3502_v47  ;;  %v2927_v21 = vld [vmem:[%s6680_s1 + $0xd0] sm:$0xf0] }
  0x3d   :  { %v4273_v53 = vld [vmem:[%s6680_s1 + $0x52c] sm:$0xf0]  ;;  %v3613_v54 = vld [vmem:[%s6680_s1 + $0x620] sm:$0xf]  ;;  %v3358_v59 = vor.u32 %v4241_v50, %v3357_v49  ;;  %1682 = vmatpush.bf16.msrb.mxu2 %v3630_v48  ;;  %v4163_v30 = vld [vmem:[%s6680_s1 + $0x1c4] sm:$0xf]  ;;  %v2930_v41 = vor.u32 %v4131_v20, %v2927_v21 }
  0x3e   :  { %v4305_v55 = vld [vmem:[%s6680_s1 + $0x62c] sm:$0xf0]  ;;  %v3741_v56 = vld [vmem:[%s6680_s1 + $0x720] sm:$0xf]  ;;  %v3486_v63 = vor.u32 %v4273_v53, %v3485_v51  ;;  %1695 = vmatpush.bf16.msrb.mxu3 %v3758_v52  ;;  %v3055_v34 = vld [vmem:[%s6680_s1 + $0x1d0] sm:$0xf0] }
  0x3f   :  { %v4337_v57 = vld [vmem:[%s6680_s1 + $0x72c] sm:$0xf0]  ;;  %v3341_v58 = vld [vmem:[%s6680_s1 + $0x400] sm:$0xf]  ;;  %v3614_v0 = vor.u32 %v4305_v55, %v3613_v54  ;;  %1657 = vmatpush.bf16.msrb.mxu0 %v3358_v59  ;;  %v4195_v35 = vld [vmem:[%s6680_s1 + $0x2c4] sm:$0xf]  ;;  %v3058_v43 = vor.u32 %v4163_v30, %v3055_v34 }
  0x40   :  { %v4237_v60 = vld [vmem:[%s6680_s1 + $0x40c] sm:$0xf0]  ;;  %v3469_v61 = vld [vmem:[%s6680_s1 + $0x500] sm:$0xf]  ;;  %v3742_v4 = vor.u32 %v4337_v57, %v3741_v56  ;;  %1670 = vmatpush.bf16.msrb.mxu1 %v3486_v63  ;;  %v3183_v36 = vld [vmem:[%s6680_s1 + $0x2d0] sm:$0xf0] }
  0x41   :  { %v4269_v62 = vld [vmem:[%s6680_s1 + $0x50c] sm:$0xf0]  ;;  %v3597_v1 = vld [vmem:[%s6680_s1 + $0x600] sm:$0xf]  ;;  %v3342_v11 = vor.u32 %v4237_v60, %v3341_v58  ;;  %1683 = vmatpush.bf16.msrb.mxu2 %v3614_v0  ;;  %v4227_v39 = vld [vmem:[%s6680_s1 + $0x3c4] sm:$0xf]  ;;  %v3186_v44 = vor.u32 %v4195_v35, %v3183_v36 }
  0x42   :  { %v4301_v2 = vld [vmem:[%s6680_s1 + $0x60c] sm:$0xf0]  ;;  %v3725_v3 = vld [vmem:[%s6680_s1 + $0x700] sm:$0xf]  ;;  %v3470_v15 = vor.u32 %v4269_v62, %v3469_v61  ;;  %1696 = vmatpush.bf16.msrb.mxu3 %v3742_v4  ;;  %v3311_v40 = vld [vmem:[%s6680_s1 + $0x3d0] sm:$0xf0] }
  0x43   :  { %v4333_v5 = vld [vmem:[%s6680_s1 + $0x70c] sm:$0xf0]  ;;  %v3598_v16 = vor.u32 %v4301_v2, %v3597_v1  ;;  %v43_v24 = vld.sshfl [vmem:[#allocation1 + $0x20] sm:$0xff pattern:$0x73625140]  ;;  %1658 = vmatpush.bf16.msrb.mxu0 %v3342_v11  ;;  %v3314_v48 = vor.u32 %v4227_v39, %v3311_v40 }
  0x44   :  { %v45_v19 = vld.sshfl [vmem:[#allocation1 + $0x30] sm:$0xff pattern:$0x73625140]  ;;  %v3726_v22 = vor.u32 %v4333_v5, %v3725_v3  ;;  %v46_v27 = vld.sshfl [vmem:[#allocation1 + $0x38] sm:$0xff pattern:$0x73625140]  ;;  %1671 = vmatpush.bf16.msrb.mxu1 %v3470_v15  ;;  %v4940_v37 = vpack.c.bf16 %v43_v24, %v43_v24 }
  0x45   :  { %v44_v31 = vld.sshfl [vmem:[#allocation1 + $0x28] sm:$0xff pattern:$0x73625140]  ;;  %v4929_v33 = vpack.c.bf16 %v45_v19, %v45_v19  ;;  %1684 = vmatpush.bf16.msrb.mxu2 %v3598_v16  ;;  %v4942_v38 = vpack.c.bf16 %v46_v27, %v46_v27  ;;  %v2911_v46 = vld [vmem:[%s6680_s1 + $0xb0] sm:$0xf0] }
  0x46   :  { %1697 = vmatpush.bf16.msrb.mxu3 %v3726_v22  ;;  %v4950_v42 = vpack.c.bf16 %v44_v31, %v44_v31  ;;  %v4159_v47 = vld [vmem:[%s6680_s1 + $0x1a4] sm:$0xf]  ;;  %v3039_v49 = vld [vmem:[%s6680_s1 + $0x1b0] sm:$0xf0]  ;;  %1659 = vmatmul.bf16.vlgmr.msrb.gmra.mxu0 %v4940_v37  ;;  %v2914_v54 = vor.u32 %v4127_v45, %v2911_v46 }
  0x47   :  { %1703 = vmatpush.bf16.msra.mxu0 %v2946_v23  ;;  %v4191_v50 = vld [vmem:[%s6680_s1 + $0x2a4] sm:$0xf]  ;;  %v3167_v51 = vld [vmem:[%s6680_s1 + $0x2b0] sm:$0xf0]  ;;  %v3042_v55 = vor.u32 %v4159_v47, %v3039_v49 }
  0x48   :  { %1716 = vmatpush.bf16.msra.mxu1 %v3074_v28  ;;  %1685 = vmatmul.bf16.vlgmr.msrb.gmra.mxu2 %v4929_v33  ;;  %v4223_v52 = vld [vmem:[%s6680_s1 + $0x3a4] sm:$0xf]  ;;  %v3295_v53 = vld [vmem:[%s6680_s1 + $0x3b0] sm:$0xf0]  ;;  %v3170_v56 = vor.u32 %v4191_v50, %v3167_v51 }
  0x49   :  { %1729 = vmatpush.bf16.msra.mxu2 %v3202_v29  ;;  %1698 = vmatmul.bf16.vlgmr.msrb.gmra.mxu3 %v4942_v38  ;;  %v4123_v57 = vld [vmem:[%s6680_s1 + $0x84] sm:$0xf]  ;;  %v2895_v58 = vld [vmem:[%s6680_s1 + $0x90] sm:$0xf0]  ;;  %v3298_v60 = vor.u32 %v4223_v52, %v3295_v53 }
  0x4a   :  { %1742 = vmatpush.bf16.msra.mxu3 %v3330_v32  ;;  %1672 = vmatmul.bf16.vlgmr.msrb.gmra.mxu1 %v4950_v42  ;;  %v4155_v59 = vld [vmem:[%s6680_s1 + $0x184] sm:$0xf]  ;;  %v3023_v61 = vld [vmem:[%s6680_s1 + $0x190] sm:$0xf0]  ;;  %v2898_v2 = vor.u32 %v4123_v57, %v2895_v58 }
  0x4b   :  { %1704 = vmatpush.bf16.msra.mxu0 %v2930_v41  ;;  %v4187_v62 = vld [vmem:[%s6680_s1 + $0x284] sm:$0xf]  ;;  %v3151_v63 = vld [vmem:[%s6680_s1 + $0x290] sm:$0xf0]  ;;  %v3026_v3 = vor.u32 %v4155_v59, %v3023_v61 }
  0x4c   :  { %1717 = vmatpush.bf16.msra.mxu1 %v3058_v43  ;;  %v4219_v0 = vld [vmem:[%s6680_s1 + $0x384] sm:$0xf]  ;;  %v3279_v1 = vld [vmem:[%s6680_s1 + $0x390] sm:$0xf0]  ;;  %v3154_v4 = vor.u32 %v4187_v62, %v3151_v63 }
  0x4d   :  { %1730 = vmatpush.bf16.msra.mxu2 %v3186_v44  ;;  %v4119_v5 = vld [vmem:[%s6680_s1 + $0x64] sm:$0xf]  ;;  %v2879_v6 = vld [vmem:[%s6680_s1 + $0x70] sm:$0xf0]  ;;  %v3282_v8 = vor.u32 %v4219_v0, %v3279_v1 }
  0x4e   :  { %1743 = vmatpush.bf16.msra.mxu3 %v3314_v48  ;;  %v4151_v7 = vld [vmem:[%s6680_s1 + $0x164] sm:$0xf]  ;;  %v3007_v9 = vld [vmem:[%s6680_s1 + $0x170] sm:$0xf0]  ;;  %v2882_v14 = vor.u32 %v4119_v5, %v2879_v6 }
  0x4f   :  { %1705 = vmatpush.bf16.msra.mxu0 %v2914_v54  ;;  %v4183_v10 = vld [vmem:[%s6680_s1 + $0x264] sm:$0xf]  ;;  %v3135_v11 = vld [vmem:[%s6680_s1 + $0x270] sm:$0xf0]  ;;  %v3010_v15 = vor.u32 %v4151_v7, %v3007_v9 }
  0x50   :  { %1718 = vmatpush.bf16.msra.mxu1 %v3042_v55  ;;  %v4215_v12 = vld [vmem:[%s6680_s1 + $0x364] sm:$0xf]  ;;  %v3263_v13 = vld [vmem:[%s6680_s1 + $0x370] sm:$0xf0]  ;;  %v3138_v16 = vor.u32 %v4183_v10, %v3135_v11 }
  0x51   :  { %1731 = vmatpush.bf16.msra.mxu2 %v3170_v56  ;;  %v4115_v19 = vld [vmem:[%s6680_s1 + $0x44] sm:$0xf]  ;;  %v2863_v20 = vld [vmem:[%s6680_s1 + $0x50] sm:$0xf0]  ;;  %v3266_v22 = vor.u32 %v4215_v12, %v3263_v13 }
  0x52   :  { %1744 = vmatpush.bf16.msra.mxu3 %v3298_v60  ;;  %v4147_v21 = vld [vmem:[%s6680_s1 + $0x144] sm:$0xf]  ;;  %v2991_v23 = vld [vmem:[%s6680_s1 + $0x150] sm:$0xf0]  ;;  %v2866_v30 = vor.u32 %v4115_v19, %v2863_v20 }
  0x53   :  { %1706 = vmatpush.bf16.msra.mxu0 %v2898_v2  ;;  %v4179_v24 = vld [vmem:[%s6680_s1 + $0x244] sm:$0xf]  ;;  %v3119_v27 = vld [vmem:[%s6680_s1 + $0x250] sm:$0xf0]  ;;  %v2994_v31 = vor.u32 %v4147_v21, %v2991_v23 }
  0x54   :  { %1719 = vmatpush.bf16.msra.mxu1 %v3026_v3  ;;  %v4211_v28 = vld [vmem:[%s6680_s1 + $0x344] sm:$0xf]  ;;  %v3247_v29 = vld [vmem:[%s6680_s1 + $0x350] sm:$0xf0]  ;;  %v3122_v32 = vor.u32 %v4179_v24, %v3119_v27 }
  0x55   :  { %1732 = vmatpush.bf16.msra.mxu2 %v3154_v4  ;;  %v4111_v34 = vld [vmem:[%s6680_s1 + $0x24] sm:$0xf]  ;;  %v2847_v35 = vld [vmem:[%s6680_s1 + $0x30] sm:$0xf0]  ;;  %v3250_v39 = vor.u32 %v4211_v28, %v3247_v29 }
  0x56   :  { %1745 = vmatpush.bf16.msra.mxu3 %v3282_v8  ;;  %v4143_v36 = vld [vmem:[%s6680_s1 + $0x124] sm:$0xf]  ;;  %v2975_v40 = vld [vmem:[%s6680_s1 + $0x130] sm:$0xf0]  ;;  %v2850_v46 = vor.u32 %v4111_v34, %v2847_v35 }
  0x57   :  { %1707 = vmatpush.bf16.msra.mxu0 %v2882_v14  ;;  %v4175_v41 = vld [vmem:[%s6680_s1 + $0x224] sm:$0xf]  ;;  %v3103_v43 = vld [vmem:[%s6680_s1 + $0x230] sm:$0xf0]  ;;  %v2978_v49 = vor.u32 %v4143_v36, %v2975_v40 }
  0x58   :  { %1720 = vmatpush.bf16.msra.mxu1 %v3010_v15  ;;  %v4207_v44 = vld [vmem:[%s6680_s1 + $0x324] sm:$0xf]  ;;  %v3231_v45 = vld [vmem:[%s6680_s1 + $0x330] sm:$0xf0]  ;;  %v3106_v50 = vor.u32 %v4175_v41, %v3103_v43 }
  0x59   :  { %1733 = vmatpush.bf16.msra.mxu2 %v3138_v16  ;;  %v4107_v47 = vld [vmem:[%s6680_s1 + $0x4] sm:$0xf]  ;;  %v2831_v48 = vld [vmem:[%s6680_s1 + $0x10] sm:$0xf0]  ;;  %v3234_v54 = vor.u32 %v4207_v44, %v3231_v45 }
  0x5a   :  { %1746 = vmatpush.bf16.msra.mxu3 %v3266_v22  ;;  %v4139_v51 = vld [vmem:[%s6680_s1 + $0x104] sm:$0xf]  ;;  %v2959_v52 = vld [vmem:[%s6680_s1 + $0x110] sm:$0xf0]  ;;  %v2834_v61 = vor.u32 %v4107_v47, %v2831_v48 }
  0x5b   :  { %1708 = vmatpush.bf16.msra.mxu0 %v2866_v30  ;;  %v4171_v53 = vld [vmem:[%s6680_s1 + $0x204] sm:$0xf]  ;;  %v3087_v55 = vld [vmem:[%s6680_s1 + $0x210] sm:$0xf0]  ;;  %v2962_v1 = vor.u32 %v4139_v51, %v2959_v52 }
  0x5c   :  { %1721 = vmatpush.bf16.msra.mxu1 %v2994_v31  ;;  %v4203_v56 = vld [vmem:[%s6680_s1 + $0x304] sm:$0xf]  ;;  %v3215_v57 = vld [vmem:[%s6680_s1 + $0x310] sm:$0xf0]  ;;  %v3090_v2 = vor.u32 %v4171_v53, %v3087_v55 }
  0x5d   :  { %1734 = vmatpush.bf16.msra.mxu2 %v3122_v32  ;;  %v4263_v58 = vld [vmem:[%s6680_s1 + $0x4e4] sm:$0xf]  ;;  %v3455_v59 = vld [vmem:[%s6680_s1 + $0x4f0] sm:$0xf0]  ;;  %v3218_v5 = vor.u32 %v4203_v56, %v3215_v57 }
  0x5e   :  { %1747 = vmatpush.bf16.msra.mxu3 %v3250_v39  ;;  %v4295_v60 = vld [vmem:[%s6680_s1 + $0x5e4] sm:$0xf]  ;;  %v3583_v62 = vld [vmem:[%s6680_s1 + $0x5f0] sm:$0xf0]  ;;  %v3458_v6 = vor.u32 %v4263_v58, %v3455_v59 }
  0x5f   :  { %1709 = vmatpush.bf16.msra.mxu0 %v2850_v46  ;;  %v4327_v63 = vld [vmem:[%s6680_s1 + $0x6e4] sm:$0xf]  ;;  %v3711_v0 = vld [vmem:[%s6680_s1 + $0x6f0] sm:$0xf0]  ;;  %v3586_v7 = vor.u32 %v4295_v60, %v3583_v62 }
  0x60   :  { %1722 = vmatpush.bf16.msra.mxu1 %v2978_v49  ;;  %v4359_v3 = vld [vmem:[%s6680_s1 + $0x7e4] sm:$0xf]  ;;  %v3839_v4 = vld [vmem:[%s6680_s1 + $0x7f0] sm:$0xf0]  ;;  %v3714_v8 = vor.u32 %v4327_v63, %v3711_v0 }
  0x61   :  { %1735 = vmatpush.bf16.msra.mxu2 %v3106_v50  ;;  %v4259_v9 = vld [vmem:[%s6680_s1 + $0x4c4] sm:$0xf]  ;;  %v3439_v10 = vld [vmem:[%s6680_s1 + $0x4d0] sm:$0xf0]  ;;  %v3842_v12 = vor.u32 %v4359_v3, %v3839_v4 }
  0x62   :  { %1748 = vmatpush.bf16.msra.mxu3 %v3234_v54  ;;  %v4291_v11 = vld [vmem:[%s6680_s1 + $0x5c4] sm:$0xf]  ;;  %v3567_v13 = vld [vmem:[%s6680_s1 + $0x5d0] sm:$0xf0]  ;;  %v3442_v20 = vor.u32 %v4259_v9, %v3439_v10 }
  0x63   :  { %1710 = vmatpush.bf16.msra.mxu0 %v2834_v61  ;;  %v4323_v14 = vld [vmem:[%s6680_s1 + $0x6c4] sm:$0xf]  ;;  %v3695_v15 = vld [vmem:[%s6680_s1 + $0x6d0] sm:$0xf0]  ;;  %v3570_v21 = vor.u32 %v4291_v11, %v3567_v13 }
  0x64   :  { %1723 = vmatpush.bf16.msra.mxu1 %v2962_v1  ;;  %v4355_v16 = vld [vmem:[%s6680_s1 + $0x7c4] sm:$0xf]  ;;  %v3823_v19 = vld [vmem:[%s6680_s1 + $0x7d0] sm:$0xf0]  ;;  %v3698_v22 = vor.u32 %v4323_v14, %v3695_v15 }
  0x65   :  { %1736 = vmatpush.bf16.msra.mxu2 %v3090_v2  ;;  %v4255_v23 = vld [vmem:[%s6680_s1 + $0x4a4] sm:$0xf]  ;;  %v3423_v24 = vld [vmem:[%s6680_s1 + $0x4b0] sm:$0xf0]  ;;  %v3826_v28 = vor.u32 %v4355_v16, %v3823_v19 }
  0x66   :  { %1749 = vmatpush.bf16.msra.mxu3 %v3218_v5  ;;  %v4287_v27 = vld [vmem:[%s6680_s1 + $0x5a4] sm:$0xf]  ;;  %v3551_v29 = vld [vmem:[%s6680_s1 + $0x5b0] sm:$0xf0]  ;;  %1711 = vmatmul.bf16.vlgmr.msra.gmra.mxu0 %v4787_v18  ;;  %v3426_v35 = vor.u32 %v4255_v23, %v3423_v24 }
  0x67   :  { %1755 = vmatpush.bf16.msrb.mxu0 %v3458_v6  ;;  %v4319_v30 = vld [vmem:[%s6680_s1 + $0x6a4] sm:$0xf]  ;;  %v3679_v31 = vld [vmem:[%s6680_s1 + $0x6b0] sm:$0xf0]  ;;  %1724 = vmatmul.bf16.vlgmr.msra.gmra.mxu1 %v4800_v26  ;;  %v3554_v36 = vor.u32 %v4287_v27, %v3551_v29 }
  0x68   :  { %1768 = vmatpush.bf16.msrb.mxu1 %v3586_v7  ;;  %1737 = vmatmul.bf16.vlgmr.msra.gmra.mxu2 %v4785_v17  ;;  %v4351_v32 = vld [vmem:[%s6680_s1 + $0x7a4] sm:$0xf]  ;;  %v3807_v34 = vld [vmem:[%s6680_s1 + $0x7b0] sm:$0xf0]  ;;  %v3682_v39 = vor.u32 %v4319_v30, %v3679_v31 }
  0x69   :  { %1781 = vmatpush.bf16.msrb.mxu2 %v3714_v8  ;;  %1750 = vmatmul.bf16.vlgmr.msra.gmra.mxu3 %v4798_v25  ;;  %v4251_v40 = vld [vmem:[%s6680_s1 + $0x484] sm:$0xf]  ;;  %v3407_v41 = vld [vmem:[%s6680_s1 + $0x490] sm:$0xf0]  ;;  %v3810_v44 = vor.u32 %v4351_v32, %v3807_v34 }
  0x6a   :  { %1794 = vmatpush.bf16.msrb.mxu3 %v3842_v12  ;;  %v4283_v43 = vld [vmem:[%s6680_s1 + $0x584] sm:$0xf]  ;;  %v3535_v45 = vld [vmem:[%s6680_s1 + $0x590] sm:$0xf0]  ;;  %v3410_v50 = vor.u32 %v4251_v40, %v3407_v41  ;;  %v2949_v41 = vld [vmem:[%s6680_s1 + $0xe8] sm:$0xf] }
  0x6b   :  { %1756 = vmatpush.bf16.msrb.mxu0 %v3442_v20  ;;  %v4315_v46 = vld [vmem:[%s6680_s1 + $0x684] sm:$0xf]  ;;  %v3663_v47 = vld [vmem:[%s6680_s1 + $0x690] sm:$0xf0]  ;;  %v3538_v51 = vor.u32 %v4283_v43, %v3535_v45  ;;  %v4138_v43 = vld [vmem:[%s6680_s1 + $0xf4] sm:$0xf0] }
  0x6c   :  { %1769 = vmatpush.bf16.msrb.mxu1 %v3570_v21  ;;  %v4347_v48 = vld [vmem:[%s6680_s1 + $0x784] sm:$0xf]  ;;  %v3791_v49 = vld [vmem:[%s6680_s1 + $0x790] sm:$0xf0]  ;;  %v3666_v52 = vor.u32 %v4315_v46, %v3663_v47  ;;  %v4170_v46 = vld [vmem:[%s6680_s1 + $0x1f4] sm:$0xf0] }
  0x6d   :  { %1782 = vmatpush.bf16.msrb.mxu2 %v3698_v22  ;;  %v4247_v53 = vld [vmem:[%s6680_s1 + $0x464] sm:$0xf]  ;;  %v3391_v54 = vld [vmem:[%s6680_s1 + $0x470] sm:$0xf0]  ;;  %v3794_v56 = vor.u32 %v4347_v48, %v3791_v49  ;;  %v3205_v47 = vld [vmem:[%s6680_s1 + $0x2e8] sm:$0xf] }
  0x6e   :  { %1795 = vmatpush.bf16.msrb.mxu3 %v3826_v28  ;;  %v4279_v55 = vld [vmem:[%s6680_s1 + $0x564] sm:$0xf]  ;;  %v3519_v57 = vld [vmem:[%s6680_s1 + $0x570] sm:$0xf0]  ;;  %v3394_v62 = vor.u32 %v4247_v53, %v3391_v54  ;;  %v4202_v48 = vld [vmem:[%s6680_s1 + $0x2f4] sm:$0xf0]  ;;  %v2950_v54 = vor.u32 %v4138_v43, %v2949_v41 }
  0x6f   :  { %1757 = vmatpush.bf16.msrb.mxu0 %v3426_v35  ;;  %v4311_v58 = vld [vmem:[%s6680_s1 + $0x664] sm:$0xf]  ;;  %v3647_v59 = vld [vmem:[%s6680_s1 + $0x670] sm:$0xf0]  ;;  %v3522_v63 = vor.u32 %v4279_v55, %v3519_v57  ;;  %v2933_v57 = vld [vmem:[%s6680_s1 + $0xc8] sm:$0xf] }
  0x70   :  { %1770 = vmatpush.bf16.msrb.mxu1 %v3554_v36  ;;  %v4343_v60 = vld [vmem:[%s6680_s1 + $0x764] sm:$0xf]  ;;  %v3775_v61 = vld [vmem:[%s6680_s1 + $0x770] sm:$0xf0]  ;;  %v3650_v0 = vor.u32 %v4311_v58, %v3647_v59  ;;  %v4134_v58 = vld [vmem:[%s6680_s1 + $0xd4] sm:$0xf0] }
  0x71   :  { %1783 = vmatpush.bf16.msrb.mxu2 %v3682_v39  ;;  %v4243_v1 = vld [vmem:[%s6680_s1 + $0x444] sm:$0xf]  ;;  %v3375_v2 = vld [vmem:[%s6680_s1 + $0x450] sm:$0xf0]  ;;  %v3778_v4 = vor.u32 %v4343_v60, %v3775_v61  ;;  %v3061_v59 = vld [vmem:[%s6680_s1 + $0x1c8] sm:$0xf] }
  0x72   :  { %1796 = vmatpush.bf16.msrb.mxu3 %v3810_v44  ;;  %v4275_v3 = vld [vmem:[%s6680_s1 + $0x544] sm:$0xf]  ;;  %v3503_v5 = vld [vmem:[%s6680_s1 + $0x550] sm:$0xf0]  ;;  %v3378_v10 = vor.u32 %v4243_v1, %v3375_v2  ;;  %v3077_v44 = vld [vmem:[%s6680_s1 + $0x1e8] sm:$0xf]  ;;  %v2934_v2 = vor.u32 %v4134_v58, %v2933_v57 }
  0x73   :  { %1758 = vmatpush.bf16.msrb.mxu0 %v3410_v50  ;;  %v4307_v6 = vld [vmem:[%s6680_s1 + $0x644] sm:$0xf]  ;;  %v3631_v7 = vld [vmem:[%s6680_s1 + $0x650] sm:$0xf0]  ;;  %v3506_v11 = vor.u32 %v4275_v3, %v3503_v5  ;;  %v3078_v55 = vor.u32 %v4170_v46, %v3077_v44  ;;  %v4166_v61 = vld [vmem:[%s6680_s1 + $0x1d4] sm:$0xf0] }
  0x74   :  { %1771 = vmatpush.bf16.msrb.mxu1 %v3538_v51  ;;  %v4339_v8 = vld [vmem:[%s6680_s1 + $0x744] sm:$0xf]  ;;  %v3759_v9 = vld [vmem:[%s6680_s1 + $0x750] sm:$0xf0]  ;;  %v3634_v12 = vor.u32 %v4307_v6, %v3631_v7  ;;  %v3333_v51 = vld [vmem:[%s6680_s1 + $0x3e8] sm:$0xf]  ;;  %v3062_v3 = vor.u32 %v4166_v61, %v3061_v59 }
  0x75   :  { %1784 = vmatpush.bf16.msrb.mxu2 %v3666_v52  ;;  %v4239_v13 = vld [vmem:[%s6680_s1 + $0x424] sm:$0xf]  ;;  %v3359_v14 = vld [vmem:[%s6680_s1 + $0x430] sm:$0xf0]  ;;  %v3762_v16 = vor.u32 %v4339_v8, %v3759_v9  ;;  %v4234_v52 = vld [vmem:[%s6680_s1 + $0x3f4] sm:$0xf0] }
  0x76   :  { %1797 = vmatpush.bf16.msrb.mxu3 %v3794_v56  ;;  %v4271_v15 = vld [vmem:[%s6680_s1 + $0x524] sm:$0xf]  ;;  %v3487_v19 = vld [vmem:[%s6680_s1 + $0x530] sm:$0xf0]  ;;  %v3362_v24 = vor.u32 %v4239_v13, %v3359_v14  ;;  %v3206_v56 = vor.u32 %v4202_v48, %v3205_v47  ;;  %v3334_v60 = vor.u32 %v4234_v52, %v3333_v51  ;;  %v4230_v1 = vld [vmem:[%s6680_s1 + $0x3d4] sm:$0xf0] }
  0x77   :  { %1759 = vmatpush.bf16.msrb.mxu0 %v3394_v62  ;;  %v4303_v20 = vld [vmem:[%s6680_s1 + $0x624] sm:$0xf]  ;;  %v3615_v21 = vld [vmem:[%s6680_s1 + $0x630] sm:$0xf0]  ;;  %v3490_v29 = vor.u32 %v4271_v15, %v3487_v19  ;;  %v3189_v62 = vld [vmem:[%s6680_s1 + $0x2c8] sm:$0xf] }
  0x78   :  { %1772 = vmatpush.bf16.msrb.mxu1 %v3522_v63  ;;  %v4335_v22 = vld [vmem:[%s6680_s1 + $0x724] sm:$0xf]  ;;  %v3743_v23 = vld [vmem:[%s6680_s1 + $0x730] sm:$0xf0]  ;;  %v3618_v30 = vor.u32 %v4303_v20, %v3615_v21  ;;  %v4198_v63 = vld [vmem:[%s6680_s1 + $0x2d4] sm:$0xf0] }
  0x79   :  { %1785 = vmatpush.bf16.msrb.mxu2 %v3650_v0  ;;  %v4235_v27 = vld [vmem:[%s6680_s1 + $0x404] sm:$0xf]  ;;  %v3343_v28 = vld [vmem:[%s6680_s1 + $0x410] sm:$0xf0]  ;;  %v3746_v35 = vor.u32 %v4335_v22, %v3743_v23  ;;  %v3317_v0 = vld [vmem:[%s6680_s1 + $0x3c8] sm:$0xf] }
  0x7a   :  { %1798 = vmatpush.bf16.msrb.mxu3 %v3778_v4  ;;  %v4267_v31 = vld [vmem:[%s6680_s1 + $0x504] sm:$0xf]  ;;  %v3471_v32 = vld [vmem:[%s6680_s1 + $0x510] sm:$0xf0]  ;;  %v3346_v45 = vor.u32 %v4235_v27, %v3343_v28  ;;  %v3190_v4 = vor.u32 %v4198_v63, %v3189_v62  ;;  %v2917_v5 = vld [vmem:[%s6680_s1 + $0xa8] sm:$0xf]  ;;  %v3318_v8 = vor.u32 %v4230_v1, %v3317_v0 }
  0x7b   :  { %1760 = vmatpush.bf16.msrb.mxu0 %v3378_v10  ;;  %v4299_v34 = vld [vmem:[%s6680_s1 + $0x604] sm:$0xf]  ;;  %v3599_v36 = vld [vmem:[%s6680_s1 + $0x610] sm:$0xf0]  ;;  %v3474_v49 = vor.u32 %v4267_v31, %v3471_v32  ;;  %v4130_v6 = vld [vmem:[%s6680_s1 + $0xb4] sm:$0xf0] }
  0x7c   :  { %1773 = vmatpush.bf16.msrb.mxu1 %v3506_v11  ;;  %v4331_v39 = vld [vmem:[%s6680_s1 + $0x704] sm:$0xf]  ;;  %v3727_v40 = vld [vmem:[%s6680_s1 + $0x710] sm:$0xf0]  ;;  %v3602_v50 = vor.u32 %v4299_v34, %v3599_v36  ;;  %v3045_v7 = vld [vmem:[%s6680_s1 + $0x1a8] sm:$0xf]  ;;  %v2918_v14 = vor.u32 %v4130_v6, %v2917_v5 }
  0x7d   :  { %1786 = vmatpush.bf16.msrb.mxu2 %v3634_v12  ;;  %v3730_v53 = vor.u32 %v4331_v39, %v3727_v40  ;;  %v4162_v9 = vld [vmem:[%s6680_s1 + $0x1b4] sm:$0xf0]  ;;  %v3173_v10 = vld [vmem:[%s6680_s1 + $0x2a8] sm:$0xf] }
  0x7e   :  { %1799 = vmatpush.bf16.msrb.mxu3 %v3762_v16  ;;  %v4194_v11 = vld [vmem:[%s6680_s1 + $0x2b4] sm:$0xf0]  ;;  %v3301_v12 = vld [vmem:[%s6680_s1 + $0x3a8] sm:$0xf]  ;;  %v3046_v15 = vor.u32 %v4162_v9, %v3045_v7 }
  0x7f   :  { %1761 = vmatpush.bf16.msrb.mxu0 %v3362_v24  ;;  %v4226_v13 = vld [vmem:[%s6680_s1 + $0x3b4] sm:$0xf0]  ;;  %v3174_v16 = vor.u32 %v4194_v11, %v3173_v10  ;;  %v2901_v19 = vld [vmem:[%s6680_s1 + $0x88] sm:$0xf] }
  0x80   :  { %1774 = vmatpush.bf16.msrb.mxu1 %v3490_v29  ;;  %v4126_v20 = vld [vmem:[%s6680_s1 + $0x94] sm:$0xf0]  ;;  %v3029_v21 = vld [vmem:[%s6680_s1 + $0x188] sm:$0xf]  ;;  %v3302_v22 = vor.u32 %v4226_v13, %v3301_v12 }
  0x81   :  { %1787 = vmatpush.bf16.msrb.mxu2 %v3618_v30  ;;  %v4158_v23 = vld [vmem:[%s6680_s1 + $0x194] sm:$0xf0]  ;;  %v3157_v24 = vld [vmem:[%s6680_s1 + $0x288] sm:$0xf]  ;;  %v2902_v30 = vor.u32 %v4126_v20, %v2901_v19 }
  0x82   :  { %1800 = vmatpush.bf16.msrb.mxu3 %v3746_v35  ;;  %v4190_v27 = vld [vmem:[%s6680_s1 + $0x294] sm:$0xf0]  ;;  %v3285_v28 = vld [vmem:[%s6680_s1 + $0x388] sm:$0xf]  ;;  %v3030_v31 = vor.u32 %v4158_v23, %v3029_v21 }
  0x83   :  { %1762 = vmatpush.bf16.msrb.mxu0 %v3346_v45  ;;  %v4222_v29 = vld [vmem:[%s6680_s1 + $0x394] sm:$0xf0]  ;;  %v3158_v32 = vor.u32 %v4190_v27, %v3157_v24  ;;  %v2885_v34 = vld [vmem:[%s6680_s1 + $0x68] sm:$0xf] }
  0x84   :  { %1775 = vmatpush.bf16.msrb.mxu1 %v3474_v49  ;;  %v4122_v35 = vld [vmem:[%s6680_s1 + $0x74] sm:$0xf0]  ;;  %v3013_v36 = vld [vmem:[%s6680_s1 + $0x168] sm:$0xf]  ;;  %v3286_v39 = vor.u32 %v4222_v29, %v3285_v28 }
  0x85   :  { %1788 = vmatpush.bf16.msrb.mxu2 %v3602_v50  ;;  %v4154_v40 = vld [vmem:[%s6680_s1 + $0x174] sm:$0xf0]  ;;  %v3141_v41 = vld [vmem:[%s6680_s1 + $0x268] sm:$0xf]  ;;  %v2886_v46 = vor.u32 %v4122_v35, %v2885_v34 }
  0x86   :  { %1801 = vmatpush.bf16.msrb.mxu3 %v3730_v53  ;;  %1763 = vmatmul.bf16.vlgmr.msrb.gmra.mxu0 %v4940_v37  ;;  %v4186_v43 = vld [vmem:[%s6680_s1 + $0x274] sm:$0xf0]  ;;  %v3269_v44 = vld [vmem:[%s6680_s1 + $0x368] sm:$0xf]  ;;  %v3014_v47 = vor.u32 %v4154_v40, %v3013_v36 }
  0x87   :  { %1807 = vmatpush.bf16.msra.mxu0 %v2950_v54  ;;  %1776 = vmatmul.bf16.vlgmr.msrb.gmra.mxu1 %v4950_v42  ;;  %v4218_v45 = vld [vmem:[%s6680_s1 + $0x374] sm:$0xf0]  ;;  %v3142_v48 = vor.u32 %v4186_v43, %v3141_v41  ;;  %v2869_v49 = vld [vmem:[%s6680_s1 + $0x48] sm:$0xf] }
  0x88   :  { %1820 = vmatpush.bf16.msra.mxu1 %v3078_v55  ;;  %1789 = vmatmul.bf16.vlgmr.msrb.gmra.mxu2 %v4929_v33  ;;  %v4118_v50 = vld [vmem:[%s6680_s1 + $0x54] sm:$0xf0]  ;;  %v2997_v51 = vld [vmem:[%s6680_s1 + $0x148] sm:$0xf]  ;;  %v3270_v52 = vor.u32 %v4218_v45, %v3269_v44 }
  0x89   :  { %1833 = vmatpush.bf16.msra.mxu2 %v3206_v56  ;;  %1802 = vmatmul.bf16.vlgmr.msrb.gmra.mxu3 %v4942_v38  ;;  %v4150_v53 = vld [vmem:[%s6680_s1 + $0x154] sm:$0xf0]  ;;  %v3125_v54 = vld [vmem:[%s6680_s1 + $0x248] sm:$0xf]  ;;  %v2870_v58 = vor.u32 %v4118_v50, %v2869_v49 }
  0x8a   :  { %1846 = vmatpush.bf16.msra.mxu3 %v3334_v60  ;;  %v4182_v55 = vld [vmem:[%s6680_s1 + $0x254] sm:$0xf0]  ;;  %v3253_v56 = vld [vmem:[%s6680_s1 + $0x348] sm:$0xf]  ;;  %v2998_v59 = vor.u32 %v4150_v53, %v2997_v51 }
  0x8b   :  { %1808 = vmatpush.bf16.msra.mxu0 %v2934_v2  ;;  %v4214_v57 = vld [vmem:[%s6680_s1 + $0x354] sm:$0xf0]  ;;  %v3126_v60 = vor.u32 %v4182_v55, %v3125_v54  ;;  %v2853_v61 = vld [vmem:[%s6680_s1 + $0x28] sm:$0xf] }
  0x8c   :  { %1821 = vmatpush.bf16.msra.mxu1 %v3062_v3  ;;  %v4114_v62 = vld [vmem:[%s6680_s1 + $0x34] sm:$0xf0]  ;;  %v2981_v63 = vld [vmem:[%s6680_s1 + $0x128] sm:$0xf]  ;;  %v3254_v0 = vor.u32 %v4214_v57, %v3253_v56 }
  0x8d   :  { %1834 = vmatpush.bf16.msra.mxu2 %v3190_v4  ;;  %v4146_v1 = vld [vmem:[%s6680_s1 + $0x134] sm:$0xf0]  ;;  %v3109_v2 = vld [vmem:[%s6680_s1 + $0x228] sm:$0xf]  ;;  %v2854_v6 = vor.u32 %v4114_v62, %v2853_v61 }
  0x8e   :  { %1847 = vmatpush.bf16.msra.mxu3 %v3318_v8  ;;  %v4178_v3 = vld [vmem:[%s6680_s1 + $0x234] sm:$0xf0]  ;;  %v3237_v4 = vld [vmem:[%s6680_s1 + $0x328] sm:$0xf]  ;;  %v2982_v9 = vor.u32 %v4146_v1, %v2981_v63 }
  0x8f   :  { %1809 = vmatpush.bf16.msra.mxu0 %v2918_v14  ;;  %v4210_v5 = vld [vmem:[%s6680_s1 + $0x334] sm:$0xf0]  ;;  %v2837_v7 = vld [vmem:[%s6680_s1 + $0x8] sm:$0xf]  ;;  %v3110_v10 = vor.u32 %v4178_v3, %v3109_v2 }
  0x90   :  { %1822 = vmatpush.bf16.msra.mxu1 %v3046_v15  ;;  %v4110_v8 = vld [vmem:[%s6680_s1 + $0x14] sm:$0xf0]  ;;  %v2965_v11 = vld [vmem:[%s6680_s1 + $0x108] sm:$0xf]  ;;  %v3238_v14 = vor.u32 %v4210_v5, %v3237_v4 }
  0x91   :  { %1835 = vmatpush.bf16.msra.mxu2 %v3174_v16  ;;  %v4142_v12 = vld [vmem:[%s6680_s1 + $0x114] sm:$0xf0]  ;;  %v3093_v13 = vld [vmem:[%s6680_s1 + $0x208] sm:$0xf]  ;;  %v2838_v23 = vor.u32 %v4110_v8, %v2837_v7 }
  0x92   :  { %1848 = vmatpush.bf16.msra.mxu3 %v3302_v22  ;;  %v4174_v15 = vld [vmem:[%s6680_s1 + $0x214] sm:$0xf0]  ;;  %v3221_v16 = vld [vmem:[%s6680_s1 + $0x308] sm:$0xf]  ;;  %v2966_v29 = vor.u32 %v4142_v12, %v2965_v11 }
  0x93   :  { %1810 = vmatpush.bf16.msra.mxu0 %v2902_v30  ;;  %v4206_v19 = vld [vmem:[%s6680_s1 + $0x314] sm:$0xf0]  ;;  %v3461_v20 = vld [vmem:[%s6680_s1 + $0x4e8] sm:$0xf]  ;;  %v3094_v30 = vor.u32 %v4174_v15, %v3093_v13 }
  0x94   :  { %1823 = vmatpush.bf16.msra.mxu1 %v3030_v31  ;;  %v4266_v21 = vld [vmem:[%s6680_s1 + $0x4f4] sm:$0xf0]  ;;  %v3589_v22 = vld [vmem:[%s6680_s1 + $0x5e8] sm:$0xf]  ;;  %v3222_v34 = vor.u32 %v4206_v19, %v3221_v16 }
  0x95   :  { %1836 = vmatpush.bf16.msra.mxu2 %v3158_v32  ;;  %v4298_v24 = vld [vmem:[%s6680_s1 + $0x5f4] sm:$0xf0]  ;;  %v3717_v27 = vld [vmem:[%s6680_s1 + $0x6e8] sm:$0xf]  ;;  %v3462_v35 = vor.u32 %v4266_v21, %v3461_v20 }
  0x96   :  { %1849 = vmatpush.bf16.msra.mxu3 %v3286_v39  ;;  %v4330_v28 = vld [vmem:[%s6680_s1 + $0x6f4] sm:$0xf0]  ;;  %v3845_v31 = vld [vmem:[%s6680_s1 + $0x7e8] sm:$0xf]  ;;  %v3590_v36 = vor.u32 %v4298_v24, %v3589_v22 }
  0x97   :  { %1811 = vmatpush.bf16.msra.mxu0 %v2886_v46  ;;  %v4362_v32 = vld [vmem:[%s6680_s1 + $0x7f4] sm:$0xf0]  ;;  %v3718_v39 = vor.u32 %v4330_v28, %v3717_v27  ;;  %v3445_v40 = vld [vmem:[%s6680_s1 + $0x4c8] sm:$0xf] }
  0x98   :  { %1824 = vmatpush.bf16.msra.mxu1 %v3014_v47  ;;  %v4262_v41 = vld [vmem:[%s6680_s1 + $0x4d4] sm:$0xf0]  ;;  %v3573_v43 = vld [vmem:[%s6680_s1 + $0x5c8] sm:$0xf]  ;;  %v3846_v44 = vor.u32 %v4362_v32, %v3845_v31 }
  0x99   :  { %1837 = vmatpush.bf16.msra.mxu2 %v3142_v48  ;;  %v4294_v45 = vld [vmem:[%s6680_s1 + $0x5d4] sm:$0xf0]  ;;  %v3701_v46 = vld [vmem:[%s6680_s1 + $0x6c8] sm:$0xf]  ;;  %v3446_v50 = vor.u32 %v4262_v41, %v3445_v40 }
  0x9a   :  { %1850 = vmatpush.bf16.msra.mxu3 %v3270_v52  ;;  %v4326_v47 = vld [vmem:[%s6680_s1 + $0x6d4] sm:$0xf0]  ;;  %v3829_v48 = vld [vmem:[%s6680_s1 + $0x7c8] sm:$0xf]  ;;  %v3574_v51 = vor.u32 %v4294_v45, %v3573_v43 }
  0x9b   :  { %1812 = vmatpush.bf16.msra.mxu0 %v2870_v58  ;;  %v4358_v49 = vld [vmem:[%s6680_s1 + $0x7d4] sm:$0xf0]  ;;  %v3702_v52 = vor.u32 %v4326_v47, %v3701_v46  ;;  %v3429_v53 = vld [vmem:[%s6680_s1 + $0x4a8] sm:$0xf] }
  0x9c   :  { %1825 = vmatpush.bf16.msra.mxu1 %v2998_v59  ;;  %v4258_v54 = vld [vmem:[%s6680_s1 + $0x4b4] sm:$0xf0]  ;;  %v3557_v55 = vld [vmem:[%s6680_s1 + $0x5a8] sm:$0xf]  ;;  %v3830_v56 = vor.u32 %v4358_v49, %v3829_v48 }
  0x9d   :  { %1838 = vmatpush.bf16.msra.mxu2 %v3126_v60  ;;  %v4290_v57 = vld [vmem:[%s6680_s1 + $0x5b4] sm:$0xf0]  ;;  %v3685_v58 = vld [vmem:[%s6680_s1 + $0x6a8] sm:$0xf]  ;;  %v3430_v62 = vor.u32 %v4258_v54, %v3429_v53 }
  0x9e   :  { %1851 = vmatpush.bf16.msra.mxu3 %v3254_v0  ;;  %v4322_v59 = vld [vmem:[%s6680_s1 + $0x6b4] sm:$0xf0]  ;;  %v3813_v60 = vld [vmem:[%s6680_s1 + $0x7a8] sm:$0xf]  ;;  %v3558_v63 = vor.u32 %v4290_v57, %v3557_v55 }
  0x9f   :  { %1813 = vmatpush.bf16.msra.mxu0 %v2854_v6  ;;  %v4354_v61 = vld [vmem:[%s6680_s1 + $0x7b4] sm:$0xf0]  ;;  %v3686_v0 = vor.u32 %v4322_v59, %v3685_v58  ;;  %v3413_v1 = vld [vmem:[%s6680_s1 + $0x488] sm:$0xf] }
  0xa0   :  { %1826 = vmatpush.bf16.msra.mxu1 %v2982_v9  ;;  %v4254_v2 = vld [vmem:[%s6680_s1 + $0x494] sm:$0xf0]  ;;  %v3541_v3 = vld [vmem:[%s6680_s1 + $0x588] sm:$0xf]  ;;  %v3814_v4 = vor.u32 %v4354_v61, %v3813_v60 }
  0xa1   :  { %1839 = vmatpush.bf16.msra.mxu2 %v3110_v10  ;;  %v4286_v5 = vld [vmem:[%s6680_s1 + $0x594] sm:$0xf0]  ;;  %v3669_v6 = vld [vmem:[%s6680_s1 + $0x688] sm:$0xf]  ;;  %v3414_v10 = vor.u32 %v4254_v2, %v3413_v1 }
  0xa2   :  { %1852 = vmatpush.bf16.msra.mxu3 %v3238_v14  ;;  %v4318_v7 = vld [vmem:[%s6680_s1 + $0x694] sm:$0xf0]  ;;  %v3797_v8 = vld [vmem:[%s6680_s1 + $0x788] sm:$0xf]  ;;  %v3542_v11 = vor.u32 %v4286_v5, %v3541_v3 }
  0xa3   :  { %1814 = vmatpush.bf16.msra.mxu0 %v2838_v23  ;;  %v4350_v9 = vld [vmem:[%s6680_s1 + $0x794] sm:$0xf0]  ;;  %v3670_v12 = vor.u32 %v4318_v7, %v3669_v6  ;;  %v3397_v13 = vld [vmem:[%s6680_s1 + $0x468] sm:$0xf]  ;;  %v4136_v6 = vld [vmem:[%s6680_s1 + $0xec] sm:$0xf] }
  0xa4   :  { %1827 = vmatpush.bf16.msra.mxu1 %v2966_v29  ;;  %v4250_v14 = vld [vmem:[%s6680_s1 + $0x474] sm:$0xf0]  ;;  %v3525_v15 = vld [vmem:[%s6680_s1 + $0x568] sm:$0xf]  ;;  %v3798_v16 = vor.u32 %v4350_v9, %v3797_v8  ;;  %v2951_v7 = vld [vmem:[%s6680_s1 + $0xf8] sm:$0xf0] }
  0xa5   :  { %1840 = vmatpush.bf16.msra.mxu2 %v3094_v30  ;;  %v4282_v19 = vld [vmem:[%s6680_s1 + $0x574] sm:$0xf0]  ;;  %v3653_v20 = vld [vmem:[%s6680_s1 + $0x668] sm:$0xf]  ;;  %v3398_v24 = vor.u32 %v4250_v14, %v3397_v13  ;;  %v4168_v8 = vld [vmem:[%s6680_s1 + $0x1ec] sm:$0xf] }
  0xa6   :  { %1853 = vmatpush.bf16.msra.mxu3 %v3222_v34  ;;  %1815 = vmatmul.bf16.vlgmr.msra.gmra.mxu0 %v4787_v18  ;;  %v4314_v21 = vld [vmem:[%s6680_s1 + $0x674] sm:$0xf0]  ;;  %v3781_v22 = vld [vmem:[%s6680_s1 + $0x768] sm:$0xf]  ;;  %v3526_v27 = vor.u32 %v4282_v19, %v3525_v15  ;;  %v3335_v19 = vld [vmem:[%s6680_s1 + $0x3f8] sm:$0xf0] }
  0xa7   :  { %1859 = vmatpush.bf16.msrb.mxu0 %v3462_v35  ;;  %1828 = vmatmul.bf16.vlgmr.msra.gmra.mxu1 %v4800_v26  ;;  %v4346_v23 = vld [vmem:[%s6680_s1 + $0x774] sm:$0xf0]  ;;  %v3654_v28 = vor.u32 %v4314_v21, %v3653_v20  ;;  %v3381_v29 = vld [vmem:[%s6680_s1 + $0x448] sm:$0xf] }
  0xa8   :  { %1872 = vmatpush.bf16.msrb.mxu1 %v3590_v36  ;;  %1841 = vmatmul.bf16.vlgmr.msra.gmra.mxu2 %v4785_v17  ;;  %v4246_v30 = vld [vmem:[%s6680_s1 + $0x454] sm:$0xf0]  ;;  %v3509_v31 = vld [vmem:[%s6680_s1 + $0x548] sm:$0xf]  ;;  %v3782_v32 = vor.u32 %v4346_v23, %v3781_v22  ;;  %v2954_v22 = vor.u32 %v4136_v6, %v2951_v7 }
  0xa9   :  { %1885 = vmatpush.bf16.msrb.mxu2 %v3718_v39  ;;  %1854 = vmatmul.bf16.vlgmr.msra.gmra.mxu3 %v4798_v25  ;;  %v4278_v34 = vld [vmem:[%s6680_s1 + $0x554] sm:$0xf0]  ;;  %v3637_v35 = vld [vmem:[%s6680_s1 + $0x648] sm:$0xf]  ;;  %v3382_v41 = vor.u32 %v4246_v30, %v3381_v29  ;;  %v2935_v29 = vld [vmem:[%s6680_s1 + $0xd8] sm:$0xf0] }
  0xaa   :  { %1898 = vmatpush.bf16.msrb.mxu3 %v3846_v44  ;;  %v4310_v36 = vld [vmem:[%s6680_s1 + $0x654] sm:$0xf0]  ;;  %v3765_v39 = vld [vmem:[%s6680_s1 + $0x748] sm:$0xf]  ;;  %v3510_v44 = vor.u32 %v4278_v34, %v3509_v31  ;;  %v4164_v30 = vld [vmem:[%s6680_s1 + $0x1cc] sm:$0xf] }
  0xab   :  { %1860 = vmatpush.bf16.msrb.mxu0 %v3446_v50  ;;  %v4342_v40 = vld [vmem:[%s6680_s1 + $0x754] sm:$0xf0]  ;;  %v3638_v45 = vor.u32 %v4310_v36, %v3637_v35  ;;  %v3365_v46 = vld [vmem:[%s6680_s1 + $0x428] sm:$0xf]  ;;  %v4196_v34 = vld [vmem:[%s6680_s1 + $0x2cc] sm:$0xf] }
  0xac   :  { %1873 = vmatpush.bf16.msrb.mxu1 %v3574_v51  ;;  %v4242_v47 = vld [vmem:[%s6680_s1 + $0x434] sm:$0xf0]  ;;  %v3493_v48 = vld [vmem:[%s6680_s1 + $0x528] sm:$0xf]  ;;  %v3766_v50 = vor.u32 %v4342_v40, %v3765_v39  ;;  %v3191_v35 = vld [vmem:[%s6680_s1 + $0x2d8] sm:$0xf0] }
  0xad   :  { %1886 = vmatpush.bf16.msrb.mxu2 %v3702_v52  ;;  %v4274_v51 = vld [vmem:[%s6680_s1 + $0x534] sm:$0xf0]  ;;  %v3621_v52 = vld [vmem:[%s6680_s1 + $0x628] sm:$0xf]  ;;  %v4228_v36 = vld [vmem:[%s6680_s1 + $0x3cc] sm:$0xf] }
  0xae   :  { %1899 = vmatpush.bf16.msrb.mxu3 %v3830_v56  ;;  %v4306_v53 = vld [vmem:[%s6680_s1 + $0x634] sm:$0xf0]  ;;  %v3749_v54 = vld [vmem:[%s6680_s1 + $0x728] sm:$0xf]  ;;  %v3366_v56 = vor.u32 %v4242_v47, %v3365_v46  ;;  %v3494_v59 = vor.u32 %v4274_v51, %v3493_v48  ;;  %v3319_v39 = vld [vmem:[%s6680_s1 + $0x3d8] sm:$0xf0]  ;;  %v3194_v46 = vor.u32 %v4196_v34, %v3191_v35 }
  0xaf   :  { %1861 = vmatpush.bf16.msrb.mxu0 %v3430_v62  ;;  %v4338_v55 = vld [vmem:[%s6680_s1 + $0x734] sm:$0xf0]  ;;  %v3349_v57 = vld [vmem:[%s6680_s1 + $0x408] sm:$0xf]  ;;  %v3622_v60 = vor.u32 %v4306_v53, %v3621_v52  ;;  %v4128_v47 = vld [vmem:[%s6680_s1 + $0xac] sm:$0xf] }
  0xb0   :  { %1874 = vmatpush.bf16.msrb.mxu1 %v3558_v63  ;;  %v4238_v58 = vld [vmem:[%s6680_s1 + $0x414] sm:$0xf0]  ;;  %v3477_v61 = vld [vmem:[%s6680_s1 + $0x508] sm:$0xf]  ;;  %v3750_v1 = vor.u32 %v4338_v55, %v3749_v54  ;;  %v2919_v48 = vld [vmem:[%s6680_s1 + $0xb8] sm:$0xf0] }
  0xb1   :  { %1887 = vmatpush.bf16.msrb.mxu2 %v3686_v0  ;;  %v4270_v62 = vld [vmem:[%s6680_s1 + $0x514] sm:$0xf0]  ;;  %v3605_v63 = vld [vmem:[%s6680_s1 + $0x608] sm:$0xf]  ;;  %v3350_v9 = vor.u32 %v4238_v58, %v3349_v57  ;;  %v3047_v51 = vld [vmem:[%s6680_s1 + $0x1b8] sm:$0xf0]  ;;  %v2922_v57 = vor.u32 %v4128_v47, %v2919_v48 }
  0xb2   :  { %1900 = vmatpush.bf16.msrb.mxu3 %v3814_v4  ;;  %v1608_v43 = vpop.f32.mrf.mxu0  ;;  %v4302_v2 = vld [vmem:[%s6680_s1 + $0x614] sm:$0xf0]  ;;  %v3733_v3 = vld [vmem:[%s6680_s1 + $0x708] sm:$0xf]  ;;  %v3478_v14 = vor.u32 %v4270_v62, %v3477_v61  ;;  %v4192_v52 = vld [vmem:[%s6680_s1 + $0x2ac] sm:$0xf] }
  0xb3   :  { %1862 = vmatpush.bf16.msrb.mxu0 %v3414_v10  ;;  %v1621_v49 = vpop.f32.mrf.mxu1  ;;  %v4334_v4 = vld [vmem:[%s6680_s1 + $0x714] sm:$0xf0]  ;;  %v3079_v10 = vld [vmem:[%s6680_s1 + $0x1f8] sm:$0xf0]  ;;  %v3606_v15 = vor.u32 %v4302_v2, %v3605_v63  ;;  %v4224_v54 = vld [vmem:[%s6680_s1 + $0x3ac] sm:$0xf] }
  0xb4   :  { %1875 = vmatpush.bf16.msrb.mxu1 %v3542_v11  ;;  %v4200_v11 = vld [vmem:[%s6680_s1 + $0x2ec] sm:$0xf]  ;;  %v3734_v21 = vor.u32 %v4334_v4, %v3733_v3  ;;  %v1622_v23 = vadd.f32 %v1621_v49, %v1608_v43  ;;  %v3175_v53 = vld [vmem:[%s6680_s1 + $0x2b8] sm:$0xf0] }
  0xb5   :  { %1888 = vmatpush.bf16.msrb.mxu2 %v3670_v12  ;;  %v3207_v12 = vld [vmem:[%s6680_s1 + $0x2f8] sm:$0xf0]  ;;  %v4160_v49 = vld [vmem:[%s6680_s1 + $0x1ac] sm:$0xf] }
  0xb6   :  { %1901 = vmatpush.bf16.msrb.mxu3 %v3798_v16  ;;  %v4232_v16 = vld [vmem:[%s6680_s1 + $0x3ec] sm:$0xf]  ;;  %v3303_v55 = vld [vmem:[%s6680_s1 + $0x3b8] sm:$0xf0] }
  0xb7   :  { %1863 = vmatpush.bf16.msrb.mxu0 %v3398_v24  ;;  %v1634_v0 = vpop.f32.mrf.mxu2  ;;  %v3082_v24 = vor.u32 %v4168_v8, %v3079_v10  ;;  %v3338_v31 = vor.u32 %v4232_v16, %v3335_v19  ;;  %v4124_v61 = vld [vmem:[%s6680_s1 + $0x8c] sm:$0xf]  ;;  %v2903_v62 = vld [vmem:[%s6680_s1 + $0x98] sm:$0xf0] }
  0xb8   :  { %1876 = vmatpush.bf16.msrb.mxu1 %v3526_v27  ;;  %v5688_v5 = vpop.f32.mrf.mxu3  ;;  %v3210_v27 = vor.u32 %v4200_v11, %v3207_v12  ;;  %v4156_v63 = vld [vmem:[%s6680_s1 + $0x18c] sm:$0xf]  ;;  %v3159_v3 = vld [vmem:[%s6680_s1 + $0x298] sm:$0xf0]  ;;  %v2906_v6 = vor.u32 %v4124_v61, %v2903_v62 }
  0xb9   :  { %1889 = vmatpush.bf16.msrb.mxu2 %v3654_v28  ;;  %v4132_v28 = vld [vmem:[%s6680_s1 + $0xcc] sm:$0xf]  ;;  %v3015_v19 = vld [vmem:[%s6680_s1 + $0x178] sm:$0xf0] }
  0xba   :  { %1902 = vmatpush.bf16.msrb.mxu3 %v3782_v32  ;;  %v1610_v13 = vpop.f32.mrf.mxu0  ;;  %v3063_v32 = vld [vmem:[%s6680_s1 + $0x1d8] sm:$0xf0]  ;;  %v4188_v2 = vld [vmem:[%s6680_s1 + $0x28c] sm:$0xf] }
  0xbb   :  { %1864 = vmatpush.bf16.msrb.mxu0 %v3382_v41  ;;  %v1623_v20 = vpop.f32.mrf.mxu1  ;;  %v2938_v41 = vor.u32 %v4132_v28, %v2935_v29  ;;  %v4220_v4 = vld [vmem:[%s6680_s1 + $0x38c] sm:$0xf]  ;;  %v3162_v10 = vor.u32 %v4188_v2, %v3159_v3  ;;  %v2871_v34 = vld [vmem:[%s6680_s1 + $0x58] sm:$0xf0] }
  0xbc   :  { %1877 = vmatpush.bf16.msrb.mxu1 %v3510_v44  ;;  %v1635_v44 = vadd.f32 %v1634_v0, %v1622_v23  ;;  %v3306_v0 = vor.u32 %v4224_v54, %v3303_v55  ;;  %v4120_v13 = vld [vmem:[%s6680_s1 + $0x6c] sm:$0xf]  ;;  %v2855_v54 = vld [vmem:[%s6680_s1 + $0x38] sm:$0xf0] }
  0xbd   :  { %1890 = vmatpush.bf16.msrb.mxu2 %v3638_v45  ;;  %v3066_v45 = vor.u32 %v4164_v30, %v3063_v32  ;;  %v4184_v20 = vld [vmem:[%s6680_s1 + $0x26c] sm:$0xf]  ;;  %v3111_v61 = vld [vmem:[%s6680_s1 + $0x238] sm:$0xf0] }
  0xbe   :  { %1903 = vmatpush.bf16.msrb.mxu3 %v3766_v50  ;;  %v3322_v50 = vor.u32 %v4228_v36, %v3319_v39  ;;  %v1648_v58 = vadd.f32 %v5688_v5, %v1635_v44  ;;  %v3287_v5 = vld [vmem:[%s6680_s1 + $0x398] sm:$0xf0]  ;;  %v4216_v23 = vld [vmem:[%s6680_s1 + $0x36c] sm:$0xf] }
  0xbf   :  { %1865 = vmatpush.bf16.msrb.mxu0 %v3366_v56  ;;  %v1636_v40 = vpop.f32.mrf.mxu2  ;;  %v4443_v56 = vmov 2.0   ;;  %v3290_v16 = vor.u32 %v4220_v4, %v3287_v5  ;;  %v4116_v32 = vld [vmem:[%s6680_s1 + $0x4c] sm:$0xf]  ;;  %v3127_v44 = vld [vmem:[%s6680_s1 + $0x258] sm:$0xf0] }
  0xc0   :  { %1878 = vmatpush.bf16.msrb.mxu1 %v3494_v59  ;;  %v1649_v43 = vpop.f32.mrf.mxu3  ;;  %4429 = vrcp.f32 %v4443_v56  ;;  %v3050_v59 = vor.u32 %v4160_v49, %v3047_v51  ;;  %v4148_v35 = vld [vmem:[%s6680_s1 + $0x14c] sm:$0xf]  ;;  %v2874_v49 = vor.u32 %v4116_v32, %v2871_v34  ;;  %v2983_v56 = vld [vmem:[%s6680_s1 + $0x138] sm:$0xf0] }
  0xc1   :  { %1891 = vmatpush.bf16.msrb.mxu2 %v3622_v60  ;;  %v3178_v60 = vor.u32 %v4192_v52, %v3175_v53  ;;  %v4180_v43 = vld [vmem:[%s6680_s1 + $0x24c] sm:$0xf]  ;;  %v2839_v4 = vld [vmem:[%s6680_s1 + $0x18] sm:$0xf0] }
  0xc2   :  { %1904 = vmatpush.bf16.msrb.mxu3 %v3750_v1  ;;  %v3031_v1 = vld [vmem:[%s6680_s1 + $0x198] sm:$0xf0]  ;;  %v3130_v53 = vor.u32 %v4180_v43, %v3127_v44  ;;  %v4144_v55 = vld [vmem:[%s6680_s1 + $0x12c] sm:$0xf] }
  0xc3   :  { %1866 = vmatpush.bf16.msrb.mxu0 %v3350_v9  ;;  %v1660_v7 = vpop.f32.mrf.mxu0  ;;  %v3034_v9 = vor.u32 %v4156_v63, %v3031_v1  ;;  %v4208_v63 = vld [vmem:[%s6680_s1 + $0x32c] sm:$0xf] }
  0xc4   :  { %1879 = vmatpush.bf16.msrb.mxu1 %v3478_v14  ;;  %v1661_v11 = vadd.f32 %v1660_v7, %v1648_v58  ;;  %v2887_v14 = vld [vmem:[%s6680_s1 + $0x78] sm:$0xf0]  ;;  %v4108_v3 = vld [vmem:[%s6680_s1 + $0xc] sm:$0xf]  ;;  %v2986_v7 = vor.u32 %v4144_v55, %v2983_v56 }
  0xc5   :  { %1892 = vmatpush.bf16.msrb.mxu2 %v3606_v15  ;;  %v4152_v15 = vld [vmem:[%s6680_s1 + $0x16c] sm:$0xf]  ;;  %v3831_v55 = vld [vmem:[%s6680_s1 + $0x7d8] sm:$0xf0] }
  0xc6   :  { %1905 = vmatpush.bf16.msrb.mxu3 %v3734_v21  ;;  %1867 = vmatmul.bf16.vlgmr.msrb.gmra.mxu0 %v4940_v37  ;;  %v5791_v8 = vpop.eup %4429  ;;  %v3143_v21 = vld [vmem:[%s6680_s1 + $0x278] sm:$0xf0]  ;;  %v3018_v29 = vor.u32 %v4152_v15, %v3015_v19  ;;  %v4140_v5 = vld [vmem:[%s6680_s1 + $0x10c] sm:$0xf] }
  0xc7   :  { %1911 = vmatpush.bf16.msra.mxu0 %v2954_v22  ;;  %1880 = vmatmul.bf16.vlgmr.msrb.gmra.mxu1 %v4950_v42  ;;  %v1673_v12 = vpop.f32.mrf.mxu1  ;;  %v2047_v28 = vmul.f32 2.0, %v5791_v8  ;;  %v3146_v30 = vor.u32 %v4184_v20, %v3143_v21  ;;  %v4204_v15 = vld [vmem:[%s6680_s1 + $0x30c] sm:$0xf]  ;;  %vm2051_vm1 = vweird.f32 %v5791_v8 }
  0xc8   :  { %1924 = vmatpush.bf16.msra.mxu1 %v3082_v24  ;;  %1893 = vmatmul.bf16.vlgmr.msrb.gmra.mxu2 %v4929_v33  ;;  %v1674_v22 = vadd.f32 %v1673_v12, %v1661_v11  ;;  %v3271_v24 = vld [vmem:[%s6680_s1 + $0x378] sm:$0xf0]  ;;  %v4172_v11 = vld [vmem:[%s6680_s1 + $0x20c] sm:$0xf] }
  0xc9   :  { %1937 = vmatpush.bf16.msra.mxu2 %v3210_v27  ;;  %1906 = vmatmul.bf16.vlgmr.msrb.gmra.mxu3 %v4942_v38  ;;  %v2890_v27 = vor.u32 %v4120_v13, %v2887_v14  ;;  %v3274_v36 = vor.u32 %v4216_v23, %v3271_v24  ;;  %v2048_v48 = vsub.f32 1.0, %v2047_v28  ;;  %v3095_v12 = vld [vmem:[%s6680_s1 + $0x218] sm:$0xf0]  ;;  %v4264_v19 = vld [vmem:[%s6680_s1 + $0x4ec] sm:$0xf] }
  0xca   :  { %1950 = vmatpush.bf16.msra.mxu3 %v3338_v31  ;;  %v4296_v23 = vld [vmem:[%s6680_s1 + $0x5ec] sm:$0xf]  ;;  %v3591_v28 = vld [vmem:[%s6680_s1 + $0x5f8] sm:$0xf0]  ;;  %v3098_v34 = vor.u32 %v4172_v11, %v3095_v12 }
  0xcb   :  { %1912 = vmatpush.bf16.msra.mxu0 %v2938_v41  ;;  %v1686_v31 = vpop.f32.mrf.mxu2  ;;  %v2999_v41 = vld [vmem:[%s6680_s1 + $0x158] sm:$0xf0]  ;;  %v1662_v51 = vpop.f32.mrf.mxu0  ;;  %v2049_v1 = vmul.f32 %v5791_v8, %v2048_v48  ;;  %v3594_v44 = vor.u32 %v4296_v23, %v3591_v28  ;;  %v4292_v48 = vld [vmem:[%s6680_s1 + $0x5cc] sm:$0xf] }
  0xcc   :  { %1925 = vmatpush.bf16.msra.mxu1 %v3066_v45  ;;  %v1687_v39 = vadd.f32 %v1686_v31, %v1674_v22  ;;  %v1699_v40 = vpop.f32.mrf.mxu3  ;;  %v4212_v45 = vld [vmem:[%s6680_s1 + $0x34c] sm:$0xf]  ;;  %v3002_v52 = vor.u32 %v4148_v35, %v2999_v41  ;;  %v3463_v22 = vld [vmem:[%s6680_s1 + $0x4f8] sm:$0xf0] }
  0xcd   :  { %1938 = vmatpush.bf16.msra.mxu2 %v3194_v46  ;;  %v3255_v46 = vld [vmem:[%s6680_s1 + $0x358] sm:$0xf0]  ;;  %v2050_v24 = vadd.f32 %v5791_v8, %v2049_v1  ;;  %v4360_v35 = vld [vmem:[%s6680_s1 + $0x7ec] sm:$0xf] }
  0xce   :  { %1951 = vmatpush.bf16.msra.mxu3 %v3322_v50  ;;  %v5842_v47 = vadd.f32 %v1699_v40, %v1687_v39  ;;  %v4112_v50 = vld [vmem:[%s6680_s1 + $0x2c] sm:$0xf]  ;;  %v3466_v40 = vor.u32 %v4264_v19, %v3463_v22  ;;  %v3575_v51 = vld [vmem:[%s6680_s1 + $0x5d8] sm:$0xf0] }
  0xcf   :  { %1913 = vmatpush.bf16.msra.mxu0 %v2922_v57  ;;  %v1675_v57 = vpop.f32.mrf.mxu1  ;;  %v2858_v2 = vor.u32 %v4112_v50, %v2855_v54  ;;  %v4260_v41 = vld [vmem:[%s6680_s1 + $0x4cc] sm:$0xf]  ;;  %v3671_v12 = vld [vmem:[%s6680_s1 + $0x698] sm:$0xf0] }
  0xd0   :  { %1926 = vmatpush.bf16.msra.mxu1 %v3050_v59  ;;  %v2018_v58 = vsel %vm2017_vm0, %v5842_v47, 0.0  ;;  %v3258_v59 = vor.u32 %v4212_v45, %v3255_v46  ;;  %v3447_v46 = vld [vmem:[%s6680_s1 + $0x4d8] sm:$0xf0]  ;;  %v4320_v1 = vld [vmem:[%s6680_s1 + $0x6ac] sm:$0xf] }
  0xd1   :  { %1939 = vmatpush.bf16.msra.mxu2 %v3178_v60  ;;  %v4176_v60 = vld [vmem:[%s6680_s1 + $0x22c] sm:$0xf]  ;;  %v2019_v62 = vrot.slane %v2018_v58, 4  ;;  %v3450_v56 = vor.u32 %v4260_v41, %v3447_v46 }
  0xd2   :  { %1952 = vmatpush.bf16.msra.mxu3 %v3306_v0  ;;  %v3239_v0 = vld [vmem:[%s6680_s1 + $0x338] sm:$0xf0]  ;;  %v4316_v11 = vld [vmem:[%s6680_s1 + $0x68c] sm:$0xf] }
  0xd3   :  { %1914 = vmatpush.bf16.msra.mxu0 %v2906_v6  ;;  %v2020_v6 = vadd.f32 %v2019_v62, %v2018_v58  ;;  %v1688_v13 = vpop.f32.mrf.mxu2  ;;  %v3242_v14 = vor.u32 %v4208_v63, %v3239_v0  ;;  %v3578_v58 = vor.u32 %v4292_v48, %v3575_v51  ;;  %v4288_v62 = vld [vmem:[%s6680_s1 + $0x5ac] sm:$0xf]  ;;  %v3559_v0 = vld [vmem:[%s6680_s1 + $0x5b8] sm:$0xf0]  ;;  %v3674_v22 = vor.u32 %v4316_v11, %v3671_v12 }
  0xd4   :  { %1927 = vmatpush.bf16.msra.mxu1 %v3034_v9  ;;  %v3114_v9 = vor.u32 %v4176_v60, %v3111_v61  ;;  %v1701_v20 = vpop.f32.mrf.mxu3  ;;  %v4256_v60 = vld [vmem:[%s6680_s1 + $0x4ac] sm:$0xf]  ;;  %v3431_v61 = vld [vmem:[%s6680_s1 + $0x4b8] sm:$0xf0] }
  0xd5   :  { %1940 = vmatpush.bf16.msra.mxu2 %v3162_v10  ;;  %v2967_v10 = vld [vmem:[%s6680_s1 + $0x118] sm:$0xf0]  ;;  %v2021_v21 = vrot.slane %v2020_v6, 2  ;;  %v4248_v23 = vld [vmem:[%s6680_s1 + $0x46c] sm:$0xf] }
  0xd6   :  { %1953 = vmatpush.bf16.msra.mxu3 %v3290_v16  ;;  %v3223_v16 = vld [vmem:[%s6680_s1 + $0x318] sm:$0xf0]  ;;  %v2970_v32 = vor.u32 %v4140_v5, %v2967_v10  ;;  %v3434_v5 = vor.u32 %v4256_v60, %v3431_v61  ;;  %v4276_v46 = vld [vmem:[%s6680_s1 + $0x54c] sm:$0xf] }
  0xd7   :  { %1915 = vmatpush.bf16.msra.mxu0 %v2890_v27  ;;  %v2842_v27 = vor.u32 %v4108_v3, %v2839_v4  ;;  %v2022_v31 = vadd.f32 %v2021_v21, %v2020_v6  ;;  %v3226_v39 = vor.u32 %v4204_v15, %v3223_v16  ;;  %v4352_v4 = vld [vmem:[%s6680_s1 + $0x7ac] sm:$0xf]  ;;  %v3562_v6 = vor.u32 %v4288_v62, %v3559_v0  ;;  %v3543_v10 = vld [vmem:[%s6680_s1 + $0x598] sm:$0xf0] }
  0xd8   :  { %1928 = vmatpush.bf16.msra.mxu1 %v3018_v29  ;;  %v4328_v29 = vld [vmem:[%s6680_s1 + $0x6ec] sm:$0xf]  ;;  %v3799_v15 = vld [vmem:[%s6680_s1 + $0x798] sm:$0xf0] }
  0xd9   :  { %1941 = vmatpush.bf16.msra.mxu2 %v3146_v30  ;;  %v3719_v30 = vld [vmem:[%s6680_s1 + $0x6f8] sm:$0xf0]  ;;  %v2023_v43 = vrot.slane %v2022_v31, 1  ;;  %v4240_v62 = vld [vmem:[%s6680_s1 + $0x42c] sm:$0xf] }
  0xda   :  { %1954 = vmatpush.bf16.msra.mxu3 %v3274_v36  ;;  %v3847_v36 = vld [vmem:[%s6680_s1 + $0x7f8] sm:$0xf0]  ;;  %v3722_v45 = vor.u32 %v4328_v29, %v3719_v30  ;;  %v4272_v0 = vld [vmem:[%s6680_s1 + $0x52c] sm:$0xf] }
  0xdb   :  { %1916 = vmatpush.bf16.msra.mxu0 %v2874_v49  ;;  %v5933_v49 = vsel %vm2051_vm1, %v5791_v8, %v2050_v24  ;;  %v3850_v50 = vor.u32 %v4360_v35, %v3847_v36  ;;  %v2024_v54 = vadd.f32 %v2023_v43, %v2022_v31  ;;  %v4356_v8 = vld [vmem:[%s6680_s1 + $0x7cc] sm:$0xf]  ;;  %v3399_v24 = vld [vmem:[%s6680_s1 + $0x478] sm:$0xf0] }
  0xdc   :  { %1929 = vmatpush.bf16.msra.mxu1 %v3002_v52  ;;  %v4324_v52 = vld [vmem:[%s6680_s1 + $0x6cc] sm:$0xf]  ;;  %v3834_v63 = vor.u32 %v4356_v8, %v3831_v55  ;;  %v3527_v31 = vld [vmem:[%s6680_s1 + $0x578] sm:$0xf0] }
  0xdd   :  { %1942 = vmatpush.bf16.msra.mxu2 %v3130_v53  ;;  %v3703_v53 = vld [vmem:[%s6680_s1 + $0x6d8] sm:$0xf0]  ;;  %v2053_v57 = vmul.f32 %v5933_v49, %v2024_v54  ;;  %v4344_v35 = vld [vmem:[%s6680_s1 + $0x76c] sm:$0xf] }
  0xde   :  { %1955 = vmatpush.bf16.msra.mxu3 %v3258_v59  ;;  %v3706_v59 = vor.u32 %v4324_v52, %v3703_v53  ;;  %v3783_v36 = vld [vmem:[%s6680_s1 + $0x778] sm:$0xf0]  ;;  %v4308_v53 = vld [vmem:[%s6680_s1 + $0x64c] sm:$0xf] }
  0xdf   :  { %1917 = vmatpush.bf16.msra.mxu0 %v2858_v2  ;;  %v3687_v2 = vld [vmem:[%s6680_s1 + $0x6b8] sm:$0xf0]  ;;  %v5971_v3 = vsub.f32 %v5842_v47, %v2053_v57  ;;  %v3786_v51 = vor.u32 %v4344_v35, %v3783_v36  ;;  %v4340_v55 = vld [vmem:[%s6680_s1 + $0x74c] sm:$0xf] }
  0xe0   :  { %1930 = vmatpush.bf16.msra.mxu1 %v2986_v7  ;;  %v3690_v7 = vor.u32 %v4320_v1, %v3687_v2  ;;  %v3511_v52 = vld [vmem:[%s6680_s1 + $0x558] sm:$0xf0]  ;;  %v4268_v12 = vld [vmem:[%s6680_s1 + $0x50c] sm:$0xf] }
  0xe1   :  { %1943 = vmatpush.bf16.msra.mxu2 %v3114_v9  ;;  %v2061_v47 = vmul.f32 %v5971_v3, %v5971_v3  ;;  %v4252_v9 = vld [vmem:[%s6680_s1 + $0x48c] sm:$0xf]  ;;  %v3639_v54 = vld [vmem:[%s6680_s1 + $0x658] sm:$0xf0]  ;;  %v3514_v60 = vor.u32 %v4276_v46, %v3511_v52  ;;  %v4372_v52 = vld [vmem:[%s6682_s4 + $0x44] sm:$0xf0] }
  0xe2   :  { %1956 = vmatpush.bf16.msra.mxu3 %v3242_v14  ;;  %v4348_v14 = vld [vmem:[%s6680_s1 + $0x78c] sm:$0xf]  ;;  %v3642_v61 = vor.u32 %v4308_v53, %v3639_v54  ;;  %v4394_v54 = vld [vmem:[%s6682_s4 + $0xf4] sm:$0xf0] }
  0xe3   :  { %1918 = vmatpush.bf16.msra.mxu0 %v2842_v27  ;;  %v2065_v13 = vsel %vm2017_vm0, %v2061_v47, 0.0  ;;  %v6009_v20 = vpop.f32.mrf.mxu0  ;;  %v4280_v27 = vld [vmem:[%s6680_s1 + $0x56c] sm:$0xf]  ;;  %v3802_v30 = vor.u32 %v4348_v14, %v3799_v15  ;;  %v3623_v47 = vld [vmem:[%s6680_s1 + $0x638] sm:$0xf0] }
  0xe4   :  { %1931 = vmatpush.bf16.msra.mxu1 %v2970_v32  ;;  %v2066_v16 = vrot.slane %v2065_v13, 4  ;;  %v6020_v28 = vpop.f32.mrf.mxu1  ;;  %v4312_v32 = vld [vmem:[%s6680_s1 + $0x66c] sm:$0xf]  ;;  %v3530_v41 = vor.u32 %v4280_v27, %v3527_v31  ;;  %v3909_v27 = vld [vmem:[%s6682_s4 + $0x70] sm:$0xf] }
  0xe5   :  { %1944 = vmatpush.bf16.msra.mxu2 %v3098_v34  ;;  %v3655_v34 = vld [vmem:[%s6680_s1 + $0x678] sm:$0xf0]  ;;  %v4300_v14 = vld [vmem:[%s6680_s1 + $0x60c] sm:$0xf]  ;;  %v1726_v36 = vadd.f32 %v6020_v28, %v6009_v20  ;;  %v3893_v20 = vld [vmem:[%s6682_s4 + $0x50] sm:$0xf] }
  0xe6   :  { %1957 = vmatpush.bf16.msra.mxu3 %v3226_v39  ;;  %1919 = vmatmul.bf16.vlgmr.msra.gmra.mxu0 %v4787_v18  ;;  %v3415_v18 = vld [vmem:[%s6680_s1 + $0x498] sm:$0xf0]  ;;  %v2067_v29 = vadd.f32 %v2066_v16, %v2065_v13  ;;  %v3658_v43 = vor.u32 %v4312_v32, %v3655_v34  ;;  %v4374_v28 = vld [vmem:[%s6682_s4 + $0x54] sm:$0xf0] }
  0xe7   :  { %1963 = vmatpush.bf16.msrb.mxu0 %v3466_v40  ;;  %1932 = vmatmul.bf16.vlgmr.msra.gmra.mxu1 %v4800_v26  ;;  %v3418_v19 = vor.u32 %v4252_v9, %v3415_v18  ;;  %v3402_v40 = vor.u32 %v4248_v23, %v3399_v24  ;;  %v3479_v13 = vld [vmem:[%s6680_s1 + $0x518] sm:$0xf0] }
  0xe8   :  { %1976 = vmatpush.bf16.msrb.mxu1 %v3594_v44  ;;  %1945 = vmatmul.bf16.vlgmr.msra.gmra.mxu2 %v4785_v17  ;;  %v3815_v17 = vld [vmem:[%s6680_s1 + $0x7b8] sm:$0xf0]  ;;  %v2068_v39 = vrot.slane %v2067_v29, 2  ;;  %v4244_v44 = vld [vmem:[%s6680_s1 + $0x44c] sm:$0xf]  ;;  %v3482_v31 = vor.u32 %v4268_v12, %v3479_v13 }
  0xe9   :  { %1989 = vmatpush.bf16.msrb.mxu2 %v3722_v45  ;;  %1958 = vmatmul.bf16.vlgmr.msra.gmra.mxu3 %v4798_v25  ;;  %v4284_v25 = vld [vmem:[%s6680_s1 + $0x58c] sm:$0xf]  ;;  %v3818_v26 = vor.u32 %v4352_v4, %v3815_v17  ;;  %v3383_v45 = vld [vmem:[%s6680_s1 + $0x458] sm:$0xf0]  ;;  %v3861_v13 = vld [vmem:[%s6682_s4 + $0x10] sm:$0xf] }
  0xea   :  { %2002 = vmatpush.bf16.msrb.mxu3 %v3850_v50  ;;  %v3546_v21 = vor.u32 %v4284_v25, %v3543_v10  ;;  %v2069_v50 = vadd.f32 %v2068_v39, %v2067_v29  ;;  %v3495_v17 = vld [vmem:[%s6680_s1 + $0x538] sm:$0xf0]  ;;  %v4236_v25 = vld [vmem:[%s6680_s1 + $0x40c] sm:$0xf]  ;;  %v4378_v29 = vld [vmem:[%s6682_s4 + $0x74] sm:$0xf0] }
  0xeb   :  { %1964 = vmatpush.bf16.msrb.mxu0 %v3450_v56  ;;  %v6046_v48 = vpop.f32.mrf.mxu2  ;;  %v3767_v56 = vld [vmem:[%s6680_s1 + $0x758] sm:$0xf0]  ;;  %v3498_v10 = vor.u32 %v4272_v0, %v3495_v17  ;;  %v3910_v35 = vor.u32 %v4378_v29, %v3909_v27  ;;  %v3901_v39 = vld [vmem:[%s6682_s4 + $0x60] sm:$0xf]  ;;  %v4388_v27 = vld [vmem:[%s6682_s4 + $0xc4] sm:$0xf0] }
  0xec   :  { %1977 = vmatpush.bf16.msrb.mxu1 %v3578_v58  ;;  %v6057_v8 = vpop.f32.mrf.mxu3  ;;  %v2070_v57 = vrot.slane %v2069_v50, 1  ;;  %v3386_v58 = vor.u32 %v4244_v44, %v3383_v45  ;;  %v1727_v1 = vpop.f32.mrf.mxu1  ;;  %v3770_v4 = vor.u32 %v4340_v55, %v3767_v56  ;;  %v3735_v24 = vld [vmem:[%s6680_s1 + $0x718] sm:$0xf0]  ;;  %v1739_v45 = vadd.f32 %v6046_v48, %v1726_v36  ;;  %v3965_v0 = vld [vmem:[%s6682_s4 + $0xe0] sm:$0xf] }
  0xed   :  { %1990 = vmatpush.bf16.msrb.mxu2 %v3706_v59  ;;  %v1714_v59 = vpop.f32.mrf.mxu0  ;;  %v4392_v1 = vld [vmem:[%s6682_s4 + $0xe4] sm:$0xf0]  ;;  %v4377_v36 = vld [vmem:[%s6682_s4 + $0x74] sm:$0xf] }
  0xee   :  { %2003 = vmatpush.bf16.msrb.mxu3 %v3834_v63  ;;  %v3367_v63 = vld [vmem:[%s6680_s1 + $0x438] sm:$0xf0]  ;;  %v2071_v2 = vadd.f32 %v2070_v57, %v2069_v50  ;;  %v3894_v50 = vor.u32 %v4374_v28, %v3893_v20  ;;  %v3877_v57 = vld [vmem:[%s6682_s4 + $0x30] sm:$0xf] }
  0xef   :  { %1965 = vmatpush.bf16.msrb.mxu0 %v3434_v5  ;;  %v4304_v5 = vld [vmem:[%s6680_s1 + $0x62c] sm:$0xf]  ;;  %v3370_v18 = vor.u32 %v4240_v62, %v3367_v63 }
  0xf0   :  { %1978 = vmatpush.bf16.msrb.mxu1 %v3562_v6  ;;  %v4336_v6 = vld [vmem:[%s6680_s1 + $0x72c] sm:$0xf]  ;;  %v2093_v9 = vmul.f32 %v2071_v2, %v5933_v49  ;;  %v3626_v11 = vor.u32 %v4304_v5, %v3623_v47  ;;  %v3869_v5 = vld [vmem:[%s6682_s4 + $0x20] sm:$0xf]  ;;  %v4368_v47 = vld [vmem:[%s6682_s4 + $0x24] sm:$0xf0] }
  0xf1   :  { %1991 = vmatpush.bf16.msrb.mxu2 %v3690_v7  ;;  %v3751_v7 = vld [vmem:[%s6680_s1 + $0x738] sm:$0xf0] }
  0xf2   :  { %2004 = vmatpush.bf16.msrb.mxu3 %v3818_v26  ;;  %v3351_v26 = vld [vmem:[%s6680_s1 + $0x418] sm:$0xf0]  ;;  %v2097_v16 = vadd.f32 1e-05, %v2093_v9 }
  0xf3   :  { %1966 = vmatpush.bf16.msrb.mxu0 %v3418_v19  ;;  %v1740_v15 = vpop.f32.mrf.mxu2  ;;  %v3754_v19 = vor.u32 %v4336_v6, %v3751_v7  ;;  %v3966_v6 = vor.u32 %v4392_v1, %v3965_v0  ;;  %v3887_v0 = vld [vmem:[%s6682_s4 + $0x48] sm:$0xf0] }
  0xf4   :  { %1979 = vmatpush.bf16.msrb.mxu1 %v3546_v21  ;;  %v3607_v21 = vld [vmem:[%s6680_s1 + $0x618] sm:$0xf0]  ;;  %v1753_v23 = vpop.f32.mrf.mxu3  ;;  %4431 = vrsqrt.f32 %v2097_v16  ;;  %vm2107_vm3 = vweird.f32 %v2097_v16 }
  0xf5   :  { %1992 = vmatpush.bf16.msrb.mxu2 %v3674_v22  ;;  %v4332_v22 = vld [vmem:[%s6680_s1 + $0x70c] sm:$0xf]  ;;  %v3610_v32 = vor.u32 %v4300_v14, %v3607_v21  ;;  %v4366_v14 = vld [vmem:[%s6682_s4 + $0x14] sm:$0xf0] }
  0xf6   :  { %2005 = vmatpush.bf16.msrb.mxu3 %v3802_v30  ;;  %v3354_v30 = vor.u32 %v4236_v25, %v3351_v26  ;;  %v3738_v34 = vor.u32 %v4332_v22, %v3735_v24  ;;  %v3870_v25 = vor.u32 %v4368_v47, %v3869_v5  ;;  %v3862_v23 = vor.u32 %v4366_v14, %v3861_v13  ;;  %v3949_v24 = vld [vmem:[%s6682_s4 + $0xc0] sm:$0xf]  ;;  %v4391_v14 = vld [vmem:[%s6682_s4 + $0xe4] sm:$0xf] }
  0xf7   :  { %1967 = vmatpush.bf16.msrb.mxu0 %v3402_v40  ;;  %v4376_v40 = vld [vmem:[%s6682_s4 + $0x64] sm:$0xf0] }
  0xf8   :  { %1980 = vmatpush.bf16.msrb.mxu1 %v3530_v41 }
  0xf9   :  { %1993 = vmatpush.bf16.msrb.mxu2 %v3658_v43  ;;  %v3902_v43 = vor.u32 %v4376_v40, %v3901_v39  ;;  %v3911_v39 = vld [vmem:[%s6682_s4 + $0x78] sm:$0xf0] }
  0xfa   :  { %2006 = vmatpush.bf16.msrb.mxu3 %v3786_v51  ;;  %v4432_v41 = vpop.eup %4431  ;;  %v3885_v51 = vld [vmem:[%s6682_s4 + $0x40] sm:$0xf]  ;;  %v3914_v28 = vor.u32 %v4377_v36, %v3911_v39 }
  0xfb   :  { %1968 = vmatpush.bf16.msrb.mxu0 %v3386_v58  ;;  %v2102_v44 = vmul.f32 %v4432_v41, %v2097_v16  ;;  %vm2108_vm2 = vweird.f32 %v4432_v41  ;;  %v4370_v58 = vld [vmem:[%s6682_s4 + $0x34] sm:$0xf0] }
  0xfc   :  { %1981 = vmatpush.bf16.msrb.mxu1 %v3514_v60  ;;  %v6161_v60 = vld [vmem:[%s6683_s2] sm:$0xf]  ;;  %vm2109_vm4 = vmor %vm2107_vm3, %vm2108_vm2  ;;  %v3878_v63 = vor.u32 %v4370_v58, %v3877_v57  ;;  %v3925_v57 = vld [vmem:[%s6682_s4 + $0x90] sm:$0xf] }
  0xfd   :  { %1994 = vmatpush.bf16.msrb.mxu2 %v3642_v61  ;;  %v2103_v46 = vmul.f32 %v4432_v41, %v2102_v44  ;;  %v3941_v44 = vld [vmem:[%s6682_s4 + $0xb0] sm:$0xf]  ;;  %v4382_v58 = vld [vmem:[%s6682_s4 + $0x94] sm:$0xf0] }
  0xfe   :  { %2007 = vmatpush.bf16.msrb.mxu3 %v3770_v4  ;;  %v2146_v4 = vperm.slane %v6161_v60, 0 }
  0xff   :  { %1969 = vmatpush.bf16.msrb.mxu0 %v3370_v18  ;;  %v2104_v48 = vmul.f32 0.5, %v2103_v46  ;;  %v6180_v18 = vld [vmem:[%s6684_s3] sm:$0xf] }
 0x100   :  { %1982 = vmatpush.bf16.msrb.mxu1 %v3498_v10  ;;  %v3957_v10 = vld [vmem:[%s6682_s4 + $0xd0] sm:$0xf]  ;;  %v2159_v15 = vperm.slane %v6180_v18, 0 }
 0x101   :  { %1995 = vmatpush.bf16.msrb.mxu2 %v3626_v11  ;;  %v2105_v53 = vsub.f32 1.5, %v2104_v48  ;;  %v4390_v11 = vld [vmem:[%s6682_s4 + $0xd4] sm:$0xf0]  ;;  %v4375_v48 = vld [vmem:[%s6682_s4 + $0x64] sm:$0xf] }
 0x102   :  { %2008 = vmatpush.bf16.msrb.mxu3 %v3754_v19  ;;  %v3958_v19 = vor.u32 %v4390_v11, %v3957_v10 }
 0x103   :  { %1970 = vmatpush.bf16.msrb.mxu0 %v3354_v30  ;;  %v3853_v30 = vld [vmem:[%s6682_s4] sm:$0xf] }
 0x104   :  { %1983 = vmatpush.bf16.msrb.mxu1 %v3482_v31  ;;  %v1777_v56 = vpop.f32.mrf.mxu1  ;;  %v4364_v31 = vld [vmem:[%s6682_s4 + $0x4] sm:$0xf0] }
 0x105   :  { %1996 = vmatpush.bf16.msrb.mxu2 %v3610_v32 }
 0x106   :  { %2009 = vmatpush.bf16.msrb.mxu3 %v3738_v34  ;;  %1971 = vmatmul.bf16.vlgmr.msrb.gmra.mxu0 %v4940_v37  ;;  %v1752_v37 = vadd.f32 %v6057_v8, %v1739_v45  ;;  %v2106_v8 = vmul.f32 %v4432_v41, %v2105_v53  ;;  %v4386_v45 = vld [vmem:[%s6682_s4 + $0xb4] sm:$0xf0]  ;;  %v4384_v53 = vld [vmem:[%s6682_s4 + $0xa4] sm:$0xf0] }
 0x107   :  { %2563 = vmatpush.bf16.msra.mxu0 %v3910_v35  ;;  %1984 = vmatmul.bf16.vlgmr.msrb.gmra.mxu1 %v4950_v42  ;;  %v1764_v42 = vpop.f32.mrf.mxu0  ;;  %v3950_v35 = vor.u32 %v4388_v27, %v3949_v24 }
 0x108   :  { %1997 = vmatmul.bf16.vlgmr.msrb.gmra.mxu2 %v4929_v33  ;;  %v3886_v33 = vor.u32 %v4372_v52, %v3885_v51  ;;  %v1765_v55 = vadd.f32 %v1764_v42, %v1752_v37  ;;  %v2110_v61 = vsel %vm2109_vm4, %v4432_v41, %v2106_v8  ;;  %v3903_v37 = vld [vmem:[%s6682_s4 + $0x68] sm:$0xf0]  ;;  %v3933_v52 = vld [vmem:[%s6682_s4 + $0xa0] sm:$0xf]  ;;  %v4373_v8 = vld [vmem:[%s6682_s4 + $0x54] sm:$0xf] }
 0x109   :  { %2010 = vmatmul.bf16.vlgmr.msrb.gmra.mxu3 %v4942_v38  ;;  %v3973_v38 = vld [vmem:[%s6682_s4 + $0xf0] sm:$0xf]  ;;  %v2141_v2 = vmul.f32 %v2110_v61, %v5971_v3  ;;  %vm2821_vm4 = vcmask 66560  }
 0x10a   :  { %v3974_v59 = vor.u32 %v4394_v54, %v3973_v38  ;;  %v1778_v62 = vadd.f32 %v1777_v56, %v1765_v55  ;;  %v3906_v38 = vor.u32 %v4375_v48, %v3903_v37  ;;  %v3934_v54 = vor.u32 %v4384_v53, %v3933_v52  ;;  %v3895_v55 = vld [vmem:[%s6682_s4 + $0x58] sm:$0xf0]  ;;  %v4385_v53 = vld [vmem:[%s6682_s4 + $0xb4] sm:$0xf] }
 0x10b   :  { %2564 = vmatpush.bf16.msra.mxu0 %v3902_v43  ;;  %v1790_v17 = vpop.f32.mrf.mxu2  ;;  %v2154_v12 = vmul.f32 %v2146_v4, %v2141_v2  ;;  %v3854_v43 = vor.u32 %v4364_v31, %v3853_v30  ;;  %v3898_v61 = vor.u32 %v4373_v8, %v3895_v55  ;;  %v3917_v2 = vld [vmem:[%s6682_s4 + $0x80] sm:$0xf]  ;;  %v4380_v4 = vld [vmem:[%s6682_s4 + $0x84] sm:$0xf0]  ;;  %v4389_v30 = vld [vmem:[%s6682_s4 + $0xd4] sm:$0xf] }
 0x10c   :  { %2576 = vmatpush.bf16.msra.mxu1 %v3974_v59  ;;  %v1791_v7 = vadd.f32 %v1790_v17, %v1778_v62  ;;  %v1803_v9 = vpop.f32.mrf.mxu3  ;;  %v1779_v16 = vpop.f32.mrf.mxu1  ;;  %v3926_v62 = vor.u32 %v4382_v58, %v3925_v57  ;;  %v3918_v47 = vor.u32 %v4380_v4, %v3917_v2  ;;  %v3959_v31 = vld [vmem:[%s6682_s4 + $0xd8] sm:$0xf0]  ;;  %v4383_v8 = vld [vmem:[%s6682_s4 + $0xa4] sm:$0xf]  ;;  %v3935_v55 = vld [vmem:[%s6682_s4 + $0xa8] sm:$0xf0] }
 0x10d   :  { %v2167_v32 = vadd.f32 %v2159_v15, %v2154_v12  ;;  %v3967_v15 = vld [vmem:[%s6682_s4 + $0xe8] sm:$0xf0]  ;;  %v3962_v39 = vor.u32 %v4389_v30, %v3959_v31  ;;  %v4406_v30 = vld [vmem:[%s6682_s4 + $0x154] sm:$0xf0] }
 0x10e   :  { %v1804_v3 = vadd.f32 %v1803_v9, %v1791_v7  ;;  %v3975_v7 = vld [vmem:[%s6682_s4 + $0xf8] sm:$0xf0] }
 0x10f   :  { %2565 = vmatpush.bf16.msra.mxu0 %v3894_v50  ;;  %v1766_v26 = vpop.f32.mrf.mxu0  ;;  %v2171_v46 = vmax.f32 %v2167_v32, 0.0  ;;  %v3942_v50 = vor.u32 %v4386_v45, %v3941_v44  ;;  %v4387_v44 = vld [vmem:[%s6682_s4 + $0xc4] sm:$0xf]  ;;  %v3951_v45 = vld [vmem:[%s6682_s4 + $0xc8] sm:$0xf0] }
 0x110   :  { %2577 = vmatpush.bf16.msra.mxu1 %v3966_v6  ;;  %v2025_v21 = vsel %vm2017_vm0, %v1804_v3, 0.0  ;;  %v4393_v6 = vld [vmem:[%s6682_s4 + $0xf4] sm:$0xf] }
 0x111   :  { %v2026_v22 = vrot.slane %v2025_v21, 4  ;;  %v6232_v42 = vpack.c.bf16 %v2171_v46, %v2171_v46  ;;  %v3978_v10 = vor.u32 %v4393_v6, %v3975_v7  ;;  %v3855_v46 = vld [vmem:[%s6682_s4 + $0x8] sm:$0xf0]  ;;  %v4410_v6 = vld [vmem:[%s6682_s4 + $0x174] sm:$0xf0] }
 0x113   :  { %2566 = vmatpush.bf16.msra.mxu0 %v3886_v33  ;;  %v2027_v29 = vadd.f32 %v2026_v22, %v2025_v21  ;;  %v1792_v34 = vpop.f32.mrf.mxu2  ;;  %v3871_v21 = vld [vmem:[%s6682_s4 + $0x28] sm:$0xf0]  ;;  %v3970_v22 = vor.u32 %v4391_v14, %v3967_v15 }
 0x114   :  { %2578 = vmatpush.bf16.msra.mxu1 %v3958_v19  ;;  %v1805_v40 = vpop.f32.mrf.mxu3  ;;  %v4367_v19 = vld [vmem:[%s6682_s4 + $0x24] sm:$0xf]  ;;  %v4365_v34 = vld [vmem:[%s6682_s4 + $0x14] sm:$0xf] }
 0x115   :  { %v2028_v41 = vrot.slane %v2027_v29, 2 }
 0x117   :  { %2567 = vmatpush.bf16.msra.mxu0 %v3878_v63  ;;  %v2029_v20 = vadd.f32 %v2028_v41, %v2027_v29  ;;  %v4371_v63 = vld [vmem:[%s6682_s4 + $0x44] sm:$0xf]  ;;  %v3874_v29 = vor.u32 %v4367_v19, %v3871_v21  ;;  %v2160_v21 = vperm.slane %v6180_v18, 1 }
 0x118   :  { %2579 = vmatpush.bf16.msra.mxu1 %v3950_v35  ;;  %v3890_v5 = vor.u32 %v4371_v63, %v3887_v0  ;;  %v3863_v35 = vld [vmem:[%s6682_s4 + $0x18] sm:$0xf0] }
 0x119   :  { %v2030_v51 = vrot.slane %v2029_v20, 1  ;;  %v3927_v63 = vld [vmem:[%s6682_s4 + $0x98] sm:$0xf0] }
 0x11b   :  { %2568 = vmatpush.bf16.msra.mxu0 %v3870_v25  ;;  %v2031_v33 = vadd.f32 %v2030_v51, %v2029_v20  ;;  %v3879_v25 = vld [vmem:[%s6682_s4 + $0x38] sm:$0xf0] }
 0x11c   :  { %2580 = vmatpush.bf16.msra.mxu1 %v3942_v50  ;;  %v3954_v50 = vor.u32 %v4387_v44, %v3951_v45 }
 0x11d   :  { %v2054_v56 = vmul.f32 %v5933_v49, %v2031_v33  ;;  %v3943_v33 = vld [vmem:[%s6682_s4 + $0xb8] sm:$0xf0] }
 0x11f   :  { %2569 = vmatpush.bf16.msra.mxu0 %v3862_v23  ;;  %v6248_v59 = vsub.f32 %v1804_v3, %v2054_v56  ;;  %v4369_v3 = vld [vmem:[%s6682_s4 + $0x34] sm:$0xf]  ;;  %v3938_v56 = vor.u32 %v4383_v8, %v3935_v55  ;;  %v3989_v55 = vld [vmem:[%s6682_s4 + $0x110] sm:$0xf] }
 0x120   :  { %2581 = vmatpush.bf16.msra.mxu1 %v3934_v54  ;;  %v3882_v13 = vor.u32 %v4369_v3, %v3879_v25 }
 0x121   :  { %v2062_v1 = vmul.f32 %v6248_v59, %v6248_v59 }
 0x123   :  { %2570 = vmatpush.bf16.msra.mxu0 %v3854_v43  ;;  %v2072_v17 = vsel %vm2017_vm0, %v2062_v1, 0.0  ;;  %v1816_v26 = vpop.f32.mrf.mxu0  ;;  %v3866_v43 = vor.u32 %v4365_v34, %v3863_v35 }
 0x124   :  { %2582 = vmatpush.bf16.msra.mxu1 %v3926_v62  ;;  %v2073_v9 = vrot.slane %v2072_v17, 4  ;;  %v1829_v11 = vpop.f32.mrf.mxu1  ;;  %v4381_v62 = vld [vmem:[%s6682_s4 + $0x94] sm:$0xf] }
 0x125   :  { %v1830_v54 = vadd.f32 %v1829_v11, %v1816_v26  ;;  %v3930_v0 = vor.u32 %v4381_v62, %v3927_v63  ;;  %v2147_v11 = vperm.slane %v6161_v60, 1  ;;  %v3981_v62 = vld [vmem:[%s6682_s4 + $0x100] sm:$0xf]  ;;  %v4396_v63 = vld [vmem:[%s6682_s4 + $0x104] sm:$0xf0] }
 0x126   :  { %2571 = vmatmul.bf16.vlgmr.msra.gmra.mxu0 %v6232_v42  ;;  %v2074_v12 = vadd.f32 %v2073_v9, %v2072_v17  ;;  %v3919_v17 = vld [vmem:[%s6682_s4 + $0x88] sm:$0xf0] }
 0x127   :  { %2615 = vmatpush.bf16.msrb.mxu0 %v3914_v28  ;;  %v4363_v28 = vld [vmem:[%s6682_s4 + $0x4] sm:$0xf] }
 0x128   :  { %2583 = vmatpush.bf16.msra.mxu1 %v3918_v47  ;;  %v2075_v16 = vrot.slane %v2074_v12, 2  ;;  %v3858_v52 = vor.u32 %v4363_v28, %v3855_v46  ;;  %v4037_v47 = vld [vmem:[%s6682_s4 + $0x170] sm:$0xf] }
 0x129   :  { %v4038_v9 = vor.u32 %v4410_v6, %v4037_v47 }
 0x12a   :  { %v2076_v24 = vadd.f32 %v2075_v16, %v2074_v12  ;;  %v4029_v12 = vld [vmem:[%s6682_s4 + $0x160] sm:$0xf] }
 0x12b   :  { %2616 = vmatpush.bf16.msrb.mxu0 %v3906_v38  ;;  %v1842_v23 = vpop.f32.mrf.mxu2  ;;  %v1818_v36 = vpop.f32.mrf.mxu0  ;;  %v3946_v38 = vor.u32 %v4385_v53, %v3943_v33  ;;  %2589 = vmatpush.bf16.msra.mxu2 %v4038_v9  ;;  %v3997_v53 = vld [vmem:[%s6682_s4 + $0x120] sm:$0xf]  ;;  %v4400_v33 = vld [vmem:[%s6682_s4 + $0x124] sm:$0xf0]  ;;  %v4031_v9 = vld [vmem:[%s6682_s4 + $0x168] sm:$0xf0] }
 0x12c   :  { %2628 = vmatpush.bf16.msrb.mxu1 %v3978_v10  ;;  %v1855_v27 = vpop.f32.mrf.mxu3  ;;  %v2077_v32 = vrot.slane %v2076_v24, 1  ;;  %v1831_v40 = vpop.f32.mrf.mxu1 }
 0x12d   :  { %v4013_v40 = vld [vmem:[%s6682_s4 + $0x140] sm:$0xf] }
 0x12e   :  { %v2078_v41 = vadd.f32 %v2077_v32, %v2076_v24 }
 0x12f   :  { %2617 = vmatpush.bf16.msrb.mxu0 %v3898_v61  ;;  %v1843_v61 = vadd.f32 %v1842_v23, %v1830_v54  ;;  %v3998_v54 = vor.u32 %v4400_v33, %v3997_v53  ;;  %v4426_v53 = vld [vmem:[%s6682_s4 + $0x1f4] sm:$0xf0] }
 0x130   :  { %2629 = vmatpush.bf16.msrb.mxu1 %v3970_v22  ;;  %v2094_v20 = vmul.f32 %v2078_v41, %v5933_v49  ;;  %v4404_v41 = vld [vmem:[%s6682_s4 + $0x144] sm:$0xf0] }
 0x131   :  { %v1856_v4 = vadd.f32 %v1855_v27, %v1843_v61  ;;  %v4014_v44 = vor.u32 %v4404_v41, %v4013_v40 }
 0x132   :  { %v2098_v37 = vadd.f32 1e-05, %v2094_v20 }
 0x133   :  { %2618 = vmatpush.bf16.msrb.mxu0 %v3890_v5  ;;  %v1844_v48 = vpop.f32.mrf.mxu2 }
 0x134   :  { %2630 = vmatpush.bf16.msrb.mxu1 %v3962_v39  ;;  %v1857_v51 = vpop.f32.mrf.mxu3  ;;  %4433 = vrsqrt.f32 %v2098_v37  ;;  %vm2117_vm6 = vweird.f32 %v2098_v37  ;;  %v4402_v48 = vld [vmem:[%s6682_s4 + $0x134] sm:$0xf0] }
 0x137   :  { %2619 = vmatpush.bf16.msrb.mxu0 %v3882_v13  ;;  %v4408_v13 = vld [vmem:[%s6682_s4 + $0x164] sm:$0xf0] }
 0x138   :  { %2631 = vmatpush.bf16.msrb.mxu1 %v3954_v50  ;;  %v4030_v16 = vor.u32 %v4408_v13, %v4029_v12  ;;  %v4005_v50 = vld [vmem:[%s6682_s4 + $0x130] sm:$0xf]  ;;  %v4023_v12 = vld [vmem:[%s6682_s4 + $0x158] sm:$0xf0] }
 0x139   :  { %v4006_v51 = vor.u32 %v4402_v48, %v4005_v50  ;;  %v4395_v48 = vld [vmem:[%s6682_s4 + $0x104] sm:$0xf] }
 0x13a   :  { %v4434_v57 = vpop.eup %4433  ;;  %2590 = vmatpush.bf16.msra.mxu2 %v4030_v16 }
 0x13b   :  { %2620 = vmatpush.bf16.msrb.mxu0 %v3874_v29  ;;  %v2112_v58 = vmul.f32 %v4434_v57, %v2098_v37  ;;  %vm2118_vm5 = vweird.f32 %v4434_v57  ;;  %v4021_v29 = vld [vmem:[%s6682_s4 + $0x150] sm:$0xf] }
 0x13c   :  { %2632 = vmatpush.bf16.msrb.mxu1 %v3946_v38  ;;  %vm2119_vm7 = vmor %vm2117_vm6, %vm2118_vm5  ;;  %v4022_v31 = vor.u32 %v4406_v30, %v4021_v29 }
 0x13d   :  { %v2113_v1 = vmul.f32 %v4434_v57, %v2112_v58 }
 0x13e   :  { %2591 = vmatpush.bf16.msra.mxu2 %v4022_v31  ;;  %v4401_v31 = vld [vmem:[%s6682_s4 + $0x134] sm:$0xf] }
 0x13f   :  { %2621 = vmatpush.bf16.msrb.mxu0 %v3866_v43  ;;  %v2114_v2 = vmul.f32 0.5, %v2113_v1  ;;  %v3982_v1 = vor.u32 %v4396_v63, %v3981_v62  ;;  %v4424_v62 = vld [vmem:[%s6682_s4 + $0x1e4] sm:$0xf0] }
 0x140   :  { %2633 = vmatpush.bf16.msrb.mxu1 %v3938_v56  ;;  %v4398_v56 = vld [vmem:[%s6682_s4 + $0x114] sm:$0xf0] }
 0x141   :  { %v2115_v7 = vsub.f32 1.5, %v2114_v2  ;;  %v3990_v58 = vor.u32 %v4398_v56, %v3989_v55  ;;  %v4409_v2 = vld [vmem:[%s6682_s4 + $0x174] sm:$0xf] }
 0x142   :  { %2592 = vmatpush.bf16.msra.mxu2 %v4014_v44  ;;  %v3991_v44 = vld [vmem:[%s6682_s4 + $0x118] sm:$0xf0] }
 0x143   :  { %2622 = vmatpush.bf16.msrb.mxu0 %v3858_v52  ;;  %v1868_v3 = vpop.f32.mrf.mxu0  ;;  %v2116_v25 = vmul.f32 %v4434_v57, %v2115_v7  ;;  %v4407_v7 = vld [vmem:[%s6682_s4 + $0x164] sm:$0xf] }
 0x144   :  { %2634 = vmatpush.bf16.msrb.mxu1 %v3930_v0  ;;  %v1869_v26 = vadd.f32 %v1868_v3, %v1856_v4  ;;  %v1881_v10 = vpop.f32.mrf.mxu1  ;;  %v4039_v4 = vld [vmem:[%s6682_s4 + $0x178] sm:$0xf0] }
 0x145   :  { %v2120_v14 = vsel %vm2119_vm7, %v4434_v57, %v2116_v25  ;;  %v4034_v25 = vor.u32 %v4407_v7, %v4031_v9 }
 0x146   :  { %2623 = vmatmul.bf16.vlgmr.msrb.gmra.mxu0 %v6232_v42  ;;  %v4379_v42 = vld [vmem:[%s6682_s4 + $0x84] sm:$0xf]  ;;  %v1882_v15 = vadd.f32 %v1881_v10, %v1869_v26  ;;  %v2142_v19 = vmul.f32 %v2120_v14, %v6248_v59  ;;  %2593 = vmatpush.bf16.msra.mxu2 %v4006_v51 }
 0x147   :  { %v3922_v5 = vor.u32 %v4379_v42, %v3919_v17  ;;  %v4042_v42 = vor.u32 %v4409_v2, %v4039_v4 }
 0x148   :  { %v2155_v23 = vmul.f32 %v2147_v11, %v2142_v19  ;;  %v4405_v11 = vld [vmem:[%s6682_s4 + $0x154] sm:$0xf] }
 0x149   :  { %2635 = vmatpush.bf16.msrb.mxu1 %v3922_v5 }
 0x14a   :  { %v2168_v34 = vadd.f32 %v2160_v21, %v2155_v23  ;;  %2594 = vmatpush.bf16.msra.mxu2 %v3998_v54  ;;  %v4015_v23 = vld [vmem:[%s6682_s4 + $0x148] sm:$0xf0] }
 0x14b   :  { %v1894_v22 = vpop.f32.mrf.mxu2  ;;  %v1870_v35 = vpop.f32.mrf.mxu0 }
 0x14c   :  { %v1895_v24 = vadd.f32 %v1894_v22, %v1882_v15  ;;  %v1907_v27 = vpop.f32.mrf.mxu3  ;;  %v1883_v59 = vpop.f32.mrf.mxu1  ;;  %v2172_v39 = vmax.f32 %v2168_v34, 0.0  ;;  %v4026_v15 = vor.u32 %v4405_v11, %v4023_v12  ;;  %v4403_v22 = vld [vmem:[%s6682_s4 + $0x144] sm:$0xf]  ;;  %v4077_v12 = vld [vmem:[%s6682_s4 + $0x1c0] sm:$0xf] }
 0x14e   :  { %v1908_v32 = vadd.f32 %v1907_v27, %v1895_v24  ;;  %v2176_v45 = vpack.c.bf16 %v2172_v39, %v2172_v39  ;;  %2595 = vmatpush.bf16.msra.mxu2 %v3990_v58  ;;  %v4018_v27 = vor.u32 %v4403_v22, %v4015_v23  ;;  %v3999_v39 = vld [vmem:[%s6682_s4 + $0x128] sm:$0xf0]  ;;  %v4093_v58 = vld [vmem:[%s6682_s4 + $0x1e0] sm:$0xf]  ;;  %v4069_v22 = vld [vmem:[%s6682_s4 + $0x1b0] sm:$0xf] }
 0x14f   :  { %v4418_v23 = vld [vmem:[%s6682_s4 + $0x1b4] sm:$0xf0] }
 0x150   :  { %v2032_v36 = vsel %vm2017_vm0, %v1908_v32, 0.0  ;;  %2584 = vmatmul.bf16.vlgmr.msra.gmra.mxu1 %v2176_v45 }
 0x151   :  { %v2033_v43 = vrot.slane %v2032_v36, 4 }
 0x152   :  { %2596 = vmatpush.bf16.msra.mxu2 %v3982_v1  ;;  %v2148_v1 = vperm.slane %v6161_v60, 2 }
 0x153   :  { %v2034_v20 = vadd.f32 %v2033_v43, %v2032_v36  ;;  %v1896_v28 = vpop.f32.mrf.mxu2  ;;  %v4399_v36 = vld [vmem:[%s6682_s4 + $0x124] sm:$0xf]  ;;  %v4397_v43 = vld [vmem:[%s6682_s4 + $0x114] sm:$0xf] }
 0x154   :  { %v1909_v46 = vpop.f32.mrf.mxu3  ;;  %v4002_v40 = vor.u32 %v4399_v36, %v3999_v39  ;;  %v4053_v39 = vld [vmem:[%s6682_s4 + $0x190] sm:$0xf] }
 0x155   :  { %v2035_v37 = vrot.slane %v2034_v20, 2 }
 0x156   :  { %2641 = vmatpush.bf16.msrb.mxu2 %v4042_v42 }
 0x157   :  { %v2036_v52 = vadd.f32 %v2035_v37, %v2034_v20  ;;  %v3994_v20 = vor.u32 %v4397_v43, %v3991_v44  ;;  %v3983_v37 = vld [vmem:[%s6682_s4 + $0x108] sm:$0xf0] }
 0x158   :  { %v3986_v51 = vor.u32 %v4395_v48, %v3983_v37  ;;  %v4103_v48 = vld [vmem:[%s6682_s4 + $0x1f8] sm:$0xf0] }
 0x159   :  { %v2037_v38 = vrot.slane %v2036_v52, 1 }
 0x15a   :  { %2642 = vmatpush.bf16.msrb.mxu2 %v4034_v25 }
 0x15b   :  { %v2038_v8 = vadd.f32 %v2037_v38, %v2036_v52  ;;  %v4101_v52 = vld [vmem:[%s6682_s4 + $0x1f0] sm:$0xf] }
 0x15c   :  { %v4102_v38 = vor.u32 %v4426_v53, %v4101_v52 }
 0x15d   :  { %v2055_v57 = vmul.f32 %v5933_v49, %v2038_v8 }
 0x15e   :  { %2643 = vmatpush.bf16.msrb.mxu2 %v4026_v15  ;;  %2602 = vmatpush.bf16.msra.mxu3 %v4102_v38  ;;  %v4095_v38 = vld [vmem:[%s6682_s4 + $0x1e8] sm:$0xf0] }
 0x15f   :  { %v6386_v61 = vsub.f32 %v1908_v32, %v2055_v57  ;;  %v4007_v32 = vld [vmem:[%s6682_s4 + $0x138] sm:$0xf0] }
 0x160   :  { %2636 = vmatmul.bf16.vlgmr.msrb.gmra.mxu1 %v2176_v45  ;;  %v4010_v59 = vor.u32 %v4401_v31, %v4007_v32  ;;  %v4061_v32 = vld [vmem:[%s6682_s4 + $0x1a0] sm:$0xf] }
 0x161   :  { %v2063_v0 = vmul.f32 %v6386_v61, %v6386_v61 }
 0x162   :  { %2644 = vmatpush.bf16.msrb.mxu2 %v4018_v27 }
 0x163   :  { %v2079_v17 = vsel %vm2017_vm0, %v2063_v0, 0.0  ;;  %v1920_v47 = vpop.f32.mrf.mxu0  ;;  %v4094_v0 = vor.u32 %v4424_v62, %v4093_v58 }
 0x164   :  { %v2080_v5 = vrot.slane %v2079_v17, 4  ;;  %v1933_v6 = vpop.f32.mrf.mxu1 }
 0x165   :  { %v1934_v41 = vadd.f32 %v1933_v6, %v1920_v47  ;;  %2603 = vmatpush.bf16.msra.mxu3 %v4094_v0  ;;  %v4422_v47 = vld [vmem:[%s6682_s4 + $0x1d4] sm:$0xf0]  ;;  %v4079_v0 = vld [vmem:[%s6682_s4 + $0x1c8] sm:$0xf0] }
 0x166   :  { %v2081_v3 = vadd.f32 %v2080_v5, %v2079_v17  ;;  %2645 = vmatpush.bf16.msrb.mxu2 %v4010_v59  ;;  %v2161_v17 = vperm.slane %v6180_v18, 2  ;;  %v4085_v5 = vld [vmem:[%s6682_s4 + $0x1d0] sm:$0xf] }
 0x167   :  { %v4086_v7 = vor.u32 %v4422_v47, %v4085_v5  ;;  %v4417_v5 = vld [vmem:[%s6682_s4 + $0x1b4] sm:$0xf]  ;;  %v4071_v47 = vld [vmem:[%s6682_s4 + $0x1b8] sm:$0xf0] }
 0x168   :  { %v2082_v26 = vrot.slane %v2081_v3, 2 }
 0x169   :  { %2604 = vmatpush.bf16.msra.mxu3 %v4086_v7  ;;  %v4074_v7 = vor.u32 %v4417_v5, %v4071_v47  ;;  %v2752_v47 = vld [vmem:[%s6686_s7 + $0x38] sm:$0xff] }
 0x16a   :  { %v2083_v13 = vadd.f32 %v2082_v26, %v2081_v3  ;;  %2646 = vmatpush.bf16.msrb.mxu2 %v4002_v40  ;;  %v4414_v40 = vld [vmem:[%s6682_s4 + $0x194] sm:$0xf0] }
 0x16b   :  { %v1946_v10 = vpop.f32.mrf.mxu2  ;;  %v1922_v19 = vpop.f32.mrf.mxu0  ;;  %v4054_v43 = vor.u32 %v4414_v40, %v4053_v39 }
 0x16c   :  { %v1959_v14 = vpop.f32.mrf.mxu3  ;;  %v2084_v16 = vrot.slane %v2083_v13, 1  ;;  %v1935_v21 = vpop.f32.mrf.mxu1  ;;  %v1947_v46 = vadd.f32 %v1946_v10, %v1934_v41 }
 0x16e   :  { %v2085_v24 = vadd.f32 %v2084_v16, %v2083_v13  ;;  %2647 = vmatpush.bf16.msrb.mxu2 %v3994_v20  ;;  %v1960_v54 = vadd.f32 %v1959_v14, %v1947_v46  ;;  %v4420_v13 = vld [vmem:[%s6682_s4 + $0x1c4] sm:$0xf0] }
 0x16f   :  { %v4078_v14 = vor.u32 %v4420_v13, %v4077_v12  ;;  %v4412_v20 = vld [vmem:[%s6682_s4 + $0x184] sm:$0xf0]  ;;  %v4411_v12 = vld [vmem:[%s6682_s4 + $0x184] sm:$0xf]  ;;  %v4047_v13 = vld [vmem:[%s6682_s4 + $0x188] sm:$0xf0] }
 0x170   :  { %v2095_v29 = vmul.f32 %v2085_v24, %v5933_v49 }
 0x171   :  { %2605 = vmatpush.bf16.msra.mxu3 %v4078_v14 }
 0x172   :  { %v2099_v34 = vadd.f32 1e-05, %v2095_v29  ;;  %2648 = vmatpush.bf16.msrb.mxu2 %v3986_v51  ;;  %v4070_v29 = vor.u32 %v4418_v23, %v4069_v22 }
 0x173   :  { %v1948_v30 = vpop.f32.mrf.mxu2 }
 0x174   :  { %v1961_v35 = vpop.f32.mrf.mxu3  ;;  %4435 = vrsqrt.f32 %v2099_v34  ;;  %vm2127_vm9 = vweird.f32 %v2099_v34 }
 0x175   :  { %2606 = vmatpush.bf16.msra.mxu3 %v4070_v29 }
 0x17a   :  { %v4436_v45 = vpop.eup %4435 }
 0x17b   :  { %v2122_v28 = vmul.f32 %v4436_v45, %v2099_v34  ;;  %vm2128_vm8 = vweird.f32 %v4436_v45  ;;  %v4416_v34 = vld [vmem:[%s6682_s4 + $0x1a4] sm:$0xf0] }
 0x17c   :  { %vm2129_vm10 = vmor %vm2127_vm9, %vm2128_vm8  ;;  %v4062_v59 = vor.u32 %v4416_v34, %v4061_v32 }
 0x17d   :  { %v2123_v50 = vmul.f32 %v4436_v45, %v2122_v28 }
 0x17e   :  { %2607 = vmatpush.bf16.msra.mxu3 %v4062_v59 }
 0x17f   :  { %v2124_v33 = vmul.f32 0.5, %v2123_v50  ;;  %v4425_v50 = vld [vmem:[%s6682_s4 + $0x1f4] sm:$0xf] }
 0x180   :  { %v4106_v37 = vor.u32 %v4425_v50, %v4103_v48 }
 0x181   :  { %v2125_v55 = vsub.f32 1.5, %v2124_v33  ;;  %v4423_v33 = vld [vmem:[%s6682_s4 + $0x1e4] sm:$0xf] }
 0x182   :  { %2608 = vmatpush.bf16.msra.mxu3 %v4054_v43 }
 0x183   :  { %v1972_v8 = vpop.f32.mrf.mxu0  ;;  %v2126_v63 = vmul.f32 %v4436_v45, %v2125_v55 }
 0x184   :  { %v1985_v56 = vpop.f32.mrf.mxu1  ;;  %v1973_v57 = vadd.f32 %v1972_v8, %v1960_v54  ;;  %v4098_v8 = vor.u32 %v4423_v33, %v4095_v38  ;;  %v2758_v38 = vld [vmem:[%s6686_s7 + $0x68] sm:$0xff] }
 0x185   :  { %v2130_v2 = vsel %vm2129_vm10, %v4436_v45, %v2126_v63  ;;  %v4045_v45 = vld [vmem:[%s6682_s4 + $0x180] sm:$0xf]  ;;  %v4419_v63 = vld [vmem:[%s6682_s4 + $0x1c4] sm:$0xf] }
 0x186   :  { %v2143_v4 = vmul.f32 %v2130_v2, %v6386_v61  ;;  %v1986_v42 = vadd.f32 %v1985_v56, %v1973_v57  ;;  %v4046_v46 = vor.u32 %v4412_v20, %v4045_v45  ;;  %v4421_v56 = vld [vmem:[%s6682_s4 + $0x1d4] sm:$0xf]  ;;  %v4087_v57 = vld [vmem:[%s6682_s4 + $0x1d8] sm:$0xf0] }
 0x187   :  { %v4090_v62 = vor.u32 %v4421_v56, %v4087_v57  ;;  %v2756_v57 = vld [vmem:[%s6686_s7 + $0x58] sm:$0xff] }
 0x188   :  { %v2156_v9 = vmul.f32 %v2148_v1, %v2143_v4  ;;  %2609 = vmatpush.bf16.msra.mxu3 %v4046_v46  ;;  %v4082_v4 = vor.u32 %v4419_v63, %v4079_v0  ;;  %v2754_v0 = vld [vmem:[%s6686_s7 + $0x48] sm:$0xff] }
 0x18a   :  { %v2169_v11 = vadd.f32 %v2161_v17, %v2156_v9  ;;  %v4415_v9 = vld [vmem:[%s6682_s4 + $0x1a4] sm:$0xf] }
 0x18b   :  { %v1998_v6 = vpop.f32.mrf.mxu2  ;;  %v1974_v26 = vpop.f32.mrf.mxu0 }
 0x18c   :  { %v1999_v3 = vadd.f32 %v1998_v6, %v1986_v42  ;;  %v2011_v25 = vpop.f32.mrf.mxu3  ;;  %v1987_v10 = vpop.f32.mrf.mxu1  ;;  %v2173_v16 = vmax.f32 %v2169_v11, 0.0  ;;  %2654 = vmatpush.bf16.msrb.mxu3 %v4106_v37  ;;  %v2760_v37 = vld [vmem:[%s6686_s7 + $0x78] sm:$0xff] }
 0x18d   :  { %v4413_v10 = vld [vmem:[%s6682_s4 + $0x194] sm:$0xf]  ;;  %2781 = vmatpush.msra.mxu0 %v2760_v37  ;;  %v2765_v37 = vld [vmem:[%s6686_s7 + $0xa0] sm:$0xff] }
 0x18e   :  { %v2012_v61 = vadd.f32 %v2011_v25, %v1999_v3  ;;  %v2177_v21 = vpack.c.bf16 %v2173_v16, %v2173_v16  ;;  %v4063_v3 = vld [vmem:[%s6682_s4 + $0x1a8] sm:$0xf0] }
 0x18f   :  { %v4066_v26 = vor.u32 %v4415_v9, %v4063_v3 }
 0x190   :  { %v2039_v15 = vsel %vm2017_vm0, %v2012_v61, 0.0  ;;  %2597 = vmatmul.bf16.vlgmr.msra.gmra.mxu2 %v2177_v21  ;;  %2655 = vmatpush.bf16.msrb.mxu3 %v4098_v8 }
 0x191   :  { %v2040_v19 = vrot.slane %v2039_v15, 4 }
 0x193   :  { %v2041_v24 = vadd.f32 %v2040_v19, %v2039_v15  ;;  %v2000_v27 = vpop.f32.mrf.mxu2  ;;  %v4050_v15 = vor.u32 %v4411_v12, %v4047_v13  ;;  %v2774_v12 = vld [vmem:[%s6686_s7 + $0xe8] sm:$0xff] }
 0x194   :  { %v2013_v30 = vpop.f32.mrf.mxu3  ;;  %2656 = vmatpush.bf16.msrb.mxu3 %v4090_v62  ;;  %v2149_v27 = vperm.slane %v6161_v60, 3  ;;  %v2755_v62 = vld [vmem:[%s6686_s7 + $0x50] sm:$0xff] }
 0x195   :  { %v2042_v31 = vrot.slane %v2041_v24, 2 }
 0x197   :  { %v2043_v35 = vadd.f32 %v2042_v31, %v2041_v24  ;;  %v2162_v31 = vperm.slane %v6180_v18, 3 }
 0x198   :  { %2657 = vmatpush.bf16.msrb.mxu3 %v4082_v4 }
 0x199   :  { %v2044_v36 = vrot.slane %v2043_v35, 1 }
 0x19b   :  { %v2045_v41 = vadd.f32 %v2044_v36, %v2043_v35 }
 0x19c   :  { %2658 = vmatpush.bf16.msrb.mxu3 %v4074_v7 }
 0x19d   :  { %v2056_v44 = vmul.f32 %v5933_v49, %v2045_v41 }
 0x19f   :  { %v2060_v28 = vsub.f32 %v2012_v61, %v2056_v44  ;;  %v4055_v61 = vld [vmem:[%s6682_s4 + $0x198] sm:$0xf0] }
 0x1a0   :  { %2649 = vmatmul.bf16.vlgmr.msrb.gmra.mxu2 %v2177_v21  ;;  %2659 = vmatpush.bf16.msrb.mxu3 %v4066_v26  ;;  %v4058_v11 = vor.u32 %v4413_v10, %v4055_v61  ;;  %v2775_v26 = vld [vmem:[%s6686_s7 + $0xf0] sm:$0xff] }
 0x1a1   :  { %v2064_v51 = vmul.f32 %v2060_v28, %v2060_v28 }
 0x1a3   :  { %v6505_v52 = vpop.f32.mrf.mxu0  ;;  %v2086_v53 = vsel %vm2017_vm0, %v2064_v51, 0.0 }
 0x1a4   :  { %v2087_v54 = vrot.slane %v2086_v53, 4  ;;  %2660 = vmatpush.bf16.msrb.mxu3 %v4058_v11  ;;  %v2750_v11 = vld [vmem:[%s6686_s7 + $0x28] sm:$0xff] }
 0x1a6   :  { %v2088_v55 = vadd.f32 %v2087_v54, %v2086_v53  ;;  %v2759_v53 = vld [vmem:[%s6686_s7 + $0x70] sm:$0xff] }
 0x1a7   :  { %2782 = vmatpush.msra.mxu0 %v2759_v53 }
 0x1a8   :  { %v2089_v58 = vrot.slane %v2088_v55, 2  ;;  %2661 = vmatpush.bf16.msrb.mxu3 %v4050_v15 }
 0x1a9   :  { %2783 = vmatpush.msra.mxu0 %v2758_v38  ;;  %v2762_v38 = vld [vmem:[%s6686_s7 + $0x88] sm:$0xff] }
 0x1aa   :  { %v2090_v1 = vadd.f32 %v2089_v58, %v2088_v55  ;;  %v2757_v55 = vld [vmem:[%s6686_s7 + $0x60] sm:$0xff] }
 0x1ab   :  { %v2574_v2 = vpop.f32.mrf.mxu0  ;;  %2784 = vmatpush.msra.mxu0 %v2757_v55 }
 0x1ac   :  { %v2091_v42 = vrot.slane %v2090_v1, 1 }
 0x1ad   :  { %2785 = vmatpush.msra.mxu0 %v2756_v57 }
 0x1ae   :  { %v2092_v17 = vadd.f32 %v2091_v42, %v2090_v1  ;;  %v2753_v42 = vld [vmem:[%s6686_s7 + $0x40] sm:$0xff] }
 0x1af   :  { %2786 = vmatpush.msra.mxu0 %v2755_v62 }
 0x1b0   :  { %v2096_v6 = vmul.f32 %v2092_v17, %v5933_v49 }
 0x1b1   :  { %2787 = vmatpush.msra.mxu0 %v2754_v0 }
 0x1b2   :  { %v2100_v25 = vadd.f32 1e-05, %v2096_v6  ;;  %v2776_v6 = vld [vmem:[%s6686_s7 + $0xf8] sm:$0xff] }
 0x1b3   :  { %2788 = vmatpush.msra.mxu0 %v2753_v42  ;;  %2801 = vmatpush.msra.mxu1 %v2776_v6 }
 0x1b4   :  { %4437 = vrsqrt.f32 %v2100_v25  ;;  %vm2137_vm12 = vweird.f32 %v2100_v25 }
 0x1b5   :  { %2789 = vmatpush.msra.mxu0 %v2752_v47  ;;  %2802 = vmatpush.msra.mxu1 %v2775_v26 }
 0x1b7   :  { %2803 = vmatpush.msra.mxu1 %v2774_v12 }
 0x1ba   :  { %v4438_v14 = vpop.eup %4437 }
 0x1bb   :  { %v2132_v16 = vmul.f32 %v4438_v14, %v2100_v25  ;;  %vm2138_vm11 = vweird.f32 %v4438_v14  ;;  %v2751_v25 = vld [vmem:[%s6686_s7 + $0x30] sm:$0xff] }
 0x1bc   :  { %vm2139_vm13 = vmor %vm2137_vm12, %vm2138_vm11  ;;  %2790 = vmatpush.msra.mxu0 %v2751_v25 }
 0x1bd   :  { %v2133_v19 = vmul.f32 %v4438_v14, %v2132_v16  ;;  %v2749_v16 = vld [vmem:[%s6686_s7 + $0x20] sm:$0xff] }
 0x1be   :  { %2791 = vmatpush.msra.mxu0 %v2750_v11 }
 0x1bf   :  { %v2134_v21 = vmul.f32 0.5, %v2133_v19  ;;  %v2773_v19 = vld [vmem:[%s6686_s7 + $0xe0] sm:$0xff] }
 0x1c0   :  { %2792 = vmatpush.msra.mxu0 %v2749_v16  ;;  %2804 = vmatpush.msra.mxu1 %v2773_v19 }
 0x1c1   :  { %v2135_v23 = vsub.f32 1.5, %v2134_v21 }
 0x1c3   :  { %v2624_v22 = vpop.f32.mrf.mxu0  ;;  %v2136_v24 = vmul.f32 %v4438_v14, %v2135_v23  ;;  %v2748_v23 = vld [vmem:[%s6686_s7 + $0x18] sm:$0xff] }
 0x1c4   :  { %2793 = vmatpush.msra.mxu0 %v2748_v23  ;;  %v4428_v23 = vld [vmem:[%s6685_s8] ss:$0 sm:$0xff] }
 0x1c5   :  { %v2140_v29 = vsel %vm2139_vm13, %v4438_v14, %v2136_v24  ;;  %v2772_v24 = vld [vmem:[%s6686_s7 + $0xd8] sm:$0xff] }
 0x1c6   :  { %v2144_v30 = vmul.f32 %v2140_v29, %v2060_v28  ;;  %2805 = vmatpush.msra.mxu1 %v2772_v24 }
 0x1c8   :  { %v2157_v34 = vmul.f32 %v2149_v27, %v2144_v30  ;;  %v2747_v30 = vld [vmem:[%s6686_s7 + $0x10] sm:$0xff] }
 0x1c9   :  { %2794 = vmatpush.msra.mxu0 %v2747_v30 }
 0x1ca   :  { %v2170_v35 = vadd.f32 %v2162_v31, %v2157_v34  ;;  %v2771_v31 = vld [vmem:[%s6686_s7 + $0xd0] sm:$0xff] }
 0x1cb   :  { %v2626_v32 = vpop.f32.mrf.mxu0  ;;  %2806 = vmatpush.msra.mxu1 %v2771_v31 }
 0x1cc   :  { %v2174_v59 = vmax.f32 %v2170_v35, 0.0  ;;  %v2746_v35 = vld [vmem:[%s6686_s7 + $0x8] sm:$0xff] }
 0x1cd   :  { %v2585_v39 = vpop.f32.mrf.mxu1  ;;  %2795 = vmatpush.msra.mxu0 %v2746_v35 }
 0x1ce   :  { %v2178_v36 = vpack.c.bf16 %v2174_v59, %v2174_v59  ;;  %v2586_v40 = vadd.f32 %v2585_v39, %v6505_v52  ;;  %v2770_v59 = vld [vmem:[%s6686_s7 + $0xc8] sm:$0xff] }
 0x1cf   :  { %2807 = vmatpush.msra.mxu1 %v2770_v59 }
 0x1d0   :  { %2610 = vmatmul.bf16.vlgmr.msra.gmra.mxu3 %v2178_v36 }
 0x1d5   :  { %v2587_v41 = vpop.f32.mrf.mxu1 }
 0x1d6   :  { %v2769_v41 = vld [vmem:[%s6686_s7 + $0xc0] sm:$0xff] }
 0x1d7   :  { %2808 = vmatpush.msra.mxu1 %v2769_v41 }
 0x1dd   :  { %v2637_v43 = vpop.f32.mrf.mxu1 }
 0x1de   :  { %v2638_v44 = vadd.f32 %v2637_v43, %v2624_v22 }
 0x1e0   :  { %2662 = vmatmul.bf16.vlgmr.msrb.gmra.mxu3 %v2178_v36 }
 0x1e5   :  { %v2639_v45 = vpop.f32.mrf.mxu1 }
 0x1e6   :  { %v2768_v45 = vld [vmem:[%s6686_s7 + $0xb8] sm:$0xff] }
 0x1e7   :  { %2809 = vmatpush.msra.mxu1 %v2768_v45 }
 0x213   :  { %v2598_v20 = vpop.f32.mrf.mxu2 }
 0x214   :  { %v2599_v50 = vadd.f32 %v2598_v20, %v2586_v40  ;;  %v2745_v40 = vld [vmem:[%s6686_s7] sm:$0xff] }
 0x215   :  { %2796 = vmatpush.msra.mxu0 %v2745_v40 }
 0x21b   :  { %v2600_v60 = vpop.f32.mrf.mxu2 }
 0x223   :  { %v2650_v46 = vpop.f32.mrf.mxu2 }
 0x224   :  { %v2651_v1 = vadd.f32 %v2650_v46, %v2638_v44  ;;  %v2767_v46 = vld [vmem:[%s6686_s7 + $0xb0] sm:$0xff] }
 0x225   :  { %2810 = vmatpush.msra.mxu1 %v2767_v46 }
 0x22b   :  { %v2652_v28 = vpop.f32.mrf.mxu2 }
 0x253   :  { %v2611_v18 = vpop.f32.mrf.mxu3 }
 0x254   :  { %v2612_v48 = vadd.f32 %v2611_v18, %v2599_v50  ;;  %v2766_v18 = vld [vmem:[%s6686_s7 + $0xa8] sm:$0xff] }
 0x255   :  { %2811 = vmatpush.msra.mxu1 %v2766_v18 }
 0x256   :  { %v2669_v51 = vsel %vm2017_vm0, %v2612_v48, 0.0 }
 0x257   :  { %v2670_v52 = vrot.slane %v2669_v51, 4  ;;  %2812 = vmatpush.msra.mxu1 %v2765_v37 }
 0x259   :  { %v2671_v33 = vadd.f32 %v2670_v52, %v2669_v51  ;;  %v2764_v52 = vld [vmem:[%s6686_s7 + $0x98] sm:$0xff] }
 0x25a   :  { %2813 = vmatpush.msra.mxu1 %v2764_v52 }
 0x25b   :  { %v2672_v54 = vrot.slane %v2671_v33, 2  ;;  %v2613_v8 = vpop.f32.mrf.mxu3 }
 0x25d   :  { %v2673_v56 = vadd.f32 %v2672_v54, %v2671_v33  ;;  %v2763_v33 = vld [vmem:[%s6686_s7 + $0x90] sm:$0xff] }
 0x25e   :  { %2814 = vmatpush.msra.mxu1 %v2763_v33 }
 0x25f   :  { %v2674_v58 = vrot.slane %v2673_v56, 1 }
 0x260   :  { %2815 = vmatpush.msra.mxu1 %v2762_v38 }
 0x261   :  { %v2675_v63 = vadd.f32 %v2674_v58, %v2673_v56  ;;  %v2761_v56 = vld [vmem:[%s6686_s7 + $0x80] sm:$0xff] }
 0x262   :  { %2816 = vmatpush.msra.mxu1 %v2761_v56 }
 0x263   :  { %v2683_v2 = vmul.f32 %v2675_v63, %v5933_v49  ;;  %v2663_v4 = vpop.f32.mrf.mxu3 }
 0x264   :  { %v2664_v17 = vadd.f32 %v2663_v4, %v2651_v1  ;;  %v2667_v1 = vld [vmem:[%s6687_s5] sm:$0x3] }
 0x265   :  { %v6580_v5 = vsub.f32 %v2612_v48, %v2683_v2  ;;  %v2730_v47 = vperm.slane %v2667_v1, 0 }
 0x266   :  { %v2676_v7 = vsel %vm2017_vm0, %v2664_v17, 0.0 }
 0x267   :  { %v2687_v9 = vmul.f32 %v6580_v5, %v6580_v5  ;;  %v2677_v3 = vrot.slane %v2676_v7, 4 }
 0x269   :  { %v2689_v10 = vsel %vm2017_vm0, %v2687_v9, 0.0  ;;  %v2678_v61 = vadd.f32 %v2677_v3, %v2676_v7 }
 0x26a   :  { %v2690_v13 = vrot.slane %v2689_v10, 4 }
 0x26b   :  { %v2679_v14 = vrot.slane %v2678_v61, 2  ;;  %v2665_v15 = vpop.f32.mrf.mxu3 }
 0x26c   :  { %v2691_v21 = vadd.f32 %v2690_v13, %v2689_v10 }
 0x26d   :  { %v2680_v22 = vadd.f32 %v2679_v14, %v2678_v61  ;;  %v2731_v14 = vperm.slane %v2667_v1, 1 }
 0x26e   :  { %v2692_v27 = vrot.slane %v2691_v21, 2 }
 0x26f   :  { %v2681_v29 = vrot.slane %v2680_v22, 1 }
 0x270   :  { %v2693_v32 = vadd.f32 %v2692_v27, %v2691_v21 }
 0x271   :  { %v2682_v34 = vadd.f32 %v2681_v29, %v2680_v22 }
 0x272   :  { %v2694_v36 = vrot.slane %v2693_v32, 1 }
 0x273   :  { %v2684_v39 = vmul.f32 %v2682_v34, %v5933_v49 }
 0x274   :  { %v2695_v43 = vadd.f32 %v2694_v36, %v2693_v32 }
 0x275   :  { %v6635_v44 = vsub.f32 %v2664_v17, %v2684_v39  ;;  %v2668_v17 = vld [vmem:[%s6688_s6] sm:$0x3] }
 0x276   :  { %v2703_v20 = vmul.f32 %v2695_v43, %v5933_v49  ;;  %v2738_v19 = vperm.slane %v2668_v17, 1 }
 0x277   :  { %v2688_v60 = vmul.f32 %v6635_v44, %v6635_v44 }
 0x278   :  { %v2705_v28 = vadd.f32 1e-05, %v2703_v20 }
 0x279   :  { %v2696_v50 = vsel %vm2017_vm0, %v2688_v60, 0.0 }
 0x27a   :  { %4439 = vrsqrt.f32 %v2705_v28  ;;  %v2697_v48 = vrot.slane %v2696_v50, 4  ;;  %vm2713_vm15 = vweird.f32 %v2705_v28 }
 0x27c   :  { %v2698_v51 = vadd.f32 %v2697_v48, %v2696_v50 }
 0x27e   :  { %v2699_v53 = vrot.slane %v2698_v51, 2 }
 0x280   :  { %v4440_v54 = vpop.eup %4439  ;;  %v2700_v8 = vadd.f32 %v2699_v53, %v2698_v51 }
 0x281   :  { %v2708_v55 = vmul.f32 %v4440_v54, %v2705_v28  ;;  %vm2714_vm14 = vweird.f32 %v4440_v54 }
 0x282   :  { %v2701_v57 = vrot.slane %v2700_v8, 1  ;;  %vm2715_vm0 = vmor %vm2713_vm15, %vm2714_vm14 }
 0x283   :  { %v2709_v58 = vmul.f32 %v4440_v54, %v2708_v55 }
 0x284   :  { %v2702_v62 = vadd.f32 %v2701_v57, %v2700_v8 }
 0x285   :  { %v2710_v63 = vmul.f32 0.5, %v2709_v58 }
 0x286   :  { %v2704_v0 = vmul.f32 %v2702_v62, %v5933_v49  ;;  %v2737_v49 = vperm.slane %v2668_v17, 0 }
 0x287   :  { %v2711_v2 = vsub.f32 1.5, %v2710_v63 }
 0x288   :  { %v2706_v4 = vadd.f32 1e-05, %v2704_v0 }
 0x289   :  { %v2712_v42 = vmul.f32 %v4440_v54, %v2711_v2 }
 0x28a   :  { %4441 = vrsqrt.f32 %v2706_v4  ;;  %vm2723_vm2 = vweird.f32 %v2706_v4 }
 0x28b   :  { %v2716_v6 = vsel %vm2715_vm0, %v4440_v54, %v2712_v42 }
 0x28c   :  { %v2727_v7 = vmul.f32 %v2716_v6, %v6580_v5 }
 0x28e   :  { %v2734_v9 = vmul.f32 %v2730_v47, %v2727_v7 }
 0x290   :  { %v4442_v3 = vpop.eup %4441  ;;  %v2741_v25 = vadd.f32 %v2737_v49, %v2734_v9 }
 0x291   :  { %v2718_v26 = vmul.f32 %v4442_v3, %v2706_v4  ;;  %vm2724_vm1 = vweird.f32 %v4442_v3 }
 0x292   :  { %v2743_v10 = vmax.f32 %v2741_v25, 0.0  ;;  %vm2725_vm3 = vmor %vm2723_vm2, %vm2724_vm1 }
 0x293   :  { %v2719_v61 = vmul.f32 %v4442_v3, %v2718_v26 }
 0x294   :  { %2797 = vmatmul.f32.vlgmr.msra.gmra.mxu0 %v2743_v10 }
 0x295   :  { %v2720_v11 = vmul.f32 0.5, %v2719_v61 }
 0x297   :  { %v2721_v12 = vsub.f32 1.5, %v2720_v11 }
 0x299   :  { %v2722_v13 = vmul.f32 %v4442_v3, %v2721_v12 }
 0x29b   :  { %v2726_v15 = vsel %vm2725_vm3, %v4442_v3, %v2722_v13 }
 0x29c   :  { %v2728_v16 = vmul.f32 %v2726_v15, %v6635_v44 }
 0x29e   :  { %v2735_v5 = vmul.f32 %v2731_v14, %v2728_v16 }
 0x2a0   :  { %v2742_v21 = vadd.f32 %v2738_v19, %v2735_v5 }
 0x2a2   :  { %v2744_v22 = vmax.f32 %v2742_v21, 0.0 }
 0x2a4   :  { %2817 = vmatmul.f32.vlgmr.msra.gmra.mxu1 %v2744_v22 }
 0x311   :  { %v2798_v24 = vpop.f32.mrf.mxu0 }
 0x312   :  { %v2799_v27 = vadd.f32 %v4428_v23, %v2798_v24 }
 0x321   :  { %v2818_v29 = vpop.f32.mrf.mxu1 }
 0x322   :  { %v2819_v30 = vadd.f32 %v2818_v29, %v2799_v27 }
 0x324   :  { %2822 = vst.msk [vmem:[%s6689_s9] sm:$0x3] %vm2821_vm4, %v2819_v30 }

// kernel: pointnet_dense_cls_forward.19
= control target key start
LH: loop header
LB: loop body
LE: loop exit
PB: predicated region body
PF: predicated region fallthrough
CT: control target
= control target key end

     0   :  { %s1457_s18 = smov 0   ;;  %s1459_s19 = smov 0   ;;  %s2012_s0 = inlined_call_operand.vmem [shape: bf16[2,16,512], index: 0, kind: input, shape index: {}]   ;;  %s2013_s1 = inlined_call_operand.vmem [shape: bf16[512,256], index: 1, kind: input, shape index: {}]   ;;  %s2014_s2 = inlined_call_operand.vmem [shape: f32[1,512], index: 2, kind: input, shape index: {}]   ;;  %s2015_s3 = inlined_call_operand.vmem [shape: f32[1,512], index: 3, kind: input, shape index: {}]   ;;  %s2016_s4 = inlined_call_operand.vmem [shape: bf16[2,16,256], index: 4, kind: output, shape index: {0}]   ;;  %s2017_s5 = inlined_call_operand.vmem [shape: f32[2,1,8,256], index: 5, kind: output, shape index: {1}]  }
   0x1   :  { %s1461_s20 = smov 0  }
   0x2 LB: > { %s28_s21 = sadd.s32 1, %s1421_s19  ;;  %p1047_p0 = scmp.ge.s32.totalorder %s1425_s20, 1  ;;  %s1425_s20 = sphi %s1461_s20, %s16_s20   ;;  %s1421_s19 = sphi %s1459_s19, %s2019_s19   ;;  %s1417_s18 = sphi %s1457_s18, %s2018_s18  }
   0x3   : > { %p30_p1 = scmp.ge.s32.totalorder %s28_s21, 2  ;;  %p214_p2 = scmp.lt.s32.totalorder %s1425_s20, 3 }
   0x5   : > { %s2021_s21 = smov (%p30_p1, %s28_s21), 0  ;;  %p215_p3 = pnand %p1047_p0, %p214_p2 }
   0x6   : > { %p262_p4 = scmp.lt.s32.totalorder (!%p215_p3), %s1417_s18, 1 }
   0x7   : > { %218 = sbr.rel (%p215_p3) target bundleno = 243 (0xf3), region = 36 }
   0xc   : > { %v1112_v0 = vld [vmem:[%s2013_s1 + $0x70] sm:$0xf]  ;;  %v1330_v1 = vld [vmem:[%s2013_s1 + $0x74] sm:$0xf0]  ;;  %v1104_v11 = vld [vmem:[%s2013_s1 + $0x60] sm:$0xf] }
   0xd   : > { %v1176_v2 = vld [vmem:[%s2013_s1 + $0xf0] sm:$0xf]  ;;  %v1113_v3 = vor.u32 %v1330_v1, %v1112_v0  ;;  %v1346_v4 = vld [vmem:[%s2013_s1 + $0xf4] sm:$0xf0]  ;;  %v1328_v13 = vld [vmem:[%s2013_s1 + $0x64] sm:$0xf0] }
   0xe   : > { %v1240_v5 = vld [vmem:[%s2013_s1 + $0x170] sm:$0xf]  ;;  %v1362_v6 = vld [vmem:[%s2013_s1 + $0x174] sm:$0xf0]  ;;  %v1177_v7 = vor.u32 %v1346_v4, %v1176_v2  ;;  %v1168_v14 = vld [vmem:[%s2013_s1 + $0xe0] sm:$0xf]  ;;  %v1105_v16 = vor.u32 %v1328_v13, %v1104_v11 }
   0xf   : > { %v1241_v8 = vor.u32 %v1362_v6, %v1240_v5  ;;  %v1304_v9 = vld [vmem:[%s2013_s1 + $0x1f0] sm:$0xf]  ;;  %v1378_v10 = vld [vmem:[%s2013_s1 + $0x1f4] sm:$0xf0]  ;;  %736 = vmatpush.bf16.msra.mxu0 %v1113_v3  ;;  %v1344_v15 = vld [vmem:[%s2013_s1 + $0xe4] sm:$0xf0] }
  0x10   : > { %v1305_v12 = vor.u32 %v1378_v10, %v1304_v9  ;;  %750 = vmatpush.bf16.msra.mxu1 %v1177_v7  ;;  %v1169_v17 = vor.u32 %v1344_v15, %v1168_v14  ;;  %v1232_v18 = vld [vmem:[%s2013_s1 + $0x160] sm:$0xf]  ;;  %v1360_v19 = vld [vmem:[%s2013_s1 + $0x164] sm:$0xf0]  ;;  %v1096_v23 = vld [vmem:[%s2013_s1 + $0x50] sm:$0xf] }
  0x11   : > { %764 = vmatpush.bf16.msra.mxu2 %v1241_v8  ;;  %v1296_v20 = vld [vmem:[%s2013_s1 + $0x1e0] sm:$0xf]  ;;  %v1233_v21 = vor.u32 %v1360_v19, %v1232_v18  ;;  %v1376_v22 = vld [vmem:[%s2013_s1 + $0x1e4] sm:$0xf0]  ;;  %v1326_v24 = vld [vmem:[%s2013_s1 + $0x54] sm:$0xf0] }
  0x12   : > { %778 = vmatpush.bf16.msra.mxu3 %v1305_v12  ;;  %v1297_v25 = vor.u32 %v1376_v22, %v1296_v20  ;;  %v1160_v26 = vld [vmem:[%s2013_s1 + $0xd0] sm:$0xf]  ;;  %v1342_v27 = vld [vmem:[%s2013_s1 + $0xd4] sm:$0xf0]  ;;  %v1097_v29 = vor.u32 %v1326_v24, %v1096_v23  ;;  %v1088_v35 = vld [vmem:[%s2013_s1 + $0x40] sm:$0xf] }
  0x13   : > { %v1224_v28 = vld [vmem:[%s2013_s1 + $0x150] sm:$0xf]  ;;  %737 = vmatpush.bf16.msra.mxu0 %v1105_v16  ;;  %v1358_v30 = vld [vmem:[%s2013_s1 + $0x154] sm:$0xf0]  ;;  %v1161_v33 = vor.u32 %v1342_v27, %v1160_v26  ;;  %v1324_v36 = vld [vmem:[%s2013_s1 + $0x44] sm:$0xf0] }
  0x14   : > { %v1288_v31 = vld [vmem:[%s2013_s1 + $0x1d0] sm:$0xf]  ;;  %v1374_v32 = vld [vmem:[%s2013_s1 + $0x1d4] sm:$0xf0]  ;;  %751 = vmatpush.bf16.msra.mxu1 %v1169_v17  ;;  %v1225_v34 = vor.u32 %v1358_v30, %v1224_v28  ;;  %v1152_v37 = vld [vmem:[%s2013_s1 + $0xc0] sm:$0xf]  ;;  %v1089_v44 = vor.u32 %v1324_v36, %v1088_v35 }
  0x15   : > { %765 = vmatpush.bf16.msra.mxu2 %v1233_v21  ;;  %v1289_v38 = vor.u32 %v1374_v32, %v1288_v31  ;;  %v1340_v39 = vld [vmem:[%s2013_s1 + $0xc4] sm:$0xf0]  ;;  %v1216_v40 = vld [vmem:[%s2013_s1 + $0x140] sm:$0xf]  ;;  %v1080_v47 = vld [vmem:[%s2013_s1 + $0x30] sm:$0xf] }
  0x16   : > { %779 = vmatpush.bf16.msra.mxu3 %v1297_v25  ;;  %v1356_v41 = vld [vmem:[%s2013_s1 + $0x144] sm:$0xf0]  ;;  %v1280_v42 = vld [vmem:[%s2013_s1 + $0x1c0] sm:$0xf]  ;;  %v1153_v45 = vor.u32 %v1340_v39, %v1152_v37  ;;  %v1322_v48 = vld [vmem:[%s2013_s1 + $0x34] sm:$0xf0] }
  0x17   : > { %v1372_v43 = vld [vmem:[%s2013_s1 + $0x1c4] sm:$0xf0]  ;;  %738 = vmatpush.bf16.msra.mxu0 %v1097_v29  ;;  %v1217_v46 = vor.u32 %v1356_v41, %v1216_v40  ;;  %v1144_v49 = vld [vmem:[%s2013_s1 + $0xb0] sm:$0xf]  ;;  %v1338_v51 = vld [vmem:[%s2013_s1 + $0xb4] sm:$0xf0]  ;;  %v1081_v56 = vor.u32 %v1322_v48, %v1080_v47 }
  0x18   : > { %752 = vmatpush.bf16.msra.mxu1 %v1161_v33  ;;  %v1281_v50 = vor.u32 %v1372_v43, %v1280_v42  ;;  %v1208_v52 = vld [vmem:[%s2013_s1 + $0x130] sm:$0xf]  ;;  %v1354_v53 = vld [vmem:[%s2013_s1 + $0x134] sm:$0xf0]  ;;  %v1145_v57 = vor.u32 %v1338_v51, %v1144_v49  ;;  %v1072_v59 = vld [vmem:[%s2013_s1 + $0x20] sm:$0xf] }
  0x19   : > { %766 = vmatpush.bf16.msra.mxu2 %v1225_v34  ;;  %v1272_v54 = vld [vmem:[%s2013_s1 + $0x1b0] sm:$0xf]  ;;  %v1370_v55 = vld [vmem:[%s2013_s1 + $0x1b4] sm:$0xf0]  ;;  %v1209_v58 = vor.u32 %v1354_v53, %v1208_v52  ;;  %v1320_v60 = vld [vmem:[%s2013_s1 + $0x24] sm:$0xf0] }
  0x1a   : > { %780 = vmatpush.bf16.msra.mxu3 %v1289_v38  ;;  %v1136_v61 = vld [vmem:[%s2013_s1 + $0xa0] sm:$0xf]  ;;  %v1273_v62 = vor.u32 %v1370_v55, %v1272_v54  ;;  %v1336_v63 = vld [vmem:[%s2013_s1 + $0xa4] sm:$0xf0]  ;;  %v1064_v4 = vld [vmem:[%s2013_s1 + $0x10] sm:$0xf]  ;;  %v1073_v5 = vor.u32 %v1320_v60, %v1072_v59 }
  0x1b   : > { %739 = vmatpush.bf16.msra.mxu0 %v1089_v44  ;;  %v1200_v0 = vld [vmem:[%s2013_s1 + $0x120] sm:$0xf]  ;;  %v1352_v1 = vld [vmem:[%s2013_s1 + $0x124] sm:$0xf0]  ;;  %v1318_v6 = vld [vmem:[%s2013_s1 + $0x14] sm:$0xf0]  ;;  %v1137_v9 = vor.u32 %v1336_v63, %v1136_v61 }
  0x1c   : > { %753 = vmatpush.bf16.msra.mxu1 %v1153_v45  ;;  %v1264_v2 = vld [vmem:[%s2013_s1 + $0x1a0] sm:$0xf]  ;;  %v1368_v3 = vld [vmem:[%s2013_s1 + $0x1a4] sm:$0xf0]  ;;  %v1128_v7 = vld [vmem:[%s2013_s1 + $0x90] sm:$0xf]  ;;  %v1201_v10 = vor.u32 %v1352_v1, %v1200_v0  ;;  %v1065_v26 = vor.u32 %v1318_v6, %v1064_v4 }
  0x1d   : > { %767 = vmatpush.bf16.msra.mxu2 %v1217_v46  ;;  %v1334_v8 = vld [vmem:[%s2013_s1 + $0x94] sm:$0xf0]  ;;  %v1192_v11 = vld [vmem:[%s2013_s1 + $0x110] sm:$0xf]  ;;  %v1265_v14 = vor.u32 %v1368_v3, %v1264_v2  ;;  %v1648_v16 = vld [vmem:[%s2013_s1] sm:$0xf] }
  0x1e   : > { %781 = vmatpush.bf16.msra.mxu3 %v1281_v50  ;;  %v1350_v12 = vld [vmem:[%s2013_s1 + $0x114] sm:$0xf0]  ;;  %v1256_v13 = vld [vmem:[%s2013_s1 + $0x190] sm:$0xf]  ;;  %v1653_v17 = vld [vmem:[%s2013_s1 + $0x4] sm:$0xf0]  ;;  %v1129_v32 = vor.u32 %v1334_v8, %v1128_v7 }
  0x1f   : > { %740 = vmatpush.bf16.msra.mxu0 %v1081_v56  ;;  %v1366_v15 = vld [vmem:[%s2013_s1 + $0x194] sm:$0xf0]  ;;  %v1658_v18 = vld [vmem:[%s2013_s1 + $0x80] sm:$0xf]  ;;  %v1663_v19 = vld [vmem:[%s2013_s1 + $0x84] sm:$0xf0]  ;;  %v1193_v33 = vor.u32 %v1350_v12, %v1192_v11  ;;  %v1057_v41 = vor.u32 %v1653_v17, %v1648_v16 }
  0x20   : > { %754 = vmatpush.bf16.msra.mxu1 %v1145_v57  ;;  %v1668_v20 = vld [vmem:[%s2013_s1 + $0x100] sm:$0xf]  ;;  %v1673_v21 = vld [vmem:[%s2013_s1 + $0x104] sm:$0xf0]  ;;  %v1688_v24 = vld [vmem:[%s2013_s1 + $0x74] sm:$0xf]  ;;  %v1257_v36 = vor.u32 %v1366_v15, %v1256_v13  ;;  %v1121_v45 = vor.u32 %v1663_v19, %v1658_v18 }
  0x21   : > { %768 = vmatpush.bf16.msra.mxu2 %v1209_v58  ;;  %v1678_v22 = vld [vmem:[%s2013_s1 + $0x180] sm:$0xf]  ;;  %v1683_v23 = vld [vmem:[%s2013_s1 + $0x184] sm:$0xf0]  ;;  %v1693_v25 = vld [vmem:[%s2013_s1 + $0x78] sm:$0xf0]  ;;  %v1185_v46 = vor.u32 %v1673_v21, %v1668_v20 }
  0x22   : > { %782 = vmatpush.bf16.msra.mxu3 %v1273_v62  ;;  %v1698_v27 = vld [vmem:[%s2013_s1 + $0xf4] sm:$0xf]  ;;  %v1703_v28 = vld [vmem:[%s2013_s1 + $0xf8] sm:$0xf0]  ;;  %v1724_v34 = vld [vmem:[%s2014_s2] sm:$0xf]  ;;  %v1249_v47 = vor.u32 %v1683_v23, %v1678_v22  ;;  %v1117_v48 = vor.u32 %v1688_v24, %v1693_v25 }
  0x23   : > { %741 = vmatpush.bf16.msra.mxu0 %v1073_v5  ;;  %v1708_v29 = vld [vmem:[%s2013_s1 + $0x174] sm:$0xf]  ;;  %v1713_v30 = vld [vmem:[%s2013_s1 + $0x178] sm:$0xf0]  ;;  %v1729_v35 = vld [vmem:[%s2015_s3] sm:$0xf]  ;;  %v1181_v52 = vor.u32 %v1698_v27, %v1703_v28 }
  0x24   : > { %v1718_v31 = vld [vmem:[%s2013_s1 + $0x1f4] sm:$0xf]  ;;  %755 = vmatpush.bf16.msra.mxu1 %v1137_v9  ;;  %v1734_v37 = vld [vmem:[%s2013_s1 + $0x1f8] sm:$0xf0]  ;;  %v308_v38 = vperm.slane %v1724_v34, 2  ;;  %v326_v39 = vperm.slane %v1729_v35, 2  ;;  %v1245_v53 = vor.u32 %v1708_v29, %v1713_v30 }
  0x25   : > { %769 = vmatpush.bf16.msra.mxu2 %v1201_v10  ;;  %v1741_v40 = vld [vmem:[%s2013_s1 + $0x64] sm:$0xf]  ;;  %s2023_s18 = smov (!%p262_p4, %s1417_s18), 1  ;;  %v309_v42 = vperm.slane %v1724_v34, 3  ;;  %v1752_v43 = vld [vmem:[%s2013_s1 + $0x68] sm:$0xf0]  ;;  %v1309_v54 = vor.u32 %v1718_v31, %v1734_v37 }
  0x26   : > { %783 = vmatpush.bf16.msra.mxu3 %v1265_v14  ;;  %v1757_v44 = vld [vmem:[%s2013_s1 + $0xe4] sm:$0xf]  ;;  %v1770_v49 = vld [vmem:[%s2013_s1 + $0xe8] sm:$0xf0]  ;;  %s1312_s10 = sshll.u32 %s2023_s18, 5  ;;  %v327_v55 = vperm.slane %v1729_v35, 3  ;;  %v1109_v58 = vor.u32 %v1741_v40, %v1752_v43 }
  0x27   : > { %742 = vmatpush.bf16.msra.mxu0 %v1065_v26  ;;  %v1775_v50 = vld [vmem:[%s2013_s1 + $0x164] sm:$0xf]  ;;  %v1780_v51 = vld [vmem:[%s2013_s1 + $0x168] sm:$0xf0]  ;;  %s270_s17 = scalar_lea.vmem %s2012_s0, %s1312_s10  ;;  %v1173_v59 = vor.u32 %v1757_v44, %v1770_v49  ;;  %v306_v61 = vperm.slane %v1724_v34, 0  ;;  %v324_v4 = vperm.slane %v1729_v35, 0 }
  0x28   : > { %756 = vmatpush.bf16.msra.mxu1 %v1129_v32  ;;  %v1793_v56 = vld [vmem:[%s2013_s1 + $0x1e4] sm:$0xf]  ;;  %v1798_v57 = vld [vmem:[%s2013_s1 + $0x1e8] sm:$0xf0]  ;;  %v1237_v60 = vor.u32 %v1775_v50, %v1780_v51  ;;  %v1813_v62 = vld [vmem:[%s2013_s1 + $0x54] sm:$0xf] }
  0x29   : > { %770 = vmatpush.bf16.msra.mxu2 %v1193_v33  ;;  %v1818_v63 = vld [vmem:[%s2013_s1 + $0x58] sm:$0xf0]  ;;  %v293_v0 = vld [vmem:[%s270_s17 + $0x8] sm:$0xff]  ;;  %v1301_v2 = vor.u32 %v1793_v56, %v1798_v57  ;;  %v292_v3 = vld [vmem:[%s270_s17] sm:$0xff]  ;;  %v307_v5 = vperm.slane %v1724_v34, 1  ;;  %v325_v19 = vperm.slane %v1729_v35, 1 }
  0x2a   : > { %784 = vmatpush.bf16.msra.mxu3 %v1257_v36  ;;  %v295_v1 = vld [vmem:[%s270_s17 + $0x18] sm:$0xff]  ;;  %v1101_v6 = vor.u32 %v1813_v62, %v1818_v63  ;;  %v298_v7 = vunpack.c.l.bf16 %v293_v0  ;;  %v299_v9 = vunpack.c.h.bf16 %v293_v0  ;;  %v294_v11 = vld [vmem:[%s270_s17 + $0x10] sm:$0xff]  ;;  %v296_v12 = vunpack.c.l.bf16 %v292_v3  ;;  %v1339_v51 = vld [vmem:[%s2013_s1 + $0xc4] sm:$0xf]  ;;  %s1313_s9 = sshll.u32 %s2023_s18, 4 }
  0x2b   : > { %743 = vmatpush.bf16.msra.mxu0 %v1057_v41  ;;  %v302_v8 = vunpack.c.l.bf16 %v295_v1  ;;  %v303_v10 = vunpack.c.h.bf16 %v295_v1  ;;  %v300_v13 = vunpack.c.l.bf16 %v294_v11  ;;  %v297_v14 = vunpack.c.h.bf16 %v292_v3  ;;  %v1341_v27 = vld [vmem:[%s2013_s1 + $0xd4] sm:$0xf]  ;;  %v1162_v28 = vld [vmem:[%s2013_s1 + $0xd8] sm:$0xf0]  ;;  %v1323_v41 = vld [vmem:[%s2013_s1 + $0x44] sm:$0xf]  ;;  %s1992_s12 = scalar_lea.vmem %s2017_s5, %s1313_s9  ;;  %s281_s15 = scalar_lea.vmem %s2016_s4, %s1313_s9 }
  0x2c   : > { %757 = vmatpush.bf16.msra.mxu1 %v1121_v45  ;;  %v301_v15 = vunpack.c.h.bf16 %v294_v11  ;;  %v316_v16 = vmul.f32 %v308_v38, %v298_v7  ;;  %v317_v18 = vmul.f32 %v309_v42, %v299_v9  ;;  %v314_v21 = vmul.f32 %v306_v61, %v296_v12  ;;  %v1357_v29 = vld [vmem:[%s2013_s1 + $0x154] sm:$0xf]  ;;  %v1226_v34 = vld [vmem:[%s2013_s1 + $0x158] sm:$0xf0]  ;;  %v1355_v57 = vld [vmem:[%s2013_s1 + $0x144] sm:$0xf] }
  0x2d   : > { %771 = vmatpush.bf16.msra.mxu2 %v1185_v46  ;;  %v320_v17 = vmul.f32 %v308_v38, %v302_v8  ;;  %v321_v20 = vmul.f32 %v309_v42, %v303_v10  ;;  %v318_v22 = vmul.f32 %v306_v61, %v300_v13  ;;  %v315_v26 = vmul.f32 %v307_v5, %v297_v14  ;;  %v1373_v35 = vld [vmem:[%s2013_s1 + $0x1d4] sm:$0xf]  ;;  %v1290_v36 = vld [vmem:[%s2013_s1 + $0x1d8] sm:$0xf0]  ;;  %v1090_v46 = vld [vmem:[%s2013_s1 + $0x48] sm:$0xf0] }
  0x2e   : > { %785 = vmatpush.bf16.msra.mxu3 %v1249_v47  ;;  %v334_v23 = vadd.f32 %v326_v39, %v316_v16  ;;  %v335_v25 = vadd.f32 %v327_v55, %v317_v18  ;;  %v332_v31 = vadd.f32 %v324_v4, %v314_v21  ;;  %v319_v33 = vmul.f32 %v307_v5, %v301_v15  ;;  %v1282_v61 = vld [vmem:[%s2013_s1 + $0x1c8] sm:$0xf0]  ;;  %v1321_v62 = vld [vmem:[%s2013_s1 + $0x34] sm:$0xf]  ;;  %v1082_v63 = vld [vmem:[%s2013_s1 + $0x38] sm:$0xf0] }
  0x2f   : > { %792 = vmatpush.bf16.msrb.mxu0 %v1117_v48  ;;  %v338_v24 = vadd.f32 %v326_v39, %v320_v17  ;;  %v339_v30 = vadd.f32 %v327_v55, %v321_v20  ;;  %v336_v32 = vadd.f32 %v324_v4, %v318_v22  ;;  %v333_v40 = vadd.f32 %v325_v19, %v315_v26  ;;  %v1337_v3 = vld [vmem:[%s2013_s1 + $0xb4] sm:$0xf]  ;;  %v1146_v5 = vld [vmem:[%s2013_s1 + $0xb8] sm:$0xf0]  ;;  %v1319_v11 = vld [vmem:[%s2013_s1 + $0x24] sm:$0xf] }
  0x30   : > { %806 = vmatpush.bf16.msrb.mxu1 %v1181_v52  ;;  %v342_v37 = vmax.f32 %v334_v23, 0.0  ;;  %v343_v39 = vmax.f32 %v335_v25, 0.0  ;;  %v340_v43 = vmax.f32 %v332_v31, 0.0  ;;  %v337_v45 = vadd.f32 %v325_v19, %v319_v33  ;;  %v1154_v52 = vld [vmem:[%s2013_s1 + $0xc8] sm:$0xf0] }
  0x31   : > { %820 = vmatpush.bf16.msrb.mxu2 %v1245_v53  ;;  %v346_v38 = vmax.f32 %v338_v24, 0.0  ;;  %v347_v42 = vmax.f32 %v339_v30, 0.0  ;;  %v344_v44 = vmax.f32 %v336_v32, 0.0  ;;  %v341_v48 = vmax.f32 %v333_v40, 0.0  ;;  %v1210_v7 = vld [vmem:[%s2013_s1 + $0x138] sm:$0xf0] }
  0x32   : > { %834 = vmatpush.bf16.msrb.mxu3 %v1309_v54  ;;  %v1165_v49 = vor.u32 %v1341_v27, %v1162_v28  ;;  %v1229_v50 = vor.u32 %v1357_v29, %v1226_v34  ;;  %v345_v55 = vmax.f32 %v337_v45, 0.0  ;;  %v1293_v56 = vor.u32 %v1373_v35, %v1290_v36  ;;  %v1369_v9 = vld [vmem:[%s2013_s1 + $0x1b4] sm:$0xf]  ;;  %v1274_v10 = vld [vmem:[%s2013_s1 + $0x1b8] sm:$0xf0] }
  0x33   : > { %793 = vmatpush.bf16.msrb.mxu0 %v1109_v58  ;;  %v1855_v47 = vpack.c.bf16 %v346_v38, %v342_v37  ;;  %v1863_v53 = vpack.c.bf16 %v347_v42, %v343_v39  ;;  %v1865_v54 = vpack.c.bf16 %v344_v44, %v340_v43  ;;  %v1218_v58 = vld [vmem:[%s2013_s1 + $0x148] sm:$0xf0]  ;;  %v1157_v1 = vor.u32 %v1339_v51, %v1154_v52  ;;  %v1335_v15 = vld [vmem:[%s2013_s1 + $0xa4] sm:$0xf]  ;;  %v1317_v23 = vld [vmem:[%s2013_s1 + $0x14] sm:$0xf] }
  0x34   : > { %807 = vmatpush.bf16.msrb.mxu1 %v1173_v59  ;;  %v1093_v59 = vor.u32 %v1323_v41, %v1090_v46  ;;  %v1885_v0 = vpack.c.bf16 %v345_v55, %v341_v48  ;;  %v1085_v8 = vor.u32 %v1321_v62, %v1082_v63  ;;  %v1074_v12 = vld [vmem:[%s2013_s1 + $0x28] sm:$0xf0]  ;;  %v1149_v13 = vor.u32 %v1337_v3, %v1146_v5  ;;  %v1351_v18 = vld [vmem:[%s2013_s1 + $0x124] sm:$0xf]  ;;  %v1066_v24 = vld [vmem:[%s2013_s1 + $0x18] sm:$0xf0] }
  0x35   : > { %821 = vmatpush.bf16.msrb.mxu2 %v1237_v60  ;;  %v1371_v60 = vld [vmem:[%s2013_s1 + $0x1c4] sm:$0xf]  ;;  %786 = vmatmul.bf16.vlgmr.msra.gmra.mxu3 %v1863_v53  ;;  %v1277_v16 = vor.u32 %v1369_v9, %v1274_v10  ;;  %v1138_v17 = vld [vmem:[%s2013_s1 + $0xa8] sm:$0xf0]  ;;  %v1077_v20 = vor.u32 %v1319_v11, %v1074_v12  ;;  %v1333_v27 = vld [vmem:[%s2013_s1 + $0x94] sm:$0xf]  ;;  %v1069_v32 = vor.u32 %v1317_v23, %v1066_v24 }
  0x36   : > { %835 = vmatpush.bf16.msrb.mxu3 %v1301_v2  ;;  %772 = vmatmul.bf16.vlgmr.msra.gmra.mxu2 %v1855_v47  ;;  %v1221_v2 = vor.u32 %v1355_v57, %v1218_v58  ;;  %v1285_v4 = vor.u32 %v1371_v60, %v1282_v61  ;;  %v1202_v19 = vld [vmem:[%s2013_s1 + $0x128] sm:$0xf0]  ;;  %v1367_v21 = vld [vmem:[%s2013_s1 + $0x1a4] sm:$0xf]  ;;  %v1141_v25 = vor.u32 %v1335_v15, %v1138_v17  ;;  %v1130_v29 = vld [vmem:[%s2013_s1 + $0x98] sm:$0xf0] }
  0x37   : > { %794 = vmatpush.bf16.msrb.mxu0 %v1101_v6  ;;  %758 = vmatmul.bf16.vlgmr.msra.gmra.mxu1 %v1885_v0  ;;  %v1353_v6 = vld [vmem:[%s2013_s1 + $0x134] sm:$0xf]  ;;  %v1266_v22 = vld [vmem:[%s2013_s1 + $0x1a8] sm:$0xf0]  ;;  %v1205_v26 = vor.u32 %v1351_v18, %v1202_v19  ;;  %v1194_v31 = vld [vmem:[%s2013_s1 + $0x118] sm:$0xf0]  ;;  %v1133_v37 = vor.u32 %v1333_v27, %v1130_v29 }
  0x38   : > { %744 = vmatmul.bf16.vlgmr.msra.gmra.mxu0 %v1865_v54  ;;  %808 = vmatpush.bf16.msrb.mxu1 %v1165_v49  ;;  %v1213_v14 = vor.u32 %v1353_v6, %v1210_v7  ;;  %v1269_v28 = vor.u32 %v1367_v21, %v1266_v22  ;;  %v1349_v30 = vld [vmem:[%s2013_s1 + $0x114] sm:$0xf]  ;;  %v1258_v34 = vld [vmem:[%s2013_s1 + $0x198] sm:$0xf0]  ;;  %v1315_v35 = vld [vmem:[%s2013_s1 + $0x4] sm:$0xf]  ;;  %v880_v7 = vlaneseq }
  0x39   : > { %822 = vmatpush.bf16.msrb.mxu2 %v1229_v50  ;;  %v1365_v33 = vld [vmem:[%s2013_s1 + $0x194] sm:$0xf]  ;;  %v1058_v36 = vld [vmem:[%s2013_s1 + $0x8] sm:$0xf0]  ;;  %v1197_v38 = vor.u32 %v1349_v30, %v1194_v31  ;;  %v1331_v39 = vld [vmem:[%s2013_s1 + $0x84] sm:$0xf] }
  0x3a   : > { %836 = vmatpush.bf16.msrb.mxu3 %v1293_v56  ;;  %v1261_v40 = vor.u32 %v1365_v33, %v1258_v34  ;;  %v1122_v41 = vld [vmem:[%s2013_s1 + $0x88] sm:$0xf0]  ;;  %v1347_v42 = vld [vmem:[%s2013_s1 + $0x104] sm:$0xf]  ;;  %v1061_v44 = vor.u32 %v1315_v35, %v1058_v36  ;;  %v881_v15 = vshrl.u32 %v880_v7, 7 }
  0x3b   : > { %795 = vmatpush.bf16.msrb.mxu0 %v1093_v59  ;;  %v1186_v43 = vld [vmem:[%s2013_s1 + $0x108] sm:$0xf0]  ;;  %v1363_v45 = vld [vmem:[%s2013_s1 + $0x184] sm:$0xf]  ;;  %v1125_v48 = vor.u32 %v1331_v39, %v1122_v41 }
  0x3c   : > { %809 = vmatpush.bf16.msrb.mxu1 %v1157_v1  ;;  %v1250_v46 = vld [vmem:[%s2013_s1 + $0x188] sm:$0xf0]  ;;  %v1189_v49 = vor.u32 %v1347_v42, %v1186_v43  ;;  %vm883_vm0 = vcmp.eq.s32.totalorder %v881_v15, 1  ;;  %vm882_vm1 = vcmp.eq.s32.totalorder %v881_v15, 0 }
  0x3d   : > { %823 = vmatpush.bf16.msrb.mxu2 %v1221_v2  ;;  %v1253_v50 = vor.u32 %v1363_v45, %v1250_v46 }
  0x3e   : > { %837 = vmatpush.bf16.msrb.mxu3 %v1285_v4 }
  0x3f   : > { %796 = vmatpush.bf16.msrb.mxu0 %v1085_v8 }
  0x40   : > { %810 = vmatpush.bf16.msrb.mxu1 %v1149_v13 }
  0x41   : > { %824 = vmatpush.bf16.msrb.mxu2 %v1213_v14 }
  0x42   : > { %838 = vmatpush.bf16.msrb.mxu3 %v1277_v16 }
  0x43   : > { %797 = vmatpush.bf16.msrb.mxu0 %v1077_v20 }
  0x44   : > { %811 = vmatpush.bf16.msrb.mxu1 %v1141_v25 }
  0x45   : > { %825 = vmatpush.bf16.msrb.mxu2 %v1205_v26 }
  0x46   : > { %839 = vmatpush.bf16.msrb.mxu3 %v1269_v28 }
  0x47   : > { %798 = vmatpush.bf16.msrb.mxu0 %v1069_v32 }
  0x48   : > { %812 = vmatpush.bf16.msrb.mxu1 %v1133_v37 }
  0x49   : > { %826 = vmatpush.bf16.msrb.mxu2 %v1197_v38 }
  0x4a   : > { %840 = vmatpush.bf16.msrb.mxu3 %v1261_v40 }
  0x4b   : > { %799 = vmatpush.bf16.msrb.mxu0 %v1061_v44 }
  0x4c   : > { %813 = vmatpush.bf16.msrb.mxu1 %v1125_v48 }
  0x4d   : > { %827 = vmatpush.bf16.msrb.mxu2 %v1189_v49 }
  0x4e   : > { %841 = vmatpush.bf16.msrb.mxu3 %v1253_v50  ;;  %800 = vmatmul.bf16.vlgmr.msrb.gmra.mxu0 %v1865_v54 }
  0x4f   : > { %814 = vmatmul.bf16.vlgmr.msrb.gmra.mxu1 %v1885_v0 }
  0x50   : > { %828 = vmatmul.bf16.vlgmr.msrb.gmra.mxu2 %v1855_v47 }
  0x51   : > { %842 = vmatmul.bf16.vlgmr.msrb.gmra.mxu3 %v1863_v53 }
  0xb4   : > { %v759_v52 = vpop.f32.mrf.mxu1 }
  0xb5   : > { %v745_v51 = vpop.f32.mrf.mxu0 }
  0xb6   : > { %v760_v55 = vadd.f32 %v759_v52, %v745_v51 }
  0xb8   : > { %v787_v57 = vpop.f32.mrf.mxu3 }
  0xb9   : > { %v773_v56 = vpop.f32.mrf.mxu2 }
  0xba   : > { %v774_v58 = vadd.f32 %v773_v56, %v760_v55 }
  0xbc   : > { %v761_v60 = vpop.f32.mrf.mxu1  ;;  %v788_v62 = vadd.f32 %v787_v57, %v774_v58 }
  0xbd   : > { %v747_v59 = vpop.f32.mrf.mxu0 }
  0xbe   : > { %v762_v61 = vadd.f32 %v761_v60, %v747_v59  ;;  %v862_v54 = vmul.f32 %v788_v62, %v788_v62 }
  0xc0   : > { %v789_v2 = vpop.f32.mrf.mxu3 }
  0xc1   : > { %v775_v63 = vpop.f32.mrf.mxu2 }
  0xc2   : > { %v776_v1 = vadd.f32 %v775_v63, %v762_v61 }
  0xc4   : > { %v790_v3 = vadd.f32 %v789_v2, %v776_v1 }
  0xc6   : > { %v848_v0 = vadd.f32 %v790_v3, %v788_v62  ;;  %v864_v4 = vmul.f32 %v790_v3, %v790_v3 }
  0xc8   : > { %v849_v47 = vrot.slane %v848_v0, 4  ;;  %v866_v5 = vadd.f32 %v864_v4, %v862_v54 }
  0xca   : > { %v850_v53 = vadd.f32 %v849_v47, %v848_v0  ;;  %v867_v6 = vrot.slane %v866_v5, 4 }
  0xcb   : > { %v801_v10 = vpop.f32.mrf.mxu0 }
  0xcc   : > { %v851_v8 = vrot.slane %v850_v53, 2  ;;  %v868_v9 = vadd.f32 %v867_v6, %v866_v5  ;;  %v815_v11 = vpop.f32.mrf.mxu1 }
  0xcd   : > { %v816_v14 = vadd.f32 %v815_v11, %v801_v10 }
  0xce   : > { %v852_v12 = vadd.f32 %v851_v8, %v850_v53  ;;  %v869_v13 = vrot.slane %v868_v9, 2 }
  0xd0   : > { %v870_v16 = vadd.f32 %v869_v13, %v868_v9  ;;  %v853_v17 = vrot.slane %v852_v12, 1 }
  0xd2   : > { %v871_v18 = vrot.slane %v870_v16, 1  ;;  %v854_v23 = vadd.f32 %v853_v17, %v852_v12 }
  0xd3   : > { %v829_v19 = vpop.f32.mrf.mxu2  ;;  %v803_v26 = vpop.f32.mrf.mxu0 }
  0xd4   : > { %v830_v20 = vadd.f32 %v829_v19, %v816_v14  ;;  %v843_v21 = vpop.f32.mrf.mxu3  ;;  %v872_v22 = vadd.f32 %v871_v18, %v870_v16  ;;  %v817_v27 = vpop.f32.mrf.mxu1 }
  0xd5   : > { %v818_v30 = vadd.f32 %v817_v27, %v803_v26 }
  0xd6   : > { %v844_v24 = vadd.f32 %v843_v21, %v830_v20  ;;  %v884_v25 = vsel %vm883_vm0, %v872_v22, 0.0 }
  0xd7   : > { %v886_v28 = vsel %vm882_vm1, %v854_v23, %v884_v25 }
  0xd8   : > { %v890_v29 = vpack.c.bf16 %v844_v24, %v788_v62  ;;  %888 = vst [vmem:[%s1992_s12] sm:$0xff] %v886_v28  ;;  %v863_v35 = vmul.f32 %v844_v24, %v844_v24 }
  0xda   : > { %892 = vst [vmem:[%s281_s15] sm:$0xff] %v890_v29 }
  0xdb   : > { %v831_v31 = vpop.f32.mrf.mxu2 }
  0xdc   : > { %v832_v32 = vadd.f32 %v831_v31, %v818_v30  ;;  %v845_v33 = vpop.f32.mrf.mxu3 }
  0xde   : > { %v846_v34 = vadd.f32 %v845_v33, %v832_v32 }
  0xe0   : > { %v855_v36 = vadd.f32 %v846_v34, %v844_v24  ;;  %v865_v37 = vmul.f32 %v846_v34, %v846_v34  ;;  %v891_v38 = vpack.c.bf16 %v846_v34, %v790_v3 }
  0xe2   : > { %v856_v39 = vrot.slane %v855_v36, 4  ;;  %v873_v40 = vadd.f32 %v865_v37, %v863_v35  ;;  %893 = vst [vmem:[%s281_s15 + $0x8] sm:$0xff] %v891_v38 }
  0xe4   : > { %v857_v41 = vadd.f32 %v856_v39, %v855_v36  ;;  %v874_v42 = vrot.slane %v873_v40, 4 }
  0xe6   : > { %v858_v43 = vrot.slane %v857_v41, 2  ;;  %v875_v44 = vadd.f32 %v874_v42, %v873_v40 }
  0xe8   : > { %v859_v45 = vadd.f32 %v858_v43, %v857_v41  ;;  %v876_v46 = vrot.slane %v875_v44, 2 }
  0xea   : > { %v877_v48 = vadd.f32 %v876_v46, %v875_v44  ;;  %v860_v49 = vrot.slane %v859_v45, 1 }
  0xec   : > { %v878_v50 = vrot.slane %v877_v48, 1  ;;  %v861_v52 = vadd.f32 %v860_v49, %v859_v45 }
  0xee   : > { %v879_v51 = vadd.f32 %v878_v50, %v877_v48 }
  0xf0   : > { %v885_v55 = vsel %vm883_vm0, %v879_v51, 0.0 }
  0xf1   : > { %v887_v56 = vsel %vm882_vm1, %v861_v52, %v885_v55 }
  0xf2   : > { %889 = vst [vmem:[%s1992_s12 + $0x8] sm:$0xff] %v887_v56 }
  0xf3 PF: > { %s16_s20 = sadd.s32 1, %s1425_s20   ;;  %s2018_s18 = smov %s1421_s19 }
  0xf4   : > { %p13_p5 = scmp.ge.s32.totalorder %s16_s20, 4   ;;  %s2019_s19 = smov %s2021_s21 }
  0xf6   :  { %15 = sbr.rel (!%p13_p5) target bundleno = 2 (0x2), region = 78 }

// kernel: pointnet_dense_cls_forward.20
= control target key start
LH: loop header
LB: loop body
LE: loop exit
PB: predicated region body
PF: predicated region fallthrough
CT: control target
= control target key end

     0   :  { %s809_s18 = smov 0   ;;  %s811_s19 = smov 0   ;;  %s903_s0 = inlined_call_operand.vmem [shape: bf16[2,16,256], index: 0, kind: input, shape index: {}]   ;;  %s904_s1 = inlined_call_operand.vmem [shape: bf16[256,128], index: 1, kind: input, shape index: {}]   ;;  %s905_s2 = inlined_call_operand.vmem [shape: f32[1,256], index: 2, kind: input, shape index: {}]   ;;  %s906_s3 = inlined_call_operand.vmem [shape: f32[1,256], index: 3, kind: input, shape index: {}]   ;;  %s907_s4 = inlined_call_operand.vmem [shape: bf16[2,16,128], index: 4, kind: output, shape index: {0}]   ;;  %s908_s5 = inlined_call_operand.vmem [shape: f32[2,1,8,128], index: 5, kind: output, shape index: {1}]  }
   0x1   :  { %s813_s20 = smov 0  }
   0x2 LB: > { %s28_s21 = sadd.s32 1, %s773_s19  ;;  %p636_p0 = scmp.ge.s32.totalorder %s777_s20, 1  ;;  %s777_s20 = sphi %s813_s20, %s16_s20   ;;  %s773_s19 = sphi %s811_s19, %s910_s19   ;;  %s769_s18 = sphi %s809_s18, %s909_s18  }
   0x3   : > { %p30_p1 = scmp.ge.s32.totalorder %s28_s21, 2  ;;  %p214_p2 = scmp.lt.s32.totalorder %s777_s20, 3 }
   0x5   : > { %s912_s21 = smov (%p30_p1, %s28_s21), 0  ;;  %p215_p3 = pnand %p636_p0, %p214_p2 }
   0x6   : > { %p259_p4 = scmp.lt.s32.totalorder (!%p215_p3), %s769_s18, 1 }
   0x7   : > { %218 = sbr.rel (%p215_p3) target bundleno = 200 (0xc8), region = 36 }
   0xc   : > { %v717_v0 = vld [vmem:[%s904_s1 + $0x38] sm:$0xff]  ;;  %v716_v2 = vld [vmem:[%s904_s1 + $0x30] sm:$0xff]  ;;  %s914_s18 = smov (!%p259_p4, %s769_s18), 1  ;;  %v715_v4 = vld [vmem:[%s904_s1 + $0x28] sm:$0xff]  ;;  %v490_v56 = vlaneseq }
   0xd   : > { %v725_v1 = vld [vmem:[%s904_s1 + $0x78] sm:$0xff]  ;;  %446 = vmatpush.bf16.msra.mxu0 %v717_v0  ;;  %v724_v3 = vld [vmem:[%s904_s1 + $0x70] sm:$0xff]  ;;  %s708_s30 = sshll.u32 %s914_s18, 4  ;;  %v723_v5 = vld [vmem:[%s904_s1 + $0x68] sm:$0xff]  ;;  %s709_s16 = sshll.u32 %s914_s18, 3 }
   0xe   : > { %460 = vmatpush.bf16.msra.mxu1 %v725_v1  ;;  %s267_s12 = scalar_lea.vmem %s903_s0, %s708_s30  ;;  %v714_v6 = vld [vmem:[%s904_s1 + $0x20] sm:$0xff]  ;;  %v713_v18 = vld [vmem:[%s904_s1 + $0x18] sm:$0xff]  ;;  %v712_v26 = vld [vmem:[%s904_s1 + $0x10] sm:$0xff]  ;;  %s277_s23 = scalar_lea.vmem %s907_s4, %s709_s16  ;;  %v491_v61 = vshrl.u32 %v490_v56, 7 }
   0xf   : > { %v292_v7 = vld [vmem:[%s905_s2] sm:$0x3]  ;;  %v287_v10 = vld [vmem:[%s267_s12 + $0x8] sm:$0xff]  ;;  %v721_v19 = vld [vmem:[%s904_s1 + $0x58] sm:$0xff]  ;;  %s285_s25 = scalar_lea.vmem %s908_s5, %s709_s16 }
  0x10   : > { %v722_v8 = vld [vmem:[%s904_s1 + $0x60] sm:$0xff]  ;;  %v294_v11 = vperm.slane %v292_v7, 0  ;;  %v295_v12 = vperm.slane %v292_v7, 1  ;;  %v290_v14 = vunpack.c.l.bf16 %v287_v10  ;;  %v291_v17 = vunpack.c.h.bf16 %v287_v10  ;;  %v720_v27 = vld [vmem:[%s904_s1 + $0x50] sm:$0xff]  ;;  %v711_v32 = vld [vmem:[%s904_s1 + $0x8] sm:$0xff] }
  0x11   : > { %447 = vmatpush.bf16.msra.mxu0 %v716_v2  ;;  %v286_v9 = vld [vmem:[%s267_s12] sm:$0xff]  ;;  %v719_v33 = vld [vmem:[%s904_s1 + $0x48] sm:$0xff]  ;;  %vm493_vm0 = vcmp.eq.s32.totalorder %v491_v61, 1  ;;  %vm492_vm1 = vcmp.eq.s32.totalorder %v491_v61, 0 }
  0x12   : > { %461 = vmatpush.bf16.msra.mxu1 %v724_v3  ;;  %v288_v13 = vunpack.c.l.bf16 %v286_v9  ;;  %v302_v15 = vld [vmem:[%s906_s3] sm:$0x3]  ;;  %v289_v16 = vunpack.c.h.bf16 %v286_v9  ;;  %v300_v23 = vmul.f32 %v294_v11, %v290_v14  ;;  %v301_v25 = vmul.f32 %v295_v12, %v291_v17 }
  0x13   : > { %v304_v20 = vperm.slane %v302_v15, 0  ;;  %v305_v21 = vperm.slane %v302_v15, 1  ;;  %v710_v38 = vld [vmem:[%s904_s1] sm:$0xff] }
  0x14   : > { %v298_v22 = vmul.f32 %v294_v11, %v288_v13  ;;  %v299_v24 = vmul.f32 %v295_v12, %v289_v16  ;;  %v718_v39 = vld [vmem:[%s904_s1 + $0x40] sm:$0xff] }
  0x15   : > { %448 = vmatpush.bf16.msra.mxu0 %v715_v4  ;;  %v310_v29 = vadd.f32 %v304_v20, %v300_v23  ;;  %v311_v31 = vadd.f32 %v305_v21, %v301_v25 }
  0x16   : > { %462 = vmatpush.bf16.msra.mxu1 %v723_v5  ;;  %v308_v28 = vadd.f32 %v304_v20, %v298_v22  ;;  %v309_v30 = vadd.f32 %v305_v21, %v299_v24 }
  0x17   : > { %v314_v35 = vmax.f32 %v310_v29, 0.0  ;;  %v315_v37 = vmax.f32 %v311_v31, 0.0 }
  0x18   : > { %v312_v34 = vmax.f32 %v308_v28, 0.0  ;;  %v313_v36 = vmax.f32 %v309_v30, 0.0 }
  0x19   : > { %449 = vmatpush.bf16.msra.mxu0 %v714_v6 }
  0x1a   : > { %463 = vmatpush.bf16.msra.mxu1 %v722_v8  ;;  %v316_v40 = vpack.c.bf16 %v314_v35, %v312_v34  ;;  %v317_v41 = vpack.c.bf16 %v315_v37, %v313_v36 }
  0x1d   : > { %450 = vmatpush.bf16.msra.mxu0 %v713_v18 }
  0x1e   : > { %464 = vmatpush.bf16.msra.mxu1 %v721_v19 }
  0x21   : > { %451 = vmatpush.bf16.msra.mxu0 %v712_v26 }
  0x22   : > { %465 = vmatpush.bf16.msra.mxu1 %v720_v27 }
  0x25   : > { %452 = vmatpush.bf16.msra.mxu0 %v711_v32 }
  0x26   : > { %466 = vmatpush.bf16.msra.mxu1 %v719_v33 }
  0x29   : > { %453 = vmatpush.bf16.msra.mxu0 %v710_v38 }
  0x2a   : > { %467 = vmatpush.bf16.msra.mxu1 %v718_v39 }
  0x2c   : > { %454 = vmatmul.bf16.vlgmr.msra.gmra.mxu0 %v316_v40 }
  0x2d   : > { %468 = vmatmul.bf16.vlgmr.msra.gmra.mxu1 %v317_v41 }
  0xa9   : > { %v455_v42 = vpop.f32.mrf.mxu0 }
  0xaa   : > { %v469_v43 = vpop.f32.mrf.mxu1 }
  0xab   : > { %v470_v44 = vadd.f32 %v469_v43, %v455_v42 }
  0xad   : > { %v481_v48 = vmul.f32 %v470_v44, %v470_v44 }
  0xb1   : > { %v457_v45 = vpop.f32.mrf.mxu0 }
  0xb2   : > { %v471_v46 = vpop.f32.mrf.mxu1 }
  0xb3   : > { %v472_v47 = vadd.f32 %v471_v46, %v457_v45 }
  0xb5   : > { %v474_v49 = vadd.f32 %v472_v47, %v470_v44  ;;  %v482_v50 = vmul.f32 %v472_v47, %v472_v47  ;;  %v729_v51 = vpack.c.bf16 %v472_v47, %v470_v44 }
  0xb7   : > { %v475_v52 = vrot.slane %v474_v49, 4  ;;  %v483_v53 = vadd.f32 %v482_v50, %v481_v48  ;;  %730 = vst [vmem:[%s277_s23] sm:$0xff] %v729_v51  }
  0xb9   : > { %v476_v54 = vadd.f32 %v475_v52, %v474_v49  ;;  %v484_v55 = vrot.slane %v483_v53, 4 }
  0xbb   : > { %v477_v57 = vrot.slane %v476_v54, 2  ;;  %v485_v58 = vadd.f32 %v484_v55, %v483_v53 }
  0xbd   : > { %v478_v59 = vadd.f32 %v477_v57, %v476_v54  ;;  %v486_v60 = vrot.slane %v485_v58, 2 }
  0xbf   : > { %v487_v62 = vadd.f32 %v486_v60, %v485_v58  ;;  %v479_v63 = vrot.slane %v478_v59, 1 }
  0xc1   : > { %v488_v0 = vrot.slane %v487_v62, 1  ;;  %v480_v2 = vadd.f32 %v479_v63, %v478_v59 }
  0xc3   : > { %v489_v1 = vadd.f32 %v488_v0, %v487_v62 }
  0xc5   : > { %v494_v3 = vsel %vm493_vm0, %v489_v1, 0.0 }
  0xc6   : > { %v495_v4 = vsel %vm492_vm1, %v480_v2, %v494_v3 }
  0xc7   : > { %496 = vst [vmem:[%s285_s25] sm:$0xff] %v495_v4 }
  0xc8 PF: > { %s16_s20 = sadd.s32 1, %s777_s20   ;;  %s909_s18 = smov %s773_s19 }
  0xc9   : > { %p13_p5 = scmp.ge.s32.totalorder %s16_s20, 4   ;;  %s910_s19 = smov %s912_s21 }
  0xcb   :  { %15 = sbr.rel (!%p13_p5) target bundleno = 2 (0x2), region = 78 }

// kernel: pointnet_dense_cls_forward.21
= control target key start
LH: loop header
LB: loop body
LE: loop exit
PB: predicated region body
PF: predicated region fallthrough
CT: control target
= control target key end

     0   :  { %10 = vsyncpa [#allocation3], 0  ;;  %s682_s0 = inlined_call_operand.vmem [shape: bf16[2,16,128], index: 0, kind: input, shape index: {}]   ;;  %s683_s1 = inlined_call_operand.vmem [shape: bf16[2,128], index: 1, kind: input, shape index: {}]   ;;  %s684_s2 = inlined_call_operand.vmem [shape: f32[2,1], index: 2, kind: input, shape index: {}]   ;;  %s685_s3 = inlined_call_operand.vmem [shape: f32[1,128], index: 3, kind: input, shape index: {}]   ;;  %s686_s4 = inlined_call_operand.vmem [shape: f32[1,128], index: 4, kind: input, shape index: {}]   ;;  %s687_s5 = inlined_call_operand.hbm [shape: f32[2,2,16], index: 5, kind: output, shape index: {}]  }
   0x1   :  { %12 = vsyncpa [#allocation3 + $0x1], 0  ;;  %s573_s18 = smov 0   ;;  %s575_s19 = smov 0  }
   0x2   :  { %s577_s20 = smov 0   ;;  %s579_s21 = smov 0  }
   0x3   :  { %s581_s22 = smov 0   ;;  %s583_s23 = smov 0  }
   0x4 LB: > { %s386_s24 = sadd.s32 4294967295, %s540_s23   ;;  %s387_s25 = sadd.s32 4294967294, %s540_s23   ;;  %s540_s23 = sphi %s583_s23, %s18_s23   ;;  %s536_s22 = sphi %s581_s22, %s694_s22   ;;  %s532_s21 = sphi %s579_s21, %s693_s21   ;;  %s528_s20 = sphi %s577_s20, %s692_s20   ;;  %s524_s19 = sphi %s575_s19, %s691_s19   ;;  %s520_s18 = sphi %s573_s18, %s690_s18  }
   0x5   : > { %s30_s26 = sadd.s32 1, %s536_s22  ;;  %s151_s27 = sadd.s32 1, %s528_s20 }
   0x6   : > { %p32_p0 = scmp.ge.s32.totalorder %s30_s26, 2  ;;  %p161_p1 = scmp.ne.s32.totalorder %s528_s20, %s524_s19 }
   0x7   : > { %p162_p2 = scmp.eq.s32.totalorder %s386_s24, 1  ;;  %p167_p3 = scmp.ne.s32.totalorder %s524_s19, %s520_s18 }
   0x8   : > { %s696_s26 = smov (%p32_p0, %s30_s26), 0  ;;  %p168_p5 = scmp.eq.s32.totalorder %s387_s25, 1 }
   0x9   : > { %p613_p4 = por %p162_p2, %p161_p1  ;;  %s146_s29 = ssub.s32 %s536_s22, %s696_s26 }
   0xa   : > { %p390_p6 = scmp.ge.s32.totalorder %s540_s23, 1  ;;  %p149_p7 = scmp.eq.s32.totalorder %s146_s29, 0 }
   0xb   : > { %p620_p8 = por %p168_p5, %p167_p3  ;;  %p211_p9 = scmp.lt.s32.totalorder %s540_s23, 3 }
   0xc   : > { %s626_s6 = scalar_select %p149_p7, %s528_s20, %s151_s27  }
   0xd   : > { %p212_p10 = pnand %p390_p6, %p211_p9 }
   0xe   : > { %p244_p11 = scmp.lt.s32.totalorder (!%p212_p10), %s532_s21, 1  ;;  %s240_s27 = sand.u32 (!%p212_p10), 1, %s524_s19  }
   0xf   : > { %215 = sbr.rel (%p212_p10) target bundleno = 176 (0xb0), region = 40  ;;  %s395_s29 = sshll.u32 (!%p212_p10), %s532_s21, 1 }
  0x10   : > { %s296_s14 = scalar_lea.sflag (!%p212_p10), [#allocation3], %s240_s27  ;;  %s482_s24 = scalar_lea.hbm (!%p212_p10), %s687_s5, 4 }
  0x14   : > { %v542_v0 = vmov 0   ;;  %s245_s7 = scalar_select %p244_p11, %s532_s21, 1  ;;  %v274_v1 = vld [vmem:[%s684_s2] sm:$0x3]  ;;  %vm293_vm0 = vcmask 123904  }
  0x15   : > { %459 = vset.pattern.permute.xlu0 %v542_v0  ;;  %v460_v2 = vld [vmem:[%s685_s3] ss:$0 sm:$0xff] }
  0x16   : > { %277 = vperm.xlu0 %459, %v274_v1   ;;  %s398_s10 = sshll.u32 %s245_s7, 3  ;;  %v461_v6 = vld [vmem:[%s686_s4] ss:$0 sm:$0xff]  ;;  %s391_s7 = sshll.u32 %s240_s27, 1 }
  0x17   : > { %s251_s13 = scalar_lea.vmem %s682_s0, %s398_s10  ;;  %v272_v14 = vld [vmem:[%s683_s1] sm:$0x1]  ;;  %s307_s10 = scalar_lea.hbm %s687_s5, %s395_s29 }
  0x18   : > { %v400_v3 = vld [vmem:[%s251_s13] sm:$0xff]   ;;  %s242_s11 = scalar_lea.vmem [#allocation2], %s391_s7  ;;  %s311_s13 = sshll.u32 %s307_s10, 4  ;;  %s312_s13 = int_to_ptr.hbm [resolvable:$true] %s311_s13 }
  0x19   : > { %v401_v4 = vunpack.c.l.bf16 %v400_v3  ;;  %v402_v5 = vunpack.c.h.bf16 %v400_v3  ;;  %s309_s12 = sshll.u32 %s242_s11, 4  ;;  %s476_s15 = sshra.s32 %s312_s13, 4  ;;  %s310_s12 = int_to_ptr.vmem [resolvable:$true] %s309_s12  ;;  %s477_s15 = int_to_ptr.hbm [resolvable:$true] %s476_s15 }
  0x1a   : > { %s478_s21 = scalar_lea.hbm %s477_s15, 2  ;;  %p483_p1 = scmp.lt.s32.totalorder %s477_s15, %s687_s5 }
  0x1b   : > { %v262_v7 = vmul.f32 %v460_v2, %v401_v4  ;;  %v263_v8 = vmul.f32 %v460_v2, %v402_v5  ;;  %p479_p12 = scmp.ne.s32.totalorder %s477_s15, %s478_s21  ;;  %p484_p2 = scmp.lt.s32.totalorder %s482_s24, %s478_s21 }
  0x1d   : > { %v268_v9 = vadd.f32 %v461_v6, %v262_v7  ;;  %v269_v10 = vadd.f32 %v461_v6, %v263_v8  ;;  %p480_p13 = pnand %p479_p12, %p613_p4  ;;  %p485_p3 = por %p484_p2, %p483_p1 }
  0x1f   : > { %v270_v11 = vmax.f32 %v268_v9, 0.0  ;;  %v271_v12 = vmax.f32 %v269_v10, 0.0  ;;  %p481_p0 = pneg %p480_p13 }
  0x21   : > { %v273_v13 = vpack.c.bf16 %v271_v12, %v270_v11  ;;  %p486_p5 = pnand %p485_p3, %p481_p0 }
  0x23   : > { %287 = vmatpush.bf16.xpose.msra.mxu0 %v273_v13 }
  0x2a   : > { %288 = vmatmul.bf16.vlgmr.msra.gmra.mxu0 %v272_v14 }
  0x88   : > { %v278_v15 = vpop.permute.xlu0 %277 }
  0xa7   : > { %v289_v16 = vpop.f32.mrf.mxu0 }
  0xa8   : > { %v290_v17 = vadd.f32 %v289_v16, %v278_v15 }
  0xaa   : > { %294 = vst.msk [vmem:[%s242_s11] sm:$0x3] %vm293_vm0, %v290_v17 }
  0xab   : > { %489 = shalt.err (!%p486_p5)
}
  0xac   : > { %403 = dma.vmem_to_hbm [thread:$0]  (%p613_p4), %s310_s12, 32, %s312_s13, %s296_s14  }
  0xaf   : > { %v291_v18 = vpop.f32.mrf.mxu0 }
  0xb0 PF: > { %p409_p6 = scmp.ge.s32.totalorder %s540_s23, 2  ;;  %s323_s27 = sand.u32 1, %s520_s18  }
  0xb1   : > { %s324_s7 = scalar_lea.sflag [#allocation3], %s323_s27 }
  0xb2   : > { %p406_p7 = pnand %p409_p6, %p620_p8 }
  0xb4   : > { %p407_p9 = pneg %p406_p7 }
  0xb6   : > { %515 = dma.done.wait (%p407_p9), %s324_s7, 32  }
  0xb7   : > { %517 = vsyncadd (%p407_p9), %s324_s7, 4294967264  ;;  %s18_s23 = sadd.s32 1, %s540_s23   ;;  %s690_s18 = smov %s524_s19 }
  0xb8   : > { %p15_p10 = scmp.ge.s32.totalorder %s18_s23, 4   ;;  %s691_s19 = smov %s528_s20 }
  0xb9   : > { %s692_s20 = smov %s626_s6  ;;  %s693_s21 = smov %s536_s22 }
  0xba   : > { %s694_s22 = smov %s696_s26  ;;  %17 = sbr.rel (!%p15_p10) target bundleno = 4 (0x4), region = 75 }
  0xbf   :  { %330 = vsyncpa [#allocation3], 1 }
  0xc0   :  { %332 = vsyncpa [#allocation3 + $0x1], 1 }

</bundles_post_ra>
